<compile_context>
chip_gen: v7x
topology: tpu7x:2x2x1
jax: 0.10.0
libtpu: 0.0.40
codegen_flags: <defaults>
</compile_context>

<pallas_src>
import functools

import jax
import jax.numpy as jnp
from jax import lax
from jax.experimental import pallas as pl
from jax.experimental.pallas import tpu as pltpu

HIDDEN = 51      # logical hidden size (matches the PyTorch module)
HP = 128         # padded hidden size (lane aligned)


def _unroll(n):
    return True if n <= 32 else 4


def sequence_kernel(x_ref, whh1_ref, w1fb_ref, w2_ref,
                    wih1_ref, b1_ref, bfb_ref, b2_ref, h2_ref):
    """Whole recurrence in one kernel invocation (fully serial dependence).

    x_ref    : (T, Bp, 1)   f32   input, time-major (Bp = batch padded to 8)
    whh1_ref : (HP, 4*HP)   bf16  lstm1 hidden weights (teacher-forcing phase)
    w1fb_ref : (2*HP, 4*HP) bf16  [W_hh1 ; W_fb], W_fb = w_lin^T (outer) w_ih1
    w2_ref   : (2*HP, 4*HP) bf16  [W_ih2 ; W_hh2]
    wih1_ref : (1, 4*HP)    f32   w_ih1 row (for the in-kernel rank-1 projection)
    b1_ref   : (1, 4*HP)    f32   b_ih1 + b_hh1
    bfb_ref  : (1, 4*HP)    f32   b1 + b_lin * w_ih1   (feedback-phase input bias)
    b2_ref   : (1, 4*HP)    f32   b_ih2 + b_hh2
    h2_ref   : (total, Bp, HP) f32 output: lstm2 hidden state per step, time-major
    """
    T, Bp, _ = x_ref.shape
    total = h2_ref.shape[0]
    G = w2_ref.shape[1]
    hp = G // 4
    bf16 = jnp.bfloat16

    # Weight loads (loop-invariant reads; Mosaic streams them from VMEM per use).
    whh1 = whh1_ref[...]
    w1fb = w1fb_ref[...]
    w2 = w2_ref[...]

    # Hoist broadcasts out of the loops (JAX does not CSE broadcast_in_dim).
    wih1_b = jnp.broadcast_to(wih1_ref[...], (Bp, G))
    b1_b = jnp.broadcast_to(b1_ref[...], (Bp, G))
    bfb_b = jnp.broadcast_to(bfb_ref[...], (Bp, G))
    b2_b = jnp.broadcast_to(b2_ref[...], (Bp, G))
    zeros_h = jnp.zeros((Bp, hp), jnp.float32)

    def lstm_act(gates, c):
        # Gate order (i, f, o, g): one contiguous sigmoid block + one tanh block.
        s = jax.nn.sigmoid(gates[:, :3 * hp])
        g = jnp.tanh(gates[:, 3 * hp:])
        i = s[:, 0 * hp:1 * hp]
        f = s[:, 1 * hp:2 * hp]
        o = s[:, 2 * hp:3 * hp]
        c_new = f * c + i * g
        h_new = o * jnp.tanh(c_new)
        return h_new, c_new

    def lstm2_step(h1n, h2, c2, t):
        lhs2 = jnp.concatenate([h1n, h2], axis=1).astype(bf16)     # (Bp, 2*HP)
        g2 = jnp.dot(lhs2, w2, preferred_element_type=jnp.float32) + b2_b
        h2n, c2n = lstm_act(g2, c2)
        # Time-major, lane-dense, full-tile (8 sublanes) dynamic store.
        h2_ref[pl.ds(t, 1)] = h2n[None]
        return h2n, c2n

    # ---- teacher-forcing phase: input comes from x, lstm1 LHS is h1 only -----
    def tf_body(t, carry):
        h1, c1, h2, c2 = carry
        # Rank-1 input projection, carry-independent (schedules ahead of the dot).
        xin = x_ref[t] * wih1_b + b1_b                              # (Bp, 4*HP)
        g1 = jnp.dot(h1.astype(bf16), whh1,
                     preferred_element_type=jnp.float32) + xin
        h1n, c1n = lstm_act(g1, c1)
        h2n, c2n = lstm2_step(h1n, h2, c2, t)
        return (h1n, c1n, h2n, c2n)

    # ---- feedback phase: previous output folded in via [h1, h2] @ [Whh1; Wfb] -
    def fb_body(t, carry):
        h1, c1, h2, c2 = carry
        lhs1 = jnp.concatenate([h1, h2], axis=1).astype(bf16)       # (Bp, 2*HP)
        g1 = jnp.dot(lhs1, w1fb, preferred_element_type=jnp.float32) + bfb_b
        h1n, c1n = lstm_act(g1, c1)
        h2n, c2n = lstm2_step(h1n, h2, c2, t)
        return (h1n, c1n, h2n, c2n)

    carry = (zeros_h, zeros_h, zeros_h, zeros_h)
    carry = lax.fori_loop(0, T, tf_body, carry, unroll=_unroll(T))
    lax.fori_loop(T, total, fb_body, carry, unroll=_unroll(total - T))


def init_params(key, hidden=HIDDEN):
    """PyTorch-style uniform(-1/sqrt(H), 1/sqrt(H)) init, deterministic."""
    h = hidden
    bound = 1.0 / float(h) ** 0.5
    keys = jax.random.split(key, 10)

    def u(k, shape):
        return jax.random.uniform(k, shape, jnp.float32, -bound, bound)

    return dict(
        w_ih1=u(keys[0], (4 * h, 1)),
        w_hh1=u(keys[1], (4 * h, h)),
        b_ih1=u(keys[2], (4 * h,)),
        b_hh1=u(keys[3], (4 * h,)),
        w_ih2=u(keys[4], (4 * h, h)),
        w_hh2=u(keys[5], (4 * h, h)),
        b_ih2=u(keys[6], (4 * h,)),
        b_hh2=u(keys[7], (4 * h,)),
        w_lin=u(keys[8], (1, h)),
        b_lin=u(keys[9], (1,)),
    )


def _pack_params(p, h=HIDDEN, hp=HP):
    """Gate-fuse, reorder (i,f,g,o)->(i,f,o,g), transpose and zero-pad weights."""
    perm = jnp.array([0, 1, 3, 2])  # PyTorch (i,f,g,o) -> kernel (i,f,o,g)

    def pack_gates(w):
        # w: (rows, 4*h) with PyTorch gate order stacked contiguously ->
        #    (rows, 4*hp), each gate block zero-padded to hp lanes and reordered
        #    so every gate slice in the kernel starts at a multiple of 128.
        r = w.shape[0]
        w4 = w.reshape(r, 4, h)[:, perm, :]
        w4 = jnp.pad(w4, ((0, 0), (0, 0), (0, hp - h)))
        return w4.reshape(r, 4 * hp)

    def pad_rows(w):
        return jnp.pad(w, ((0, hp - w.shape[0]), (0, 0)))

    wih1_row = pack_gates(p["w_ih1"].T)                           # (1, 4hp)
    b1_row = pack_gates((p["b_ih1"] + p["b_hh1"])[None, :])       # (1, 4hp)
    whh1 = pad_rows(pack_gates(p["w_hh1"].T))                     # (hp, 4hp)
    wih2 = pad_rows(pack_gates(p["w_ih2"].T))                     # (hp, 4hp)
    whh2 = pad_rows(pack_gates(p["w_hh2"].T))                     # (hp, 4hp)
    b2_row = pack_gates((p["b_ih2"] + p["b_hh2"])[None, :])       # (1, 4hp)
    wlin_pad = jnp.pad(p["w_lin"][0], (0, hp - h))                # (hp,)
    b_lin = p["b_lin"][0]

    # Feedback path folded into lstm1's fused matmul:
    #   out_prev * w_ih1 = (h2 @ w_lin^T + b_lin) * w_ih1
    #                    = h2 @ (w_lin^T w_ih1) + b_lin * w_ih1
    w_fb = wlin_pad[:, None] @ wih1_row                           # (hp, 4hp)
    bfb_row = b1_row + b_lin * wih1_row                           # (1, 4hp)

    w1fb = jnp.concatenate([whh1, w_fb], axis=0)                  # (2hp, 4hp)
    w2cat = jnp.concatenate([wih2, whh2], axis=0)                 # (2hp, 4hp)

    bf16 = jnp.bfloat16
    return (whh1.astype(bf16), w1fb.astype(bf16), w2cat.astype(bf16),
            wih1_row, b1_row, bfb_row, b2_row, wlin_pad)


@functools.partial(jax.jit, static_argnames=("future",))
def sequence_forward(x, params, future=0):
    B, T = x.shape
    total = T + future
    Bp = max(8, ((B + 7) // 8) * 8)   # pad batch to the f32 sublane count

    (whh1, w1fb, w2cat, wih1_row, b1_row, bfb_row, b2_row,
     wlin_pad) = _pack_params(params)

    # Time-major, zero-padded input (padded rows stay isolated; trimmed at end).
    x_pad = jnp.pad(x.astype(jnp.float32), ((0, Bp - B), (0, 0)))
    x_tm = x_pad.T[:, :, None]                                    # (T, Bp, 1)

    vmem = pl.BlockSpec(memory_space=pltpu.MemorySpace.VMEM)
    args = (x_tm, whh1, w1fb, w2cat, wih1_row, b1_row, bfb_row, b2_row)

    # Kernel emits the lstm2 hidden state per timestep (lane-dense, time-major);
    # the bulk output projection is a single parallel matmul in the wrapper
    # (the per-step linear needed for feedback is already fused in-kernel).
    h2_states = pl.pallas_call(
        sequence_kernel,
        out_shape=jax.ShapeDtypeStruct((total, Bp, HP), jnp.float32),
        in_specs=[vmem] * len(args),
        out_specs=vmem,
    )(*args)

    # Contract against the zero-padded (HP,) w_lin: padded lanes of h2 are
    # exactly 0, so this is numerically identical to slicing [..., :51].
    outputs = jnp.einsum("tbh,h->bt", h2_states, wlin_pad) + params["b_lin"][0]
    return outputs[:B]


# ---------------- pure-JAX reference (mirrors the PyTorch forward) -----------
def _lstm_cell_ref(x, h, c, w_ih, w_hh, b_ih, b_hh):
    gates = x @ w_ih.T + b_ih + h @ w_hh.T + b_hh
    i, f, g, o = jnp.split(gates, 4, axis=1)
    c = jax.nn.sigmoid(f) * c + jax.nn.sigmoid(i) * jnp.tanh(g)
    h = jax.nn.sigmoid(o) * jnp.tanh(c)
    return h, c


def reference_forward(x, p, future=0, hidden=HIDDEN):
    B = x.shape[0]
    h1 = c1 = h2 = c2 = jnp.zeros((B, hidden), jnp.float32)
    outs = []
    out = jnp.zeros((B, 1), jnp.float32)
    for t in range(x.shape[1]):
        xt = x[:, t:t + 1]
        h1, c1 = _lstm_cell_ref(xt, h1, c1, p["w_ih1"], p["w_hh1"], p["b_ih1"], p["b_hh1"])
        h2, c2 = _lstm_cell_ref(h1, h2, c2, p["w_ih2"], p["w_hh2"], p["b_ih2"], p["b_hh2"])
        out = h2 @ p["w_lin"].T + p["b_lin"]
        outs.append(out)
    for _ in range(future):
        h1, c1 = _lstm_cell_ref(out, h1, c1, p["w_ih1"], p["w_hh1"], p["b_ih1"], p["b_hh1"])
        h2, c2 = _lstm_cell_ref(h1, h2, c2, p["w_ih2"], p["w_hh2"], p["b_ih2"], p["b_hh2"])
        out = h2 @ p["w_lin"].T + p["b_lin"]
        outs.append(out)
    return jnp.concatenate(outs, axis=1)


if __name__ == "__main__":
    key = jax.random.PRNGKey(0)
    k_param, k_x = jax.random.split(key)

    B, T, FUTURE = 4, 8, 4
    params = init_params(k_param)
    x = jax.random.normal(k_x, (B, T), jnp.float32)

    out = sequence_forward(x, params, future=FUTURE)
    out = jax.block_until_ready(out)

    ref = reference_forward(x, params, future=FUTURE)
    assert out.shape == (B, T + FUTURE), out.shape
    # Tolerance covers the bf16 MXU weights/LHS (f32 accumulation) vs the f32
    # reference over the T + future serial recurrence.
    err = float(jnp.max(jnp.abs(out - ref)))
    assert jnp.allclose(out, ref, atol=3e-3, rtol=3e-3), err

    print("KERNEL_OK")
</pallas_src>

<mosaic_0001>
module attributes {stable_mosaic.version = 11 : i64} {
  func.func @sequence_kernel(%arg0: memref<8x8x1xf32, #tpu.memory_space<vmem>>, %arg1: memref<128x512xbf16, #tpu.memory_space<vmem>>, %arg2: memref<256x512xbf16, #tpu.memory_space<vmem>>, %arg3: memref<256x512xbf16, #tpu.memory_space<vmem>>, %arg4: memref<1x512xf32, #tpu.memory_space<vmem>>, %arg5: memref<1x512xf32, #tpu.memory_space<vmem>>, %arg6: memref<1x512xf32, #tpu.memory_space<vmem>>, %arg7: memref<1x512xf32, #tpu.memory_space<vmem>>, %arg8: memref<12x8x128xf32, #tpu.memory_space<vmem>>) attributes {dimension_semantics = [], scalar_prefetch = 0 : i64, scratch_operands = 0 : i64, tpu.core_type = #tpu.core_type<tc>} {
    %c0 = arith.constant 0 : index
    %c0_0 = arith.constant 0 : index
    %0 = vector.load %arg1[%c0, %c0_0] : memref<128x512xbf16, #tpu.memory_space<vmem>>, vector<128x512xbf16>
    %c0_1 = arith.constant 0 : index
    %c0_2 = arith.constant 0 : index
    %1 = vector.load %arg2[%c0_1, %c0_2] : memref<256x512xbf16, #tpu.memory_space<vmem>>, vector<256x512xbf16>
    %c0_3 = arith.constant 0 : index
    %c0_4 = arith.constant 0 : index
    %2 = vector.load %arg3[%c0_3, %c0_4] : memref<256x512xbf16, #tpu.memory_space<vmem>>, vector<256x512xbf16>
    %c0_5 = arith.constant 0 : index
    %c0_6 = arith.constant 0 : index
    %3 = vector.load %arg4[%c0_5, %c0_6] : memref<1x512xf32, #tpu.memory_space<vmem>>, vector<1x512xf32>
    %4 = vector.shape_cast %3 : vector<1x512xf32> to vector<1x512xf32>
    %5 = vector.broadcast %4 : vector<1x512xf32> to vector<8x512xf32>
    %c0_7 = arith.constant 0 : index
    %c0_8 = arith.constant 0 : index
    %6 = vector.load %arg5[%c0_7, %c0_8] : memref<1x512xf32, #tpu.memory_space<vmem>>, vector<1x512xf32>
    %7 = vector.shape_cast %6 : vector<1x512xf32> to vector<1x512xf32>
    %8 = vector.broadcast %7 : vector<1x512xf32> to vector<8x512xf32>
    %c0_9 = arith.constant 0 : index
    %c0_10 = arith.constant 0 : index
    %9 = vector.load %arg6[%c0_9, %c0_10] : memref<1x512xf32, #tpu.memory_space<vmem>>, vector<1x512xf32>
    %10 = vector.shape_cast %9 : vector<1x512xf32> to vector<1x512xf32>
    %11 = vector.broadcast %10 : vector<1x512xf32> to vector<8x512xf32>
    %c0_11 = arith.constant 0 : index
    %c0_12 = arith.constant 0 : index
    %12 = vector.load %arg7[%c0_11, %c0_12] : memref<1x512xf32, #tpu.memory_space<vmem>>, vector<1x512xf32>
    %13 = vector.shape_cast %12 : vector<1x512xf32> to vector<1x512xf32>
    %14 = vector.broadcast %13 : vector<1x512xf32> to vector<8x512xf32>
    %cst = arith.constant 0.000000e+00 : f32
    %15 = vector.broadcast %cst : f32 to vector<8x128xf32>
    %c0_i32 = arith.constant 0 : i32
    %16 = arith.index_cast %c0_i32 : i32 to index
    %c0_13 = arith.constant 0 : index
    %c0_14 = arith.constant 0 : index
    %17 = vector.load %arg0[%16, %c0_13, %c0_14] : memref<8x8x1xf32, #tpu.memory_space<vmem>>, vector<1x8x1xf32>
    %18 = vector.shape_cast %17 : vector<1x8x1xf32> to vector<8x1xf32>
    %19 = vector.broadcast %18 : vector<8x1xf32> to vector<8x512xf32>
    %20 = arith.mulf %19, %5 : vector<8x512xf32>
    %21 = arith.addf %20, %8 : vector<8x512xf32>
    %22 = arith.truncf %15 : vector<8x128xf32> to vector<8x128xbf16>
    %cst_15 = arith.constant dense<0.000000e+00> : vector<8x512xf32>
    %23 = tpu.matmul %22, %0, %cst_15 {dimension_numbers = #tpu.dot_dimension_numbers<[1], [0], [0], [1], [0, 0, 1, 1], [], []>} : vector<8x128xbf16>, vector<128x512xbf16>, vector<8x512xf32> -> vector<8x512xf32>
    %24 = arith.addf %23, %21 : vector<8x512xf32>
    %25 = vector.extract_strided_slice %24 {offsets = [0, 0], sizes = [8, 384], strides = [1, 1]} : vector<8x512xf32> to vector<8x384xf32>
    %26 = arith.negf %25 : vector<8x384xf32>
    %27 = math.exp %26 : vector<8x384xf32>
    %cst_16 = arith.constant 1.000000e+00 : f32
    %28 = vector.broadcast %cst_16 : f32 to vector<8x384xf32>
    %29 = arith.addf %28, %27 : vector<8x384xf32>
    %30 = arith.divf %28, %29 : vector<8x384xf32>
    %31 = vector.extract_strided_slice %24 {offsets = [0, 384], sizes = [8, 128], strides = [1, 1]} : vector<8x512xf32> to vector<8x128xf32>
    %32 = math.tanh %31 : vector<8x128xf32>
    %33 = vector.extract_strided_slice %30 {offsets = [0, 0], sizes = [8, 128], strides = [1, 1]} : vector<8x384xf32> to vector<8x128xf32>
    %34 = vector.extract_strided_slice %30 {offsets = [0, 128], sizes = [8, 128], strides = [1, 1]} : vector<8x384xf32> to vector<8x128xf32>
    %35 = vector.extract_strided_slice %30 {offsets = [0, 256], sizes = [8, 128], strides = [1, 1]} : vector<8x384xf32> to vector<8x128xf32>
    %36 = arith.mulf %34, %15 : vector<8x128xf32>
    %37 = arith.mulf %33, %32 : vector<8x128xf32>
    %38 = arith.addf %36, %37 : vector<8x128xf32>
    %39 = math.tanh %38 : vector<8x128xf32>
    %40 = arith.mulf %35, %39 : vector<8x128xf32>
    %41 = tpu.concatenate %40, %15 in 1 : vector<8x128xf32>, vector<8x128xf32> -> vector<8x256xf32>
    %42 = arith.truncf %41 : vector<8x256xf32> to vector<8x256xbf16>
    %cst_17 = arith.constant dense<0.000000e+00> : vector<8x512xf32>
    %43 = tpu.matmul %42, %2, %cst_17 {dimension_numbers = #tpu.dot_dimension_numbers<[1], [0], [0], [1], [0, 0, 1, 1], [], []>} : vector<8x256xbf16>, vector<256x512xbf16>, vector<8x512xf32> -> vector<8x512xf32>
    %44 = arith.addf %43, %14 : vector<8x512xf32>
    %45 = vector.extract_strided_slice %44 {offsets = [0, 0], sizes = [8, 384], strides = [1, 1]} : vector<8x512xf32> to vector<8x384xf32>
    %46 = arith.negf %45 : vector<8x384xf32>
    %47 = math.exp %46 : vector<8x384xf32>
    %cst_18 = arith.constant 1.000000e+00 : f32
    %48 = vector.broadcast %cst_18 : f32 to vector<8x384xf32>
    %49 = arith.addf %48, %47 : vector<8x384xf32>
    %50 = arith.divf %48, %49 : vector<8x384xf32>
    %51 = vector.extract_strided_slice %44 {offsets = [0, 384], sizes = [8, 128], strides = [1, 1]} : vector<8x512xf32> to vector<8x128xf32>
    %52 = math.tanh %51 : vector<8x128xf32>
    %53 = vector.extract_strided_slice %50 {offsets = [0, 0], sizes = [8, 128], strides = [1, 1]} : vector<8x384xf32> to vector<8x128xf32>
    %54 = vector.extract_strided_slice %50 {offsets = [0, 128], sizes = [8, 128], strides = [1, 1]} : vector<8x384xf32> to vector<8x128xf32>
    %55 = vector.extract_strided_slice %50 {offsets = [0, 256], sizes = [8, 128], strides = [1, 1]} : vector<8x384xf32> to vector<8x128xf32>
    %56 = arith.mulf %54, %15 : vector<8x128xf32>
    %57 = arith.mulf %53, %52 : vector<8x128xf32>
    %58 = arith.addf %56, %57 : vector<8x128xf32>
    %59 = math.tanh %58 : vector<8x128xf32>
    %60 = arith.mulf %55, %59 : vector<8x128xf32>
    %61 = vector.shape_cast %60 : vector<8x128xf32> to vector<1x8x128xf32>
    %62 = arith.index_cast %c0_i32 : i32 to index
    %c0_19 = arith.constant 0 : index
    %c0_20 = arith.constant 0 : index
    %63 = vector.load %arg8[%62, %c0_19, %c0_20] : memref<12x8x128xf32, #tpu.memory_space<vmem>>, vector<1x8x128xf32>
    tpu.vector_store %arg8[%62, %c0_19, %c0_20], %61 {strides = array<i32>} : memref<12x8x128xf32, #tpu.memory_space<vmem>>, vector<1x8x128xf32>,
    %c1_i32 = arith.constant 1 : i32
    %64 = arith.index_cast %c1_i32 : i32 to index
    %c0_21 = arith.constant 0 : index
    %c0_22 = arith.constant 0 : index
    %65 = vector.load %arg0[%64, %c0_21, %c0_22] : memref<8x8x1xf32, #tpu.memory_space<vmem>>, vector<1x8x1xf32>
    %66 = vector.shape_cast %65 : vector<1x8x1xf32> to vector<8x1xf32>
    %67 = vector.broadcast %66 : vector<8x1xf32> to vector<8x512xf32>
    %68 = arith.mulf %67, %5 : vector<8x512xf32>
    %69 = arith.addf %68, %8 : vector<8x512xf32>
    %70 = arith.truncf %40 : vector<8x128xf32> to vector<8x128xbf16>
    %cst_23 = arith.constant dense<0.000000e+00> : vector<8x512xf32>
    %71 = tpu.matmul %70, %0, %cst_23 {dimension_numbers = #tpu.dot_dimension_numbers<[1], [0], [0], [1], [0, 0, 1, 1], [], []>} : vector<8x128xbf16>, vector<128x512xbf16>, vector<8x512xf32> -> vector<8x512xf32>
    %72 = arith.addf %71, %69 : vector<8x512xf32>
    %73 = vector.extract_strided_slice %72 {offsets = [0, 0], sizes = [8, 384], strides = [1, 1]} : vector<8x512xf32> to vector<8x384xf32>
    %74 = arith.negf %73 : vector<8x384xf32>
    %75 = math.exp %74 : vector<8x384xf32>
    %cst_24 = arith.constant 1.000000e+00 : f32
    %76 = vector.broadcast %cst_24 : f32 to vector<8x384xf32>
    %77 = arith.addf %76, %75 : vector<8x384xf32>
    %78 = arith.divf %76, %77 : vector<8x384xf32>
    %79 = vector.extract_strided_slice %72 {offsets = [0, 384], sizes = [8, 128], strides = [1, 1]} : vector<8x512xf32> to vector<8x128xf32>
    %80 = math.tanh %79 : vector<8x128xf32>
    %81 = vector.extract_strided_slice %78 {offsets = [0, 0], sizes = [8, 128], strides = [1, 1]} : vector<8x384xf32> to vector<8x128xf32>
    %82 = vector.extract_strided_slice %78 {offsets = [0, 128], sizes = [8, 128], strides = [1, 1]} : vector<8x384xf32> to vector<8x128xf32>
    %83 = vector.extract_strided_slice %78 {offsets = [0, 256], sizes = [8, 128], strides = [1, 1]} : vector<8x384xf32> to vector<8x128xf32>
    %84 = arith.mulf %82, %38 : vector<8x128xf32>
    %85 = arith.mulf %81, %80 : vector<8x128xf32>
    %86 = arith.addf %84, %85 : vector<8x128xf32>
    %87 = math.tanh %86 : vector<8x128xf32>
    %88 = arith.mulf %83, %87 : vector<8x128xf32>
    %89 = tpu.concatenate %88, %60 in 1 : vector<8x128xf32>, vector<8x128xf32> -> vector<8x256xf32>
    %90 = arith.truncf %89 : vector<8x256xf32> to vector<8x256xbf16>
    %cst_25 = arith.constant dense<0.000000e+00> : vector<8x512xf32>
    %91 = tpu.matmul %90, %2, %cst_25 {dimension_numbers = #tpu.dot_dimension_numbers<[1], [0], [0], [1], [0, 0, 1, 1], [], []>} : vector<8x256xbf16>, vector<256x512xbf16>, vector<8x512xf32> -> vector<8x512xf32>
    %92 = arith.addf %91, %14 : vector<8x512xf32>
    %93 = vector.extract_strided_slice %92 {offsets = [0, 0], sizes = [8, 384], strides = [1, 1]} : vector<8x512xf32> to vector<8x384xf32>
    %94 = arith.negf %93 : vector<8x384xf32>
    %95 = math.exp %94 : vector<8x384xf32>
    %cst_26 = arith.constant 1.000000e+00 : f32
    %96 = vector.broadcast %cst_26 : f32 to vector<8x384xf32>
    %97 = arith.addf %96, %95 : vector<8x384xf32>
    %98 = arith.divf %96, %97 : vector<8x384xf32>
    %99 = vector.extract_strided_slice %92 {offsets = [0, 384], sizes = [8, 128], strides = [1, 1]} : vector<8x512xf32> to vector<8x128xf32>
    %100 = math.tanh %99 : vector<8x128xf32>
    %101 = vector.extract_strided_slice %98 {offsets = [0, 0], sizes = [8, 128], strides = [1, 1]} : vector<8x384xf32> to vector<8x128xf32>
    %102 = vector.extract_strided_slice %98 {offsets = [0, 128], sizes = [8, 128], strides = [1, 1]} : vector<8x384xf32> to vector<8x128xf32>
    %103 = vector.extract_strided_slice %98 {offsets = [0, 256], sizes = [8, 128], strides = [1, 1]} : vector<8x384xf32> to vector<8x128xf32>
    %104 = arith.mulf %102, %58 : vector<8x128xf32>
    %105 = arith.mulf %101, %100 : vector<8x128xf32>
    %106 = arith.addf %104, %105 : vector<8x128xf32>
    %107 = math.tanh %106 : vector<8x128xf32>
    %108 = arith.mulf %103, %107 : vector<8x128xf32>
    %109 = vector.shape_cast %108 : vector<8x128xf32> to vector<1x8x128xf32>
    %110 = arith.index_cast %c1_i32 : i32 to index
    %c0_27 = arith.constant 0 : index
    %c0_28 = arith.constant 0 : index
    %111 = vector.load %arg8[%110, %c0_27, %c0_28] : memref<12x8x128xf32, #tpu.memory_space<vmem>>, vector<1x8x128xf32>
    tpu.vector_store %arg8[%110, %c0_27, %c0_28], %109 {strides = array<i32>} : memref<12x8x128xf32, #tpu.memory_space<vmem>>, vector<1x8x128xf32>,
    %c2_i32 = arith.constant 2 : i32
    %112 = arith.index_cast %c2_i32 : i32 to index
    %c0_29 = arith.constant 0 : index
    %c0_30 = arith.constant 0 : index
    %113 = vector.load %arg0[%112, %c0_29, %c0_30] : memref<8x8x1xf32, #tpu.memory_space<vmem>>, vector<1x8x1xf32>
    %114 = vector.shape_cast %113 : vector<1x8x1xf32> to vector<8x1xf32>
    %115 = vector.broadcast %114 : vector<8x1xf32> to vector<8x512xf32>
    %116 = arith.mulf %115, %5 : vector<8x512xf32>
    %117 = arith.addf %116, %8 : vector<8x512xf32>
    %118 = arith.truncf %88 : vector<8x128xf32> to vector<8x128xbf16>
    %cst_31 = arith.constant dense<0.000000e+00> : vector<8x512xf32>
    %119 = tpu.matmul %118, %0, %cst_31 {dimension_numbers = #tpu.dot_dimension_numbers<[1], [0], [0], [1], [0, 0, 1, 1], [], []>} : vector<8x128xbf16>, vector<128x512xbf16>, vector<8x512xf32> -> vector<8x512xf32>
    %120 = arith.addf %119, %117 : vector<8x512xf32>
    %121 = vector.extract_strided_slice %120 {offsets = [0, 0], sizes = [8, 384], strides = [1, 1]} : vector<8x512xf32> to vector<8x384xf32>
    %122 = arith.negf %121 : vector<8x384xf32>
    %123 = math.exp %122 : vector<8x384xf32>
    %cst_32 = arith.constant 1.000000e+00 : f32
    %124 = vector.broadcast %cst_32 : f32 to vector<8x384xf32>
    %125 = arith.addf %124, %123 : vector<8x384xf32>
    %126 = arith.divf %124, %125 : vector<8x384xf32>
    %127 = vector.extract_strided_slice %120 {offsets = [0, 384], sizes = [8, 128], strides = [1, 1]} : vector<8x512xf32> to vector<8x128xf32>
    %128 = math.tanh %127 : vector<8x128xf32>
    %129 = vector.extract_strided_slice %126 {offsets = [0, 0], sizes = [8, 128], strides = [1, 1]} : vector<8x384xf32> to vector<8x128xf32>
    %130 = vector.extract_strided_slice %126 {offsets = [0, 128], sizes = [8, 128], strides = [1, 1]} : vector<8x384xf32> to vector<8x128xf32>
    %131 = vector.extract_strided_slice %126 {offsets = [0, 256], sizes = [8, 128], strides = [1, 1]} : vector<8x384xf32> to vector<8x128xf32>
    %132 = arith.mulf %130, %86 : vector<8x128xf32>
    %133 = arith.mulf %129, %128 : vector<8x128xf32>
    %134 = arith.addf %132, %133 : vector<8x128xf32>
    %135 = math.tanh %134 : vector<8x128xf32>
    %136 = arith.mulf %131, %135 : vector<8x128xf32>
    %137 = tpu.concatenate %136, %108 in 1 : vector<8x128xf32>, vector<8x128xf32> -> vector<8x256xf32>
    %138 = arith.truncf %137 : vector<8x256xf32> to vector<8x256xbf16>
    %cst_33 = arith.constant dense<0.000000e+00> : vector<8x512xf32>
    %139 = tpu.matmul %138, %2, %cst_33 {dimension_numbers = #tpu.dot_dimension_numbers<[1], [0], [0], [1], [0, 0, 1, 1], [], []>} : vector<8x256xbf16>, vector<256x512xbf16>, vector<8x512xf32> -> vector<8x512xf32>
    %140 = arith.addf %139, %14 : vector<8x512xf32>
    %141 = vector.extract_strided_slice %140 {offsets = [0, 0], sizes = [8, 384], strides = [1, 1]} : vector<8x512xf32> to vector<8x384xf32>
    %142 = arith.negf %141 : vector<8x384xf32>
    %143 = math.exp %142 : vector<8x384xf32>
    %cst_34 = arith.constant 1.000000e+00 : f32
    %144 = vector.broadcast %cst_34 : f32 to vector<8x384xf32>
    %145 = arith.addf %144, %143 : vector<8x384xf32>
    %146 = arith.divf %144, %145 : vector<8x384xf32>
    %147 = vector.extract_strided_slice %140 {offsets = [0, 384], sizes = [8, 128], strides = [1, 1]} : vector<8x512xf32> to vector<8x128xf32>
    %148 = math.tanh %147 : vector<8x128xf32>
    %149 = vector.extract_strided_slice %146 {offsets = [0, 0], sizes = [8, 128], strides = [1, 1]} : vector<8x384xf32> to vector<8x128xf32>
    %150 = vector.extract_strided_slice %146 {offsets = [0, 128], sizes = [8, 128], strides = [1, 1]} : vector<8x384xf32> to vector<8x128xf32>
    %151 = vector.extract_strided_slice %146 {offsets = [0, 256], sizes = [8, 128], strides = [1, 1]} : vector<8x384xf32> to vector<8x128xf32>
    %152 = arith.mulf %150, %106 : vector<8x128xf32>
    %153 = arith.mulf %149, %148 : vector<8x128xf32>
    %154 = arith.addf %152, %153 : vector<8x128xf32>
    %155 = math.tanh %154 : vector<8x128xf32>
    %156 = arith.mulf %151, %155 : vector<8x128xf32>
    %157 = vector.shape_cast %156 : vector<8x128xf32> to vector<1x8x128xf32>
    %158 = arith.index_cast %c2_i32 : i32 to index
    %c0_35 = arith.constant 0 : index
    %c0_36 = arith.constant 0 : index
    %159 = vector.load %arg8[%158, %c0_35, %c0_36] : memref<12x8x128xf32, #tpu.memory_space<vmem>>, vector<1x8x128xf32>
    tpu.vector_store %arg8[%158, %c0_35, %c0_36], %157 {strides = array<i32>} : memref<12x8x128xf32, #tpu.memory_space<vmem>>, vector<1x8x128xf32>,
    %c3_i32 = arith.constant 3 : i32
    %160 = arith.index_cast %c3_i32 : i32 to index
    %c0_37 = arith.constant 0 : index
    %c0_38 = arith.constant 0 : index
    %161 = vector.load %arg0[%160, %c0_37, %c0_38] : memref<8x8x1xf32, #tpu.memory_space<vmem>>, vector<1x8x1xf32>
    %162 = vector.shape_cast %161 : vector<1x8x1xf32> to vector<8x1xf32>
    %163 = vector.broadcast %162 : vector<8x1xf32> to vector<8x512xf32>
    %164 = arith.mulf %163, %5 : vector<8x512xf32>
    %165 = arith.addf %164, %8 : vector<8x512xf32>
    %166 = arith.truncf %136 : vector<8x128xf32> to vector<8x128xbf16>
    %cst_39 = arith.constant dense<0.000000e+00> : vector<8x512xf32>
    %167 = tpu.matmul %166, %0, %cst_39 {dimension_numbers = #tpu.dot_dimension_numbers<[1], [0], [0], [1], [0, 0, 1, 1], [], []>} : vector<8x128xbf16>, vector<128x512xbf16>, vector<8x512xf32> -> vector<8x512xf32>
    %168 = arith.addf %167, %165 : vector<8x512xf32>
    %169 = vector.extract_strided_slice %168 {offsets = [0, 0], sizes = [8, 384], strides = [1, 1]} : vector<8x512xf32> to vector<8x384xf32>
    %170 = arith.negf %169 : vector<8x384xf32>
    %171 = math.exp %170 : vector<8x384xf32>
    %cst_40 = arith.constant 1.000000e+00 : f32
    %172 = vector.broadcast %cst_40 : f32 to vector<8x384xf32>
    %173 = arith.addf %172, %171 : vector<8x384xf32>
    %174 = arith.divf %172, %173 : vector<8x384xf32>
    %175 = vector.extract_strided_slice %168 {offsets = [0, 384], sizes = [8, 128], strides = [1, 1]} : vector<8x512xf32> to vector<8x128xf32>
    %176 = math.tanh %175 : vector<8x128xf32>
    %177 = vector.extract_strided_slice %174 {offsets = [0, 0], sizes = [8, 128], strides = [1, 1]} : vector<8x384xf32> to vector<8x128xf32>
    %178 = vector.extract_strided_slice %174 {offsets = [0, 128], sizes = [8, 128], strides = [1, 1]} : vector<8x384xf32> to vector<8x128xf32>
    %179 = vector.extract_strided_slice %174 {offsets = [0, 256], sizes = [8, 128], strides = [1, 1]} : vector<8x384xf32> to vector<8x128xf32>
    %180 = arith.mulf %178, %134 : vector<8x128xf32>
    %181 = arith.mulf %177, %176 : vector<8x128xf32>
    %182 = arith.addf %180, %181 : vector<8x128xf32>
    %183 = math.tanh %182 : vector<8x128xf32>
    %184 = arith.mulf %179, %183 : vector<8x128xf32>
    %185 = tpu.concatenate %184, %156 in 1 : vector<8x128xf32>, vector<8x128xf32> -> vector<8x256xf32>
    %186 = arith.truncf %185 : vector<8x256xf32> to vector<8x256xbf16>
    %cst_41 = arith.constant dense<0.000000e+00> : vector<8x512xf32>
    %187 = tpu.matmul %186, %2, %cst_41 {dimension_numbers = #tpu.dot_dimension_numbers<[1], [0], [0], [1], [0, 0, 1, 1], [], []>} : vector<8x256xbf16>, vector<256x512xbf16>, vector<8x512xf32> -> vector<8x512xf32>
    %188 = arith.addf %187, %14 : vector<8x512xf32>
    %189 = vector.extract_strided_slice %188 {offsets = [0, 0], sizes = [8, 384], strides = [1, 1]} : vector<8x512xf32> to vector<8x384xf32>
    %190 = arith.negf %189 : vector<8x384xf32>
    %191 = math.exp %190 : vector<8x384xf32>
    %cst_42 = arith.constant 1.000000e+00 : f32
    %192 = vector.broadcast %cst_42 : f32 to vector<8x384xf32>
    %193 = arith.addf %192, %191 : vector<8x384xf32>
    %194 = arith.divf %192, %193 : vector<8x384xf32>
    %195 = vector.extract_strided_slice %188 {offsets = [0, 384], sizes = [8, 128], strides = [1, 1]} : vector<8x512xf32> to vector<8x128xf32>
    %196 = math.tanh %195 : vector<8x128xf32>
    %197 = vector.extract_strided_slice %194 {offsets = [0, 0], sizes = [8, 128], strides = [1, 1]} : vector<8x384xf32> to vector<8x128xf32>
    %198 = vector.extract_strided_slice %194 {offsets = [0, 128], sizes = [8, 128], strides = [1, 1]} : vector<8x384xf32> to vector<8x128xf32>
    %199 = vector.extract_strided_slice %194 {offsets = [0, 256], sizes = [8, 128], strides = [1, 1]} : vector<8x384xf32> to vector<8x128xf32>
    %200 = arith.mulf %198, %154 : vector<8x128xf32>
    %201 = arith.mulf %197, %196 : vector<8x128xf32>
    %202 = arith.addf %200, %201 : vector<8x128xf32>
    %203 = math.tanh %202 : vector<8x128xf32>
    %204 = arith.mulf %199, %203 : vector<8x128xf32>
    %205 = vector.shape_cast %204 : vector<8x128xf32> to vector<1x8x128xf32>
    %206 = arith.index_cast %c3_i32 : i32 to index
    %c0_43 = arith.constant 0 : index
    %c0_44 = arith.constant 0 : index
    %207 = vector.load %arg8[%206, %c0_43, %c0_44] : memref<12x8x128xf32, #tpu.memory_space<vmem>>, vector<1x8x128xf32>
    tpu.vector_store %arg8[%206, %c0_43, %c0_44], %205 {strides = array<i32>} : memref<12x8x128xf32, #tpu.memory_space<vmem>>, vector<1x8x128xf32>,
    %c4_i32 = arith.constant 4 : i32
    %208 = arith.index_cast %c4_i32 : i32 to index
    %c0_45 = arith.constant 0 : index
    %c0_46 = arith.constant 0 : index
    %209 = vector.load %arg0[%208, %c0_45, %c0_46] : memref<8x8x1xf32, #tpu.memory_space<vmem>>, vector<1x8x1xf32>
    %210 = vector.shape_cast %209 : vector<1x8x1xf32> to vector<8x1xf32>
    %211 = vector.broadcast %210 : vector<8x1xf32> to vector<8x512xf32>
    %212 = arith.mulf %211, %5 : vector<8x512xf32>
    %213 = arith.addf %212, %8 : vector<8x512xf32>
    %214 = arith.truncf %184 : vector<8x128xf32> to vector<8x128xbf16>
    %cst_47 = arith.constant dense<0.000000e+00> : vector<8x512xf32>
    %215 = tpu.matmul %214, %0, %cst_47 {dimension_numbers = #tpu.dot_dimension_numbers<[1], [0], [0], [1], [0, 0, 1, 1], [], []>} : vector<8x128xbf16>, vector<128x512xbf16>, vector<8x512xf32> -> vector<8x512xf32>
    %216 = arith.addf %215, %213 : vector<8x512xf32>
    %217 = vector.extract_strided_slice %216 {offsets = [0, 0], sizes = [8, 384], strides = [1, 1]} : vector<8x512xf32> to vector<8x384xf32>
    %218 = arith.negf %217 : vector<8x384xf32>
    %219 = math.exp %218 : vector<8x384xf32>
    %cst_48 = arith.constant 1.000000e+00 : f32
    %220 = vector.broadcast %cst_48 : f32 to vector<8x384xf32>
    %221 = arith.addf %220, %219 : vector<8x384xf32>
    %222 = arith.divf %220, %221 : vector<8x384xf32>
    %223 = vector.extract_strided_slice %216 {offsets = [0, 384], sizes = [8, 128], strides = [1, 1]} : vector<8x512xf32> to vector<8x128xf32>
    %224 = math.tanh %223 : vector<8x128xf32>
    %225 = vector.extract_strided_slice %222 {offsets = [0, 0], sizes = [8, 128], strides = [1, 1]} : vector<8x384xf32> to vector<8x128xf32>
    %226 = vector.extract_strided_slice %222 {offsets = [0, 128], sizes = [8, 128], strides = [1, 1]} : vector<8x384xf32> to vector<8x128xf32>
    %227 = vector.extract_strided_slice %222 {offsets = [0, 256], sizes = [8, 128], strides = [1, 1]} : vector<8x384xf32> to vector<8x128xf32>
    %228 = arith.mulf %226, %182 : vector<8x128xf32>
    %229 = arith.mulf %225, %224 : vector<8x128xf32>
    %230 = arith.addf %228, %229 : vector<8x128xf32>
    %231 = math.tanh %230 : vector<8x128xf32>
    %232 = arith.mulf %227, %231 : vector<8x128xf32>
    %233 = tpu.concatenate %232, %204 in 1 : vector<8x128xf32>, vector<8x128xf32> -> vector<8x256xf32>
    %234 = arith.truncf %233 : vector<8x256xf32> to vector<8x256xbf16>
    %cst_49 = arith.constant dense<0.000000e+00> : vector<8x512xf32>
    %235 = tpu.matmul %234, %2, %cst_49 {dimension_numbers = #tpu.dot_dimension_numbers<[1], [0], [0], [1], [0, 0, 1, 1], [], []>} : vector<8x256xbf16>, vector<256x512xbf16>, vector<8x512xf32> -> vector<8x512xf32>
    %236 = arith.addf %235, %14 : vector<8x512xf32>
    %237 = vector.extract_strided_slice %236 {offsets = [0, 0], sizes = [8, 384], strides = [1, 1]} : vector<8x512xf32> to vector<8x384xf32>
    %238 = arith.negf %237 : vector<8x384xf32>
    %239 = math.exp %238 : vector<8x384xf32>
    %cst_50 = arith.constant 1.000000e+00 : f32
    %240 = vector.broadcast %cst_50 : f32 to vector<8x384xf32>
    %241 = arith.addf %240, %239 : vector<8x384xf32>
    %242 = arith.divf %240, %241 : vector<8x384xf32>
    %243 = vector.extract_strided_slice %236 {offsets = [0, 384], sizes = [8, 128], strides = [1, 1]} : vector<8x512xf32> to vector<8x128xf32>
    %244 = math.tanh %243 : vector<8x128xf32>
    %245 = vector.extract_strided_slice %242 {offsets = [0, 0], sizes = [8, 128], strides = [1, 1]} : vector<8x384xf32> to vector<8x128xf32>
    %246 = vector.extract_strided_slice %242 {offsets = [0, 128], sizes = [8, 128], strides = [1, 1]} : vector<8x384xf32> to vector<8x128xf32>
    %247 = vector.extract_strided_slice %242 {offsets = [0, 256], sizes = [8, 128], strides = [1, 1]} : vector<8x384xf32> to vector<8x128xf32>
    %248 = arith.mulf %246, %202 : vector<8x128xf32>
    %249 = arith.mulf %245, %244 : vector<8x128xf32>
    %250 = arith.addf %248, %249 : vector<8x128xf32>
    %251 = math.tanh %250 : vector<8x128xf32>
    %252 = arith.mulf %247, %251 : vector<8x128xf32>
    %253 = vector.shape_cast %252 : vector<8x128xf32> to vector<1x8x128xf32>
    %254 = arith.index_cast %c4_i32 : i32 to index
    %c0_51 = arith.constant 0 : index
    %c0_52 = arith.constant 0 : index
    %255 = vector.load %arg8[%254, %c0_51, %c0_52] : memref<12x8x128xf32, #tpu.memory_space<vmem>>, vector<1x8x128xf32>
    tpu.vector_store %arg8[%254, %c0_51, %c0_52], %253 {strides = array<i32>} : memref<12x8x128xf32, #tpu.memory_space<vmem>>, vector<1x8x128xf32>,
    %c5_i32 = arith.constant 5 : i32
    %256 = arith.index_cast %c5_i32 : i32 to index
    %c0_53 = arith.constant 0 : index
    %c0_54 = arith.constant 0 : index
    %257 = vector.load %arg0[%256, %c0_53, %c0_54] : memref<8x8x1xf32, #tpu.memory_space<vmem>>, vector<1x8x1xf32>
    %258 = vector.shape_cast %257 : vector<1x8x1xf32> to vector<8x1xf32>
    %259 = vector.broadcast %258 : vector<8x1xf32> to vector<8x512xf32>
    %260 = arith.mulf %259, %5 : vector<8x512xf32>
    %261 = arith.addf %260, %8 : vector<8x512xf32>
    %262 = arith.truncf %232 : vector<8x128xf32> to vector<8x128xbf16>
    %cst_55 = arith.constant dense<0.000000e+00> : vector<8x512xf32>
    %263 = tpu.matmul %262, %0, %cst_55 {dimension_numbers = #tpu.dot_dimension_numbers<[1], [0], [0], [1], [0, 0, 1, 1], [], []>} : vector<8x128xbf16>, vector<128x512xbf16>, vector<8x512xf32> -> vector<8x512xf32>
    %264 = arith.addf %263, %261 : vector<8x512xf32>
    %265 = vector.extract_strided_slice %264 {offsets = [0, 0], sizes = [8, 384], strides = [1, 1]} : vector<8x512xf32> to vector<8x384xf32>
    %266 = arith.negf %265 : vector<8x384xf32>
    %267 = math.exp %266 : vector<8x384xf32>
    %cst_56 = arith.constant 1.000000e+00 : f32
    %268 = vector.broadcast %cst_56 : f32 to vector<8x384xf32>
    %269 = arith.addf %268, %267 : vector<8x384xf32>
    %270 = arith.divf %268, %269 : vector<8x384xf32>
    %271 = vector.extract_strided_slice %264 {offsets = [0, 384], sizes = [8, 128], strides = [1, 1]} : vector<8x512xf32> to vector<8x128xf32>
    %272 = math.tanh %271 : vector<8x128xf32>
    %273 = vector.extract_strided_slice %270 {offsets = [0, 0], sizes = [8, 128], strides = [1, 1]} : vector<8x384xf32> to vector<8x128xf32>
    %274 = vector.extract_strided_slice %270 {offsets = [0, 128], sizes = [8, 128], strides = [1, 1]} : vector<8x384xf32> to vector<8x128xf32>
    %275 = vector.extract_strided_slice %270 {offsets = [0, 256], sizes = [8, 128], strides = [1, 1]} : vector<8x384xf32> to vector<8x128xf32>
    %276 = arith.mulf %274, %230 : vector<8x128xf32>
    %277 = arith.mulf %273, %272 : vector<8x128xf32>
    %278 = arith.addf %276, %277 : vector<8x128xf32>
    %279 = math.tanh %278 : vector<8x128xf32>
    %280 = arith.mulf %275, %279 : vector<8x128xf32>
    %281 = tpu.concatenate %280, %252 in 1 : vector<8x128xf32>, vector<8x128xf32> -> vector<8x256xf32>
    %282 = arith.truncf %281 : vector<8x256xf32> to vector<8x256xbf16>
    %cst_57 = arith.constant dense<0.000000e+00> : vector<8x512xf32>
    %283 = tpu.matmul %282, %2, %cst_57 {dimension_numbers = #tpu.dot_dimension_numbers<[1], [0], [0], [1], [0, 0, 1, 1], [], []>} : vector<8x256xbf16>, vector<256x512xbf16>, vector<8x512xf32> -> vector<8x512xf32>
    %284 = arith.addf %283, %14 : vector<8x512xf32>
    %285 = vector.extract_strided_slice %284 {offsets = [0, 0], sizes = [8, 384], strides = [1, 1]} : vector<8x512xf32> to vector<8x384xf32>
    %286 = arith.negf %285 : vector<8x384xf32>
    %287 = math.exp %286 : vector<8x384xf32>
    %cst_58 = arith.constant 1.000000e+00 : f32
    %288 = vector.broadcast %cst_58 : f32 to vector<8x384xf32>
    %289 = arith.addf %288, %287 : vector<8x384xf32>
    %290 = arith.divf %288, %289 : vector<8x384xf32>
    %291 = vector.extract_strided_slice %284 {offsets = [0, 384], sizes = [8, 128], strides = [1, 1]} : vector<8x512xf32> to vector<8x128xf32>
    %292 = math.tanh %291 : vector<8x128xf32>
    %293 = vector.extract_strided_slice %290 {offsets = [0, 0], sizes = [8, 128], strides = [1, 1]} : vector<8x384xf32> to vector<8x128xf32>
    %294 = vector.extract_strided_slice %290 {offsets = [0, 128], sizes = [8, 128], strides = [1, 1]} : vector<8x384xf32> to vector<8x128xf32>
    %295 = vector.extract_strided_slice %290 {offsets = [0, 256], sizes = [8, 128], strides = [1, 1]} : vector<8x384xf32> to vector<8x128xf32>
    %296 = arith.mulf %294, %250 : vector<8x128xf32>
    %297 = arith.mulf %293, %292 : vector<8x128xf32>
    %298 = arith.addf %296, %297 : vector<8x128xf32>
    %299 = math.tanh %298 : vector<8x128xf32>
    %300 = arith.mulf %295, %299 : vector<8x128xf32>
    %301 = vector.shape_cast %300 : vector<8x128xf32> to vector<1x8x128xf32>
    %302 = arith.index_cast %c5_i32 : i32 to index
    %c0_59 = arith.constant 0 : index
    %c0_60 = arith.constant 0 : index
    %303 = vector.load %arg8[%302, %c0_59, %c0_60] : memref<12x8x128xf32, #tpu.memory_space<vmem>>, vector<1x8x128xf32>
    tpu.vector_store %arg8[%302, %c0_59, %c0_60], %301 {strides = array<i32>} : memref<12x8x128xf32, #tpu.memory_space<vmem>>, vector<1x8x128xf32>,
    %c6_i32 = arith.constant 6 : i32
    %304 = arith.index_cast %c6_i32 : i32 to index
    %c0_61 = arith.constant 0 : index
    %c0_62 = arith.constant 0 : index
    %305 = vector.load %arg0[%304, %c0_61, %c0_62] : memref<8x8x1xf32, #tpu.memory_space<vmem>>, vector<1x8x1xf32>
    %306 = vector.shape_cast %305 : vector<1x8x1xf32> to vector<8x1xf32>
    %307 = vector.broadcast %306 : vector<8x1xf32> to vector<8x512xf32>
    %308 = arith.mulf %307, %5 : vector<8x512xf32>
    %309 = arith.addf %308, %8 : vector<8x512xf32>
    %310 = arith.truncf %280 : vector<8x128xf32> to vector<8x128xbf16>
    %cst_63 = arith.constant dense<0.000000e+00> : vector<8x512xf32>
    %311 = tpu.matmul %310, %0, %cst_63 {dimension_numbers = #tpu.dot_dimension_numbers<[1], [0], [0], [1], [0, 0, 1, 1], [], []>} : vector<8x128xbf16>, vector<128x512xbf16>, vector<8x512xf32> -> vector<8x512xf32>
    %312 = arith.addf %311, %309 : vector<8x512xf32>
    %313 = vector.extract_strided_slice %312 {offsets = [0, 0], sizes = [8, 384], strides = [1, 1]} : vector<8x512xf32> to vector<8x384xf32>
    %314 = arith.negf %313 : vector<8x384xf32>
    %315 = math.exp %314 : vector<8x384xf32>
    %cst_64 = arith.constant 1.000000e+00 : f32
    %316 = vector.broadcast %cst_64 : f32 to vector<8x384xf32>
    %317 = arith.addf %316, %315 : vector<8x384xf32>
    %318 = arith.divf %316, %317 : vector<8x384xf32>
    %319 = vector.extract_strided_slice %312 {offsets = [0, 384], sizes = [8, 128], strides = [1, 1]} : vector<8x512xf32> to vector<8x128xf32>
    %320 = math.tanh %319 : vector<8x128xf32>
    %321 = vector.extract_strided_slice %318 {offsets = [0, 0], sizes = [8, 128], strides = [1, 1]} : vector<8x384xf32> to vector<8x128xf32>
    %322 = vector.extract_strided_slice %318 {offsets = [0, 128], sizes = [8, 128], strides = [1, 1]} : vector<8x384xf32> to vector<8x128xf32>
    %323 = vector.extract_strided_slice %318 {offsets = [0, 256], sizes = [8, 128], strides = [1, 1]} : vector<8x384xf32> to vector<8x128xf32>
    %324 = arith.mulf %322, %278 : vector<8x128xf32>
    %325 = arith.mulf %321, %320 : vector<8x128xf32>
    %326 = arith.addf %324, %325 : vector<8x128xf32>
    %327 = math.tanh %326 : vector<8x128xf32>
    %328 = arith.mulf %323, %327 : vector<8x128xf32>
    %329 = tpu.concatenate %328, %300 in 1 : vector<8x128xf32>, vector<8x128xf32> -> vector<8x256xf32>
    %330 = arith.truncf %329 : vector<8x256xf32> to vector<8x256xbf16>
    %cst_65 = arith.constant dense<0.000000e+00> : vector<8x512xf32>
    %331 = tpu.matmul %330, %2, %cst_65 {dimension_numbers = #tpu.dot_dimension_numbers<[1], [0], [0], [1], [0, 0, 1, 1], [], []>} : vector<8x256xbf16>, vector<256x512xbf16>, vector<8x512xf32> -> vector<8x512xf32>
    %332 = arith.addf %331, %14 : vector<8x512xf32>
    %333 = vector.extract_strided_slice %332 {offsets = [0, 0], sizes = [8, 384], strides = [1, 1]} : vector<8x512xf32> to vector<8x384xf32>
    %334 = arith.negf %333 : vector<8x384xf32>
    %335 = math.exp %334 : vector<8x384xf32>
    %cst_66 = arith.constant 1.000000e+00 : f32
    %336 = vector.broadcast %cst_66 : f32 to vector<8x384xf32>
    %337 = arith.addf %336, %335 : vector<8x384xf32>
    %338 = arith.divf %336, %337 : vector<8x384xf32>
    %339 = vector.extract_strided_slice %332 {offsets = [0, 384], sizes = [8, 128], strides = [1, 1]} : vector<8x512xf32> to vector<8x128xf32>
    %340 = math.tanh %339 : vector<8x128xf32>
    %341 = vector.extract_strided_slice %338 {offsets = [0, 0], sizes = [8, 128], strides = [1, 1]} : vector<8x384xf32> to vector<8x128xf32>
    %342 = vector.extract_strided_slice %338 {offsets = [0, 128], sizes = [8, 128], strides = [1, 1]} : vector<8x384xf32> to vector<8x128xf32>
    %343 = vector.extract_strided_slice %338 {offsets = [0, 256], sizes = [8, 128], strides = [1, 1]} : vector<8x384xf32> to vector<8x128xf32>
    %344 = arith.mulf %342, %298 : vector<8x128xf32>
    %345 = arith.mulf %341, %340 : vector<8x128xf32>
    %346 = arith.addf %344, %345 : vector<8x128xf32>
    %347 = math.tanh %346 : vector<8x128xf32>
    %348 = arith.mulf %343, %347 : vector<8x128xf32>
    %349 = vector.shape_cast %348 : vector<8x128xf32> to vector<1x8x128xf32>
    %350 = arith.index_cast %c6_i32 : i32 to index
    %c0_67 = arith.constant 0 : index
    %c0_68 = arith.constant 0 : index
    %351 = vector.load %arg8[%350, %c0_67, %c0_68] : memref<12x8x128xf32, #tpu.memory_space<vmem>>, vector<1x8x128xf32>
    tpu.vector_store %arg8[%350, %c0_67, %c0_68], %349 {strides = array<i32>} : memref<12x8x128xf32, #tpu.memory_space<vmem>>, vector<1x8x128xf32>,
    %c7_i32 = arith.constant 7 : i32
    %352 = arith.index_cast %c7_i32 : i32 to index
    %c0_69 = arith.constant 0 : index
    %c0_70 = arith.constant 0 : index
    %353 = vector.load %arg0[%352, %c0_69, %c0_70] : memref<8x8x1xf32, #tpu.memory_space<vmem>>, vector<1x8x1xf32>
    %354 = vector.shape_cast %353 : vector<1x8x1xf32> to vector<8x1xf32>
    %355 = vector.broadcast %354 : vector<8x1xf32> to vector<8x512xf32>
    %356 = arith.mulf %355, %5 : vector<8x512xf32>
    %357 = arith.addf %356, %8 : vector<8x512xf32>
    %358 = arith.truncf %328 : vector<8x128xf32> to vector<8x128xbf16>
    %cst_71 = arith.constant dense<0.000000e+00> : vector<8x512xf32>
    %359 = tpu.matmul %358, %0, %cst_71 {dimension_numbers = #tpu.dot_dimension_numbers<[1], [0], [0], [1], [0, 0, 1, 1], [], []>} : vector<8x128xbf16>, vector<128x512xbf16>, vector<8x512xf32> -> vector<8x512xf32>
    %360 = arith.addf %359, %357 : vector<8x512xf32>
    %361 = vector.extract_strided_slice %360 {offsets = [0, 0], sizes = [8, 384], strides = [1, 1]} : vector<8x512xf32> to vector<8x384xf32>
    %362 = arith.negf %361 : vector<8x384xf32>
    %363 = math.exp %362 : vector<8x384xf32>
    %cst_72 = arith.constant 1.000000e+00 : f32
    %364 = vector.broadcast %cst_72 : f32 to vector<8x384xf32>
    %365 = arith.addf %364, %363 : vector<8x384xf32>
    %366 = arith.divf %364, %365 : vector<8x384xf32>
    %367 = vector.extract_strided_slice %360 {offsets = [0, 384], sizes = [8, 128], strides = [1, 1]} : vector<8x512xf32> to vector<8x128xf32>
    %368 = math.tanh %367 : vector<8x128xf32>
    %369 = vector.extract_strided_slice %366 {offsets = [0, 0], sizes = [8, 128], strides = [1, 1]} : vector<8x384xf32> to vector<8x128xf32>
    %370 = vector.extract_strided_slice %366 {offsets = [0, 128], sizes = [8, 128], strides = [1, 1]} : vector<8x384xf32> to vector<8x128xf32>
    %371 = vector.extract_strided_slice %366 {offsets = [0, 256], sizes = [8, 128], strides = [1, 1]} : vector<8x384xf32> to vector<8x128xf32>
    %372 = arith.mulf %370, %326 : vector<8x128xf32>
    %373 = arith.mulf %369, %368 : vector<8x128xf32>
    %374 = arith.addf %372, %373 : vector<8x128xf32>
    %375 = math.tanh %374 : vector<8x128xf32>
    %376 = arith.mulf %371, %375 : vector<8x128xf32>
    %377 = tpu.concatenate %376, %348 in 1 : vector<8x128xf32>, vector<8x128xf32> -> vector<8x256xf32>
    %378 = arith.truncf %377 : vector<8x256xf32> to vector<8x256xbf16>
    %cst_73 = arith.constant dense<0.000000e+00> : vector<8x512xf32>
    %379 = tpu.matmul %378, %2, %cst_73 {dimension_numbers = #tpu.dot_dimension_numbers<[1], [0], [0], [1], [0, 0, 1, 1], [], []>} : vector<8x256xbf16>, vector<256x512xbf16>, vector<8x512xf32> -> vector<8x512xf32>
    %380 = arith.addf %379, %14 : vector<8x512xf32>
    %381 = vector.extract_strided_slice %380 {offsets = [0, 0], sizes = [8, 384], strides = [1, 1]} : vector<8x512xf32> to vector<8x384xf32>
    %382 = arith.negf %381 : vector<8x384xf32>
    %383 = math.exp %382 : vector<8x384xf32>
    %cst_74 = arith.constant 1.000000e+00 : f32
    %384 = vector.broadcast %cst_74 : f32 to vector<8x384xf32>
    %385 = arith.addf %384, %383 : vector<8x384xf32>
    %386 = arith.divf %384, %385 : vector<8x384xf32>
    %387 = vector.extract_strided_slice %380 {offsets = [0, 384], sizes = [8, 128], strides = [1, 1]} : vector<8x512xf32> to vector<8x128xf32>
    %388 = math.tanh %387 : vector<8x128xf32>
    %389 = vector.extract_strided_slice %386 {offsets = [0, 0], sizes = [8, 128], strides = [1, 1]} : vector<8x384xf32> to vector<8x128xf32>
    %390 = vector.extract_strided_slice %386 {offsets = [0, 128], sizes = [8, 128], strides = [1, 1]} : vector<8x384xf32> to vector<8x128xf32>
    %391 = vector.extract_strided_slice %386 {offsets = [0, 256], sizes = [8, 128], strides = [1, 1]} : vector<8x384xf32> to vector<8x128xf32>
    %392 = arith.mulf %390, %346 : vector<8x128xf32>
    %393 = arith.mulf %389, %388 : vector<8x128xf32>
    %394 = arith.addf %392, %393 : vector<8x128xf32>
    %395 = math.tanh %394 : vector<8x128xf32>
    %396 = arith.mulf %391, %395 : vector<8x128xf32>
    %397 = vector.shape_cast %396 : vector<8x128xf32> to vector<1x8x128xf32>
    %398 = arith.index_cast %c7_i32 : i32 to index
    %c0_75 = arith.constant 0 : index
    %c0_76 = arith.constant 0 : index
    %399 = vector.load %arg8[%398, %c0_75, %c0_76] : memref<12x8x128xf32, #tpu.memory_space<vmem>>, vector<1x8x128xf32>
    tpu.vector_store %arg8[%398, %c0_75, %c0_76], %397 {strides = array<i32>} : memref<12x8x128xf32, #tpu.memory_space<vmem>>, vector<1x8x128xf32>,
    %c8_i32 = arith.constant 8 : i32
    %c8_i32_77 = arith.constant 8 : i32
    %400 = tpu.concatenate %376, %396 in 1 : vector<8x128xf32>, vector<8x128xf32> -> vector<8x256xf32>
    %401 = arith.truncf %400 : vector<8x256xf32> to vector<8x256xbf16>
    %cst_78 = arith.constant dense<0.000000e+00> : vector<8x512xf32>
    %402 = tpu.matmul %401, %1, %cst_78 {dimension_numbers = #tpu.dot_dimension_numbers<[1], [0], [0], [1], [0, 0, 1, 1], [], []>} : vector<8x256xbf16>, vector<256x512xbf16>, vector<8x512xf32> -> vector<8x512xf32>
    %403 = arith.addf %402, %11 : vector<8x512xf32>
    %404 = vector.extract_strided_slice %403 {offsets = [0, 0], sizes = [8, 384], strides = [1, 1]} : vector<8x512xf32> to vector<8x384xf32>
    %405 = arith.negf %404 : vector<8x384xf32>
    %406 = math.exp %405 : vector<8x384xf32>
    %cst_79 = arith.constant 1.000000e+00 : f32
    %407 = vector.broadcast %cst_79 : f32 to vector<8x384xf32>
    %408 = arith.addf %407, %406 : vector<8x384xf32>
    %409 = arith.divf %407, %408 : vector<8x384xf32>
    %410 = vector.extract_strided_slice %403 {offsets = [0, 384], sizes = [8, 128], strides = [1, 1]} : vector<8x512xf32> to vector<8x128xf32>
    %411 = math.tanh %410 : vector<8x128xf32>
    %412 = vector.extract_strided_slice %409 {offsets = [0, 0], sizes = [8, 128], strides = [1, 1]} : vector<8x384xf32> to vector<8x128xf32>
    %413 = vector.extract_strided_slice %409 {offsets = [0, 128], sizes = [8, 128], strides = [1, 1]} : vector<8x384xf32> to vector<8x128xf32>
    %414 = vector.extract_strided_slice %409 {offsets = [0, 256], sizes = [8, 128], strides = [1, 1]} : vector<8x384xf32> to vector<8x128xf32>
    %415 = arith.mulf %413, %374 : vector<8x128xf32>
    %416 = arith.mulf %412, %411 : vector<8x128xf32>
    %417 = arith.addf %415, %416 : vector<8x128xf32>
    %418 = math.tanh %417 : vector<8x128xf32>
    %419 = arith.mulf %414, %418 : vector<8x128xf32>
    %420 = tpu.concatenate %419, %396 in 1 : vector<8x128xf32>, vector<8x128xf32> -> vector<8x256xf32>
    %421 = arith.truncf %420 : vector<8x256xf32> to vector<8x256xbf16>
    %cst_80 = arith.constant dense<0.000000e+00> : vector<8x512xf32>
    %422 = tpu.matmul %421, %2, %cst_80 {dimension_numbers = #tpu.dot_dimension_numbers<[1], [0], [0], [1], [0, 0, 1, 1], [], []>} : vector<8x256xbf16>, vector<256x512xbf16>, vector<8x512xf32> -> vector<8x512xf32>
    %423 = arith.addf %422, %14 : vector<8x512xf32>
    %424 = vector.extract_strided_slice %423 {offsets = [0, 0], sizes = [8, 384], strides = [1, 1]} : vector<8x512xf32> to vector<8x384xf32>
    %425 = arith.negf %424 : vector<8x384xf32>
    %426 = math.exp %425 : vector<8x384xf32>
    %cst_81 = arith.constant 1.000000e+00 : f32
    %427 = vector.broadcast %cst_81 : f32 to vector<8x384xf32>
    %428 = arith.addf %427, %426 : vector<8x384xf32>
    %429 = arith.divf %427, %428 : vector<8x384xf32>
    %430 = vector.extract_strided_slice %423 {offsets = [0, 384], sizes = [8, 128], strides = [1, 1]} : vector<8x512xf32> to vector<8x128xf32>
    %431 = math.tanh %430 : vector<8x128xf32>
    %432 = vector.extract_strided_slice %429 {offsets = [0, 0], sizes = [8, 128], strides = [1, 1]} : vector<8x384xf32> to vector<8x128xf32>
    %433 = vector.extract_strided_slice %429 {offsets = [0, 128], sizes = [8, 128], strides = [1, 1]} : vector<8x384xf32> to vector<8x128xf32>
    %434 = vector.extract_strided_slice %429 {offsets = [0, 256], sizes = [8, 128], strides = [1, 1]} : vector<8x384xf32> to vector<8x128xf32>
    %435 = arith.mulf %433, %394 : vector<8x128xf32>
    %436 = arith.mulf %432, %431 : vector<8x128xf32>
    %437 = arith.addf %435, %436 : vector<8x128xf32>
    %438 = math.tanh %437 : vector<8x128xf32>
    %439 = arith.mulf %434, %438 : vector<8x128xf32>
    %440 = vector.shape_cast %439 : vector<8x128xf32> to vector<1x8x128xf32>
    %441 = arith.index_cast %c8_i32_77 : i32 to index
    %c0_82 = arith.constant 0 : index
    %c0_83 = arith.constant 0 : index
    %442 = vector.load %arg8[%441, %c0_82, %c0_83] : memref<12x8x128xf32, #tpu.memory_space<vmem>>, vector<1x8x128xf32>
    tpu.vector_store %arg8[%441, %c0_82, %c0_83], %440 {strides = array<i32>} : memref<12x8x128xf32, #tpu.memory_space<vmem>>, vector<1x8x128xf32>,
    %c9_i32 = arith.constant 9 : i32
    %443 = tpu.concatenate %419, %439 in 1 : vector<8x128xf32>, vector<8x128xf32> -> vector<8x256xf32>
    %444 = arith.truncf %443 : vector<8x256xf32> to vector<8x256xbf16>
    %cst_84 = arith.constant dense<0.000000e+00> : vector<8x512xf32>
    %445 = tpu.matmul %444, %1, %cst_84 {dimension_numbers = #tpu.dot_dimension_numbers<[1], [0], [0], [1], [0, 0, 1, 1], [], []>} : vector<8x256xbf16>, vector<256x512xbf16>, vector<8x512xf32> -> vector<8x512xf32>
    %446 = arith.addf %445, %11 : vector<8x512xf32>
    %447 = vector.extract_strided_slice %446 {offsets = [0, 0], sizes = [8, 384], strides = [1, 1]} : vector<8x512xf32> to vector<8x384xf32>
    %448 = arith.negf %447 : vector<8x384xf32>
    %449 = math.exp %448 : vector<8x384xf32>
    %cst_85 = arith.constant 1.000000e+00 : f32
    %450 = vector.broadcast %cst_85 : f32 to vector<8x384xf32>
    %451 = arith.addf %450, %449 : vector<8x384xf32>
    %452 = arith.divf %450, %451 : vector<8x384xf32>
    %453 = vector.extract_strided_slice %446 {offsets = [0, 384], sizes = [8, 128], strides = [1, 1]} : vector<8x512xf32> to vector<8x128xf32>
    %454 = math.tanh %453 : vector<8x128xf32>
    %455 = vector.extract_strided_slice %452 {offsets = [0, 0], sizes = [8, 128], strides = [1, 1]} : vector<8x384xf32> to vector<8x128xf32>
    %456 = vector.extract_strided_slice %452 {offsets = [0, 128], sizes = [8, 128], strides = [1, 1]} : vector<8x384xf32> to vector<8x128xf32>
    %457 = vector.extract_strided_slice %452 {offsets = [0, 256], sizes = [8, 128], strides = [1, 1]} : vector<8x384xf32> to vector<8x128xf32>
    %458 = arith.mulf %456, %417 : vector<8x128xf32>
    %459 = arith.mulf %455, %454 : vector<8x128xf32>
    %460 = arith.addf %458, %459 : vector<8x128xf32>
    %461 = math.tanh %460 : vector<8x128xf32>
    %462 = arith.mulf %457, %461 : vector<8x128xf32>
    %463 = tpu.concatenate %462, %439 in 1 : vector<8x128xf32>, vector<8x128xf32> -> vector<8x256xf32>
    %464 = arith.truncf %463 : vector<8x256xf32> to vector<8x256xbf16>
    %cst_86 = arith.constant dense<0.000000e+00> : vector<8x512xf32>
    %465 = tpu.matmul %464, %2, %cst_86 {dimension_numbers = #tpu.dot_dimension_numbers<[1], [0], [0], [1], [0, 0, 1, 1], [], []>} : vector<8x256xbf16>, vector<256x512xbf16>, vector<8x512xf32> -> vector<8x512xf32>
    %466 = arith.addf %465, %14 : vector<8x512xf32>
    %467 = vector.extract_strided_slice %466 {offsets = [0, 0], sizes = [8, 384], strides = [1, 1]} : vector<8x512xf32> to vector<8x384xf32>
    %468 = arith.negf %467 : vector<8x384xf32>
    %469 = math.exp %468 : vector<8x384xf32>
    %cst_87 = arith.constant 1.000000e+00 : f32
    %470 = vector.broadcast %cst_87 : f32 to vector<8x384xf32>
    %471 = arith.addf %470, %469 : vector<8x384xf32>
    %472 = arith.divf %470, %471 : vector<8x384xf32>
    %473 = vector.extract_strided_slice %466 {offsets = [0, 384], sizes = [8, 128], strides = [1, 1]} : vector<8x512xf32> to vector<8x128xf32>
    %474 = math.tanh %473 : vector<8x128xf32>
    %475 = vector.extract_strided_slice %472 {offsets = [0, 0], sizes = [8, 128], strides = [1, 1]} : vector<8x384xf32> to vector<8x128xf32>
    %476 = vector.extract_strided_slice %472 {offsets = [0, 128], sizes = [8, 128], strides = [1, 1]} : vector<8x384xf32> to vector<8x128xf32>
    %477 = vector.extract_strided_slice %472 {offsets = [0, 256], sizes = [8, 128], strides = [1, 1]} : vector<8x384xf32> to vector<8x128xf32>
    %478 = arith.mulf %476, %437 : vector<8x128xf32>
    %479 = arith.mulf %475, %474 : vector<8x128xf32>
    %480 = arith.addf %478, %479 : vector<8x128xf32>
    %481 = math.tanh %480 : vector<8x128xf32>
    %482 = arith.mulf %477, %481 : vector<8x128xf32>
    %483 = vector.shape_cast %482 : vector<8x128xf32> to vector<1x8x128xf32>
    %484 = arith.index_cast %c9_i32 : i32 to index
    %c0_88 = arith.constant 0 : index
    %c0_89 = arith.constant 0 : index
    %485 = vector.load %arg8[%484, %c0_88, %c0_89] : memref<12x8x128xf32, #tpu.memory_space<vmem>>, vector<1x8x128xf32>
    tpu.vector_store %arg8[%484, %c0_88, %c0_89], %483 {strides = array<i32>} : memref<12x8x128xf32, #tpu.memory_space<vmem>>, vector<1x8x128xf32>,
    %c10_i32 = arith.constant 10 : i32
    %486 = tpu.concatenate %462, %482 in 1 : vector<8x128xf32>, vector<8x128xf32> -> vector<8x256xf32>
    %487 = arith.truncf %486 : vector<8x256xf32> to vector<8x256xbf16>
    %cst_90 = arith.constant dense<0.000000e+00> : vector<8x512xf32>
    %488 = tpu.matmul %487, %1, %cst_90 {dimension_numbers = #tpu.dot_dimension_numbers<[1], [0], [0], [1], [0, 0, 1, 1], [], []>} : vector<8x256xbf16>, vector<256x512xbf16>, vector<8x512xf32> -> vector<8x512xf32>
    %489 = arith.addf %488, %11 : vector<8x512xf32>
    %490 = vector.extract_strided_slice %489 {offsets = [0, 0], sizes = [8, 384], strides = [1, 1]} : vector<8x512xf32> to vector<8x384xf32>
    %491 = arith.negf %490 : vector<8x384xf32>
    %492 = math.exp %491 : vector<8x384xf32>
    %cst_91 = arith.constant 1.000000e+00 : f32
    %493 = vector.broadcast %cst_91 : f32 to vector<8x384xf32>
    %494 = arith.addf %493, %492 : vector<8x384xf32>
    %495 = arith.divf %493, %494 : vector<8x384xf32>
    %496 = vector.extract_strided_slice %489 {offsets = [0, 384], sizes = [8, 128], strides = [1, 1]} : vector<8x512xf32> to vector<8x128xf32>
    %497 = math.tanh %496 : vector<8x128xf32>
    %498 = vector.extract_strided_slice %495 {offsets = [0, 0], sizes = [8, 128], strides = [1, 1]} : vector<8x384xf32> to vector<8x128xf32>
    %499 = vector.extract_strided_slice %495 {offsets = [0, 128], sizes = [8, 128], strides = [1, 1]} : vector<8x384xf32> to vector<8x128xf32>
    %500 = vector.extract_strided_slice %495 {offsets = [0, 256], sizes = [8, 128], strides = [1, 1]} : vector<8x384xf32> to vector<8x128xf32>
    %501 = arith.mulf %499, %460 : vector<8x128xf32>
    %502 = arith.mulf %498, %497 : vector<8x128xf32>
    %503 = arith.addf %501, %502 : vector<8x128xf32>
    %504 = math.tanh %503 : vector<8x128xf32>
    %505 = arith.mulf %500, %504 : vector<8x128xf32>
    %506 = tpu.concatenate %505, %482 in 1 : vector<8x128xf32>, vector<8x128xf32> -> vector<8x256xf32>
    %507 = arith.truncf %506 : vector<8x256xf32> to vector<8x256xbf16>
    %cst_92 = arith.constant dense<0.000000e+00> : vector<8x512xf32>
    %508 = tpu.matmul %507, %2, %cst_92 {dimension_numbers = #tpu.dot_dimension_numbers<[1], [0], [0], [1], [0, 0, 1, 1], [], []>} : vector<8x256xbf16>, vector<256x512xbf16>, vector<8x512xf32> -> vector<8x512xf32>
    %509 = arith.addf %508, %14 : vector<8x512xf32>
    %510 = vector.extract_strided_slice %509 {offsets = [0, 0], sizes = [8, 384], strides = [1, 1]} : vector<8x512xf32> to vector<8x384xf32>
    %511 = arith.negf %510 : vector<8x384xf32>
    %512 = math.exp %511 : vector<8x384xf32>
    %cst_93 = arith.constant 1.000000e+00 : f32
    %513 = vector.broadcast %cst_93 : f32 to vector<8x384xf32>
    %514 = arith.addf %513, %512 : vector<8x384xf32>
    %515 = arith.divf %513, %514 : vector<8x384xf32>
    %516 = vector.extract_strided_slice %509 {offsets = [0, 384], sizes = [8, 128], strides = [1, 1]} : vector<8x512xf32> to vector<8x128xf32>
    %517 = math.tanh %516 : vector<8x128xf32>
    %518 = vector.extract_strided_slice %515 {offsets = [0, 0], sizes = [8, 128], strides = [1, 1]} : vector<8x384xf32> to vector<8x128xf32>
    %519 = vector.extract_strided_slice %515 {offsets = [0, 128], sizes = [8, 128], strides = [1, 1]} : vector<8x384xf32> to vector<8x128xf32>
    %520 = vector.extract_strided_slice %515 {offsets = [0, 256], sizes = [8, 128], strides = [1, 1]} : vector<8x384xf32> to vector<8x128xf32>
    %521 = arith.mulf %519, %480 : vector<8x128xf32>
    %522 = arith.mulf %518, %517 : vector<8x128xf32>
    %523 = arith.addf %521, %522 : vector<8x128xf32>
    %524 = math.tanh %523 : vector<8x128xf32>
    %525 = arith.mulf %520, %524 : vector<8x128xf32>
    %526 = vector.shape_cast %525 : vector<8x128xf32> to vector<1x8x128xf32>
    %527 = arith.index_cast %c10_i32 : i32 to index
    %c0_94 = arith.constant 0 : index
    %c0_95 = arith.constant 0 : index
    %528 = vector.load %arg8[%527, %c0_94, %c0_95] : memref<12x8x128xf32, #tpu.memory_space<vmem>>, vector<1x8x128xf32>
    tpu.vector_store %arg8[%527, %c0_94, %c0_95], %526 {strides = array<i32>} : memref<12x8x128xf32, #tpu.memory_space<vmem>>, vector<1x8x128xf32>,
    %c11_i32 = arith.constant 11 : i32
    %529 = tpu.concatenate %505, %525 in 1 : vector<8x128xf32>, vector<8x128xf32> -> vector<8x256xf32>
    %530 = arith.truncf %529 : vector<8x256xf32> to vector<8x256xbf16>
    %cst_96 = arith.constant dense<0.000000e+00> : vector<8x512xf32>
    %531 = tpu.matmul %530, %1, %cst_96 {dimension_numbers = #tpu.dot_dimension_numbers<[1], [0], [0], [1], [0, 0, 1, 1], [], []>} : vector<8x256xbf16>, vector<256x512xbf16>, vector<8x512xf32> -> vector<8x512xf32>
    %532 = arith.addf %531, %11 : vector<8x512xf32>
    %533 = vector.extract_strided_slice %532 {offsets = [0, 0], sizes = [8, 384], strides = [1, 1]} : vector<8x512xf32> to vector<8x384xf32>
    %534 = arith.negf %533 : vector<8x384xf32>
    %535 = math.exp %534 : vector<8x384xf32>
    %cst_97 = arith.constant 1.000000e+00 : f32
    %536 = vector.broadcast %cst_97 : f32 to vector<8x384xf32>
    %537 = arith.addf %536, %535 : vector<8x384xf32>
    %538 = arith.divf %536, %537 : vector<8x384xf32>
    %539 = vector.extract_strided_slice %532 {offsets = [0, 384], sizes = [8, 128], strides = [1, 1]} : vector<8x512xf32> to vector<8x128xf32>
    %540 = math.tanh %539 : vector<8x128xf32>
    %541 = vector.extract_strided_slice %538 {offsets = [0, 0], sizes = [8, 128], strides = [1, 1]} : vector<8x384xf32> to vector<8x128xf32>
    %542 = vector.extract_strided_slice %538 {offsets = [0, 128], sizes = [8, 128], strides = [1, 1]} : vector<8x384xf32> to vector<8x128xf32>
    %543 = vector.extract_strided_slice %538 {offsets = [0, 256], sizes = [8, 128], strides = [1, 1]} : vector<8x384xf32> to vector<8x128xf32>
    %544 = arith.mulf %542, %503 : vector<8x128xf32>
    %545 = arith.mulf %541, %540 : vector<8x128xf32>
    %546 = arith.addf %544, %545 : vector<8x128xf32>
    %547 = math.tanh %546 : vector<8x128xf32>
    %548 = arith.mulf %543, %547 : vector<8x128xf32>
    %549 = tpu.concatenate %548, %525 in 1 : vector<8x128xf32>, vector<8x128xf32> -> vector<8x256xf32>
    %550 = arith.truncf %549 : vector<8x256xf32> to vector<8x256xbf16>
    %cst_98 = arith.constant dense<0.000000e+00> : vector<8x512xf32>
    %551 = tpu.matmul %550, %2, %cst_98 {dimension_numbers = #tpu.dot_dimension_numbers<[1], [0], [0], [1], [0, 0, 1, 1], [], []>} : vector<8x256xbf16>, vector<256x512xbf16>, vector<8x512xf32> -> vector<8x512xf32>
    %552 = arith.addf %551, %14 : vector<8x512xf32>
    %553 = vector.extract_strided_slice %552 {offsets = [0, 0], sizes = [8, 384], strides = [1, 1]} : vector<8x512xf32> to vector<8x384xf32>
    %554 = arith.negf %553 : vector<8x384xf32>
    %555 = math.exp %554 : vector<8x384xf32>
    %cst_99 = arith.constant 1.000000e+00 : f32
    %556 = vector.broadcast %cst_99 : f32 to vector<8x384xf32>
    %557 = arith.addf %556, %555 : vector<8x384xf32>
    %558 = arith.divf %556, %557 : vector<8x384xf32>
    %559 = vector.extract_strided_slice %552 {offsets = [0, 384], sizes = [8, 128], strides = [1, 1]} : vector<8x512xf32> to vector<8x128xf32>
    %560 = math.tanh %559 : vector<8x128xf32>
    %561 = vector.extract_strided_slice %558 {offsets = [0, 0], sizes = [8, 128], strides = [1, 1]} : vector<8x384xf32> to vector<8x128xf32>
    %562 = vector.extract_strided_slice %558 {offsets = [0, 128], sizes = [8, 128], strides = [1, 1]} : vector<8x384xf32> to vector<8x128xf32>
    %563 = vector.extract_strided_slice %558 {offsets = [0, 256], sizes = [8, 128], strides = [1, 1]} : vector<8x384xf32> to vector<8x128xf32>
    %564 = arith.mulf %562, %523 : vector<8x128xf32>
    %565 = arith.mulf %561, %560 : vector<8x128xf32>
    %566 = arith.addf %564, %565 : vector<8x128xf32>
    %567 = math.tanh %566 : vector<8x128xf32>
    %568 = arith.mulf %563, %567 : vector<8x128xf32>
    %569 = vector.shape_cast %568 : vector<8x128xf32> to vector<1x8x128xf32>
    %570 = arith.index_cast %c11_i32 : i32 to index
    %c0_100 = arith.constant 0 : index
    %c0_101 = arith.constant 0 : index
    %571 = vector.load %arg8[%570, %c0_100, %c0_101] : memref<12x8x128xf32, #tpu.memory_space<vmem>>, vector<1x8x128xf32>
    tpu.vector_store %arg8[%570, %c0_100, %c0_101], %569 {strides = array<i32>} : memref<12x8x128xf32, #tpu.memory_space<vmem>>, vector<1x8x128xf32>,
    %c4_i32_102 = arith.constant 4 : i32
    return
  }
}

</mosaic_0001>

<bundles_post_ra>
// kernel: sequence_forward.1
= control target key start
LH: loop header
LB: loop body
LE: loop exit
PB: predicated region body
PF: predicated region fallthrough
CT: control target
= control target key end

     0   :  { %v9132_v1 = vmov 0   ;;  %s9123_s1 = inlined_call_operand.vmem [shape: bf16[128,512], index: 1, kind: input, shape index: {}]   ;;  %s9124_s0 = inlined_call_operand.vmem [shape: f32[8,8,1], index: 0, kind: input, shape index: {}]   ;;  %s9125_s3 = inlined_call_operand.vmem [shape: bf16[256,512], index: 3, kind: input, shape index: {}]   ;;  %s9126_s4 = inlined_call_operand.vmem [shape: f32[1,512], index: 4, kind: input, shape index: {}]   ;;  %s9127_s5 = inlined_call_operand.vmem [shape: f32[1,512], index: 5, kind: input, shape index: {}]   ;;  %s9128_s7 = inlined_call_operand.vmem [shape: f32[1,512], index: 7, kind: input, shape index: {}]   ;;  %s9129_s8 = inlined_call_operand.vmem [shape: f32[12,8,128], index: 8, kind: output, shape index: {}]   ;;  %s9130_s2 = inlined_call_operand.vmem [shape: bf16[256,512], index: 2, kind: input, shape index: {}]   ;;  %s9131_s6 = inlined_call_operand.vmem [shape: f32[1,512], index: 6, kind: input, shape index: {}]  }
   0x1   :  { %v5104_v0 = vld [vmem:[%s9123_s1 + $0x4] ss:$16 sps:$4 sm:$0xff]   ;;  %484 = vmatprep.mubr.bf16.mxu0 %v9132_v1  ;;  %525 = vmatprep.mubr.bf16.mxu1 %v9132_v1  ;;  %v5111_v2 = vld [vmem:[%s9123_s1 + $0xc] ss:$16 sps:$4 sm:$0xff]   ;;  %v5119_v3 = vld [vmem:[%s9123_s1] ss:$16 sps:$4 sm:$0xff]  }
   0x2   :  { %9682 = vst [vmem:[#allocation2_spill] sm:$0xff] %v5104_v0  ;;  %9683 = vst [vmem:[#allocation3_spill] sm:$0xff] %v5111_v2  ;;  %4044 = vset.pattern.permute.xlu0 %v9132_v1  ;;  %4045 = vset.pattern.permute.xlu1 %v9132_v1  ;;  %v5124_v4 = vld [vmem:[%s9123_s1 + $0x8] ss:$16 sps:$4 sm:$0xff]   ;;  %v5130_v5 = vld [vmem:[%s9123_s1 + $0x24] ss:$16 sps:$4 sm:$0xff]  }
   0x3   :  { %452 = vmatprep.subr.bf16.mxu0 %v5104_v0  ;;  %493 = vmatprep.subr.bf16.mxu1 %v5111_v2  ;;  %v5137_v6 = vld [vmem:[%s9123_s1 + $0x2c] ss:$16 sps:$4 sm:$0xff]   ;;  %v5142_v7 = vld [vmem:[%s9123_s1 + $0x20] ss:$16 sps:$4 sm:$0xff]   ;;  %v5148_v8 = vld [vmem:[%s9123_s1 + $0x28] ss:$16 sps:$4 sm:$0xff]  }
   0x4   :  { %453 = vmatpush1.bf16.msra.mxu0 %v5119_v3  ;;  %494 = vmatpush1.bf16.msra.mxu1 %v5124_v4  ;;  %v5154_v9 = vld [vmem:[%s9123_s1 + $0x44] ss:$16 sps:$4 sm:$0xff]   ;;  %v5159_v10 = vld [vmem:[%s9123_s1 + $0x4c] ss:$16 sps:$4 sm:$0xff]   ;;  %v5164_v11 = vld [vmem:[%s9123_s1 + $0x40] ss:$16 sps:$4 sm:$0xff]  }
   0x5   :  { %454 = vmatprep.subr.bf16.mxu0 %v5130_v5  ;;  %495 = vmatprep.subr.bf16.mxu1 %v5137_v6  ;;  %v5169_v12 = vld [vmem:[%s9123_s1 + $0x48] ss:$16 sps:$4 sm:$0xff]   ;;  %v5176_v13 = vld [vmem:[%s9123_s1 + $0x64] ss:$16 sps:$4 sm:$0xff]   ;;  %v5183_v14 = vld [vmem:[%s9123_s1 + $0x6c] ss:$16 sps:$4 sm:$0xff]  }
   0x6   :  { %v5188_v15 = vld [vmem:[%s9123_s1 + $0x60] ss:$16 sps:$4 sm:$0xff]   ;;  %v5195_v16 = vld [vmem:[%s9123_s1 + $0x68] ss:$16 sps:$4 sm:$0xff]   ;;  %v5200_v17 = vld [vmem:[%s9123_s1 + $0x84] ss:$16 sps:$4 sm:$0xff]  }
   0x7   :  { %v5207_v18 = vld [vmem:[%s9123_s1 + $0x8c] ss:$16 sps:$4 sm:$0xff]   ;;  %v5212_v19 = vld [vmem:[%s9123_s1 + $0x80] ss:$16 sps:$4 sm:$0xff]   ;;  %v5217_v20 = vld [vmem:[%s9123_s1 + $0x88] ss:$16 sps:$4 sm:$0xff]  }
   0x8   :  { %455 = vmatpush1.bf16.msra.mxu0 %v5142_v7  ;;  %496 = vmatpush1.bf16.msra.mxu1 %v5148_v8  ;;  %v5224_v21 = vld [vmem:[%s9123_s1 + $0xa4] ss:$16 sps:$4 sm:$0xff]   ;;  %v5231_v22 = vld [vmem:[%s9123_s1 + $0xac] ss:$16 sps:$4 sm:$0xff]   ;;  %v5238_v23 = vld [vmem:[%s9123_s1 + $0xa0] ss:$16 sps:$4 sm:$0xff]  }
   0x9   :  { %456 = vmatprep.subr.bf16.mxu0 %v5154_v9  ;;  %497 = vmatprep.subr.bf16.mxu1 %v5159_v10  ;;  %v5243_v24 = vld [vmem:[%s9123_s1 + $0xa8] ss:$16 sps:$4 sm:$0xff]   ;;  %v5250_v25 = vld [vmem:[%s9123_s1 + $0xc4] ss:$16 sps:$4 sm:$0xff]   ;;  %v5255_v26 = vld [vmem:[%s9123_s1 + $0xcc] ss:$16 sps:$4 sm:$0xff]  }
   0xa   :  { %v278_v27 = vld [vmem:[%s9124_s0] sm:$0xff]  ;;  %v3894_v29 = vld [vmem:[%s9124_s0 + $0x8] sm:$0xff]  ;;  %v3934_v38 = vld [vmem:[%s9124_s0 + $0x30] sm:$0xff] }
   0xb   :  { %v5263_v28 = vld [vmem:[%s9123_s1 + $0xc0] ss:$16 sps:$4 sm:$0xff]   ;;  %281 = vperm.xlu0 %4044, %v278_v27   ;;  %v5273_v30 = vld [vmem:[%s9123_s1 + $0xc8] ss:$16 sps:$4 sm:$0xff]   ;;  %v5278_v31 = vld [vmem:[%s9123_s1 + $0xe4] ss:$16 sps:$4 sm:$0xff]  }
   0xc   :  { %457 = vmatpush1.bf16.msra.mxu0 %v5164_v11  ;;  %498 = vmatpush1.bf16.msra.mxu1 %v5169_v12  ;;  %v5285_v32 = vld [vmem:[%s9123_s1 + $0xec] ss:$16 sps:$4 sm:$0xff]   ;;  %v5290_v33 = vld [vmem:[%s9123_s1 + $0xe0] ss:$16 sps:$4 sm:$0xff]   ;;  %v5295_v34 = vld [vmem:[%s9123_s1 + $0xe8] ss:$16 sps:$4 sm:$0xff]  }
   0xd   :  { %458 = vmatprep.subr.bf16.mxu0 %v5176_v13  ;;  %499 = vmatprep.subr.bf16.mxu1 %v5183_v14  ;;  %v3918_v35 = vld [vmem:[%s9124_s0 + $0x20] sm:$0xff]  ;;  %v5312_v37 = vld [vmem:[%s9125_s3 + $0xc] ss:$16 sps:$4 sm:$0xff]   ;;  %v5327_v40 = vld [vmem:[%s9125_s3 + $0x8] ss:$16 sps:$4 sm:$0xff]  }
   0xe   :  { %v5305_v36 = vld [vmem:[%s9125_s3 + $0x4] ss:$16 sps:$4 sm:$0xff]   ;;  %v5322_v39 = vld [vmem:[%s9125_s3] ss:$16 sps:$4 sm:$0xff]   ;;  %v5339_v42 = vld [vmem:[%s9125_s3 + $0x2c] ss:$16 sps:$4 sm:$0xff]  }
   0xf   :  { %991 = vperm.xlu0 %4044, %v3894_v29   ;;  %v5334_v41 = vld [vmem:[%s9125_s3 + $0x24] ss:$16 sps:$4 sm:$0xff]   ;;  %v5344_v43 = vld [vmem:[%s9125_s3 + $0x20] ss:$16 sps:$4 sm:$0xff]   ;;  %v5349_v44 = vld [vmem:[%s9125_s3 + $0x28] ss:$16 sps:$4 sm:$0xff]  }
  0x10   :  { %459 = vmatpush1.bf16.msra.mxu0 %v5188_v15  ;;  %500 = vmatpush1.bf16.msra.mxu1 %v5195_v16  ;;  %v5356_v45 = vld [vmem:[%s9125_s3 + $0x44] ss:$16 sps:$4 sm:$0xff]   ;;  %v5361_v46 = vld [vmem:[%s9125_s3 + $0x4c] ss:$16 sps:$4 sm:$0xff]   ;;  %v5370_v47 = vld [vmem:[%s9125_s3 + $0x40] ss:$16 sps:$4 sm:$0xff]  }
  0x11   :  { %460 = vmatprep.subr.bf16.mxu0 %v5200_v17  ;;  %501 = vmatprep.subr.bf16.mxu1 %v5207_v18  ;;  %9684 = vst [vmem:[#allocation4_spill] sm:$0xff] %v5370_v47  ;;  %v5375_v48 = vld [vmem:[%s9125_s3 + $0x48] ss:$16 sps:$4 sm:$0xff]   ;;  %v5380_v49 = vld [vmem:[%s9125_s3 + $0x64] ss:$16 sps:$4 sm:$0xff]  }
  0x12   :  { %9685 = vst [vmem:[#allocation5_spill] sm:$0xff] %v5375_v48  ;;  %9686 = vst [vmem:[#allocation6_spill] sm:$0xff] %v5380_v49  ;;  %v5385_v50 = vld [vmem:[%s9125_s3 + $0x6c] ss:$16 sps:$4 sm:$0xff]   ;;  %v5394_v51 = vld [vmem:[%s9125_s3 + $0x60] ss:$16 sps:$4 sm:$0xff]  }
  0x13   :  { %1684 = vperm.xlu0 %4044, %v3918_v35   ;;  %9687 = vst [vmem:[#allocation7_spill] sm:$0xff] %v5385_v50  ;;  %9688 = vst [vmem:[#allocation8_spill] sm:$0xff] %v5394_v51  ;;  %v5399_v52 = vld [vmem:[%s9125_s3 + $0x68] ss:$16 sps:$4 sm:$0xff]   ;;  %v5410_v53 = vld [vmem:[%s9125_s3 + $0x84] ss:$16 sps:$4 sm:$0xff]  }
  0x14   :  { %461 = vmatpush1.bf16.msra.mxu0 %v5212_v19  ;;  %502 = vmatpush1.bf16.msra.mxu1 %v5217_v20  ;;  %9689 = vst [vmem:[#allocation9_spill] sm:$0xff] %v5399_v52  ;;  %9690 = vst [vmem:[#allocation10_spill] sm:$0xff] %v5410_v53  ;;  %v5415_v54 = vld [vmem:[%s9125_s3 + $0x8c] ss:$16 sps:$4 sm:$0xff]   ;;  %v5422_v55 = vld [vmem:[%s9125_s3 + $0x80] ss:$16 sps:$4 sm:$0xff]  }
  0x15   :  { %462 = vmatprep.subr.bf16.mxu0 %v5224_v21  ;;  %503 = vmatprep.subr.bf16.mxu1 %v5231_v22  ;;  %9691 = vst [vmem:[#allocation11_spill] sm:$0xff] %v5415_v54  ;;  %9692 = vst [vmem:[#allocation12_spill] sm:$0xff] %v5422_v55  ;;  %v5427_v56 = vld [vmem:[%s9125_s3 + $0x88] ss:$16 sps:$4 sm:$0xff]   ;;  %v5434_v57 = vld [vmem:[%s9125_s3 + $0xa4] ss:$16 sps:$4 sm:$0xff]  }
  0x16   :  { %9693 = vst [vmem:[#allocation13_spill] sm:$0xff] %v5427_v56  ;;  %9694 = vst [vmem:[#allocation14_spill] sm:$0xff] %v5434_v57  ;;  %v5439_v58 = vld [vmem:[%s9125_s3 + $0xac] ss:$16 sps:$4 sm:$0xff]   ;;  %v5444_v59 = vld [vmem:[%s9125_s3 + $0xa0] ss:$16 sps:$4 sm:$0xff]  }
  0x17   :  { %2146 = vperm.xlu0 %4044, %v3934_v38   ;;  %9695 = vst [vmem:[#allocation15_spill] sm:$0xff] %v5439_v58  ;;  %9696 = vst [vmem:[#allocation16_spill] sm:$0xff] %v5444_v59  ;;  %v5449_v60 = vld [vmem:[%s9125_s3 + $0xa8] ss:$16 sps:$4 sm:$0xff]   ;;  %v5458_v61 = vld [vmem:[%s9125_s3 + $0xc4] ss:$16 sps:$4 sm:$0xff]  }
  0x18   :  { %463 = vmatpush1.bf16.msra.mxu0 %v5238_v23  ;;  %504 = vmatpush1.bf16.msra.mxu1 %v5243_v24  ;;  %9697 = vst [vmem:[#allocation17_spill] sm:$0xff] %v5449_v60  ;;  %9698 = vst [vmem:[#allocation18_spill] sm:$0xff] %v5458_v61  ;;  %v5463_v62 = vld [vmem:[%s9125_s3 + $0xcc] ss:$16 sps:$4 sm:$0xff]   ;;  %v5468_v63 = vld [vmem:[%s9125_s3 + $0xc0] ss:$16 sps:$4 sm:$0xff]  }
  0x19   :  { %464 = vmatprep.subr.bf16.mxu0 %v5250_v25  ;;  %505 = vmatprep.subr.bf16.mxu1 %v5255_v26  ;;  %9699 = vst [vmem:[#allocation19_spill] sm:$0xff] %v5463_v62  ;;  %9700 = vst [vmem:[#allocation20_spill] sm:$0xff] %v5468_v63  ;;  %v5473_v27 = vld [vmem:[%s9125_s3 + $0xc8] ss:$16 sps:$4 sm:$0xff]   ;;  %v5482_v29 = vld [vmem:[%s9125_s3 + $0xe4] ss:$16 sps:$4 sm:$0xff]  }
  0x1a   :  { %9701 = vst [vmem:[#allocation21_spill] sm:$0xff] %v5473_v27  ;;  %9702 = vst [vmem:[#allocation22_spill] sm:$0xff] %v5482_v29  ;;  %v5487_v35 = vld [vmem:[%s9125_s3 + $0xec] ss:$16 sps:$4 sm:$0xff]   ;;  %v5492_v38 = vld [vmem:[%s9125_s3 + $0xe0] ss:$16 sps:$4 sm:$0xff]  }
  0x1b   :  { %9703 = vst [vmem:[#allocation23_spill] sm:$0xff] %v5487_v35  ;;  %9704 = vst [vmem:[#allocation24_spill] sm:$0xff] %v5492_v38 }
  0x1c   :  { %465 = vmatpush1.bf16.msra.mxu0 %v5263_v28  ;;  %506 = vmatpush1.bf16.msra.mxu1 %v5273_v30 }
  0x1d   :  { %466 = vmatprep.subr.bf16.mxu0 %v5278_v31  ;;  %507 = vmatprep.subr.bf16.mxu1 %v5285_v32 }
  0x20   :  { %467 = vmatpush1.bf16.msra.mxu0 %v5290_v33  ;;  %508 = vmatpush1.bf16.msra.mxu1 %v5295_v34 }
  0x21   :  { %880 = vmatprep.subr.bf16.mxu0 %v5305_v36  ;;  %921 = vmatprep.subr.bf16.mxu1 %v5312_v37 }
  0x23   :  { %485 = vmatmul.mubr.bf16.vlgmr.msra.gmra.mrb[0].mxu0 %v9132_v1  ;;  %526 = vmatmul.mubr.bf16.vlgmr.msra.gmra.mrb[0].mxu1 %v9132_v1  ;;  %v5497_v1 = vld [vmem:[%s9125_s3 + $0xe8] ss:$16 sps:$4 sm:$0xff]  }
  0x24   :  { %881 = vmatpush1.bf16.msra.mxu0 %v5322_v39  ;;  %922 = vmatpush1.bf16.msra.mxu1 %v5327_v40  ;;  %9705 = vst [vmem:[#allocation25_spill] sm:$0xff] %v5497_v1 }
  0x25   :  { %882 = vmatprep.subr.bf16.mxu0 %v5334_v41  ;;  %923 = vmatprep.subr.bf16.mxu1 %v5339_v42 }
  0x28   :  { %883 = vmatpush1.bf16.msra.mxu0 %v5344_v43  ;;  %924 = vmatpush1.bf16.msra.mxu1 %v5349_v44 }
  0x29   :  { %884 = vmatprep.subr.bf16.mxu0 %v5356_v45  ;;  %925 = vmatprep.subr.bf16.mxu1 %v5361_v46 }
  0x2c   :  { %885 = vmatpush1.bf16.msra.mxu0 %v5370_v47  ;;  %926 = vmatpush1.bf16.msra.mxu1 %v5375_v48 }
  0x2d   :  { %886 = vmatprep.subr.bf16.mxu0 %v5380_v49  ;;  %927 = vmatprep.subr.bf16.mxu1 %v5385_v50 }
  0x30   :  { %887 = vmatpush1.bf16.msra.mxu0 %v5394_v51  ;;  %928 = vmatpush1.bf16.msra.mxu1 %v5399_v52 }
  0x31   :  { %888 = vmatprep.subr.bf16.mxu0 %v5410_v53  ;;  %929 = vmatprep.subr.bf16.mxu1 %v5415_v54 }
  0x34   :  { %889 = vmatpush1.bf16.msra.mxu0 %v5422_v55  ;;  %930 = vmatpush1.bf16.msra.mxu1 %v5427_v56 }
  0x35   :  { %890 = vmatprep.subr.bf16.mxu0 %v5434_v57  ;;  %931 = vmatprep.subr.bf16.mxu1 %v5439_v58 }
  0x38   :  { %891 = vmatpush1.bf16.msra.mxu0 %v5444_v59  ;;  %932 = vmatpush1.bf16.msra.mxu1 %v5449_v60 }
  0x39   :  { %892 = vmatprep.subr.bf16.mxu0 %v5458_v61  ;;  %933 = vmatprep.subr.bf16.mxu1 %v5463_v62  ;;  %v5659_v62 = vld [vmem:[%s9125_s3 + $0x1c0] ss:$16 sps:$4 sm:$0xff]   ;;  %v5666_v61 = vld [vmem:[%s9125_s3 + $0x1c8] ss:$16 sps:$4 sm:$0xff]  }
  0x3a   :  { %9732 = vst [vmem:[#allocation52_spill] sm:$0xff] %v5659_v62  ;;  %9733 = vst [vmem:[#allocation53_spill] sm:$0xff] %v5666_v61 }
  0x3c   :  { %893 = vmatpush1.bf16.msra.mxu0 %v5468_v63  ;;  %934 = vmatpush1.bf16.msra.mxu1 %v5473_v27  ;;  %v5506_v27 = vld [vmem:[%s9125_s3 + $0x104] ss:$16 sps:$4 sm:$0xff]   ;;  %v5511_v63 = vld [vmem:[%s9125_s3 + $0x10c] ss:$16 sps:$4 sm:$0xff]  }
  0x3d   :  { %894 = vmatprep.subr.bf16.mxu0 %v5482_v29  ;;  %935 = vmatprep.subr.bf16.mxu1 %v5487_v35  ;;  %9706 = vst [vmem:[#allocation26_spill] sm:$0xff] %v5506_v27  ;;  %9707 = vst [vmem:[#allocation27_spill] sm:$0xff] %v5511_v63  ;;  %v5516_v29 = vld [vmem:[%s9125_s3 + $0x100] ss:$16 sps:$4 sm:$0xff]   ;;  %v5535_v35 = vld [vmem:[%s9125_s3 + $0x12c] ss:$16 sps:$4 sm:$0xff]  }
  0x3e   :  { %9708 = vst [vmem:[#allocation28_spill] sm:$0xff] %v5516_v29  ;;  %9711 = vst [vmem:[#allocation31_spill] sm:$0xff] %v5535_v35 }
  0x40   :  { %895 = vmatpush1.bf16.msra.mxu0 %v5492_v38  ;;  %936 = vmatpush1.bf16.msra.mxu1 %v5497_v1  ;;  %v5521_v38 = vld [vmem:[%s9125_s3 + $0x108] ss:$16 sps:$4 sm:$0xff]   ;;  %v5530_v1 = vld [vmem:[%s9125_s3 + $0x124] ss:$16 sps:$4 sm:$0xff]  }
  0x41   :  { %9709 = vst [vmem:[#allocation29_spill] sm:$0xff] %v5521_v38  ;;  %896 = vmatprep.subr.bf16.mxu0 %v5506_v27  ;;  %937 = vmatprep.subr.bf16.mxu1 %v5511_v63  ;;  %9710 = vst [vmem:[#allocation30_spill] sm:$0xff] %v5530_v1  ;;  %v5540_v27 = vld [vmem:[%s9125_s3 + $0x120] ss:$16 sps:$4 sm:$0xff]   ;;  %v5559_v63 = vld [vmem:[%s9125_s3 + $0x14c] ss:$16 sps:$4 sm:$0xff]  }
  0x42   :  { %9712 = vst [vmem:[#allocation32_spill] sm:$0xff] %v5540_v27  ;;  %9715 = vst [vmem:[#allocation35_spill] sm:$0xff] %v5559_v63 }
  0x44   :  { %897 = vmatpush1.bf16.msra.mxu0 %v5516_v29  ;;  %938 = vmatpush1.bf16.msra.mxu1 %v5521_v38  ;;  %v5545_v29 = vld [vmem:[%s9125_s3 + $0x128] ss:$16 sps:$4 sm:$0xff]   ;;  %v5554_v38 = vld [vmem:[%s9125_s3 + $0x144] ss:$16 sps:$4 sm:$0xff]  }
  0x45   :  { %9713 = vst [vmem:[#allocation33_spill] sm:$0xff] %v5545_v29  ;;  %898 = vmatprep.subr.bf16.mxu0 %v5530_v1  ;;  %939 = vmatprep.subr.bf16.mxu1 %v5535_v35  ;;  %9714 = vst [vmem:[#allocation34_spill] sm:$0xff] %v5554_v38  ;;  %v5564_v1 = vld [vmem:[%s9125_s3 + $0x140] ss:$16 sps:$4 sm:$0xff]   ;;  %v5583_v35 = vld [vmem:[%s9125_s3 + $0x16c] ss:$16 sps:$4 sm:$0xff]  }
  0x46   :  { %9716 = vst [vmem:[#allocation36_spill] sm:$0xff] %v5564_v1  ;;  %9719 = vst [vmem:[#allocation39_spill] sm:$0xff] %v5583_v35 }
  0x48   :  { %899 = vmatpush1.bf16.msra.mxu0 %v5540_v27  ;;  %940 = vmatpush1.bf16.msra.mxu1 %v5545_v29  ;;  %v5569_v27 = vld [vmem:[%s9125_s3 + $0x148] ss:$16 sps:$4 sm:$0xff]   ;;  %v5578_v29 = vld [vmem:[%s9125_s3 + $0x164] ss:$16 sps:$4 sm:$0xff]  }
  0x49   :  { %9717 = vst [vmem:[#allocation37_spill] sm:$0xff] %v5569_v27  ;;  %900 = vmatprep.subr.bf16.mxu0 %v5554_v38  ;;  %941 = vmatprep.subr.bf16.mxu1 %v5559_v63  ;;  %9718 = vst [vmem:[#allocation38_spill] sm:$0xff] %v5578_v29  ;;  %v5588_v38 = vld [vmem:[%s9125_s3 + $0x160] ss:$16 sps:$4 sm:$0xff]   ;;  %v5607_v63 = vld [vmem:[%s9125_s3 + $0x18c] ss:$16 sps:$4 sm:$0xff]  }
  0x4a   :  { %9720 = vst [vmem:[#allocation40_spill] sm:$0xff] %v5588_v38  ;;  %9723 = vst [vmem:[#allocation43_spill] sm:$0xff] %v5607_v63 }
  0x4c   :  { %901 = vmatpush1.bf16.msra.mxu0 %v5564_v1  ;;  %942 = vmatpush1.bf16.msra.mxu1 %v5569_v27  ;;  %v5593_v1 = vld [vmem:[%s9125_s3 + $0x168] ss:$16 sps:$4 sm:$0xff]   ;;  %v5602_v27 = vld [vmem:[%s9125_s3 + $0x184] ss:$16 sps:$4 sm:$0xff]  }
  0x4d   :  { %9721 = vst [vmem:[#allocation41_spill] sm:$0xff] %v5593_v1  ;;  %902 = vmatprep.subr.bf16.mxu0 %v5578_v29  ;;  %943 = vmatprep.subr.bf16.mxu1 %v5583_v35  ;;  %9722 = vst [vmem:[#allocation42_spill] sm:$0xff] %v5602_v27  ;;  %v5612_v29 = vld [vmem:[%s9125_s3 + $0x180] ss:$16 sps:$4 sm:$0xff]   ;;  %v5631_v35 = vld [vmem:[%s9125_s3 + $0x1ac] ss:$16 sps:$4 sm:$0xff]  }
  0x4e   :  { %9724 = vst [vmem:[#allocation44_spill] sm:$0xff] %v5612_v29  ;;  %9727 = vst [vmem:[#allocation47_spill] sm:$0xff] %v5631_v35 }
  0x50   :  { %903 = vmatpush1.bf16.msra.mxu0 %v5588_v38  ;;  %944 = vmatpush1.bf16.msra.mxu1 %v5593_v1  ;;  %v5617_v38 = vld [vmem:[%s9125_s3 + $0x188] ss:$16 sps:$4 sm:$0xff]   ;;  %v5626_v1 = vld [vmem:[%s9125_s3 + $0x1a4] ss:$16 sps:$4 sm:$0xff]  }
  0x51   :  { %9725 = vst [vmem:[#allocation45_spill] sm:$0xff] %v5617_v38  ;;  %904 = vmatprep.subr.bf16.mxu0 %v5602_v27  ;;  %945 = vmatprep.subr.bf16.mxu1 %v5607_v63  ;;  %9726 = vst [vmem:[#allocation46_spill] sm:$0xff] %v5626_v1  ;;  %v5636_v27 = vld [vmem:[%s9125_s3 + $0x1a0] ss:$16 sps:$4 sm:$0xff]   ;;  %v5651_v63 = vld [vmem:[%s9125_s3 + $0x1cc] ss:$16 sps:$4 sm:$0xff]  }
  0x52   :  { %9728 = vst [vmem:[#allocation48_spill] sm:$0xff] %v5636_v27  ;;  %9731 = vst [vmem:[#allocation51_spill] sm:$0xff] %v5651_v63 }
  0x54   :  { %905 = vmatpush1.bf16.msra.mxu0 %v5612_v29  ;;  %946 = vmatpush1.bf16.msra.mxu1 %v5617_v38  ;;  %v5641_v29 = vld [vmem:[%s9125_s3 + $0x1a8] ss:$16 sps:$4 sm:$0xff]   ;;  %v5646_v38 = vld [vmem:[%s9125_s3 + $0x1c4] ss:$16 sps:$4 sm:$0xff]  }
  0x55   :  { %9729 = vst [vmem:[#allocation49_spill] sm:$0xff] %v5641_v29  ;;  %9730 = vst [vmem:[#allocation50_spill] sm:$0xff] %v5646_v38  ;;  %906 = vmatprep.subr.bf16.mxu0 %v5626_v1  ;;  %947 = vmatprep.subr.bf16.mxu1 %v5631_v35  ;;  %v5671_v35 = vld [vmem:[%s9125_s3 + $0x1e4] ss:$16 sps:$4 sm:$0xff]  }
  0x56   :  { %9734 = vst [vmem:[#allocation54_spill] sm:$0xff] %v5671_v35 }
  0x58   :  { %907 = vmatpush1.bf16.msra.mxu0 %v5636_v27  ;;  %948 = vmatpush1.bf16.msra.mxu1 %v5641_v29  ;;  %v5677_v27 = vld [vmem:[%s9125_s3 + $0x1ec] ss:$16 sps:$4 sm:$0xff]   ;;  %v5055_v29 = vmov 0.0|0.0  }
  0x59   :  { %908 = vmatprep.subr.bf16.mxu0 %v5646_v38  ;;  %949 = vmatprep.subr.bf16.mxu1 %v5651_v63  ;;  %9735 = vst [vmem:[#allocation55_spill] sm:$0xff] %v5677_v27  ;;  %v5683_v38 = vld [vmem:[%s9125_s3 + $0x1e0] ss:$16 sps:$4 sm:$0xff]   ;;  %v5690_v63 = vld [vmem:[%s9125_s3 + $0x1e8] ss:$16 sps:$4 sm:$0xff]  }
  0x5a   :  { %912 = vmatprep.mubr.bf16.mxu0 %v5055_v29  ;;  %953 = vmatprep.mubr.bf16.mxu1 %v5055_v29  ;;  %9736 = vst [vmem:[#allocation56_spill] sm:$0xff] %v5683_v38  ;;  %9737 = vst [vmem:[#allocation57_spill] sm:$0xff] %v5690_v63  ;;  %v192_v29 = vlaneseq }
  0x5c   :  { %909 = vmatpush1.bf16.msra.mxu0 %v5659_v62  ;;  %950 = vmatpush1.bf16.msra.mxu1 %v5666_v61  ;;  %v193_v62 = vshrl.u32 %v192_v29, 7 }
  0x5d   :  { %910 = vmatprep.subr.bf16.mxu0 %v5671_v35  ;;  %951 = vmatprep.subr.bf16.mxu1 %v5677_v27  ;;  %v190_v35 = vld [vmem:[%s9126_s4] sm:$0xf] }
  0x5e   :  { %v5697_v61 = vsub.s32 0, %v193_v62  ;;  %v5702_v1 = vsub.s32 1, %v193_v62  ;;  %v5713_v29 = vsub.s32 2, %v193_v62  ;;  %v5723_v57 = vsub.s32 3, %v193_v62 }
  0x60   :  { %911 = vmatpush1.bf16.msra.mxu0 %v5683_v38  ;;  %952 = vmatpush1.bf16.msra.mxu1 %v5690_v63  ;;  %9738 = vst [vmem:[#allocation58_spill] sm:$0xff] %v5697_v61  ;;  %9739 = vst [vmem:[#allocation59_spill] sm:$0xff] %v5702_v1  ;;  %v5705_v27 = vrot.slane %v190_v35, %v5697_v61  ;;  %v5708_v38 = vrot.slane %v190_v35, %v5702_v1 }
  0x61   :  { %1002 = vmatprep.subr.bf16.mxu0 %v5104_v0  ;;  %1043 = vmatprep.subr.bf16.mxu1 %v5111_v2  ;;  %v212_v2 = vld [vmem:[%s9127_s5] sm:$0xf]  ;;  %9742 = vst [vmem:[#allocation62_spill] sm:$0xff] %v5713_v29  ;;  %9745 = vst [vmem:[#allocation65_spill] sm:$0xff] %v5723_v57  ;;  %v5726_v56 = vrot.slane %v190_v35, %v5713_v29  ;;  %v5731_v53 = vrot.slane %v190_v35, %v5723_v57 }
  0x62   :  { %9740 = vst [vmem:[#allocation60_spill] sm:$0xff] %v5705_v27  ;;  %9741 = vst [vmem:[#allocation61_spill] sm:$0xff] %v5708_v38  ;;  %v5716_v63 = vrot.slane %v212_v2, %v5697_v61  ;;  %v5720_v59 = vrot.slane %v212_v2, %v5702_v1  ;;  %v5734_v1 = vrot.slane %v212_v2, %v5713_v29 }
  0x63   :  { %9746 = vst [vmem:[#allocation66_spill] sm:$0xff] %v5726_v56  ;;  %v5738_v35 = vrot.slane %v212_v2, %v5723_v57 }
  0x64   :  { %9743 = vst [vmem:[#allocation63_spill] sm:$0xff] %v5716_v63  ;;  %9744 = vst [vmem:[#allocation64_spill] sm:$0xff] %v5720_v59 }
  0x8a   :  { %v282_v0 = vpop.permute.xlu0 %281 }
  0x8b   :  { %v284_v60 = vmul.f32 %v282_v0, %v5705_v27  ;;  %v285_v58 = vmul.f32 %v282_v0, %v5708_v38  ;;  %v286_v38 = vmul.f32 %v282_v0, %v5726_v56 }
  0x8d   :  { %v288_v55 = vadd.f32 %v284_v60, %v5716_v63  ;;  %v289_v54 = vadd.f32 %v285_v58, %v5720_v59  ;;  %v287_v59 = vmul.f32 %v282_v0, %v5731_v53 }
  0xf6   :  { %v486_v61 = vpop.f32.mrb[0].mxu0  ;;  %v527_v52 = vpop.f32.mrb[0].mxu1 }
  0xf7   :  { %v487_v27 = vadd.f32 %v486_v61, %v288_v55  ;;  %v488_v62 = vpop.f32.mrb[1].mxu0  ;;  %v529_v51 = vpop.f32.mrb[1].mxu1  ;;  %v290_v55 = vadd.f32 %v286_v38, %v5734_v1  ;;  %v291_v61 = vadd.f32 %v287_v59, %v5738_v35 }
  0xf8   :  { %v489_v50 = vadd.f32 %v488_v62, %v289_v54  ;;  %v490_v49 = vpop.f32.mrb[2].mxu0  ;;  %v531_v48 = vpop.f32.mrb[2].mxu1 }
  0xf9   :  { %v3824_v47 = vmul.f32 -1.442695, %v487_v27  ;;  %v491_v60 = vpop.f32.mrb[3].mxu0  ;;  %v532_v63 = vpop.f32.mrb[3].mxu1  ;;  %v528_v56 = vadd.f32 %v527_v52, %v290_v55  ;;  %v530_v29 = vadd.f32 %v529_v51, %v291_v61  ;;  %v9776_v55 = vld [vmem:[#allocation32_spill] sm:$0xff]  ;;  %v9777_v61 = vld [vmem:[#allocation33_spill] sm:$0xff] }
  0xfa   :  { %v3825_v58 = vmul.f32 -1.442695, %v489_v50 }
  0xfb   :  { %4286 = vpow2.f32 %v3824_v47  ;;  %v3826_v54 = vmul.f32 -1.442695, %v528_v56 }
  0xfc   :  { %4288 = vpow2.f32 %v3825_v58 }
  0xfd   :  { %4290 = vtanh.f32 %v530_v29  ;;  %v9747_v29 = vmov 0  }
  0xfe   :  { %4292 = vpow2.f32 %v3826_v54  ;;  %v9778_v54 = vld [vmem:[#allocation34_spill] sm:$0xff] }
 0x105   :  { %v4287_v49 = vpop.eup %4286 }
 0x106   :  { %v543_v48 = vadd.f32 1.0, %v4287_v49  ;;  %v4289_v27 = vpop.eup %4288  ;;  %v9779_v49 = vld [vmem:[#allocation35_spill] sm:$0xff] }
 0x107   :  { %v544_v50 = vadd.f32 1.0, %v4289_v27  ;;  %v4291_v2 = vpop.eup %4290  ;;  %v9781_v27 = vld [vmem:[#allocation37_spill] sm:$0xff] }
 0x108   :  { %4294 = vrcp.f32 %v543_v48  ;;  %v4293_v63 = vpop.eup %4292  ;;  %v9780_v48 = vld [vmem:[#allocation36_spill] sm:$0xff] }
 0x109   :  { %4296 = vrcp.f32 %v544_v50  ;;  %v545_v38 = vadd.f32 1.0, %v4293_v63  ;;  %v9782_v50 = vld [vmem:[#allocation38_spill] sm:$0xff]  ;;  %v9784_v63 = vld [vmem:[#allocation40_spill] sm:$0xff] }
 0x10b   :  { %4298 = vrcp.f32 %v545_v38  ;;  %v9788_v38 = vld [vmem:[#allocation44_spill] sm:$0xff] }
 0x112   :  { %v4295_v0 = vpop.eup %4294 }
 0x113   :  { %v554_v47 = vmul.f32 %v4295_v0, %v4291_v2  ;;  %v4297_v62 = vpop.eup %4296  ;;  %v9783_v2 = vld [vmem:[#allocation39_spill] sm:$0xff]  ;;  %v9785_v0 = vld [vmem:[#allocation41_spill] sm:$0xff] }
 0x114   :  { %v553_v60 = vmul.f32 0.0, %v4297_v62  ;;  %v9787_v62 = vld [vmem:[#allocation43_spill] sm:$0xff] }
 0x115   :  { %v4299_v51 = vpop.eup %4298 }
 0x116   :  { %v5743_v58 = vadd.f32 %v554_v47, %v553_v60  ;;  %v9786_v47 = vld [vmem:[#allocation42_spill] sm:$0xff]  ;;  %v9789_v60 = vld [vmem:[#allocation45_spill] sm:$0xff] }
 0x118   :  { %4300 = vtanh.f32 %v5743_v58 }
 0x122   :  { %v4301_v52 = vpop.eup %4300 }
 0x123   :  { %v557_v56 = vmul.f32 %v4301_v52, %v4299_v51  ;;  %v9790_v51 = vld [vmem:[#allocation46_spill] sm:$0xff]  ;;  %v9791_v52 = vld [vmem:[#allocation47_spill] sm:$0xff] }
 0x125   :  { %v558_v59 = vpack.c.bf16 %v557_v56, %v557_v56  ;;  %v9792_v56 = vld [vmem:[#allocation48_spill] sm:$0xff] }
 0x127   :  { %913 = vmatmul.mubr.bf16.vlgmr.msra.gmra.mrb[4].mxu0 %v558_v59  ;;  %954 = vmatmul.mubr.bf16.vlgmr.msra.gmra.mrb[4].mxu1 %v558_v59 }
 0x128   :  { %1003 = vmatpush1.bf16.msra.mxu0 %v5119_v3  ;;  %1044 = vmatpush1.bf16.msra.mxu1 %v5124_v4  ;;  %v9748_v3 = vld [vmem:[#allocation4_spill] sm:$0xff]  ;;  %v9749_v4 = vld [vmem:[#allocation5_spill] sm:$0xff] }
 0x129   :  { %1004 = vmatprep.subr.bf16.mxu0 %v5130_v5  ;;  %1045 = vmatprep.subr.bf16.mxu1 %v5137_v6  ;;  %v9750_v5 = vld [vmem:[#allocation6_spill] sm:$0xff]  ;;  %v9751_v6 = vld [vmem:[#allocation7_spill] sm:$0xff] }
 0x12a   :  { %1034 = vmatprep.mubr.bf16.mxu0 %v9747_v29  ;;  %1075 = vmatprep.mubr.bf16.mxu1 %v9747_v29 }
 0x12c   :  { %1005 = vmatpush1.bf16.msra.mxu0 %v5142_v7  ;;  %1046 = vmatpush1.bf16.msra.mxu1 %v5148_v8  ;;  %v9752_v7 = vld [vmem:[#allocation8_spill] sm:$0xff]  ;;  %v9753_v8 = vld [vmem:[#allocation9_spill] sm:$0xff] }
 0x12d   :  { %1006 = vmatprep.subr.bf16.mxu0 %v5154_v9  ;;  %1047 = vmatprep.subr.bf16.mxu1 %v5159_v10  ;;  %v9754_v9 = vld [vmem:[#allocation10_spill] sm:$0xff]  ;;  %v9755_v10 = vld [vmem:[#allocation11_spill] sm:$0xff] }
 0x130   :  { %1007 = vmatpush1.bf16.msra.mxu0 %v5164_v11  ;;  %1048 = vmatpush1.bf16.msra.mxu1 %v5169_v12  ;;  %v9756_v11 = vld [vmem:[#allocation12_spill] sm:$0xff]  ;;  %v9757_v12 = vld [vmem:[#allocation13_spill] sm:$0xff] }
 0x131   :  { %1008 = vmatprep.subr.bf16.mxu0 %v5176_v13  ;;  %1049 = vmatprep.subr.bf16.mxu1 %v5183_v14  ;;  %v9758_v13 = vld [vmem:[#allocation14_spill] sm:$0xff]  ;;  %v9759_v14 = vld [vmem:[#allocation15_spill] sm:$0xff] }
 0x134   :  { %1009 = vmatpush1.bf16.msra.mxu0 %v5188_v15  ;;  %1050 = vmatpush1.bf16.msra.mxu1 %v5195_v16  ;;  %v9760_v15 = vld [vmem:[#allocation16_spill] sm:$0xff]  ;;  %v9761_v16 = vld [vmem:[#allocation17_spill] sm:$0xff] }
 0x135   :  { %1010 = vmatprep.subr.bf16.mxu0 %v5200_v17  ;;  %1051 = vmatprep.subr.bf16.mxu1 %v5207_v18  ;;  %v9762_v17 = vld [vmem:[#allocation18_spill] sm:$0xff]  ;;  %v9763_v18 = vld [vmem:[#allocation19_spill] sm:$0xff] }
 0x138   :  { %1011 = vmatpush1.bf16.msra.mxu0 %v5212_v19  ;;  %1052 = vmatpush1.bf16.msra.mxu1 %v5217_v20  ;;  %v9764_v19 = vld [vmem:[#allocation20_spill] sm:$0xff]  ;;  %v9765_v20 = vld [vmem:[#allocation21_spill] sm:$0xff] }
 0x139   :  { %1012 = vmatprep.subr.bf16.mxu0 %v5224_v21  ;;  %1053 = vmatprep.subr.bf16.mxu1 %v5231_v22  ;;  %v9766_v21 = vld [vmem:[#allocation22_spill] sm:$0xff]  ;;  %v9767_v22 = vld [vmem:[#allocation23_spill] sm:$0xff] }
 0x13c   :  { %1013 = vmatpush1.bf16.msra.mxu0 %v5238_v23  ;;  %1054 = vmatpush1.bf16.msra.mxu1 %v5243_v24  ;;  %v9768_v23 = vld [vmem:[#allocation24_spill] sm:$0xff]  ;;  %v9769_v24 = vld [vmem:[#allocation25_spill] sm:$0xff] }
 0x13d   :  { %1014 = vmatprep.subr.bf16.mxu0 %v5250_v25  ;;  %1055 = vmatprep.subr.bf16.mxu1 %v5255_v26  ;;  %v9770_v25 = vld [vmem:[#allocation26_spill] sm:$0xff]  ;;  %v9771_v26 = vld [vmem:[#allocation27_spill] sm:$0xff] }
 0x140   :  { %1015 = vmatpush1.bf16.msra.mxu0 %v5263_v28  ;;  %1056 = vmatpush1.bf16.msra.mxu1 %v5273_v30  ;;  %v9772_v28 = vld [vmem:[#allocation28_spill] sm:$0xff]  ;;  %v9773_v30 = vld [vmem:[#allocation29_spill] sm:$0xff] }
 0x141   :  { %1016 = vmatprep.subr.bf16.mxu0 %v5278_v31  ;;  %1057 = vmatprep.subr.bf16.mxu1 %v5285_v32  ;;  %v9774_v31 = vld [vmem:[#allocation30_spill] sm:$0xff]  ;;  %v9775_v32 = vld [vmem:[#allocation31_spill] sm:$0xff] }
 0x144   :  { %1017 = vmatpush1.bf16.msra.mxu0 %v5290_v33  ;;  %1058 = vmatpush1.bf16.msra.mxu1 %v5295_v34 }
 0x145   :  { %1110 = vmatprep.subr.bf16.mxu0 %v5305_v36  ;;  %1151 = vmatprep.subr.bf16.mxu1 %v5312_v37 }
 0x147   :  { %1035 = vmatmul.mubr.bf16.vlgmr.msra.gmra.mrb[8].mxu0 %v558_v59  ;;  %1076 = vmatmul.mubr.bf16.vlgmr.msra.gmra.mrb[8].mxu1 %v558_v59  ;;  %v9793_v59 = vld [vmem:[#allocation49_spill] sm:$0xff] }
 0x148   :  { %1111 = vmatpush1.bf16.msra.mxu0 %v5322_v39  ;;  %1152 = vmatpush1.bf16.msra.mxu1 %v5327_v40 }
 0x149   :  { %1112 = vmatprep.subr.bf16.mxu0 %v5334_v41  ;;  %1153 = vmatprep.subr.bf16.mxu1 %v5339_v42 }
 0x14c   :  { %1113 = vmatpush1.bf16.msra.mxu0 %v5344_v43  ;;  %1154 = vmatpush1.bf16.msra.mxu1 %v5349_v44 }
 0x14d   :  { %1114 = vmatprep.subr.bf16.mxu0 %v5356_v45  ;;  %1155 = vmatprep.subr.bf16.mxu1 %v5361_v46 }
 0x150   :  { %1115 = vmatpush1.bf16.msra.mxu0 %v9748_v3  ;;  %1156 = vmatpush1.bf16.msra.mxu1 %v9749_v4 }
 0x151   :  { %1116 = vmatprep.subr.bf16.mxu0 %v9750_v5  ;;  %1157 = vmatprep.subr.bf16.mxu1 %v9751_v6 }
 0x154   :  { %1117 = vmatpush1.bf16.msra.mxu0 %v9752_v7  ;;  %1158 = vmatpush1.bf16.msra.mxu1 %v9753_v8 }
 0x155   :  { %1118 = vmatprep.subr.bf16.mxu0 %v9754_v9  ;;  %1159 = vmatprep.subr.bf16.mxu1 %v9755_v10 }
 0x158   :  { %1119 = vmatpush1.bf16.msra.mxu0 %v9756_v11  ;;  %1160 = vmatpush1.bf16.msra.mxu1 %v9757_v12 }
 0x159   :  { %1120 = vmatprep.subr.bf16.mxu0 %v9758_v13  ;;  %1161 = vmatprep.subr.bf16.mxu1 %v9759_v14 }
 0x15c   :  { %1121 = vmatpush1.bf16.msra.mxu0 %v9760_v15  ;;  %1162 = vmatpush1.bf16.msra.mxu1 %v9761_v16 }
 0x15d   :  { %1122 = vmatprep.subr.bf16.mxu0 %v9762_v17  ;;  %1163 = vmatprep.subr.bf16.mxu1 %v9763_v18 }
 0x160   :  { %1123 = vmatpush1.bf16.msra.mxu0 %v9764_v19  ;;  %1164 = vmatpush1.bf16.msra.mxu1 %v9765_v20 }
 0x161   :  { %1124 = vmatprep.subr.bf16.mxu0 %v9766_v21  ;;  %1165 = vmatprep.subr.bf16.mxu1 %v9767_v22 }
 0x164   :  { %1125 = vmatpush1.bf16.msra.mxu0 %v9768_v23  ;;  %1166 = vmatpush1.bf16.msra.mxu1 %v9769_v24 }
 0x165   :  { %1126 = vmatprep.subr.bf16.mxu0 %v9770_v25  ;;  %1167 = vmatprep.subr.bf16.mxu1 %v9771_v26 }
 0x168   :  { %1127 = vmatpush1.bf16.msra.mxu0 %v9772_v28  ;;  %1168 = vmatpush1.bf16.msra.mxu1 %v9773_v30 }
 0x169   :  { %1128 = vmatprep.subr.bf16.mxu0 %v9774_v31  ;;  %1169 = vmatprep.subr.bf16.mxu1 %v9775_v32 }
 0x16c   :  { %1129 = vmatpush1.bf16.msra.mxu0 %v9776_v55  ;;  %1170 = vmatpush1.bf16.msra.mxu1 %v9777_v61 }
 0x16d   :  { %1130 = vmatprep.subr.bf16.mxu0 %v9778_v54  ;;  %1171 = vmatprep.subr.bf16.mxu1 %v9779_v49 }
 0x170   :  { %1131 = vmatpush1.bf16.msra.mxu0 %v9780_v48  ;;  %1172 = vmatpush1.bf16.msra.mxu1 %v9781_v27 }
 0x171   :  { %1132 = vmatprep.subr.bf16.mxu0 %v9782_v50  ;;  %1173 = vmatprep.subr.bf16.mxu1 %v9783_v2  ;;  %v9794_v2 = vld [vmem:[#allocation50_spill] sm:$0xff] }
 0x174   :  { %1133 = vmatpush1.bf16.msra.mxu0 %v9784_v63  ;;  %1174 = vmatpush1.bf16.msra.mxu1 %v9785_v0  ;;  %v9795_v63 = vld [vmem:[#allocation51_spill] sm:$0xff]  ;;  %v9796_v0 = vld [vmem:[#allocation52_spill] sm:$0xff] }
 0x175   :  { %1134 = vmatprep.subr.bf16.mxu0 %v9786_v47  ;;  %1175 = vmatprep.subr.bf16.mxu1 %v9787_v62  ;;  %v9797_v47 = vld [vmem:[#allocation53_spill] sm:$0xff]  ;;  %v9798_v62 = vld [vmem:[#allocation54_spill] sm:$0xff] }
 0x178   :  { %1135 = vmatpush1.bf16.msra.mxu0 %v9788_v38  ;;  %1176 = vmatpush1.bf16.msra.mxu1 %v9789_v60  ;;  %v9799_v38 = vld [vmem:[#allocation55_spill] sm:$0xff]  ;;  %v9800_v60 = vld [vmem:[#allocation56_spill] sm:$0xff] }
 0x179   :  { %1136 = vmatprep.subr.bf16.mxu0 %v9790_v51  ;;  %1177 = vmatprep.subr.bf16.mxu1 %v9791_v52  ;;  %v9801_v51 = vld [vmem:[#allocation57_spill] sm:$0xff]  ;;  %v9802_v52 = vld [vmem:[#allocation2_spill] sm:$0xff] }
 0x17c   :  { %1137 = vmatpush1.bf16.msra.mxu0 %v9792_v56  ;;  %1178 = vmatpush1.bf16.msra.mxu1 %v9793_v59  ;;  %v9803_v56 = vld [vmem:[#allocation3_spill] sm:$0xff] }
 0x17d   :  { %1138 = vmatprep.subr.bf16.mxu0 %v9794_v2  ;;  %1179 = vmatprep.subr.bf16.mxu1 %v9795_v63  ;;  %v3902_v63 = vld [vmem:[%s9124_s0 + $0x10] sm:$0xff] }
 0x17e   :  { %1222 = vperm.xlu1 %4045, %v3902_v63  }
 0x180   :  { %1139 = vmatpush1.bf16.msra.mxu0 %v9796_v0  ;;  %1180 = vmatpush1.bf16.msra.mxu1 %v9797_v47  ;;  %v3910_v47 = vld [vmem:[%s9124_s0 + $0x18] sm:$0xff] }
 0x181   :  { %1140 = vmatprep.subr.bf16.mxu0 %v9798_v62  ;;  %1181 = vmatprep.subr.bf16.mxu1 %v9799_v38  ;;  %v9806_v38 = vld [vmem:[#allocation59_spill] sm:$0xff] }
 0x182   :  { %1453 = vperm.xlu1 %4045, %v3910_v47  }
 0x184   :  { %1141 = vmatpush1.bf16.msra.mxu0 %v9800_v60  ;;  %1182 = vmatpush1.bf16.msra.mxu1 %v9801_v51  ;;  %v3926_v60 = vld [vmem:[%s9124_s0 + $0x28] sm:$0xff]  ;;  %v9804_v51 = vld [vmem:[#allocation58_spill] sm:$0xff] }
 0x185   :  { %1233 = vmatprep.subr.bf16.mxu0 %v9802_v52  ;;  %1274 = vmatprep.subr.bf16.mxu1 %v9803_v56  ;;  %v256_v52 = vld [vmem:[%s9128_s7] sm:$0xf]  ;;  %v3942_v56 = vld [vmem:[%s9124_s0 + $0x38] sm:$0xff] }
 0x186   :  { %1915 = vperm.xlu1 %4045, %v3926_v60   ;;  %v5860_v63 = vrot.slane %v256_v52, %v9804_v51  ;;  %v5863_v62 = vrot.slane %v256_v52, %v9806_v38  ;;  %v9808_v51 = vld [vmem:[#allocation62_spill] sm:$0xff] }
 0x187   :  { %v5868_v32 = vrot.slane %v256_v52, %v9808_v51 }
 0x188   :  { %9805 = vst [vmem:[#allocation4_spill] sm:$0xff] %v5860_v63  ;;  %9807 = vst [vmem:[#allocation5_spill] sm:$0xff] %v5863_v62 }
 0x189   :  { %9809 = vst [vmem:[#allocation6_spill] sm:$0xff] %v5868_v32 }
 0x18a   :  { %2377 = vperm.xlu1 %4045, %v3942_v56   ;;  %v5871_v56 = vrot.slane %v256_v52, %v5723_v57  ;;  %v9812_v57 = vld [vmem:[#allocation61_spill] sm:$0xff] }
 0x18c   :  { %9810 = vst [vmem:[#allocation7_spill] sm:$0xff] %v5871_v56 }
 0x1fa   :  { %v914_v47 = vpop.f32.mrb[4].mxu0  ;;  %v955_v0 = vpop.f32.mrb[4].mxu1 }
 0x1fb   :  { %v915_v2 = vadd.f32 %v914_v47, %v5860_v63  ;;  %v916_v59 = vpop.f32.mrb[5].mxu0  ;;  %v957_v50 = vpop.f32.mrb[5].mxu1  ;;  %v956_v47 = vadd.f32 %v955_v0, %v5868_v32 }
 0x1fc   :  { %v917_v27 = vadd.f32 %v916_v59, %v5863_v62  ;;  %v918_v60 = vpop.f32.mrb[6].mxu0  ;;  %v959_v48 = vpop.f32.mrb[6].mxu1  ;;  %v958_v38 = vadd.f32 %v957_v50, %v5871_v56  ;;  %v9813_v56 = vld [vmem:[#allocation63_spill] sm:$0xff] }
 0x1fd   :  { %v3891_v49 = vmul.f32 -1.442695, %v915_v2  ;;  %v919_v54 = vpop.f32.mrb[7].mxu0  ;;  %v960_v61 = vpop.f32.mrb[7].mxu1  ;;  %v3893_v63 = vmul.f32 -1.442695, %v956_v47 }
 0x1fe   :  { %v3892_v55 = vmul.f32 -1.442695, %v917_v27  ;;  %v992_v27 = vpop.permute.xlu0 %991 }
 0x1ff   :  { %4302 = vpow2.f32 %v3891_v49  ;;  %v995_v51 = vmul.f32 %v992_v27, %v9812_v57 }
 0x200   :  { %4304 = vpow2.f32 %v3892_v55  ;;  %v9811_v55 = vld [vmem:[#allocation60_spill] sm:$0xff] }
 0x201   :  { %4306 = vtanh.f32 %v958_v38  ;;  %v994_v2 = vmul.f32 %v992_v27, %v9811_v55 }
 0x202   :  { %4308 = vpow2.f32 %v3893_v63  ;;  %v9814_v63 = vld [vmem:[#allocation64_spill] sm:$0xff] }
 0x209   :  { %v4303_v59 = vpop.eup %4302 }
 0x20a   :  { %v971_v60 = vadd.f32 1.0, %v4303_v59  ;;  %v4305_v48 = vpop.eup %4304  ;;  %v998_v59 = vadd.f32 %v994_v2, %v9813_v56 }
 0x20b   :  { %v972_v61 = vadd.f32 1.0, %v4305_v48  ;;  %v4307_v54 = vpop.eup %4306 }
 0x20c   :  { %4310 = vrcp.f32 %v971_v60  ;;  %v4309_v49 = vpop.eup %4308  ;;  %v999_v60 = vadd.f32 %v995_v51, %v9814_v63  ;;  %v997_v51 = vmul.f32 %v992_v27, %v5731_v53 }
 0x20d   :  { %4312 = vrcp.f32 %v972_v61  ;;  %v973_v50 = vadd.f32 1.0, %v4309_v49  ;;  %v9815_v49 = vld [vmem:[#allocation66_spill] sm:$0xff] }
 0x20f   :  { %4314 = vrcp.f32 %v973_v50  ;;  %v1001_v50 = vadd.f32 %v997_v51, %v5738_v35 }
 0x216   :  { %v4311_v52 = vpop.eup %4310 }
 0x217   :  { %v982_v0 = vmul.f32 %v4311_v52, %v4307_v54  ;;  %v4313_v32 = vpop.eup %4312 }
 0x218   :  { %v981_v47 = vmul.f32 0.0, %v4313_v32  ;;  %v996_v32 = vmul.f32 %v992_v27, %v9815_v49 }
 0x21a   :  { %v1036_v38 = vpop.f32.mrb[8].mxu0  ;;  %v1077_v62 = vpop.f32.mrb[8].mxu1  ;;  %v5879_v48 = vadd.f32 %v982_v0, %v981_v47  ;;  %v1000_v0 = vadd.f32 %v996_v32, %v5734_v1 }
 0x21b   :  { %v1037_v61 = vadd.f32 %v1036_v38, %v998_v59  ;;  %v1038_v31 = vpop.f32.mrb[9].mxu0  ;;  %v1079_v30 = vpop.f32.mrb[9].mxu1 }
 0x21c   :  { %v1039_v55 = vadd.f32 %v1038_v31, %v999_v60  ;;  %v1040_v28 = vpop.f32.mrb[10].mxu0  ;;  %v1081_v26 = vpop.f32.mrb[10].mxu1  ;;  %4316 = vtanh.f32 %v5879_v48  ;;  %v1078_v47 = vadd.f32 %v1077_v62, %v1000_v0 }
 0x21d   :  { %v3895_v54 = vmul.f32 -1.442695, %v1037_v61  ;;  %v1041_v52 = vpop.f32.mrb[11].mxu0  ;;  %v1082_v2 = vpop.f32.mrb[11].mxu1  ;;  %v1080_v28 = vadd.f32 %v1079_v30, %v1001_v50 }
 0x21e   :  { %v3896_v56 = vmul.f32 -1.442695, %v1039_v55  ;;  %v4315_v31 = vpop.eup %4314  ;;  %v3897_v59 = vmul.f32 -1.442695, %v1078_v47 }
 0x21f   :  { %4318 = vpow2.f32 %v3895_v54 }
 0x220   :  { %4320 = vpow2.f32 %v3896_v56 }
 0x221   :  { %4322 = vtanh.f32 %v1080_v28 }
 0x222   :  { %4324 = vpow2.f32 %v3897_v59  ;;  %v5912_v59 = vld [vmem:[%s9123_s1 + $0x24] ss:$16 sps:$4 sm:$0xff]  }
 0x226   :  { %v4317_v26 = vpop.eup %4316 }
 0x227   :  { %v985_v38 = vmul.f32 %v4317_v26, %v4315_v31  ;;  %v5900_v26 = vld [vmem:[%s9123_s1] ss:$16 sps:$4 sm:$0xff]  }
 0x229   :  { %v4319_v60 = vpop.eup %4318  ;;  %986 = vst [vmem:[%s9129_s8] sm:$0xff] %v985_v38  ;;  %v1109_v55 = vpack.c.bf16 %v985_v38, %v985_v38  ;;  %v5918_v38 = vld [vmem:[%s9123_s1 + $0x2c] ss:$16 sps:$4 sm:$0xff]  }
 0x22a   :  { %v1093_v61 = vadd.f32 1.0, %v4319_v60  ;;  %v4321_v27 = vpop.eup %4320  ;;  %v5926_v60 = vld [vmem:[%s9123_s1 + $0x20] ss:$16 sps:$4 sm:$0xff]  }
 0x22b   :  { %v1094_v56 = vadd.f32 1.0, %v4321_v27  ;;  %1142 = vmatprep.mubr.bf16.mxu0 %v1109_v55  ;;  %1183 = vmatprep.mubr.bf16.mxu1 %v1109_v55  ;;  %v4323_v62 = vpop.eup %4322  ;;  %v5938_v55 = vld [vmem:[%s9123_s1 + $0x44] ss:$16 sps:$4 sm:$0xff]   ;;  %v5944_v27 = vld [vmem:[%s9123_s1 + $0x4c] ss:$16 sps:$4 sm:$0xff]  }
 0x22c   :  { %4326 = vrcp.f32 %v1093_v61  ;;  %v4325_v30 = vpop.eup %4324  ;;  %v5932_v61 = vld [vmem:[%s9123_s1 + $0x28] ss:$16 sps:$4 sm:$0xff]  }
 0x22d   :  { %4328 = vrcp.f32 %v1094_v56  ;;  %v1095_v2 = vadd.f32 1.0, %v4325_v30  ;;  %v5950_v56 = vld [vmem:[%s9123_s1 + $0x40] ss:$16 sps:$4 sm:$0xff]   ;;  %v5962_v30 = vld [vmem:[%s9123_s1 + $0x64] ss:$16 sps:$4 sm:$0xff]  }
 0x22f   :  { %4330 = vrcp.f32 %v1095_v2  ;;  %v5986_v2 = vld [vmem:[%s9123_s1 + $0x84] ss:$16 sps:$4 sm:$0xff]  }
 0x236   :  { %v4327_v54 = vpop.eup %4326 }
 0x237   :  { %v1104_v32 = vmul.f32 %v4327_v54, %v4323_v62  ;;  %v4329_v52 = vpop.eup %4328  ;;  %v5956_v62 = vld [vmem:[%s9123_s1 + $0x48] ss:$16 sps:$4 sm:$0xff]   ;;  %v5968_v54 = vld [vmem:[%s9123_s1 + $0x6c] ss:$16 sps:$4 sm:$0xff]  }
 0x238   :  { %v1103_v51 = vmul.f32 %v4329_v52, %v5743_v58  ;;  %v5906_v58 = vld [vmem:[%s9123_s1 + $0x8] ss:$16 sps:$4 sm:$0xff]  }
 0x239   :  { %v4331_v47 = vpop.eup %4330  ;;  %v5980_v52 = vld [vmem:[%s9123_s1 + $0x68] ss:$16 sps:$4 sm:$0xff]  }
 0x23a   :  { %v5890_v0 = vadd.f32 %v1104_v32, %v1103_v51  ;;  %v5974_v32 = vld [vmem:[%s9123_s1 + $0x60] ss:$16 sps:$4 sm:$0xff]   ;;  %v5992_v51 = vld [vmem:[%s9123_s1 + $0x8c] ss:$16 sps:$4 sm:$0xff]  }
 0x23b   :  { %9816 = vst [vmem:[#allocation8_spill] sm:$0xff] %v5992_v51 }
 0x23c   :  { %4332 = vtanh.f32 %v5890_v0 }
 0x246   :  { %v4333_v50 = vpop.eup %4332 }
 0x247   :  { %v1107_v31 = vmul.f32 %v4333_v50, %v4331_v47  ;;  %v5998_v47 = vld [vmem:[%s9123_s1 + $0x80] ss:$16 sps:$4 sm:$0xff]   ;;  %v6004_v50 = vld [vmem:[%s9123_s1 + $0x88] ss:$16 sps:$4 sm:$0xff]  }
 0x248   :  { %9817 = vst [vmem:[#allocation9_spill] sm:$0xff] %v5998_v47  ;;  %9818 = vst [vmem:[#allocation10_spill] sm:$0xff] %v6004_v50 }
 0x249   :  { %v5893_v28 = vpack.c.bf16 %v1107_v31, %v1107_v31  ;;  %v6010_v31 = vld [vmem:[%s9123_s1 + $0xa4] ss:$16 sps:$4 sm:$0xff]  }
 0x24a   :  { %9819 = vst [vmem:[#allocation11_spill] sm:$0xff] %v6010_v31 }
 0x24b   :  { %1143 = vmatmul.mubr.bf16.vlgmr.msra.gmra.mrb[12].mxu0 %v5893_v28  ;;  %1184 = vmatmul.mubr.bf16.vlgmr.msra.gmra.mrb[12].mxu1 %v5893_v28 }
 0x24c   :  { %1234 = vmatpush1.bf16.msra.mxu0 %v5900_v26  ;;  %1275 = vmatpush1.bf16.msra.mxu1 %v5906_v58 }
 0x24d   :  { %1235 = vmatprep.subr.bf16.mxu0 %v5912_v59  ;;  %1276 = vmatprep.subr.bf16.mxu1 %v5918_v38 }
 0x24e   :  { %1265 = vmatprep.mubr.bf16.mxu0 %v9747_v29  ;;  %1306 = vmatprep.mubr.bf16.mxu1 %v9747_v29 }
 0x250   :  { %1236 = vmatpush1.bf16.msra.mxu0 %v5926_v60  ;;  %1277 = vmatpush1.bf16.msra.mxu1 %v5932_v61 }
 0x251   :  { %1237 = vmatprep.subr.bf16.mxu0 %v5938_v55  ;;  %1278 = vmatprep.subr.bf16.mxu1 %v5944_v27 }
 0x254   :  { %1238 = vmatpush1.bf16.msra.mxu0 %v5950_v56  ;;  %1279 = vmatpush1.bf16.msra.mxu1 %v5956_v62 }
 0x255   :  { %1239 = vmatprep.subr.bf16.mxu0 %v5962_v30  ;;  %1280 = vmatprep.subr.bf16.mxu1 %v5968_v54 }
 0x258   :  { %1240 = vmatpush1.bf16.msra.mxu0 %v5974_v32  ;;  %1281 = vmatpush1.bf16.msra.mxu1 %v5980_v52 }
 0x259   :  { %1241 = vmatprep.subr.bf16.mxu0 %v5986_v2  ;;  %1282 = vmatprep.subr.bf16.mxu1 %v5992_v51  ;;  %v6016_v51 = vld [vmem:[%s9123_s1 + $0xac] ss:$16 sps:$4 sm:$0xff]  }
 0x25a   :  { %9820 = vst [vmem:[#allocation12_spill] sm:$0xff] %v6016_v51 }
 0x25c   :  { %1242 = vmatpush1.bf16.msra.mxu0 %v5998_v47  ;;  %1283 = vmatpush1.bf16.msra.mxu1 %v6004_v50  ;;  %v6022_v47 = vld [vmem:[%s9123_s1 + $0xa0] ss:$16 sps:$4 sm:$0xff]   ;;  %v6028_v50 = vld [vmem:[%s9123_s1 + $0xa8] ss:$16 sps:$4 sm:$0xff]  }
 0x25d   :  { %1243 = vmatprep.subr.bf16.mxu0 %v6010_v31  ;;  %1284 = vmatprep.subr.bf16.mxu1 %v6016_v51  ;;  %9821 = vst [vmem:[#allocation13_spill] sm:$0xff] %v6022_v47  ;;  %9822 = vst [vmem:[#allocation14_spill] sm:$0xff] %v6028_v50  ;;  %v6034_v31 = vld [vmem:[%s9123_s1 + $0xc4] ss:$16 sps:$4 sm:$0xff]   ;;  %v6040_v51 = vld [vmem:[%s9123_s1 + $0xcc] ss:$16 sps:$4 sm:$0xff]  }
 0x25e   :  { %9823 = vst [vmem:[#allocation15_spill] sm:$0xff] %v6034_v31  ;;  %9824 = vst [vmem:[#allocation16_spill] sm:$0xff] %v6040_v51 }
 0x260   :  { %1244 = vmatpush1.bf16.msra.mxu0 %v6022_v47  ;;  %1285 = vmatpush1.bf16.msra.mxu1 %v6028_v50  ;;  %v6046_v47 = vld [vmem:[%s9123_s1 + $0xc0] ss:$16 sps:$4 sm:$0xff]   ;;  %v6052_v50 = vld [vmem:[%s9123_s1 + $0xc8] ss:$16 sps:$4 sm:$0xff]  }
 0x261   :  { %1245 = vmatprep.subr.bf16.mxu0 %v6034_v31  ;;  %1286 = vmatprep.subr.bf16.mxu1 %v6040_v51  ;;  %v6058_v31 = vld [vmem:[%s9123_s1 + $0xe4] ss:$16 sps:$4 sm:$0xff]   ;;  %v6064_v51 = vld [vmem:[%s9123_s1 + $0xec] ss:$16 sps:$4 sm:$0xff]  }
 0x264   :  { %1246 = vmatpush1.bf16.msra.mxu0 %v6046_v47  ;;  %1287 = vmatpush1.bf16.msra.mxu1 %v6052_v50 }
 0x265   :  { %1247 = vmatprep.subr.bf16.mxu0 %v6058_v31  ;;  %1288 = vmatprep.subr.bf16.mxu1 %v6064_v51 }
 0x268   :  { %1248 = vmatpush1.bf16.msra.mxu0 %v5290_v33  ;;  %1289 = vmatpush1.bf16.msra.mxu1 %v5295_v34  ;;  %v9825_v33 = vld [vmem:[#allocation27_spill] sm:$0xff]  ;;  %v9826_v34 = vld [vmem:[#allocation28_spill] sm:$0xff] }
 0x269   :  { %1341 = vmatprep.subr.bf16.mxu0 %v5305_v36  ;;  %1382 = vmatprep.subr.bf16.mxu1 %v5312_v37  ;;  %v9827_v36 = vld [vmem:[#allocation29_spill] sm:$0xff]  ;;  %v9828_v37 = vld [vmem:[#allocation30_spill] sm:$0xff] }
 0x26b   :  { %1266 = vmatmul.mubr.bf16.vlgmr.msra.gmra.mrb[16].mxu0 %v5893_v28  ;;  %1307 = vmatmul.mubr.bf16.vlgmr.msra.gmra.mrb[16].mxu1 %v5893_v28  ;;  %v9858_v28 = vld [vmem:[#allocation4_spill] sm:$0xff] }
 0x26c   :  { %1342 = vmatpush1.bf16.msra.mxu0 %v5322_v39  ;;  %1383 = vmatpush1.bf16.msra.mxu1 %v5327_v40  ;;  %v9829_v39 = vld [vmem:[#allocation31_spill] sm:$0xff]  ;;  %v9830_v40 = vld [vmem:[#allocation32_spill] sm:$0xff] }
 0x26d   :  { %1343 = vmatprep.subr.bf16.mxu0 %v5334_v41  ;;  %1384 = vmatprep.subr.bf16.mxu1 %v5339_v42  ;;  %v9831_v41 = vld [vmem:[#allocation33_spill] sm:$0xff]  ;;  %v9832_v42 = vld [vmem:[#allocation34_spill] sm:$0xff] }
 0x270   :  { %1344 = vmatpush1.bf16.msra.mxu0 %v5344_v43  ;;  %1385 = vmatpush1.bf16.msra.mxu1 %v5349_v44  ;;  %v9833_v43 = vld [vmem:[#allocation35_spill] sm:$0xff]  ;;  %v9834_v44 = vld [vmem:[#allocation36_spill] sm:$0xff] }
 0x271   :  { %1345 = vmatprep.subr.bf16.mxu0 %v5356_v45  ;;  %1386 = vmatprep.subr.bf16.mxu1 %v5361_v46  ;;  %v9835_v45 = vld [vmem:[#allocation37_spill] sm:$0xff]  ;;  %v9836_v46 = vld [vmem:[#allocation38_spill] sm:$0xff] }
 0x274   :  { %1346 = vmatpush1.bf16.msra.mxu0 %v9748_v3  ;;  %1387 = vmatpush1.bf16.msra.mxu1 %v9749_v4  ;;  %v9837_v3 = vld [vmem:[#allocation39_spill] sm:$0xff]  ;;  %v9838_v4 = vld [vmem:[#allocation40_spill] sm:$0xff] }
 0x275   :  { %1347 = vmatprep.subr.bf16.mxu0 %v9750_v5  ;;  %1388 = vmatprep.subr.bf16.mxu1 %v9751_v6  ;;  %v9839_v5 = vld [vmem:[#allocation41_spill] sm:$0xff]  ;;  %v9840_v6 = vld [vmem:[#allocation42_spill] sm:$0xff] }
 0x278   :  { %1348 = vmatpush1.bf16.msra.mxu0 %v9752_v7  ;;  %1389 = vmatpush1.bf16.msra.mxu1 %v9753_v8  ;;  %v9841_v7 = vld [vmem:[#allocation43_spill] sm:$0xff]  ;;  %v9842_v8 = vld [vmem:[#allocation44_spill] sm:$0xff] }
 0x279   :  { %1349 = vmatprep.subr.bf16.mxu0 %v9754_v9  ;;  %1390 = vmatprep.subr.bf16.mxu1 %v9755_v10  ;;  %v9843_v9 = vld [vmem:[#allocation45_spill] sm:$0xff]  ;;  %v9844_v10 = vld [vmem:[#allocation46_spill] sm:$0xff] }
 0x27c   :  { %1350 = vmatpush1.bf16.msra.mxu0 %v9756_v11  ;;  %1391 = vmatpush1.bf16.msra.mxu1 %v9757_v12  ;;  %v9845_v11 = vld [vmem:[#allocation47_spill] sm:$0xff]  ;;  %v9846_v12 = vld [vmem:[#allocation48_spill] sm:$0xff] }
 0x27d   :  { %1351 = vmatprep.subr.bf16.mxu0 %v9758_v13  ;;  %1392 = vmatprep.subr.bf16.mxu1 %v9759_v14  ;;  %v9847_v13 = vld [vmem:[#allocation49_spill] sm:$0xff]  ;;  %v9848_v14 = vld [vmem:[#allocation50_spill] sm:$0xff] }
 0x280   :  { %1352 = vmatpush1.bf16.msra.mxu0 %v9760_v15  ;;  %1393 = vmatpush1.bf16.msra.mxu1 %v9761_v16  ;;  %v9849_v15 = vld [vmem:[#allocation51_spill] sm:$0xff]  ;;  %v9850_v16 = vld [vmem:[#allocation52_spill] sm:$0xff] }
 0x281   :  { %1353 = vmatprep.subr.bf16.mxu0 %v9762_v17  ;;  %1394 = vmatprep.subr.bf16.mxu1 %v9763_v18  ;;  %v9851_v17 = vld [vmem:[#allocation53_spill] sm:$0xff]  ;;  %v9852_v18 = vld [vmem:[#allocation54_spill] sm:$0xff] }
 0x284   :  { %1354 = vmatpush1.bf16.msra.mxu0 %v9764_v19  ;;  %1395 = vmatpush1.bf16.msra.mxu1 %v9765_v20  ;;  %v9853_v19 = vld [vmem:[#allocation55_spill] sm:$0xff]  ;;  %v9854_v20 = vld [vmem:[#allocation56_spill] sm:$0xff] }
 0x285   :  { %1355 = vmatprep.subr.bf16.mxu0 %v9766_v21  ;;  %1396 = vmatprep.subr.bf16.mxu1 %v9767_v22  ;;  %v9855_v21 = vld [vmem:[#allocation57_spill] sm:$0xff]  ;;  %v6138_v22 = vld [vmem:[%s9123_s1 + $0x4] ss:$16 sps:$4 sm:$0xff]  }
 0x286   :  { %9856 = vst [vmem:[#allocation17_spill] sm:$0xff] %v6138_v22 }
 0x288   :  { %1356 = vmatpush1.bf16.msra.mxu0 %v9768_v23  ;;  %1397 = vmatpush1.bf16.msra.mxu1 %v9769_v24  ;;  %v6144_v23 = vld [vmem:[%s9123_s1 + $0xc] ss:$16 sps:$4 sm:$0xff]  }
 0x289   :  { %1357 = vmatprep.subr.bf16.mxu0 %v9770_v25  ;;  %1398 = vmatprep.subr.bf16.mxu1 %v9825_v33  ;;  %9857 = vst [vmem:[#allocation18_spill] sm:$0xff] %v6144_v23 }
 0x28c   :  { %1358 = vmatpush1.bf16.msra.mxu0 %v9826_v34  ;;  %1399 = vmatpush1.bf16.msra.mxu1 %v9827_v36 }
 0x28d   :  { %1359 = vmatprep.subr.bf16.mxu0 %v9828_v37  ;;  %1400 = vmatprep.subr.bf16.mxu1 %v9829_v39  ;;  %v9859_v37 = vld [vmem:[#allocation5_spill] sm:$0xff] }
 0x290   :  { %1360 = vmatpush1.bf16.msra.mxu0 %v9830_v40  ;;  %1401 = vmatpush1.bf16.msra.mxu1 %v9831_v41 }
 0x291   :  { %1361 = vmatprep.subr.bf16.mxu0 %v9832_v42  ;;  %1402 = vmatprep.subr.bf16.mxu1 %v9833_v43 }
 0x294   :  { %1362 = vmatpush1.bf16.msra.mxu0 %v9834_v44  ;;  %1403 = vmatpush1.bf16.msra.mxu1 %v9835_v45 }
 0x295   :  { %1363 = vmatprep.subr.bf16.mxu0 %v9836_v46  ;;  %1404 = vmatprep.subr.bf16.mxu1 %v9837_v3  ;;  %v9860_v46 = vld [vmem:[#allocation6_spill] sm:$0xff] }
 0x298   :  { %1364 = vmatpush1.bf16.msra.mxu0 %v9838_v4  ;;  %1405 = vmatpush1.bf16.msra.mxu1 %v9839_v5  ;;  %v9861_v4 = vld [vmem:[#allocation7_spill] sm:$0xff] }
 0x299   :  { %1365 = vmatprep.subr.bf16.mxu0 %v9840_v6  ;;  %1406 = vmatprep.subr.bf16.mxu1 %v9841_v7 }
 0x29c   :  { %1366 = vmatpush1.bf16.msra.mxu0 %v9842_v8  ;;  %1407 = vmatpush1.bf16.msra.mxu1 %v9843_v9 }
 0x29d   :  { %1367 = vmatprep.subr.bf16.mxu0 %v9844_v10  ;;  %1408 = vmatprep.subr.bf16.mxu1 %v9845_v11  ;;  %v1223_v11 = vpop.permute.xlu1 %1222 }
 0x2a0   :  { %1368 = vmatpush1.bf16.msra.mxu0 %v9846_v12  ;;  %1409 = vmatpush1.bf16.msra.mxu1 %v9847_v13  ;;  %v9862_v12 = vld [vmem:[#allocation60_spill] sm:$0xff] }
 0x2a1   :  { %1369 = vmatprep.subr.bf16.mxu0 %v9848_v14  ;;  %1410 = vmatprep.subr.bf16.mxu1 %v9849_v15  ;;  %v1225_v13 = vmul.f32 %v1223_v11, %v9862_v12  ;;  %v1226_v15 = vmul.f32 %v1223_v11, %v9812_v57 }
 0x2a4   :  { %1370 = vmatpush1.bf16.msra.mxu0 %v9850_v16  ;;  %1411 = vmatpush1.bf16.msra.mxu1 %v9851_v17 }
 0x2a5   :  { %1371 = vmatprep.subr.bf16.mxu0 %v9852_v18  ;;  %1412 = vmatprep.subr.bf16.mxu1 %v9853_v19  ;;  %v9863_v19 = vld [vmem:[#allocation63_spill] sm:$0xff] }
 0x2a8   :  { %1372 = vmatpush1.bf16.msra.mxu0 %v9854_v20  ;;  %1413 = vmatpush1.bf16.msra.mxu1 %v9855_v21  ;;  %v1229_v20 = vadd.f32 %v1225_v13, %v9863_v19 }
 0x2a9   :  { %1464 = vmatprep.subr.bf16.mxu0 %v6138_v22  ;;  %1505 = vmatprep.subr.bf16.mxu1 %v6144_v23 }
 0x31e   :  { %v1144_v24 = vpop.f32.mrb[12].mxu0  ;;  %v1185_v25 = vpop.f32.mrb[12].mxu1 }
 0x31f   :  { %v1145_v33 = vadd.f32 %v1144_v24, %v9858_v28  ;;  %v1146_v34 = vpop.f32.mrb[13].mxu0  ;;  %v1187_v36 = vpop.f32.mrb[13].mxu1  ;;  %v1186_v3 = vadd.f32 %v1185_v25, %v9860_v46  ;;  %v1230_v25 = vadd.f32 %v1226_v15, %v9814_v63 }
 0x320   :  { %v1147_v39 = vadd.f32 %v1146_v34, %v9859_v37  ;;  %v1148_v40 = vpop.f32.mrb[14].mxu0  ;;  %v1189_v41 = vpop.f32.mrb[14].mxu1  ;;  %v1188_v5 = vadd.f32 %v1187_v36, %v9861_v4 }
 0x321   :  { %v3898_v42 = vmul.f32 -1.442695, %v1145_v33  ;;  %v1149_v43 = vpop.f32.mrb[15].mxu0  ;;  %v1190_v44 = vpop.f32.mrb[15].mxu1  ;;  %v3900_v6 = vmul.f32 -1.442695, %v1186_v3  ;;  %v1227_v41 = vmul.f32 %v1223_v11, %v9815_v49 }
 0x322   :  { %v3899_v45 = vmul.f32 -1.442695, %v1147_v39 }
 0x323   :  { %4334 = vpow2.f32 %v3898_v42 }
 0x324   :  { %4336 = vpow2.f32 %v3899_v45 }
 0x325   :  { %4338 = vtanh.f32 %v1188_v5 }
 0x326   :  { %4340 = vpow2.f32 %v3900_v6 }
 0x32d   :  { %v4335_v7 = vpop.eup %4334 }
 0x32e   :  { %v1201_v8 = vadd.f32 1.0, %v4335_v7  ;;  %v4337_v9 = vpop.eup %4336 }
 0x32f   :  { %v1202_v10 = vadd.f32 1.0, %v4337_v9  ;;  %v4339_v14 = vpop.eup %4338  ;;  %v1231_v9 = vadd.f32 %v1227_v41, %v5734_v1 }
 0x330   :  { %4342 = vrcp.f32 %v1201_v8  ;;  %v4341_v16 = vpop.eup %4340 }
 0x331   :  { %4344 = vrcp.f32 %v1202_v10  ;;  %v1203_v24 = vadd.f32 1.0, %v4341_v16 }
 0x333   :  { %4346 = vrcp.f32 %v1203_v24 }
 0x33a   :  { %v4343_v17 = vpop.eup %4342 }
 0x33b   :  { %v1212_v18 = vmul.f32 %v4343_v17, %v4339_v14  ;;  %v4345_v21 = vpop.eup %4344 }
 0x33c   :  { %v1211_v33 = vmul.f32 %v4345_v21, %v5879_v48  ;;  %v1228_v48 = vmul.f32 %v1223_v11, %v5731_v53 }
 0x33d   :  { %v4347_v14 = vpop.eup %4346 }
 0x33e   :  { %v1267_v34 = vpop.f32.mrb[16].mxu0  ;;  %v1308_v36 = vpop.f32.mrb[16].mxu1  ;;  %v6156_v39 = vadd.f32 %v1212_v18, %v1211_v33  ;;  %v1232_v10 = vadd.f32 %v1228_v48, %v5738_v35  ;;  %v9867_v48 = vld [vmem:[#allocation11_spill] sm:$0xff] }
 0x33f   :  { %v1268_v40 = vadd.f32 %v1267_v34, %v1229_v20  ;;  %v1269_v42 = vpop.f32.mrb[17].mxu0  ;;  %v1310_v43 = vpop.f32.mrb[17].mxu1  ;;  %v1309_v13 = vadd.f32 %v1308_v36, %v1231_v9  ;;  %v9868_v9 = vld [vmem:[#allocation12_spill] sm:$0xff] }
 0x340   :  { %v1270_v44 = vadd.f32 %v1269_v42, %v1230_v25  ;;  %v1271_v45 = vpop.f32.mrb[18].mxu0  ;;  %v1312_v3 = vpop.f32.mrb[18].mxu1  ;;  %4348 = vtanh.f32 %v6156_v39  ;;  %v1311_v15 = vadd.f32 %v1310_v43, %v1232_v10  ;;  %v9869_v10 = vld [vmem:[#allocation13_spill] sm:$0xff] }
 0x341   :  { %v3903_v5 = vmul.f32 -1.442695, %v1268_v40  ;;  %v1272_v6 = vpop.f32.mrb[19].mxu0  ;;  %v1313_v7 = vpop.f32.mrb[19].mxu1  ;;  %v3905_v17 = vmul.f32 -1.442695, %v1309_v13 }
 0x342   :  { %v3904_v8 = vmul.f32 -1.442695, %v1270_v44  ;;  %v9865_v7 = vld [vmem:[#allocation9_spill] sm:$0xff]  ;;  %v9870_v13 = vld [vmem:[#allocation14_spill] sm:$0xff] }
 0x343   :  { %4350 = vpow2.f32 %v3903_v5 }
 0x344   :  { %4352 = vpow2.f32 %v3904_v8  ;;  %v9866_v8 = vld [vmem:[#allocation10_spill] sm:$0xff] }
 0x345   :  { %4354 = vtanh.f32 %v1311_v15  ;;  %v9872_v15 = vld [vmem:[#allocation16_spill] sm:$0xff] }
 0x346   :  { %4356 = vpow2.f32 %v3905_v17  ;;  %v6209_v17 = vld [vmem:[%s9123_s1 + $0xe8] ss:$16 sps:$4 sm:$0xff]  }
 0x34a   :  { %v4349_v16 = vpop.eup %4348 }
 0x34b   :  { %v1215_v18 = vmul.f32 %v4349_v16, %v4347_v14  ;;  %v9871_v14 = vld [vmem:[#allocation15_spill] sm:$0xff]  ;;  %v6203_v16 = vld [vmem:[%s9123_s1 + $0xe0] ss:$16 sps:$4 sm:$0xff]  }
 0x34d   :  { %v4351_v20 = vpop.eup %4350  ;;  %3901 = vst [vmem:[%s9129_s8 + $0x8] sm:$0xff] %v1215_v18  ;;  %v1340_v11 = vpack.c.bf16 %v1215_v18, %v1215_v18  ;;  %v6215_v18 = vld [vmem:[%s9125_s3 + $0x4] ss:$16 sps:$4 sm:$0xff]  }
 0x34e   :  { %v1324_v21 = vadd.f32 1.0, %v4351_v20  ;;  %v4353_v24 = vpop.eup %4352  ;;  %v6221_v20 = vld [vmem:[%s9125_s3 + $0xc] ss:$16 sps:$4 sm:$0xff]  }
 0x34f   :  { %v1325_v25 = vadd.f32 1.0, %v4353_v24  ;;  %1373 = vmatprep.mubr.bf16.mxu0 %v1340_v11  ;;  %1414 = vmatprep.mubr.bf16.mxu1 %v1340_v11  ;;  %v4355_v33 = vpop.eup %4354  ;;  %v6233_v11 = vld [vmem:[%s9125_s3 + $0x8] ss:$16 sps:$4 sm:$0xff]   ;;  %v6239_v24 = vld [vmem:[%s9125_s3 + $0x24] ss:$16 sps:$4 sm:$0xff]  }
 0x350   :  { %4358 = vrcp.f32 %v1324_v21  ;;  %v4357_v34 = vpop.eup %4356  ;;  %v6227_v21 = vld [vmem:[%s9125_s3] ss:$16 sps:$4 sm:$0xff]   ;;  %9874 = vst [vmem:[#allocation20_spill] sm:$0xff] %v6233_v11  ;;  %9875 = vst [vmem:[#allocation21_spill] sm:$0xff] %v6239_v24 }
 0x351   :  { %4360 = vrcp.f32 %v1325_v25  ;;  %v1326_v42 = vadd.f32 1.0, %v4357_v34  ;;  %9873 = vst [vmem:[#allocation19_spill] sm:$0xff] %v6227_v21  ;;  %v6245_v25 = vld [vmem:[%s9125_s3 + $0x2c] ss:$16 sps:$4 sm:$0xff]   ;;  %v6257_v34 = vld [vmem:[%s9125_s3 + $0x28] ss:$16 sps:$4 sm:$0xff]  }
 0x352   :  { %9876 = vst [vmem:[#allocation22_spill] sm:$0xff] %v6245_v25  ;;  %9878 = vst [vmem:[#allocation24_spill] sm:$0xff] %v6257_v34 }
 0x353   :  { %4362 = vrcp.f32 %v1326_v42  ;;  %v6281_v42 = vld [vmem:[%s9125_s3 + $0x48] ss:$16 sps:$4 sm:$0xff]  }
 0x354   :  { %9882 = vst [vmem:[#allocation3_spill] sm:$0xff] %v6281_v42 }
 0x35a   :  { %v4359_v36 = vpop.eup %4358 }
 0x35b   :  { %v1335_v40 = vmul.f32 %v4359_v36, %v4355_v33  ;;  %v4361_v41 = vpop.eup %4360  ;;  %v6251_v33 = vld [vmem:[%s9125_s3 + $0x20] ss:$16 sps:$4 sm:$0xff]   ;;  %v6263_v36 = vld [vmem:[%s9125_s3 + $0x44] ss:$16 sps:$4 sm:$0xff]  }
 0x35c   :  { %v1334_v43 = vmul.f32 %v4361_v41, %v5890_v0  ;;  %v9864_v0 = vld [vmem:[#allocation8_spill] sm:$0xff]  ;;  %9877 = vst [vmem:[#allocation23_spill] sm:$0xff] %v6251_v33  ;;  %9879 = vst [vmem:[#allocation25_spill] sm:$0xff] %v6263_v36 }
 0x35d   :  { %v4363_v45 = vpop.eup %4362  ;;  %v6275_v41 = vld [vmem:[%s9125_s3 + $0x40] ss:$16 sps:$4 sm:$0xff]  }
 0x35e   :  { %v6167_v44 = vadd.f32 %v1335_v40, %v1334_v43  ;;  %v6269_v40 = vld [vmem:[%s9125_s3 + $0x4c] ss:$16 sps:$4 sm:$0xff]   ;;  %9881 = vst [vmem:[#allocation2_spill] sm:$0xff] %v6275_v41  ;;  %v6287_v43 = vld [vmem:[%s9125_s3 + $0x64] ss:$16 sps:$4 sm:$0xff]  }
 0x35f   :  { %9880 = vst [vmem:[#allocation26_spill] sm:$0xff] %v6269_v40  ;;  %9883 = vst [vmem:[#allocation64_spill] sm:$0xff] %v6287_v43 }
 0x360   :  { %4364 = vtanh.f32 %v6167_v44 }
 0x36a   :  { %v4365_v3 = vpop.eup %4364 }
 0x36b   :  { %v1338_v5 = vmul.f32 %v4365_v3, %v4363_v45  ;;  %v6293_v45 = vld [vmem:[%s9125_s3 + $0x6c] ss:$16 sps:$4 sm:$0xff]   ;;  %v6299_v3 = vld [vmem:[%s9125_s3 + $0x60] ss:$16 sps:$4 sm:$0xff]  }
 0x36c   :  { %9884 = vst [vmem:[#allocation66_spill] sm:$0xff] %v6293_v45  ;;  %9885 = vst [vmem:[#allocation27_spill] sm:$0xff] %v6299_v3 }
 0x36d   :  { %v1339_v6 = vpack.c.bf16 %v1338_v5, %v1338_v5  ;;  %v6305_v5 = vld [vmem:[%s9125_s3 + $0x68] ss:$16 sps:$4 sm:$0xff]  }
 0x36e   :  { %9886 = vst [vmem:[#allocation28_spill] sm:$0xff] %v6305_v5 }
 0x36f   :  { %1374 = vmatmul.mubr.bf16.vlgmr.msra.gmra.mrb[20].mxu0 %v1339_v6  ;;  %1415 = vmatmul.mubr.bf16.vlgmr.msra.gmra.mrb[20].mxu1 %v1339_v6 }
 0x370   :  { %1465 = vmatpush1.bf16.msra.mxu0 %v5900_v26  ;;  %1506 = vmatpush1.bf16.msra.mxu1 %v5906_v58 }
 0x371   :  { %1466 = vmatprep.subr.bf16.mxu0 %v5912_v59  ;;  %1507 = vmatprep.subr.bf16.mxu1 %v5918_v38 }
 0x372   :  { %1496 = vmatprep.mubr.bf16.mxu0 %v9747_v29  ;;  %1537 = vmatprep.mubr.bf16.mxu1 %v9747_v29 }
 0x374   :  { %1467 = vmatpush1.bf16.msra.mxu0 %v5926_v60  ;;  %1508 = vmatpush1.bf16.msra.mxu1 %v5932_v61 }
 0x375   :  { %1468 = vmatprep.subr.bf16.mxu0 %v5938_v55  ;;  %1509 = vmatprep.subr.bf16.mxu1 %v5944_v27 }
 0x378   :  { %1469 = vmatpush1.bf16.msra.mxu0 %v5950_v56  ;;  %1510 = vmatpush1.bf16.msra.mxu1 %v5956_v62 }
 0x379   :  { %1470 = vmatprep.subr.bf16.mxu0 %v5962_v30  ;;  %1511 = vmatprep.subr.bf16.mxu1 %v5968_v54 }
 0x37c   :  { %1471 = vmatpush1.bf16.msra.mxu0 %v5974_v32  ;;  %1512 = vmatpush1.bf16.msra.mxu1 %v5980_v52 }
 0x37d   :  { %1472 = vmatprep.subr.bf16.mxu0 %v5986_v2  ;;  %1513 = vmatprep.subr.bf16.mxu1 %v9864_v0 }
 0x380   :  { %1473 = vmatpush1.bf16.msra.mxu0 %v9865_v7  ;;  %1514 = vmatpush1.bf16.msra.mxu1 %v9866_v8 }
 0x381   :  { %1474 = vmatprep.subr.bf16.mxu0 %v9867_v48  ;;  %1515 = vmatprep.subr.bf16.mxu1 %v9868_v9 }
 0x384   :  { %1475 = vmatpush1.bf16.msra.mxu0 %v9869_v10  ;;  %1516 = vmatpush1.bf16.msra.mxu1 %v9870_v13 }
 0x385   :  { %1476 = vmatprep.subr.bf16.mxu0 %v9871_v14  ;;  %1517 = vmatprep.subr.bf16.mxu1 %v9872_v15 }
 0x388   :  { %1477 = vmatpush1.bf16.msra.mxu0 %v6046_v47  ;;  %1518 = vmatpush1.bf16.msra.mxu1 %v6052_v50 }
 0x389   :  { %1478 = vmatprep.subr.bf16.mxu0 %v6058_v31  ;;  %1519 = vmatprep.subr.bf16.mxu1 %v6064_v51 }
 0x38c   :  { %1479 = vmatpush1.bf16.msra.mxu0 %v6203_v16  ;;  %1520 = vmatpush1.bf16.msra.mxu1 %v6209_v17 }
 0x38d   :  { %1572 = vmatprep.subr.bf16.mxu0 %v6215_v18  ;;  %1613 = vmatprep.subr.bf16.mxu1 %v6221_v20 }
 0x38f   :  { %1497 = vmatmul.mubr.bf16.vlgmr.msra.gmra.mrb[24].mxu0 %v1339_v6  ;;  %1538 = vmatmul.mubr.bf16.vlgmr.msra.gmra.mrb[24].mxu1 %v1339_v6  ;;  %v6311_v6 = vld [vmem:[%s9125_s3 + $0x84] ss:$16 sps:$4 sm:$0xff]  }
 0x390   :  { %1573 = vmatpush1.bf16.msra.mxu0 %v6227_v21  ;;  %1614 = vmatpush1.bf16.msra.mxu1 %v6233_v11  ;;  %9887 = vst [vmem:[#allocation29_spill] sm:$0xff] %v6311_v6 }
 0x391   :  { %1574 = vmatprep.subr.bf16.mxu0 %v6239_v24  ;;  %1615 = vmatprep.subr.bf16.mxu1 %v6245_v25 }
 0x394   :  { %1575 = vmatpush1.bf16.msra.mxu0 %v6251_v33  ;;  %1616 = vmatpush1.bf16.msra.mxu1 %v6257_v34 }
 0x395   :  { %1576 = vmatprep.subr.bf16.mxu0 %v6263_v36  ;;  %1617 = vmatprep.subr.bf16.mxu1 %v6269_v40 }
 0x398   :  { %1577 = vmatpush1.bf16.msra.mxu0 %v6275_v41  ;;  %1618 = vmatpush1.bf16.msra.mxu1 %v6281_v42 }
 0x399   :  { %1578 = vmatprep.subr.bf16.mxu0 %v6287_v43  ;;  %1619 = vmatprep.subr.bf16.mxu1 %v6293_v45  ;;  %v6317_v45 = vld [vmem:[%s9125_s3 + $0x8c] ss:$16 sps:$4 sm:$0xff]  }
 0x39a   :  { %9888 = vst [vmem:[#allocation30_spill] sm:$0xff] %v6317_v45 }
 0x39c   :  { %1579 = vmatpush1.bf16.msra.mxu0 %v6299_v3  ;;  %1620 = vmatpush1.bf16.msra.mxu1 %v6305_v5  ;;  %v6323_v3 = vld [vmem:[%s9125_s3 + $0x80] ss:$16 sps:$4 sm:$0xff]   ;;  %v6329_v5 = vld [vmem:[%s9125_s3 + $0x88] ss:$16 sps:$4 sm:$0xff]  }
 0x39d   :  { %1580 = vmatprep.subr.bf16.mxu0 %v6311_v6  ;;  %1621 = vmatprep.subr.bf16.mxu1 %v6317_v45  ;;  %9889 = vst [vmem:[#allocation31_spill] sm:$0xff] %v6323_v3  ;;  %9890 = vst [vmem:[#allocation32_spill] sm:$0xff] %v6329_v5  ;;  %v6335_v6 = vld [vmem:[%s9125_s3 + $0xa4] ss:$16 sps:$4 sm:$0xff]   ;;  %v6341_v45 = vld [vmem:[%s9125_s3 + $0xac] ss:$16 sps:$4 sm:$0xff]  }
 0x39e   :  { %9891 = vst [vmem:[#allocation33_spill] sm:$0xff] %v6335_v6  ;;  %9892 = vst [vmem:[#allocation34_spill] sm:$0xff] %v6341_v45 }
 0x3a0   :  { %1581 = vmatpush1.bf16.msra.mxu0 %v6323_v3  ;;  %1622 = vmatpush1.bf16.msra.mxu1 %v6329_v5  ;;  %v6347_v3 = vld [vmem:[%s9125_s3 + $0xa0] ss:$16 sps:$4 sm:$0xff]   ;;  %v6353_v5 = vld [vmem:[%s9125_s3 + $0xa8] ss:$16 sps:$4 sm:$0xff]  }
 0x3a1   :  { %1582 = vmatprep.subr.bf16.mxu0 %v6335_v6  ;;  %1623 = vmatprep.subr.bf16.mxu1 %v6341_v45  ;;  %9893 = vst [vmem:[#allocation35_spill] sm:$0xff] %v6347_v3  ;;  %9894 = vst [vmem:[#allocation36_spill] sm:$0xff] %v6353_v5  ;;  %v6359_v6 = vld [vmem:[%s9125_s3 + $0xc4] ss:$16 sps:$4 sm:$0xff]   ;;  %v6365_v45 = vld [vmem:[%s9125_s3 + $0xcc] ss:$16 sps:$4 sm:$0xff]  }
 0x3a2   :  { %9895 = vst [vmem:[#allocation37_spill] sm:$0xff] %v6359_v6  ;;  %9896 = vst [vmem:[#allocation38_spill] sm:$0xff] %v6365_v45 }
 0x3a4   :  { %1583 = vmatpush1.bf16.msra.mxu0 %v6347_v3  ;;  %1624 = vmatpush1.bf16.msra.mxu1 %v6353_v5  ;;  %v6371_v3 = vld [vmem:[%s9125_s3 + $0xc0] ss:$16 sps:$4 sm:$0xff]   ;;  %v6377_v5 = vld [vmem:[%s9125_s3 + $0xc8] ss:$16 sps:$4 sm:$0xff]  }
 0x3a5   :  { %1584 = vmatprep.subr.bf16.mxu0 %v6359_v6  ;;  %1625 = vmatprep.subr.bf16.mxu1 %v6365_v45  ;;  %9897 = vst [vmem:[#allocation39_spill] sm:$0xff] %v6371_v3  ;;  %9898 = vst [vmem:[#allocation40_spill] sm:$0xff] %v6377_v5  ;;  %v6383_v6 = vld [vmem:[%s9125_s3 + $0xe4] ss:$16 sps:$4 sm:$0xff]   ;;  %v6389_v45 = vld [vmem:[%s9125_s3 + $0xec] ss:$16 sps:$4 sm:$0xff]  }
 0x3a6   :  { %9899 = vst [vmem:[#allocation41_spill] sm:$0xff] %v6383_v6  ;;  %9900 = vst [vmem:[#allocation42_spill] sm:$0xff] %v6389_v45 }
 0x3a8   :  { %1585 = vmatpush1.bf16.msra.mxu0 %v6371_v3  ;;  %1626 = vmatpush1.bf16.msra.mxu1 %v6377_v5  ;;  %v6395_v3 = vld [vmem:[%s9125_s3 + $0xe0] ss:$16 sps:$4 sm:$0xff]   ;;  %v6401_v5 = vld [vmem:[%s9125_s3 + $0xe8] ss:$16 sps:$4 sm:$0xff]  }
 0x3a9   :  { %1586 = vmatprep.subr.bf16.mxu0 %v6383_v6  ;;  %1627 = vmatprep.subr.bf16.mxu1 %v6389_v45  ;;  %9901 = vst [vmem:[#allocation43_spill] sm:$0xff] %v6395_v3  ;;  %9902 = vst [vmem:[#allocation44_spill] sm:$0xff] %v6401_v5  ;;  %v6407_v6 = vld [vmem:[%s9125_s3 + $0x104] ss:$16 sps:$4 sm:$0xff]   ;;  %v6413_v45 = vld [vmem:[%s9125_s3 + $0x10c] ss:$16 sps:$4 sm:$0xff]  }
 0x3aa   :  { %9903 = vst [vmem:[#allocation45_spill] sm:$0xff] %v6407_v6  ;;  %9904 = vst [vmem:[#allocation46_spill] sm:$0xff] %v6413_v45 }
 0x3ac   :  { %1587 = vmatpush1.bf16.msra.mxu0 %v6395_v3  ;;  %1628 = vmatpush1.bf16.msra.mxu1 %v6401_v5  ;;  %v6419_v3 = vld [vmem:[%s9125_s3 + $0x100] ss:$16 sps:$4 sm:$0xff]   ;;  %v6425_v5 = vld [vmem:[%s9125_s3 + $0x108] ss:$16 sps:$4 sm:$0xff]  }
 0x3ad   :  { %1588 = vmatprep.subr.bf16.mxu0 %v6407_v6  ;;  %1629 = vmatprep.subr.bf16.mxu1 %v6413_v45  ;;  %9905 = vst [vmem:[#allocation47_spill] sm:$0xff] %v6419_v3  ;;  %9906 = vst [vmem:[#allocation48_spill] sm:$0xff] %v6425_v5  ;;  %v6431_v6 = vld [vmem:[%s9125_s3 + $0x124] ss:$16 sps:$4 sm:$0xff]   ;;  %v6437_v45 = vld [vmem:[%s9125_s3 + $0x12c] ss:$16 sps:$4 sm:$0xff]  }
 0x3ae   :  { %9907 = vst [vmem:[#allocation49_spill] sm:$0xff] %v6431_v6  ;;  %9908 = vst [vmem:[#allocation50_spill] sm:$0xff] %v6437_v45 }
 0x3b0   :  { %1589 = vmatpush1.bf16.msra.mxu0 %v6419_v3  ;;  %1630 = vmatpush1.bf16.msra.mxu1 %v6425_v5  ;;  %v6443_v3 = vld [vmem:[%s9125_s3 + $0x120] ss:$16 sps:$4 sm:$0xff]   ;;  %v6449_v5 = vld [vmem:[%s9125_s3 + $0x128] ss:$16 sps:$4 sm:$0xff]  }
 0x3b1   :  { %1590 = vmatprep.subr.bf16.mxu0 %v6431_v6  ;;  %1631 = vmatprep.subr.bf16.mxu1 %v6437_v45  ;;  %9909 = vst [vmem:[#allocation51_spill] sm:$0xff] %v6443_v3  ;;  %9910 = vst [vmem:[#allocation52_spill] sm:$0xff] %v6449_v5  ;;  %v6455_v6 = vld [vmem:[%s9125_s3 + $0x144] ss:$16 sps:$4 sm:$0xff]   ;;  %v6461_v45 = vld [vmem:[%s9125_s3 + $0x14c] ss:$16 sps:$4 sm:$0xff]  }
 0x3b2   :  { %9911 = vst [vmem:[#allocation53_spill] sm:$0xff] %v6455_v6  ;;  %9912 = vst [vmem:[#allocation54_spill] sm:$0xff] %v6461_v45 }
 0x3b4   :  { %1591 = vmatpush1.bf16.msra.mxu0 %v6443_v3  ;;  %1632 = vmatpush1.bf16.msra.mxu1 %v6449_v5  ;;  %v6467_v3 = vld [vmem:[%s9125_s3 + $0x140] ss:$16 sps:$4 sm:$0xff]   ;;  %v6473_v5 = vld [vmem:[%s9125_s3 + $0x148] ss:$16 sps:$4 sm:$0xff]  }
 0x3b5   :  { %1592 = vmatprep.subr.bf16.mxu0 %v6455_v6  ;;  %1633 = vmatprep.subr.bf16.mxu1 %v6461_v45  ;;  %9913 = vst [vmem:[#allocation55_spill] sm:$0xff] %v6467_v3  ;;  %9914 = vst [vmem:[#allocation56_spill] sm:$0xff] %v6473_v5  ;;  %v6479_v6 = vld [vmem:[%s9125_s3 + $0x164] ss:$16 sps:$4 sm:$0xff]   ;;  %v6485_v45 = vld [vmem:[%s9125_s3 + $0x16c] ss:$16 sps:$4 sm:$0xff]  }
 0x3b6   :  { %9915 = vst [vmem:[#allocation57_spill] sm:$0xff] %v6479_v6  ;;  %9916 = vst [vmem:[#allocation63_spill] sm:$0xff] %v6485_v45 }
 0x3b8   :  { %1593 = vmatpush1.bf16.msra.mxu0 %v6467_v3  ;;  %1634 = vmatpush1.bf16.msra.mxu1 %v6473_v5  ;;  %v6491_v3 = vld [vmem:[%s9125_s3 + $0x160] ss:$16 sps:$4 sm:$0xff]   ;;  %v6497_v5 = vld [vmem:[%s9125_s3 + $0x168] ss:$16 sps:$4 sm:$0xff]  }
 0x3b9   :  { %1594 = vmatprep.subr.bf16.mxu0 %v6479_v6  ;;  %1635 = vmatprep.subr.bf16.mxu1 %v6485_v45  ;;  %9917 = vst [vmem:[#allocation8_spill] sm:$0xff] %v6491_v3  ;;  %9918 = vst [vmem:[#allocation9_spill] sm:$0xff] %v6497_v5  ;;  %v6503_v6 = vld [vmem:[%s9125_s3 + $0x184] ss:$16 sps:$4 sm:$0xff]   ;;  %v6509_v45 = vld [vmem:[%s9125_s3 + $0x18c] ss:$16 sps:$4 sm:$0xff]  }
 0x3ba   :  { %9919 = vst [vmem:[#allocation10_spill] sm:$0xff] %v6503_v6  ;;  %9920 = vst [vmem:[#allocation11_spill] sm:$0xff] %v6509_v45 }
 0x3bc   :  { %1595 = vmatpush1.bf16.msra.mxu0 %v6491_v3  ;;  %1636 = vmatpush1.bf16.msra.mxu1 %v6497_v5  ;;  %v6515_v3 = vld [vmem:[%s9125_s3 + $0x180] ss:$16 sps:$4 sm:$0xff]   ;;  %v6521_v5 = vld [vmem:[%s9125_s3 + $0x188] ss:$16 sps:$4 sm:$0xff]  }
 0x3bd   :  { %1596 = vmatprep.subr.bf16.mxu0 %v6503_v6  ;;  %1637 = vmatprep.subr.bf16.mxu1 %v6509_v45  ;;  %9921 = vst [vmem:[#allocation12_spill] sm:$0xff] %v6515_v3  ;;  %9922 = vst [vmem:[#allocation13_spill] sm:$0xff] %v6521_v5  ;;  %v6527_v6 = vld [vmem:[%s9125_s3 + $0x1a4] ss:$16 sps:$4 sm:$0xff]   ;;  %v6533_v45 = vld [vmem:[%s9125_s3 + $0x1ac] ss:$16 sps:$4 sm:$0xff]  }
 0x3be   :  { %9923 = vst [vmem:[#allocation14_spill] sm:$0xff] %v6527_v6  ;;  %9924 = vst [vmem:[#allocation15_spill] sm:$0xff] %v6533_v45 }
 0x3c0   :  { %1597 = vmatpush1.bf16.msra.mxu0 %v6515_v3  ;;  %1638 = vmatpush1.bf16.msra.mxu1 %v6521_v5  ;;  %v6539_v3 = vld [vmem:[%s9125_s3 + $0x1a0] ss:$16 sps:$4 sm:$0xff]   ;;  %v6545_v5 = vld [vmem:[%s9125_s3 + $0x1a8] ss:$16 sps:$4 sm:$0xff]  }
 0x3c1   :  { %1598 = vmatprep.subr.bf16.mxu0 %v6527_v6  ;;  %1639 = vmatprep.subr.bf16.mxu1 %v6533_v45  ;;  %9925 = vst [vmem:[#allocation16_spill] sm:$0xff] %v6539_v3  ;;  %9926 = vst [vmem:[#allocation67_spill] sm:$0xff] %v6545_v5  ;;  %v6551_v6 = vld [vmem:[%s9125_s3 + $0x1c4] ss:$16 sps:$4 sm:$0xff]   ;;  %v6557_v45 = vld [vmem:[%s9125_s3 + $0x1cc] ss:$16 sps:$4 sm:$0xff]  }
 0x3c2   :  { %9927 = vst [vmem:[#allocation68_spill] sm:$0xff] %v6551_v6  ;;  %9928 = vst [vmem:[#allocation69_spill] sm:$0xff] %v6557_v45 }
 0x3c4   :  { %1599 = vmatpush1.bf16.msra.mxu0 %v6539_v3  ;;  %1640 = vmatpush1.bf16.msra.mxu1 %v6545_v5  ;;  %v6563_v3 = vld [vmem:[%s9125_s3 + $0x1c0] ss:$16 sps:$4 sm:$0xff]   ;;  %v6569_v5 = vld [vmem:[%s9125_s3 + $0x1c8] ss:$16 sps:$4 sm:$0xff]  }
 0x3c5   :  { %1600 = vmatprep.subr.bf16.mxu0 %v6551_v6  ;;  %1641 = vmatprep.subr.bf16.mxu1 %v6557_v45  ;;  %9929 = vst [vmem:[#allocation70_spill] sm:$0xff] %v6563_v3  ;;  %9930 = vst [vmem:[#allocation71_spill] sm:$0xff] %v6569_v5  ;;  %v6575_v6 = vld [vmem:[%s9125_s3 + $0x1e4] ss:$16 sps:$4 sm:$0xff]   ;;  %v6581_v45 = vld [vmem:[%s9125_s3 + $0x1ec] ss:$16 sps:$4 sm:$0xff]  }
 0x3c6   :  { %9931 = vst [vmem:[#allocation72_spill] sm:$0xff] %v6575_v6  ;;  %9932 = vst [vmem:[#allocation73_spill] sm:$0xff] %v6581_v45 }
 0x3c8   :  { %1601 = vmatpush1.bf16.msra.mxu0 %v6563_v3  ;;  %1642 = vmatpush1.bf16.msra.mxu1 %v6569_v5  ;;  %v6587_v3 = vld [vmem:[%s9125_s3 + $0x1e0] ss:$16 sps:$4 sm:$0xff]   ;;  %v6593_v5 = vld [vmem:[%s9125_s3 + $0x1e8] ss:$16 sps:$4 sm:$0xff]  }
 0x3c9   :  { %1602 = vmatprep.subr.bf16.mxu0 %v6575_v6  ;;  %1643 = vmatprep.subr.bf16.mxu1 %v6581_v45  ;;  %9933 = vst [vmem:[#allocation74_spill] sm:$0xff] %v6587_v3  ;;  %9934 = vst [vmem:[#allocation75_spill] sm:$0xff] %v6593_v5 }
 0x3cc   :  { %1603 = vmatpush1.bf16.msra.mxu0 %v6587_v3  ;;  %1644 = vmatpush1.bf16.msra.mxu1 %v6593_v5 }
 0x3cd   :  { %1695 = vmatprep.subr.bf16.mxu0 %v6138_v22  ;;  %1736 = vmatprep.subr.bf16.mxu1 %v6144_v23 }
 0x442   :  { %v1375_v6 = vpop.f32.mrb[20].mxu0  ;;  %v1416_v45 = vpop.f32.mrb[20].mxu1 }
 0x443   :  { %v1376_v43 = vadd.f32 %v1375_v6, %v9858_v28  ;;  %v1377_v42 = vpop.f32.mrb[21].mxu0  ;;  %v1418_v41 = vpop.f32.mrb[21].mxu1  ;;  %v1417_v22 = vadd.f32 %v1416_v45, %v9860_v46 }
 0x444   :  { %v1378_v40 = vadd.f32 %v1377_v42, %v9859_v37  ;;  %v1379_v3 = vpop.f32.mrb[22].mxu0  ;;  %v1420_v36 = vpop.f32.mrb[22].mxu1  ;;  %v1419_v23 = vadd.f32 %v1418_v41, %v9861_v4 }
 0x445   :  { %v3906_v34 = vmul.f32 -1.442695, %v1376_v43  ;;  %v1380_v33 = vpop.f32.mrb[23].mxu0  ;;  %v1421_v25 = vpop.f32.mrb[23].mxu1  ;;  %v3908_v5 = vmul.f32 -1.442695, %v1417_v22 }
 0x446   :  { %v3907_v24 = vmul.f32 -1.442695, %v1378_v40  ;;  %v1454_v43 = vpop.permute.xlu1 %1453 }
 0x447   :  { %4366 = vpow2.f32 %v3906_v34  ;;  %v1456_v25 = vmul.f32 %v1454_v43, %v9862_v12 }
 0x448   :  { %4368 = vpow2.f32 %v3907_v24  ;;  %v1457_v24 = vmul.f32 %v1454_v43, %v9812_v57 }
 0x449   :  { %4370 = vtanh.f32 %v1419_v23  ;;  %v1460_v23 = vadd.f32 %v1456_v25, %v9863_v19 }
 0x44a   :  { %4372 = vpow2.f32 %v3908_v5 }
 0x451   :  { %v4367_v11 = vpop.eup %4366 }
 0x452   :  { %v1432_v21 = vadd.f32 1.0, %v4367_v11  ;;  %v4369_v6 = vpop.eup %4368 }
 0x453   :  { %v1433_v42 = vadd.f32 1.0, %v4369_v6  ;;  %v4371_v36 = vpop.eup %4370 }
 0x454   :  { %4374 = vrcp.f32 %v1432_v21  ;;  %v4373_v33 = vpop.eup %4372  ;;  %v1461_v21 = vadd.f32 %v1457_v24, %v9814_v63  ;;  %v1459_v24 = vmul.f32 %v1454_v43, %v5731_v53 }
 0x455   :  { %4376 = vrcp.f32 %v1433_v42  ;;  %v1434_v41 = vadd.f32 1.0, %v4373_v33 }
 0x457   :  { %4378 = vrcp.f32 %v1434_v41  ;;  %v1463_v41 = vadd.f32 %v1459_v24, %v5738_v35 }
 0x45e   :  { %v4375_v34 = vpop.eup %4374 }
 0x45f   :  { %v1443_v40 = vmul.f32 %v4375_v34, %v4371_v36  ;;  %v4377_v45 = vpop.eup %4376 }
 0x460   :  { %v1442_v22 = vmul.f32 %v4377_v45, %v6156_v39  ;;  %v1458_v39 = vmul.f32 %v1454_v43, %v9815_v49 }
 0x462   :  { %v1498_v11 = vpop.f32.mrb[24].mxu0  ;;  %v1539_v3 = vpop.f32.mrb[24].mxu1  ;;  %v6607_v5 = vadd.f32 %v1443_v40, %v1442_v22  ;;  %v1462_v40 = vadd.f32 %v1458_v39, %v5734_v1 }
 0x463   :  { %v1499_v6 = vadd.f32 %v1498_v11, %v1460_v23  ;;  %v1500_v42 = vpop.f32.mrb[25].mxu0  ;;  %v1541_v4 = vpop.f32.mrb[25].mxu1 }
 0x464   :  { %v1501_v12 = vadd.f32 %v1500_v42, %v1461_v21  ;;  %v1502_v46 = vpop.f32.mrb[26].mxu0  ;;  %v1543_v57 = vpop.f32.mrb[26].mxu1  ;;  %4380 = vtanh.f32 %v6607_v5  ;;  %v1540_v45 = vadd.f32 %v1539_v3, %v1462_v40 }
 0x465   :  { %v3911_v36 = vmul.f32 -1.442695, %v1499_v6  ;;  %v1503_v33 = vpop.f32.mrb[27].mxu0  ;;  %v1544_v25 = vpop.f32.mrb[27].mxu1  ;;  %v1542_v46 = vadd.f32 %v1541_v4, %v1463_v41 }
 0x466   :  { %v3912_v34 = vmul.f32 -1.442695, %v1501_v12  ;;  %v4379_v22 = vpop.eup %4378  ;;  %v3913_v23 = vmul.f32 -1.442695, %v1540_v45 }
 0x467   :  { %4382 = vpow2.f32 %v3911_v36 }
 0x468   :  { %4384 = vpow2.f32 %v3912_v34 }
 0x469   :  { %4386 = vtanh.f32 %v1542_v46  ;;  %v9964_v46 = vld [vmem:[#allocation44_spill] sm:$0xff] }
 0x46a   :  { %4388 = vpow2.f32 %v3913_v23  ;;  %v9966_v23 = vld [vmem:[#allocation46_spill] sm:$0xff] }
 0x46e   :  { %v4381_v57 = vpop.eup %4380 }
 0x46f   :  { %v1446_v11 = vmul.f32 %v4381_v57, %v4379_v22  ;;  %v9965_v57 = vld [vmem:[#allocation45_spill] sm:$0xff] }
 0x471   :  { %v4383_v21 = vpop.eup %4382  ;;  %3909 = vst [vmem:[%s9129_s8 + $0x10] sm:$0xff] %v1446_v11  ;;  %v1571_v12 = vpack.c.bf16 %v1446_v11, %v1446_v11  ;;  %v9967_v11 = vld [vmem:[#allocation47_spill] sm:$0xff] }
 0x472   :  { %v1555_v6 = vadd.f32 1.0, %v4383_v21  ;;  %v4385_v43 = vpop.eup %4384  ;;  %v9968_v21 = vld [vmem:[#allocation48_spill] sm:$0xff] }
 0x473   :  { %v1556_v42 = vadd.f32 1.0, %v4385_v43  ;;  %1604 = vmatprep.mubr.bf16.mxu0 %v1571_v12  ;;  %1645 = vmatprep.mubr.bf16.mxu1 %v1571_v12  ;;  %v4387_v3 = vpop.eup %4386  ;;  %v9970_v12 = vld [vmem:[#allocation50_spill] sm:$0xff]  ;;  %v9971_v43 = vld [vmem:[#allocation51_spill] sm:$0xff] }
 0x474   :  { %4390 = vrcp.f32 %v1555_v6  ;;  %v4389_v4 = vpop.eup %4388  ;;  %v9969_v6 = vld [vmem:[#allocation49_spill] sm:$0xff] }
 0x475   :  { %4392 = vrcp.f32 %v1556_v42  ;;  %v1557_v25 = vadd.f32 1.0, %v4389_v4  ;;  %v9972_v42 = vld [vmem:[#allocation52_spill] sm:$0xff]  ;;  %v9974_v4 = vld [vmem:[#allocation54_spill] sm:$0xff] }
 0x477   :  { %4394 = vrcp.f32 %v1557_v25  ;;  %v9978_v25 = vld [vmem:[#allocation63_spill] sm:$0xff] }
 0x47e   :  { %v4391_v36 = vpop.eup %4390 }
 0x47f   :  { %v1566_v39 = vmul.f32 %v4391_v36, %v4387_v3  ;;  %v4393_v33 = vpop.eup %4392  ;;  %v9973_v3 = vld [vmem:[#allocation53_spill] sm:$0xff]  ;;  %v9975_v36 = vld [vmem:[#allocation55_spill] sm:$0xff] }
 0x480   :  { %v1565_v34 = vmul.f32 %v4393_v33, %v6167_v44  ;;  %v9954_v44 = vld [vmem:[#allocation34_spill] sm:$0xff]  ;;  %v9977_v33 = vld [vmem:[#allocation57_spill] sm:$0xff] }
 0x481   :  { %v4395_v40 = vpop.eup %4394 }
 0x482   :  { %v6618_v24 = vadd.f32 %v1566_v39, %v1565_v34  ;;  %v9976_v39 = vld [vmem:[#allocation56_spill] sm:$0xff] }
 0x483   :  { %v9979_v34 = vld [vmem:[#allocation8_spill] sm:$0xff] }
 0x484   :  { %4396 = vtanh.f32 %v6618_v24 }
 0x48e   :  { %v4397_v45 = vpop.eup %4396 }
 0x48f   :  { %v1569_v41 = vmul.f32 %v4397_v45, %v4395_v40  ;;  %v9980_v40 = vld [vmem:[#allocation9_spill] sm:$0xff]  ;;  %v9981_v45 = vld [vmem:[#allocation10_spill] sm:$0xff] }
 0x491   :  { %v1570_v22 = vpack.c.bf16 %v1569_v41, %v1569_v41  ;;  %v9982_v41 = vld [vmem:[#allocation11_spill] sm:$0xff] }
 0x493   :  { %1605 = vmatmul.mubr.bf16.vlgmr.msra.gmra.mrb[28].mxu0 %v1570_v22  ;;  %1646 = vmatmul.mubr.bf16.vlgmr.msra.gmra.mrb[28].mxu1 %v1570_v22 }
 0x494   :  { %1696 = vmatpush1.bf16.msra.mxu0 %v5900_v26  ;;  %1737 = vmatpush1.bf16.msra.mxu1 %v5906_v58  ;;  %v9935_v26 = vld [vmem:[#allocation19_spill] sm:$0xff]  ;;  %v9936_v58 = vld [vmem:[#allocation20_spill] sm:$0xff] }
 0x495   :  { %1697 = vmatprep.subr.bf16.mxu0 %v5912_v59  ;;  %1738 = vmatprep.subr.bf16.mxu1 %v5918_v38  ;;  %v9937_v59 = vld [vmem:[#allocation21_spill] sm:$0xff]  ;;  %v9938_v38 = vld [vmem:[#allocation22_spill] sm:$0xff] }
 0x496   :  { %1727 = vmatprep.mubr.bf16.mxu0 %v9747_v29  ;;  %1768 = vmatprep.mubr.bf16.mxu1 %v9747_v29 }
 0x498   :  { %1698 = vmatpush1.bf16.msra.mxu0 %v5926_v60  ;;  %1739 = vmatpush1.bf16.msra.mxu1 %v5932_v61  ;;  %v9939_v60 = vld [vmem:[#allocation23_spill] sm:$0xff]  ;;  %v9940_v61 = vld [vmem:[#allocation24_spill] sm:$0xff] }
 0x499   :  { %1699 = vmatprep.subr.bf16.mxu0 %v5938_v55  ;;  %1740 = vmatprep.subr.bf16.mxu1 %v5944_v27  ;;  %v9941_v55 = vld [vmem:[#allocation25_spill] sm:$0xff]  ;;  %v9942_v27 = vld [vmem:[#allocation26_spill] sm:$0xff] }
 0x49c   :  { %1700 = vmatpush1.bf16.msra.mxu0 %v5950_v56  ;;  %1741 = vmatpush1.bf16.msra.mxu1 %v5956_v62  ;;  %v9943_v56 = vld [vmem:[#allocation2_spill] sm:$0xff]  ;;  %v9944_v62 = vld [vmem:[#allocation3_spill] sm:$0xff] }
 0x49d   :  { %1701 = vmatprep.subr.bf16.mxu0 %v5962_v30  ;;  %1742 = vmatprep.subr.bf16.mxu1 %v5968_v54  ;;  %v9945_v30 = vld [vmem:[#allocation64_spill] sm:$0xff]  ;;  %v9946_v54 = vld [vmem:[#allocation66_spill] sm:$0xff] }
 0x4a0   :  { %1702 = vmatpush1.bf16.msra.mxu0 %v5974_v32  ;;  %1743 = vmatpush1.bf16.msra.mxu1 %v5980_v52  ;;  %v9947_v32 = vld [vmem:[#allocation27_spill] sm:$0xff]  ;;  %v9948_v52 = vld [vmem:[#allocation28_spill] sm:$0xff] }
 0x4a1   :  { %1703 = vmatprep.subr.bf16.mxu0 %v5986_v2  ;;  %1744 = vmatprep.subr.bf16.mxu1 %v9864_v0  ;;  %v9949_v2 = vld [vmem:[#allocation29_spill] sm:$0xff]  ;;  %v9955_v0 = vld [vmem:[#allocation35_spill] sm:$0xff] }
 0x4a4   :  { %1704 = vmatpush1.bf16.msra.mxu0 %v9865_v7  ;;  %1745 = vmatpush1.bf16.msra.mxu1 %v9866_v8  ;;  %v9956_v7 = vld [vmem:[#allocation36_spill] sm:$0xff]  ;;  %v9957_v8 = vld [vmem:[#allocation37_spill] sm:$0xff] }
 0x4a5   :  { %1705 = vmatprep.subr.bf16.mxu0 %v9867_v48  ;;  %1746 = vmatprep.subr.bf16.mxu1 %v9868_v9  ;;  %v9958_v48 = vld [vmem:[#allocation38_spill] sm:$0xff]  ;;  %v9959_v9 = vld [vmem:[#allocation39_spill] sm:$0xff] }
 0x4a8   :  { %1706 = vmatpush1.bf16.msra.mxu0 %v9869_v10  ;;  %1747 = vmatpush1.bf16.msra.mxu1 %v9870_v13  ;;  %v9960_v10 = vld [vmem:[#allocation40_spill] sm:$0xff]  ;;  %v9961_v13 = vld [vmem:[#allocation41_spill] sm:$0xff] }
 0x4a9   :  { %1707 = vmatprep.subr.bf16.mxu0 %v9871_v14  ;;  %1748 = vmatprep.subr.bf16.mxu1 %v9872_v15  ;;  %v9962_v14 = vld [vmem:[#allocation42_spill] sm:$0xff]  ;;  %v9963_v15 = vld [vmem:[#allocation43_spill] sm:$0xff] }
 0x4ac   :  { %1708 = vmatpush1.bf16.msra.mxu0 %v6046_v47  ;;  %1749 = vmatpush1.bf16.msra.mxu1 %v6052_v50  ;;  %v9951_v47 = vld [vmem:[#allocation31_spill] sm:$0xff]  ;;  %v9952_v50 = vld [vmem:[#allocation32_spill] sm:$0xff] }
 0x4ad   :  { %1709 = vmatprep.subr.bf16.mxu0 %v6058_v31  ;;  %1750 = vmatprep.subr.bf16.mxu1 %v6064_v51  ;;  %v9950_v51 = vld [vmem:[#allocation30_spill] sm:$0xff]  ;;  %v9953_v31 = vld [vmem:[#allocation33_spill] sm:$0xff] }
 0x4b0   :  { %1710 = vmatpush1.bf16.msra.mxu0 %v6203_v16  ;;  %1751 = vmatpush1.bf16.msra.mxu1 %v6209_v17 }
 0x4b1   :  { %1803 = vmatprep.subr.bf16.mxu0 %v6215_v18  ;;  %1844 = vmatprep.subr.bf16.mxu1 %v6221_v20 }
 0x4b3   :  { %1728 = vmatmul.mubr.bf16.vlgmr.msra.gmra.mrb[32].mxu0 %v1570_v22  ;;  %1769 = vmatmul.mubr.bf16.vlgmr.msra.gmra.mrb[32].mxu1 %v1570_v22  ;;  %v9983_v22 = vld [vmem:[#allocation12_spill] sm:$0xff] }
 0x4b4   :  { %1804 = vmatpush1.bf16.msra.mxu0 %v9935_v26  ;;  %1845 = vmatpush1.bf16.msra.mxu1 %v9936_v58 }
 0x4b5   :  { %1805 = vmatprep.subr.bf16.mxu0 %v9937_v59  ;;  %1846 = vmatprep.subr.bf16.mxu1 %v9938_v38 }
 0x4b8   :  { %1806 = vmatpush1.bf16.msra.mxu0 %v9939_v60  ;;  %1847 = vmatpush1.bf16.msra.mxu1 %v9940_v61 }
 0x4b9   :  { %1807 = vmatprep.subr.bf16.mxu0 %v9941_v55  ;;  %1848 = vmatprep.subr.bf16.mxu1 %v9942_v27 }
 0x4bc   :  { %1808 = vmatpush1.bf16.msra.mxu0 %v9943_v56  ;;  %1849 = vmatpush1.bf16.msra.mxu1 %v9944_v62 }
 0x4bd   :  { %1809 = vmatprep.subr.bf16.mxu0 %v9945_v30  ;;  %1850 = vmatprep.subr.bf16.mxu1 %v9946_v54 }
 0x4c0   :  { %1810 = vmatpush1.bf16.msra.mxu0 %v9947_v32  ;;  %1851 = vmatpush1.bf16.msra.mxu1 %v9948_v52 }
 0x4c1   :  { %1811 = vmatprep.subr.bf16.mxu0 %v9949_v2  ;;  %1852 = vmatprep.subr.bf16.mxu1 %v9950_v51 }
 0x4c4   :  { %1812 = vmatpush1.bf16.msra.mxu0 %v9951_v47  ;;  %1853 = vmatpush1.bf16.msra.mxu1 %v9952_v50 }
 0x4c5   :  { %1813 = vmatprep.subr.bf16.mxu0 %v9953_v31  ;;  %1854 = vmatprep.subr.bf16.mxu1 %v9954_v44 }
 0x4c8   :  { %1814 = vmatpush1.bf16.msra.mxu0 %v9955_v0  ;;  %1855 = vmatpush1.bf16.msra.mxu1 %v9956_v7 }
 0x4c9   :  { %1815 = vmatprep.subr.bf16.mxu0 %v9957_v8  ;;  %1856 = vmatprep.subr.bf16.mxu1 %v9958_v48 }
 0x4cc   :  { %1816 = vmatpush1.bf16.msra.mxu0 %v9959_v9  ;;  %1857 = vmatpush1.bf16.msra.mxu1 %v9960_v10 }
 0x4cd   :  { %1817 = vmatprep.subr.bf16.mxu0 %v9961_v13  ;;  %1858 = vmatprep.subr.bf16.mxu1 %v9962_v14 }
 0x4d0   :  { %1818 = vmatpush1.bf16.msra.mxu0 %v9963_v15  ;;  %1859 = vmatpush1.bf16.msra.mxu1 %v9964_v46 }
 0x4d1   :  { %1819 = vmatprep.subr.bf16.mxu0 %v9965_v57  ;;  %1860 = vmatprep.subr.bf16.mxu1 %v9966_v23 }
 0x4d4   :  { %1820 = vmatpush1.bf16.msra.mxu0 %v9967_v11  ;;  %1861 = vmatpush1.bf16.msra.mxu1 %v9968_v21  ;;  %v10000_v21 = vld [vmem:[#allocation7_spill] sm:$0xff] }
 0x4d5   :  { %1821 = vmatprep.subr.bf16.mxu0 %v9969_v6  ;;  %1862 = vmatprep.subr.bf16.mxu1 %v9970_v12 }
 0x4d8   :  { %1822 = vmatpush1.bf16.msra.mxu0 %v9971_v43  ;;  %1863 = vmatpush1.bf16.msra.mxu1 %v9972_v42 }
 0x4d9   :  { %1823 = vmatprep.subr.bf16.mxu0 %v9973_v3  ;;  %1864 = vmatprep.subr.bf16.mxu1 %v9974_v4  ;;  %v9984_v3 = vld [vmem:[#allocation13_spill] sm:$0xff]  ;;  %v9985_v4 = vld [vmem:[#allocation14_spill] sm:$0xff] }
 0x4dc   :  { %1824 = vmatpush1.bf16.msra.mxu0 %v9975_v36  ;;  %1865 = vmatpush1.bf16.msra.mxu1 %v9976_v39  ;;  %v9986_v36 = vld [vmem:[#allocation15_spill] sm:$0xff]  ;;  %v9987_v39 = vld [vmem:[#allocation16_spill] sm:$0xff] }
 0x4dd   :  { %1825 = vmatprep.subr.bf16.mxu0 %v9977_v33  ;;  %1866 = vmatprep.subr.bf16.mxu1 %v9978_v25  ;;  %v9988_v33 = vld [vmem:[#allocation67_spill] sm:$0xff]  ;;  %v9989_v25 = vld [vmem:[#allocation68_spill] sm:$0xff] }
 0x4e0   :  { %1826 = vmatpush1.bf16.msra.mxu0 %v9979_v34  ;;  %1867 = vmatpush1.bf16.msra.mxu1 %v9980_v40  ;;  %v9990_v34 = vld [vmem:[#allocation69_spill] sm:$0xff]  ;;  %v9991_v40 = vld [vmem:[#allocation70_spill] sm:$0xff] }
 0x4e1   :  { %1827 = vmatprep.subr.bf16.mxu0 %v9981_v45  ;;  %1868 = vmatprep.subr.bf16.mxu1 %v9982_v41  ;;  %v9992_v45 = vld [vmem:[#allocation71_spill] sm:$0xff]  ;;  %v9993_v41 = vld [vmem:[#allocation72_spill] sm:$0xff] }
 0x4e4   :  { %1828 = vmatpush1.bf16.msra.mxu0 %v9983_v22  ;;  %1869 = vmatpush1.bf16.msra.mxu1 %v9984_v3  ;;  %v9994_v22 = vld [vmem:[#allocation73_spill] sm:$0xff]  ;;  %v9995_v3 = vld [vmem:[#allocation74_spill] sm:$0xff] }
 0x4e5   :  { %1829 = vmatprep.subr.bf16.mxu0 %v9985_v4  ;;  %1870 = vmatprep.subr.bf16.mxu1 %v9986_v36  ;;  %v9996_v4 = vld [vmem:[#allocation75_spill] sm:$0xff]  ;;  %v9997_v36 = vld [vmem:[#allocation17_spill] sm:$0xff] }
 0x4e8   :  { %1830 = vmatpush1.bf16.msra.mxu0 %v9987_v39  ;;  %1871 = vmatpush1.bf16.msra.mxu1 %v9988_v33  ;;  %v9998_v39 = vld [vmem:[#allocation18_spill] sm:$0xff] }
 0x4e9   :  { %1831 = vmatprep.subr.bf16.mxu0 %v9989_v25  ;;  %1872 = vmatprep.subr.bf16.mxu1 %v9990_v34 }
 0x4ec   :  { %1832 = vmatpush1.bf16.msra.mxu0 %v9991_v40  ;;  %1873 = vmatpush1.bf16.msra.mxu1 %v9992_v45 }
 0x4ed   :  { %1833 = vmatprep.subr.bf16.mxu0 %v9993_v41  ;;  %1874 = vmatprep.subr.bf16.mxu1 %v9994_v22 }
 0x4f0   :  { %1834 = vmatpush1.bf16.msra.mxu0 %v9995_v3  ;;  %1875 = vmatpush1.bf16.msra.mxu1 %v9996_v4  ;;  %v9999_v4 = vld [vmem:[#allocation6_spill] sm:$0xff] }
 0x4f1   :  { %1926 = vmatprep.subr.bf16.mxu0 %v9997_v36  ;;  %1967 = vmatprep.subr.bf16.mxu1 %v9998_v39 }
 0x566   :  { %v1606_v33 = vpop.f32.mrb[28].mxu0  ;;  %v1647_v25 = vpop.f32.mrb[28].mxu1 }
 0x567   :  { %v1607_v34 = vadd.f32 %v1606_v33, %v9858_v28  ;;  %v1608_v42 = vpop.f32.mrb[29].mxu0  ;;  %v1649_v40 = vpop.f32.mrb[29].mxu1  ;;  %v1648_v36 = vadd.f32 %v1647_v25, %v9999_v4 }
 0x568   :  { %v1609_v45 = vadd.f32 %v1608_v42, %v9859_v37  ;;  %v1610_v43 = vpop.f32.mrb[30].mxu0  ;;  %v1651_v41 = vpop.f32.mrb[30].mxu1  ;;  %v1650_v39 = vadd.f32 %v1649_v40, %v10000_v21 }
 0x569   :  { %v3914_v12 = vmul.f32 -1.442695, %v1607_v34  ;;  %v1611_v22 = vpop.f32.mrb[31].mxu0  ;;  %v1652_v6 = vpop.f32.mrb[31].mxu1  ;;  %v3916_v11 = vmul.f32 -1.442695, %v1648_v36 }
 0x56a   :  { %v3915_v3 = vmul.f32 -1.442695, %v1609_v45  ;;  %v1685_v34 = vpop.permute.xlu0 %1684  ;;  %v10001_v6 = vld [vmem:[#allocation60_spill] sm:$0xff] }
 0x56b   :  { %4398 = vpow2.f32 %v3914_v12  ;;  %v1687_v45 = vmul.f32 %v1685_v34, %v10001_v6 }
 0x56c   :  { %4400 = vpow2.f32 %v3915_v3  ;;  %v10002_v3 = vld [vmem:[#allocation61_spill] sm:$0xff] }
 0x56d   :  { %4402 = vtanh.f32 %v1650_v39  ;;  %v1688_v22 = vmul.f32 %v1685_v34, %v10002_v3 }
 0x56e   :  { %4404 = vpow2.f32 %v3916_v11 }
 0x575   :  { %v4399_v23 = vpop.eup %4398 }
 0x576   :  { %v1663_v57 = vadd.f32 1.0, %v4399_v23  ;;  %v4401_v33 = vpop.eup %4400  ;;  %v1691_v23 = vadd.f32 %v1687_v45, %v9863_v19 }
 0x577   :  { %v1664_v42 = vadd.f32 1.0, %v4401_v33  ;;  %v4403_v43 = vpop.eup %4402 }
 0x578   :  { %4406 = vrcp.f32 %v1663_v57  ;;  %v4405_v41 = vpop.eup %4404  ;;  %v1692_v57 = vadd.f32 %v1688_v22, %v9814_v63 }
 0x579   :  { %4408 = vrcp.f32 %v1664_v42  ;;  %v1665_v40 = vadd.f32 1.0, %v4405_v41 }
 0x57b   :  { %4410 = vrcp.f32 %v1665_v40 }
 0x582   :  { %v4407_v12 = vpop.eup %4406 }
 0x583   :  { %v1674_v25 = vmul.f32 %v4407_v12, %v4403_v43  ;;  %v4409_v4 = vpop.eup %4408  ;;  %v1690_v12 = vmul.f32 %v1685_v34, %v5731_v53 }
 0x584   :  { %v1673_v36 = vmul.f32 %v4409_v4, %v6607_v5  ;;  %v1689_v5 = vmul.f32 %v1685_v34, %v9815_v49 }
 0x585   :  { %v1694_v40 = vadd.f32 %v1690_v12, %v5738_v35 }
 0x586   :  { %v1729_v39 = vpop.f32.mrb[32].mxu0  ;;  %v1770_v11 = vpop.f32.mrb[32].mxu1  ;;  %v6728_v33 = vadd.f32 %v1674_v25, %v1673_v36  ;;  %v1693_v22 = vadd.f32 %v1689_v5, %v5734_v1 }
 0x587   :  { %v1730_v42 = vadd.f32 %v1729_v39, %v1691_v23  ;;  %v1731_v21 = vpop.f32.mrb[33].mxu0  ;;  %v1772_v37 = vpop.f32.mrb[33].mxu1 }
 0x588   :  { %v1732_v6 = vadd.f32 %v1731_v21, %v1692_v57  ;;  %v1733_v28 = vpop.f32.mrb[34].mxu0  ;;  %v1774_v3 = vpop.f32.mrb[34].mxu1  ;;  %4412 = vtanh.f32 %v6728_v33  ;;  %v1771_v25 = vadd.f32 %v1770_v11, %v1693_v22 }
 0x589   :  { %v3919_v43 = vmul.f32 -1.442695, %v1730_v42  ;;  %v1734_v4 = vpop.f32.mrb[35].mxu0  ;;  %v1775_v41 = vpop.f32.mrb[35].mxu1  ;;  %v1773_v28 = vadd.f32 %v1772_v37, %v1694_v40 }
 0x58a   :  { %v3920_v45 = vmul.f32 -1.442695, %v1732_v6  ;;  %v4411_v21 = vpop.eup %4410  ;;  %v3921_v36 = vmul.f32 -1.442695, %v1771_v25 }
 0x58b   :  { %4414 = vpow2.f32 %v3919_v43 }
 0x58c   :  { %4416 = vpow2.f32 %v3920_v45 }
 0x58d   :  { %4418 = vtanh.f32 %v1773_v28  ;;  %v6749_v28 = vld [vmem:[%s9123_s1] ss:$16 sps:$4 sm:$0xff]  }
 0x58e   :  { %4420 = vpow2.f32 %v3921_v36  ;;  %v6767_v36 = vld [vmem:[%s9123_s1 + $0x2c] ss:$16 sps:$4 sm:$0xff]  }
 0x592   :  { %v4413_v3 = vpop.eup %4412 }
 0x593   :  { %v1677_v23 = vmul.f32 %v4413_v3, %v4411_v21  ;;  %v6761_v3 = vld [vmem:[%s9123_s1 + $0x24] ss:$16 sps:$4 sm:$0xff]  }
 0x595   :  { %v4415_v39 = vpop.eup %4414  ;;  %3917 = vst [vmem:[%s9129_s8 + $0x18] sm:$0xff] %v1677_v23  ;;  %v1802_v6 = vpack.c.bf16 %v1677_v23, %v1677_v23  ;;  %v6775_v23 = vld [vmem:[%s9123_s1 + $0x20] ss:$16 sps:$4 sm:$0xff]  }
 0x596   :  { %v1786_v57 = vadd.f32 1.0, %v4415_v39  ;;  %v4417_v34 = vpop.eup %4416  ;;  %v6781_v39 = vld [vmem:[%s9123_s1 + $0x28] ss:$16 sps:$4 sm:$0xff]  }
 0x597   :  { %v1787_v42 = vadd.f32 1.0, %v4417_v34  ;;  %1835 = vmatprep.mubr.bf16.mxu0 %v1802_v6  ;;  %1876 = vmatprep.mubr.bf16.mxu1 %v1802_v6  ;;  %v4419_v11 = vpop.eup %4418  ;;  %v6793_v6 = vld [vmem:[%s9123_s1 + $0x4c] ss:$16 sps:$4 sm:$0xff]   ;;  %v6799_v34 = vld [vmem:[%s9123_s1 + $0x40] ss:$16 sps:$4 sm:$0xff]  }
 0x598   :  { %4422 = vrcp.f32 %v1786_v57  ;;  %v4421_v37 = vpop.eup %4420  ;;  %v6787_v57 = vld [vmem:[%s9123_s1 + $0x44] ss:$16 sps:$4 sm:$0xff]  }
 0x599   :  { %4424 = vrcp.f32 %v1787_v42  ;;  %v1788_v41 = vadd.f32 1.0, %v4421_v37  ;;  %v6805_v42 = vld [vmem:[%s9123_s1 + $0x48] ss:$16 sps:$4 sm:$0xff]   ;;  %v6817_v37 = vld [vmem:[%s9123_s1 + $0x6c] ss:$16 sps:$4 sm:$0xff]  }
 0x59b   :  { %4426 = vrcp.f32 %v1788_v41  ;;  %v6841_v41 = vld [vmem:[%s9123_s1 + $0x8c] ss:$16 sps:$4 sm:$0xff]  }
 0x5a2   :  { %v4423_v43 = vpop.eup %4422 }
 0x5a3   :  { %v1797_v5 = vmul.f32 %v4423_v43, %v4419_v11  ;;  %v4425_v4 = vpop.eup %4424  ;;  %v6811_v11 = vld [vmem:[%s9123_s1 + $0x64] ss:$16 sps:$4 sm:$0xff]   ;;  %v6823_v43 = vld [vmem:[%s9123_s1 + $0x60] ss:$16 sps:$4 sm:$0xff]  }
 0x5a4   :  { %v1796_v45 = vmul.f32 %v4425_v4, %v6618_v24  ;;  %v6755_v24 = vld [vmem:[%s9123_s1 + $0x8] ss:$16 sps:$4 sm:$0xff]   ;;  %v6835_v4 = vld [vmem:[%s9123_s1 + $0x84] ss:$16 sps:$4 sm:$0xff]  }
 0x5a5   :  { %v4427_v22 = vpop.eup %4426 }
 0x5a6   :  { %v6739_v12 = vadd.f32 %v1797_v5, %v1796_v45  ;;  %v6829_v5 = vld [vmem:[%s9123_s1 + $0x68] ss:$16 sps:$4 sm:$0xff]   ;;  %v6847_v45 = vld [vmem:[%s9123_s1 + $0x80] ss:$16 sps:$4 sm:$0xff]  }
 0x5a7   :  { %10003 = vst [vmem:[#allocation19_spill] sm:$0xff] %v6847_v45 }
 0x5a8   :  { %4428 = vtanh.f32 %v6739_v12 }
 0x5b2   :  { %v4429_v25 = vpop.eup %4428 }
 0x5b3   :  { %v1800_v40 = vmul.f32 %v4429_v25, %v4427_v22  ;;  %v6853_v22 = vld [vmem:[%s9123_s1 + $0x88] ss:$16 sps:$4 sm:$0xff]   ;;  %v6859_v25 = vld [vmem:[%s9123_s1 + $0xa4] ss:$16 sps:$4 sm:$0xff]  }
 0x5b4   :  { %10004 = vst [vmem:[#allocation20_spill] sm:$0xff] %v6853_v22  ;;  %10005 = vst [vmem:[#allocation21_spill] sm:$0xff] %v6859_v25 }
 0x5b5   :  { %v6742_v21 = vpack.c.bf16 %v1800_v40, %v1800_v40  ;;  %v6865_v40 = vld [vmem:[%s9123_s1 + $0xac] ss:$16 sps:$4 sm:$0xff]  }
 0x5b6   :  { %10006 = vst [vmem:[#allocation22_spill] sm:$0xff] %v6865_v40 }
 0x5b7   :  { %1836 = vmatmul.mubr.bf16.vlgmr.msra.gmra.mrb[36].mxu0 %v6742_v21  ;;  %1877 = vmatmul.mubr.bf16.vlgmr.msra.gmra.mrb[36].mxu1 %v6742_v21 }
 0x5b8   :  { %1927 = vmatpush1.bf16.msra.mxu0 %v6749_v28  ;;  %1968 = vmatpush1.bf16.msra.mxu1 %v6755_v24 }
 0x5b9   :  { %1928 = vmatprep.subr.bf16.mxu0 %v6761_v3  ;;  %1969 = vmatprep.subr.bf16.mxu1 %v6767_v36 }
 0x5ba   :  { %1958 = vmatprep.mubr.bf16.mxu0 %v9747_v29  ;;  %1999 = vmatprep.mubr.bf16.mxu1 %v9747_v29 }
 0x5bc   :  { %1929 = vmatpush1.bf16.msra.mxu0 %v6775_v23  ;;  %1970 = vmatpush1.bf16.msra.mxu1 %v6781_v39 }
 0x5bd   :  { %1930 = vmatprep.subr.bf16.mxu0 %v6787_v57  ;;  %1971 = vmatprep.subr.bf16.mxu1 %v6793_v6 }
 0x5c0   :  { %1931 = vmatpush1.bf16.msra.mxu0 %v6799_v34  ;;  %1972 = vmatpush1.bf16.msra.mxu1 %v6805_v42 }
 0x5c1   :  { %1932 = vmatprep.subr.bf16.mxu0 %v6811_v11  ;;  %1973 = vmatprep.subr.bf16.mxu1 %v6817_v37 }
 0x5c4   :  { %1933 = vmatpush1.bf16.msra.mxu0 %v6823_v43  ;;  %1974 = vmatpush1.bf16.msra.mxu1 %v6829_v5 }
 0x5c5   :  { %1934 = vmatprep.subr.bf16.mxu0 %v6835_v4  ;;  %1975 = vmatprep.subr.bf16.mxu1 %v6841_v41 }
 0x5c8   :  { %1935 = vmatpush1.bf16.msra.mxu0 %v6847_v45  ;;  %1976 = vmatpush1.bf16.msra.mxu1 %v6853_v22  ;;  %v6871_v45 = vld [vmem:[%s9123_s1 + $0xa0] ss:$16 sps:$4 sm:$0xff]   ;;  %v6877_v22 = vld [vmem:[%s9123_s1 + $0xa8] ss:$16 sps:$4 sm:$0xff]  }
 0x5c9   :  { %1936 = vmatprep.subr.bf16.mxu0 %v6859_v25  ;;  %1977 = vmatprep.subr.bf16.mxu1 %v6865_v40  ;;  %10007 = vst [vmem:[#allocation23_spill] sm:$0xff] %v6871_v45  ;;  %10008 = vst [vmem:[#allocation24_spill] sm:$0xff] %v6877_v22  ;;  %v6883_v25 = vld [vmem:[%s9123_s1 + $0xc4] ss:$16 sps:$4 sm:$0xff]   ;;  %v6889_v40 = vld [vmem:[%s9123_s1 + $0xcc] ss:$16 sps:$4 sm:$0xff]  }
 0x5ca   :  { %10009 = vst [vmem:[#allocation25_spill] sm:$0xff] %v6883_v25  ;;  %10010 = vst [vmem:[#allocation26_spill] sm:$0xff] %v6889_v40 }
 0x5cc   :  { %1937 = vmatpush1.bf16.msra.mxu0 %v6871_v45  ;;  %1978 = vmatpush1.bf16.msra.mxu1 %v6877_v22  ;;  %v6895_v45 = vld [vmem:[%s9123_s1 + $0xc0] ss:$16 sps:$4 sm:$0xff]   ;;  %v6901_v22 = vld [vmem:[%s9123_s1 + $0xc8] ss:$16 sps:$4 sm:$0xff]  }
 0x5cd   :  { %1938 = vmatprep.subr.bf16.mxu0 %v6883_v25  ;;  %1979 = vmatprep.subr.bf16.mxu1 %v6889_v40  ;;  %v6907_v25 = vld [vmem:[%s9123_s1 + $0xe4] ss:$16 sps:$4 sm:$0xff]   ;;  %v6913_v40 = vld [vmem:[%s9123_s1 + $0xec] ss:$16 sps:$4 sm:$0xff]  }
 0x5d0   :  { %1939 = vmatpush1.bf16.msra.mxu0 %v6895_v45  ;;  %1980 = vmatpush1.bf16.msra.mxu1 %v6901_v22 }
 0x5d1   :  { %1940 = vmatprep.subr.bf16.mxu0 %v6907_v25  ;;  %1981 = vmatprep.subr.bf16.mxu1 %v6913_v40 }
 0x5d4   :  { %1941 = vmatpush1.bf16.msra.mxu0 %v6203_v16  ;;  %1982 = vmatpush1.bf16.msra.mxu1 %v6209_v17  ;;  %v10011_v16 = vld [vmem:[#allocation45_spill] sm:$0xff]  ;;  %v10012_v17 = vld [vmem:[#allocation46_spill] sm:$0xff] }
 0x5d5   :  { %2034 = vmatprep.subr.bf16.mxu0 %v6215_v18  ;;  %2075 = vmatprep.subr.bf16.mxu1 %v6221_v20  ;;  %v10013_v18 = vld [vmem:[#allocation47_spill] sm:$0xff]  ;;  %v10014_v20 = vld [vmem:[#allocation48_spill] sm:$0xff] }
 0x5d7   :  { %1959 = vmatmul.mubr.bf16.vlgmr.msra.gmra.mrb[40].mxu0 %v6742_v21  ;;  %2000 = vmatmul.mubr.bf16.vlgmr.msra.gmra.mrb[40].mxu1 %v6742_v21 }
 0x5d8   :  { %2035 = vmatpush1.bf16.msra.mxu0 %v9935_v26  ;;  %2076 = vmatpush1.bf16.msra.mxu1 %v9936_v58  ;;  %v10015_v26 = vld [vmem:[#allocation49_spill] sm:$0xff]  ;;  %v10016_v58 = vld [vmem:[#allocation50_spill] sm:$0xff] }
 0x5d9   :  { %2036 = vmatprep.subr.bf16.mxu0 %v9937_v59  ;;  %2077 = vmatprep.subr.bf16.mxu1 %v9938_v38  ;;  %v10017_v59 = vld [vmem:[#allocation51_spill] sm:$0xff]  ;;  %v10018_v38 = vld [vmem:[#allocation52_spill] sm:$0xff] }
 0x5dc   :  { %2037 = vmatpush1.bf16.msra.mxu0 %v9939_v60  ;;  %2078 = vmatpush1.bf16.msra.mxu1 %v9940_v61  ;;  %v10019_v60 = vld [vmem:[#allocation53_spill] sm:$0xff]  ;;  %v10020_v61 = vld [vmem:[#allocation54_spill] sm:$0xff] }
 0x5dd   :  { %2038 = vmatprep.subr.bf16.mxu0 %v9941_v55  ;;  %2079 = vmatprep.subr.bf16.mxu1 %v9942_v27  ;;  %v10021_v55 = vld [vmem:[#allocation55_spill] sm:$0xff]  ;;  %v10022_v27 = vld [vmem:[#allocation56_spill] sm:$0xff] }
 0x5e0   :  { %2039 = vmatpush1.bf16.msra.mxu0 %v9943_v56  ;;  %2080 = vmatpush1.bf16.msra.mxu1 %v9944_v62  ;;  %v10023_v56 = vld [vmem:[#allocation57_spill] sm:$0xff]  ;;  %v10024_v62 = vld [vmem:[#allocation63_spill] sm:$0xff] }
 0x5e1   :  { %2040 = vmatprep.subr.bf16.mxu0 %v9945_v30  ;;  %2081 = vmatprep.subr.bf16.mxu1 %v9946_v54  ;;  %v10025_v30 = vld [vmem:[#allocation8_spill] sm:$0xff]  ;;  %v10026_v54 = vld [vmem:[#allocation9_spill] sm:$0xff] }
 0x5e4   :  { %2041 = vmatpush1.bf16.msra.mxu0 %v9947_v32  ;;  %2082 = vmatpush1.bf16.msra.mxu1 %v9948_v52  ;;  %v10027_v32 = vld [vmem:[#allocation10_spill] sm:$0xff]  ;;  %v10028_v52 = vld [vmem:[#allocation11_spill] sm:$0xff] }
 0x5e5   :  { %2042 = vmatprep.subr.bf16.mxu0 %v9949_v2  ;;  %2083 = vmatprep.subr.bf16.mxu1 %v9950_v51  ;;  %v10029_v2 = vld [vmem:[#allocation12_spill] sm:$0xff]  ;;  %v10030_v51 = vld [vmem:[#allocation13_spill] sm:$0xff] }
 0x5e8   :  { %2043 = vmatpush1.bf16.msra.mxu0 %v9951_v47  ;;  %2084 = vmatpush1.bf16.msra.mxu1 %v9952_v50  ;;  %v10031_v47 = vld [vmem:[#allocation14_spill] sm:$0xff]  ;;  %v10032_v50 = vld [vmem:[#allocation15_spill] sm:$0xff] }
 0x5e9   :  { %2044 = vmatprep.subr.bf16.mxu0 %v9953_v31  ;;  %2085 = vmatprep.subr.bf16.mxu1 %v9954_v44  ;;  %v10033_v31 = vld [vmem:[#allocation16_spill] sm:$0xff]  ;;  %v10034_v44 = vld [vmem:[#allocation67_spill] sm:$0xff] }
 0x5ec   :  { %2045 = vmatpush1.bf16.msra.mxu0 %v9955_v0  ;;  %2086 = vmatpush1.bf16.msra.mxu1 %v9956_v7  ;;  %v10035_v0 = vld [vmem:[#allocation68_spill] sm:$0xff]  ;;  %v10036_v7 = vld [vmem:[#allocation69_spill] sm:$0xff] }
 0x5ed   :  { %2046 = vmatprep.subr.bf16.mxu0 %v9957_v8  ;;  %2087 = vmatprep.subr.bf16.mxu1 %v9958_v48  ;;  %v10037_v8 = vld [vmem:[#allocation70_spill] sm:$0xff]  ;;  %v10038_v48 = vld [vmem:[#allocation71_spill] sm:$0xff] }
 0x5f0   :  { %2047 = vmatpush1.bf16.msra.mxu0 %v9959_v9  ;;  %2088 = vmatpush1.bf16.msra.mxu1 %v9960_v10  ;;  %v10039_v9 = vld [vmem:[#allocation72_spill] sm:$0xff]  ;;  %v10040_v10 = vld [vmem:[#allocation73_spill] sm:$0xff] }
 0x5f1   :  { %2048 = vmatprep.subr.bf16.mxu0 %v9961_v13  ;;  %2089 = vmatprep.subr.bf16.mxu1 %v9962_v14  ;;  %v10041_v13 = vld [vmem:[#allocation74_spill] sm:$0xff]  ;;  %v10042_v14 = vld [vmem:[#allocation75_spill] sm:$0xff] }
 0x5f4   :  { %2049 = vmatpush1.bf16.msra.mxu0 %v9963_v15  ;;  %2090 = vmatpush1.bf16.msra.mxu1 %v9964_v46  ;;  %v6987_v15 = vld [vmem:[%s9123_s1 + $0x4] ss:$16 sps:$4 sm:$0xff]   ;;  %v6993_v46 = vld [vmem:[%s9123_s1 + $0xc] ss:$16 sps:$4 sm:$0xff]  }
 0x5f5   :  { %2050 = vmatprep.subr.bf16.mxu0 %v10011_v16  ;;  %2091 = vmatprep.subr.bf16.mxu1 %v10012_v17  ;;  %v10043_v17 = vld [vmem:[#allocation4_spill] sm:$0xff] }
 0x5f8   :  { %2051 = vmatpush1.bf16.msra.mxu0 %v10013_v18  ;;  %2092 = vmatpush1.bf16.msra.mxu1 %v10014_v20 }
 0x5f9   :  { %2052 = vmatprep.subr.bf16.mxu0 %v10015_v26  ;;  %2093 = vmatprep.subr.bf16.mxu1 %v10016_v58  ;;  %v10044_v58 = vld [vmem:[#allocation5_spill] sm:$0xff] }
 0x5fc   :  { %2053 = vmatpush1.bf16.msra.mxu0 %v10017_v59  ;;  %2094 = vmatpush1.bf16.msra.mxu1 %v10018_v38 }
 0x5fd   :  { %2054 = vmatprep.subr.bf16.mxu0 %v10019_v60  ;;  %2095 = vmatprep.subr.bf16.mxu1 %v10020_v61 }
 0x600   :  { %2055 = vmatpush1.bf16.msra.mxu0 %v10021_v55  ;;  %2096 = vmatpush1.bf16.msra.mxu1 %v10022_v27 }
 0x601   :  { %2056 = vmatprep.subr.bf16.mxu0 %v10023_v56  ;;  %2097 = vmatprep.subr.bf16.mxu1 %v10024_v62  ;;  %v10045_v62 = vld [vmem:[#allocation6_spill] sm:$0xff] }
 0x604   :  { %2057 = vmatpush1.bf16.msra.mxu0 %v10025_v30  ;;  %2098 = vmatpush1.bf16.msra.mxu1 %v10026_v54  ;;  %v10046_v54 = vld [vmem:[#allocation7_spill] sm:$0xff] }
 0x605   :  { %2058 = vmatprep.subr.bf16.mxu0 %v10027_v32  ;;  %2099 = vmatprep.subr.bf16.mxu1 %v10028_v52 }
 0x608   :  { %2059 = vmatpush1.bf16.msra.mxu0 %v10029_v2  ;;  %2100 = vmatpush1.bf16.msra.mxu1 %v10030_v51 }
 0x609   :  { %2060 = vmatprep.subr.bf16.mxu0 %v10031_v47  ;;  %2101 = vmatprep.subr.bf16.mxu1 %v10032_v50 }
 0x60c   :  { %2061 = vmatpush1.bf16.msra.mxu0 %v10033_v31  ;;  %2102 = vmatpush1.bf16.msra.mxu1 %v10034_v44  ;;  %v1916_v44 = vpop.permute.xlu1 %1915 }
 0x60d   :  { %2062 = vmatprep.subr.bf16.mxu0 %v10035_v0  ;;  %2103 = vmatprep.subr.bf16.mxu1 %v10036_v7  ;;  %v10047_v7 = vld [vmem:[#allocation60_spill] sm:$0xff] }
 0x610   :  { %2063 = vmatpush1.bf16.msra.mxu0 %v10037_v8  ;;  %2104 = vmatpush1.bf16.msra.mxu1 %v10038_v48  ;;  %v1918_v8 = vmul.f32 %v1916_v44, %v10047_v7 }
 0x611   :  { %2064 = vmatprep.subr.bf16.mxu0 %v10039_v9  ;;  %2105 = vmatprep.subr.bf16.mxu1 %v10040_v10  ;;  %v10048_v9 = vld [vmem:[#allocation61_spill] sm:$0xff] }
 0x612   :  { %v1919_v10 = vmul.f32 %v1916_v44, %v10048_v9 }
 0x614   :  { %2065 = vmatpush1.bf16.msra.mxu0 %v10041_v13  ;;  %2106 = vmatpush1.bf16.msra.mxu1 %v10042_v14 }
 0x615   :  { %2157 = vmatprep.subr.bf16.mxu0 %v6987_v15  ;;  %2198 = vmatprep.subr.bf16.mxu1 %v6993_v46 }
 0x68a   :  { %v1837_v21 = vpop.f32.mrb[36].mxu0  ;;  %v1878_v16 = vpop.f32.mrb[36].mxu1 }
 0x68b   :  { %v1838_v18 = vadd.f32 %v1837_v21, %v10043_v17  ;;  %v1839_v20 = vpop.f32.mrb[37].mxu0  ;;  %v1880_v26 = vpop.f32.mrb[37].mxu1  ;;  %v1879_v30 = vadd.f32 %v1878_v16, %v10045_v62 }
 0x68c   :  { %v1840_v59 = vadd.f32 %v1839_v20, %v10044_v58  ;;  %v1841_v38 = vpop.f32.mrb[38].mxu0  ;;  %v1882_v60 = vpop.f32.mrb[38].mxu1  ;;  %v1881_v32 = vadd.f32 %v1880_v26, %v10046_v54 }
 0x68d   :  { %v3922_v61 = vmul.f32 -1.442695, %v1838_v18  ;;  %v1842_v55 = vpop.f32.mrb[39].mxu0  ;;  %v1883_v27 = vpop.f32.mrb[39].mxu1  ;;  %v3924_v52 = vmul.f32 -1.442695, %v1879_v30  ;;  %v1922_v18 = vadd.f32 %v1918_v8, %v9863_v19 }
 0x68e   :  { %v3923_v56 = vmul.f32 -1.442695, %v1840_v59  ;;  %v1923_v59 = vadd.f32 %v1919_v10, %v9814_v63 }
 0x68f   :  { %4430 = vpow2.f32 %v3922_v61 }
 0x690   :  { %4432 = vpow2.f32 %v3923_v56 }
 0x691   :  { %4434 = vtanh.f32 %v1881_v32 }
 0x692   :  { %4436 = vpow2.f32 %v3924_v52 }
 0x699   :  { %v4431_v2 = vpop.eup %4430 }
 0x69a   :  { %v1894_v51 = vadd.f32 1.0, %v4431_v2  ;;  %v4433_v47 = vpop.eup %4432 }
 0x69b   :  { %v1895_v50 = vadd.f32 1.0, %v4433_v47  ;;  %v4435_v31 = vpop.eup %4434  ;;  %v1921_v47 = vmul.f32 %v1916_v44, %v5731_v53 }
 0x69c   :  { %4438 = vrcp.f32 %v1894_v51  ;;  %v4437_v0 = vpop.eup %4436 }
 0x69d   :  { %4440 = vrcp.f32 %v1895_v50  ;;  %v1896_v21 = vadd.f32 1.0, %v4437_v0  ;;  %v1925_v0 = vadd.f32 %v1921_v47, %v5738_v35  ;;  %v10051_v47 = vld [vmem:[#allocation21_spill] sm:$0xff] }
 0x69f   :  { %4442 = vrcp.f32 %v1896_v21 }
 0x6a6   :  { %v4439_v48 = vpop.eup %4438 }
 0x6a7   :  { %v1905_v13 = vmul.f32 %v4439_v48, %v4435_v31  ;;  %v4441_v14 = vpop.eup %4440 }
 0x6a8   :  { %v1904_v16 = vmul.f32 %v4441_v14, %v6728_v33  ;;  %v1920_v33 = vmul.f32 %v1916_v44, %v9815_v49 }
 0x6a9   :  { %v4443_v8 = vpop.eup %4442 }
 0x6aa   :  { %v1960_v20 = vpop.f32.mrb[40].mxu0  ;;  %v2001_v26 = vpop.f32.mrb[40].mxu1  ;;  %v7005_v38 = vadd.f32 %v1905_v13, %v1904_v16  ;;  %v1924_v50 = vadd.f32 %v1920_v33, %v5734_v1 }
 0x6ab   :  { %v1961_v60 = vadd.f32 %v1960_v20, %v1922_v18  ;;  %v1962_v61 = vpop.f32.mrb[41].mxu0  ;;  %v2003_v55 = vpop.f32.mrb[41].mxu1 }
 0x6ac   :  { %v1963_v27 = vadd.f32 %v1962_v61, %v1923_v59  ;;  %v1964_v56 = vpop.f32.mrb[42].mxu0  ;;  %v2005_v30 = vpop.f32.mrb[42].mxu1  ;;  %4444 = vtanh.f32 %v7005_v38  ;;  %v2002_v31 = vadd.f32 %v2001_v26, %v1924_v50  ;;  %v2004_v48 = vadd.f32 %v2003_v55, %v1925_v0  ;;  %v10052_v50 = vld [vmem:[#allocation22_spill] sm:$0xff]  ;;  %v10054_v0 = vld [vmem:[#allocation24_spill] sm:$0xff] }
 0x6ad   :  { %v3927_v32 = vmul.f32 -1.442695, %v1961_v60  ;;  %v1965_v52 = vpop.f32.mrb[43].mxu0  ;;  %v2006_v2 = vpop.f32.mrb[43].mxu1 }
 0x6ae   :  { %v3928_v51 = vmul.f32 -1.442695, %v1963_v27  ;;  %v3929_v13 = vmul.f32 -1.442695, %v2002_v31  ;;  %v10053_v31 = vld [vmem:[#allocation23_spill] sm:$0xff] }
 0x6af   :  { %4446 = vpow2.f32 %v3927_v32 }
 0x6b0   :  { %4448 = vpow2.f32 %v3928_v51  ;;  %v10050_v51 = vld [vmem:[#allocation20_spill] sm:$0xff] }
 0x6b1   :  { %4450 = vtanh.f32 %v2004_v48  ;;  %v10056_v48 = vld [vmem:[#allocation26_spill] sm:$0xff] }
 0x6b2   :  { %4452 = vpow2.f32 %v3929_v13  ;;  %v7058_v13 = vld [vmem:[%s9123_s1 + $0xe8] ss:$16 sps:$4 sm:$0xff]  }
 0x6b6   :  { %v4445_v10 = vpop.eup %4444 }
 0x6b7   :  { %v1908_v14 = vmul.f32 %v4445_v10, %v4443_v8  ;;  %v10055_v8 = vld [vmem:[#allocation25_spill] sm:$0xff]  ;;  %v7052_v10 = vld [vmem:[%s9123_s1 + $0xe0] ss:$16 sps:$4 sm:$0xff]  }
 0x6b9   :  { %v4447_v21 = vpop.eup %4446  ;;  %3925 = vst [vmem:[%s9129_s8 + $0x20] sm:$0xff] %v1908_v14  ;;  %v2033_v18 = vpack.c.bf16 %v1908_v14, %v1908_v14  ;;  %v7064_v14 = vld [vmem:[%s9125_s3 + $0x4] ss:$16 sps:$4 sm:$0xff]  }
 0x6ba   :  { %v2017_v16 = vadd.f32 1.0, %v4447_v21  ;;  %v4449_v44 = vpop.eup %4448  ;;  %v7070_v21 = vld [vmem:[%s9125_s3 + $0xc] ss:$16 sps:$4 sm:$0xff]  }
 0x6bb   :  { %v2018_v20 = vadd.f32 1.0, %v4449_v44  ;;  %2066 = vmatprep.mubr.bf16.mxu0 %v2033_v18  ;;  %2107 = vmatprep.mubr.bf16.mxu1 %v2033_v18  ;;  %v4451_v26 = vpop.eup %4450  ;;  %v7082_v18 = vld [vmem:[%s9125_s3 + $0x8] ss:$16 sps:$4 sm:$0xff]   ;;  %v7088_v44 = vld [vmem:[%s9125_s3 + $0x24] ss:$16 sps:$4 sm:$0xff]  }
 0x6bc   :  { %4454 = vrcp.f32 %v2017_v16  ;;  %v4453_v59 = vpop.eup %4452  ;;  %v7076_v16 = vld [vmem:[%s9125_s3] ss:$16 sps:$4 sm:$0xff]   ;;  %10058 = vst [vmem:[#allocation3_spill] sm:$0xff] %v7082_v18  ;;  %10059 = vst [vmem:[#allocation64_spill] sm:$0xff] %v7088_v44 }
 0x6bd   :  { %4456 = vrcp.f32 %v2018_v20  ;;  %v2019_v27 = vadd.f32 1.0, %v4453_v59  ;;  %10057 = vst [vmem:[#allocation2_spill] sm:$0xff] %v7076_v16  ;;  %v7094_v20 = vld [vmem:[%s9125_s3 + $0x2c] ss:$16 sps:$4 sm:$0xff]   ;;  %v7106_v59 = vld [vmem:[%s9125_s3 + $0x28] ss:$16 sps:$4 sm:$0xff]  }
 0x6be   :  { %10060 = vst [vmem:[#allocation66_spill] sm:$0xff] %v7094_v20  ;;  %10062 = vst [vmem:[#allocation28_spill] sm:$0xff] %v7106_v59 }
 0x6bf   :  { %4458 = vrcp.f32 %v2019_v27  ;;  %v7130_v27 = vld [vmem:[%s9125_s3 + $0x48] ss:$16 sps:$4 sm:$0xff]  }
 0x6c0   :  { %10066 = vst [vmem:[#allocation32_spill] sm:$0xff] %v7130_v27 }
 0x6c6   :  { %v4455_v60 = vpop.eup %4454 }
 0x6c7   :  { %v2028_v61 = vmul.f32 %v4455_v60, %v4451_v26  ;;  %v4457_v55 = vpop.eup %4456  ;;  %v7100_v26 = vld [vmem:[%s9125_s3 + $0x20] ss:$16 sps:$4 sm:$0xff]   ;;  %v7112_v60 = vld [vmem:[%s9125_s3 + $0x44] ss:$16 sps:$4 sm:$0xff]  }
 0x6c8   :  { %v2027_v56 = vmul.f32 %v4457_v55, %v6739_v12  ;;  %v10049_v12 = vld [vmem:[#allocation19_spill] sm:$0xff]  ;;  %10061 = vst [vmem:[#allocation27_spill] sm:$0xff] %v7100_v26  ;;  %10063 = vst [vmem:[#allocation29_spill] sm:$0xff] %v7112_v60  ;;  %v7124_v55 = vld [vmem:[%s9125_s3 + $0x40] ss:$16 sps:$4 sm:$0xff]  }
 0x6c9   :  { %v4459_v32 = vpop.eup %4458  ;;  %10065 = vst [vmem:[#allocation31_spill] sm:$0xff] %v7124_v55 }
 0x6ca   :  { %v7016_v30 = vadd.f32 %v2028_v61, %v2027_v56  ;;  %v7118_v61 = vld [vmem:[%s9125_s3 + $0x4c] ss:$16 sps:$4 sm:$0xff]   ;;  %v7136_v56 = vld [vmem:[%s9125_s3 + $0x64] ss:$16 sps:$4 sm:$0xff]  }
 0x6cb   :  { %10064 = vst [vmem:[#allocation30_spill] sm:$0xff] %v7118_v61  ;;  %10067 = vst [vmem:[#allocation33_spill] sm:$0xff] %v7136_v56 }
 0x6cc   :  { %4460 = vtanh.f32 %v7016_v30 }
 0x6d6   :  { %v4461_v33 = vpop.eup %4460 }
 0x6d7   :  { %v2031_v52 = vmul.f32 %v4461_v33, %v4459_v32  ;;  %v7142_v32 = vld [vmem:[%s9125_s3 + $0x6c] ss:$16 sps:$4 sm:$0xff]   ;;  %v7148_v33 = vld [vmem:[%s9125_s3 + $0x60] ss:$16 sps:$4 sm:$0xff]  }
 0x6d8   :  { %10068 = vst [vmem:[#allocation34_spill] sm:$0xff] %v7142_v32  ;;  %10069 = vst [vmem:[#allocation35_spill] sm:$0xff] %v7148_v33 }
 0x6d9   :  { %v2032_v2 = vpack.c.bf16 %v2031_v52, %v2031_v52  ;;  %v7154_v52 = vld [vmem:[%s9125_s3 + $0x68] ss:$16 sps:$4 sm:$0xff]  }
 0x6da   :  { %10070 = vst [vmem:[#allocation36_spill] sm:$0xff] %v7154_v52 }
 0x6db   :  { %2067 = vmatmul.mubr.bf16.vlgmr.msra.gmra.mrb[44].mxu0 %v2032_v2  ;;  %2108 = vmatmul.mubr.bf16.vlgmr.msra.gmra.mrb[44].mxu1 %v2032_v2 }
 0x6dc   :  { %2158 = vmatpush1.bf16.msra.mxu0 %v6749_v28  ;;  %2199 = vmatpush1.bf16.msra.mxu1 %v6755_v24 }
 0x6dd   :  { %2159 = vmatprep.subr.bf16.mxu0 %v6761_v3  ;;  %2200 = vmatprep.subr.bf16.mxu1 %v6767_v36 }
 0x6de   :  { %2189 = vmatprep.mubr.bf16.mxu0 %v9747_v29  ;;  %2230 = vmatprep.mubr.bf16.mxu1 %v9747_v29 }
 0x6e0   :  { %2160 = vmatpush1.bf16.msra.mxu0 %v6775_v23  ;;  %2201 = vmatpush1.bf16.msra.mxu1 %v6781_v39 }
 0x6e1   :  { %2161 = vmatprep.subr.bf16.mxu0 %v6787_v57  ;;  %2202 = vmatprep.subr.bf16.mxu1 %v6793_v6 }
 0x6e4   :  { %2162 = vmatpush1.bf16.msra.mxu0 %v6799_v34  ;;  %2203 = vmatpush1.bf16.msra.mxu1 %v6805_v42 }
 0x6e5   :  { %2163 = vmatprep.subr.bf16.mxu0 %v6811_v11  ;;  %2204 = vmatprep.subr.bf16.mxu1 %v6817_v37 }
 0x6e8   :  { %2164 = vmatpush1.bf16.msra.mxu0 %v6823_v43  ;;  %2205 = vmatpush1.bf16.msra.mxu1 %v6829_v5 }
 0x6e9   :  { %2165 = vmatprep.subr.bf16.mxu0 %v6835_v4  ;;  %2206 = vmatprep.subr.bf16.mxu1 %v6841_v41 }
 0x6ec   :  { %2166 = vmatpush1.bf16.msra.mxu0 %v10049_v12  ;;  %2207 = vmatpush1.bf16.msra.mxu1 %v10050_v51 }
 0x6ed   :  { %2167 = vmatprep.subr.bf16.mxu0 %v10051_v47  ;;  %2208 = vmatprep.subr.bf16.mxu1 %v10052_v50 }
 0x6f0   :  { %2168 = vmatpush1.bf16.msra.mxu0 %v10053_v31  ;;  %2209 = vmatpush1.bf16.msra.mxu1 %v10054_v0 }
 0x6f1   :  { %2169 = vmatprep.subr.bf16.mxu0 %v10055_v8  ;;  %2210 = vmatprep.subr.bf16.mxu1 %v10056_v48 }
 0x6f4   :  { %2170 = vmatpush1.bf16.msra.mxu0 %v6895_v45  ;;  %2211 = vmatpush1.bf16.msra.mxu1 %v6901_v22 }
 0x6f5   :  { %2171 = vmatprep.subr.bf16.mxu0 %v6907_v25  ;;  %2212 = vmatprep.subr.bf16.mxu1 %v6913_v40 }
 0x6f8   :  { %2172 = vmatpush1.bf16.msra.mxu0 %v7052_v10  ;;  %2213 = vmatpush1.bf16.msra.mxu1 %v7058_v13 }
 0x6f9   :  { %2265 = vmatprep.subr.bf16.mxu0 %v7064_v14  ;;  %2306 = vmatprep.subr.bf16.mxu1 %v7070_v21 }
 0x6fb   :  { %2190 = vmatmul.mubr.bf16.vlgmr.msra.gmra.mrb[48].mxu0 %v2032_v2  ;;  %2231 = vmatmul.mubr.bf16.vlgmr.msra.gmra.mrb[48].mxu1 %v2032_v2  ;;  %v7160_v2 = vld [vmem:[%s9125_s3 + $0x84] ss:$16 sps:$4 sm:$0xff]  }
 0x6fc   :  { %2266 = vmatpush1.bf16.msra.mxu0 %v7076_v16  ;;  %2307 = vmatpush1.bf16.msra.mxu1 %v7082_v18  ;;  %10071 = vst [vmem:[#allocation37_spill] sm:$0xff] %v7160_v2 }
 0x6fd   :  { %2267 = vmatprep.subr.bf16.mxu0 %v7088_v44  ;;  %2308 = vmatprep.subr.bf16.mxu1 %v7094_v20 }
 0x700   :  { %2268 = vmatpush1.bf16.msra.mxu0 %v7100_v26  ;;  %2309 = vmatpush1.bf16.msra.mxu1 %v7106_v59 }
 0x701   :  { %2269 = vmatprep.subr.bf16.mxu0 %v7112_v60  ;;  %2310 = vmatprep.subr.bf16.mxu1 %v7118_v61 }
 0x704   :  { %2270 = vmatpush1.bf16.msra.mxu0 %v7124_v55  ;;  %2311 = vmatpush1.bf16.msra.mxu1 %v7130_v27 }
 0x705   :  { %2271 = vmatprep.subr.bf16.mxu0 %v7136_v56  ;;  %2312 = vmatprep.subr.bf16.mxu1 %v7142_v32  ;;  %v7166_v32 = vld [vmem:[%s9125_s3 + $0x8c] ss:$16 sps:$4 sm:$0xff]  }
 0x706   :  { %10072 = vst [vmem:[#allocation38_spill] sm:$0xff] %v7166_v32 }
 0x708   :  { %2272 = vmatpush1.bf16.msra.mxu0 %v7148_v33  ;;  %2313 = vmatpush1.bf16.msra.mxu1 %v7154_v52  ;;  %v7172_v33 = vld [vmem:[%s9125_s3 + $0x80] ss:$16 sps:$4 sm:$0xff]   ;;  %v7178_v52 = vld [vmem:[%s9125_s3 + $0x88] ss:$16 sps:$4 sm:$0xff]  }
 0x709   :  { %2273 = vmatprep.subr.bf16.mxu0 %v7160_v2  ;;  %2314 = vmatprep.subr.bf16.mxu1 %v7166_v32  ;;  %10073 = vst [vmem:[#allocation39_spill] sm:$0xff] %v7172_v33  ;;  %10074 = vst [vmem:[#allocation40_spill] sm:$0xff] %v7178_v52  ;;  %v7184_v2 = vld [vmem:[%s9125_s3 + $0xa4] ss:$16 sps:$4 sm:$0xff]   ;;  %v7190_v32 = vld [vmem:[%s9125_s3 + $0xac] ss:$16 sps:$4 sm:$0xff]  }
 0x70a   :  { %10075 = vst [vmem:[#allocation41_spill] sm:$0xff] %v7184_v2  ;;  %10076 = vst [vmem:[#allocation42_spill] sm:$0xff] %v7190_v32 }
 0x70c   :  { %2274 = vmatpush1.bf16.msra.mxu0 %v7172_v33  ;;  %2315 = vmatpush1.bf16.msra.mxu1 %v7178_v52  ;;  %v7196_v33 = vld [vmem:[%s9125_s3 + $0xa0] ss:$16 sps:$4 sm:$0xff]   ;;  %v7202_v52 = vld [vmem:[%s9125_s3 + $0xa8] ss:$16 sps:$4 sm:$0xff]  }
 0x70d   :  { %2275 = vmatprep.subr.bf16.mxu0 %v7184_v2  ;;  %2316 = vmatprep.subr.bf16.mxu1 %v7190_v32  ;;  %10077 = vst [vmem:[#allocation43_spill] sm:$0xff] %v7196_v33  ;;  %10078 = vst [vmem:[#allocation44_spill] sm:$0xff] %v7202_v52  ;;  %v7208_v2 = vld [vmem:[%s9125_s3 + $0xc4] ss:$16 sps:$4 sm:$0xff]   ;;  %v7214_v32 = vld [vmem:[%s9125_s3 + $0xcc] ss:$16 sps:$4 sm:$0xff]  }
 0x70e   :  { %10079 = vst [vmem:[#allocation17_spill] sm:$0xff] %v7208_v2  ;;  %10080 = vst [vmem:[#allocation18_spill] sm:$0xff] %v7214_v32 }
 0x710   :  { %2276 = vmatpush1.bf16.msra.mxu0 %v7196_v33  ;;  %2317 = vmatpush1.bf16.msra.mxu1 %v7202_v52  ;;  %v7220_v33 = vld [vmem:[%s9125_s3 + $0xc0] ss:$16 sps:$4 sm:$0xff]   ;;  %v7226_v52 = vld [vmem:[%s9125_s3 + $0xc8] ss:$16 sps:$4 sm:$0xff]  }
 0x711   :  { %2277 = vmatprep.subr.bf16.mxu0 %v7208_v2  ;;  %2318 = vmatprep.subr.bf16.mxu1 %v7214_v32  ;;  %10081 = vst [vmem:[#allocation45_spill] sm:$0xff] %v7220_v33  ;;  %10082 = vst [vmem:[#allocation46_spill] sm:$0xff] %v7226_v52  ;;  %v7232_v2 = vld [vmem:[%s9125_s3 + $0xe4] ss:$16 sps:$4 sm:$0xff]   ;;  %v7238_v32 = vld [vmem:[%s9125_s3 + $0xec] ss:$16 sps:$4 sm:$0xff]  }
 0x712   :  { %10083 = vst [vmem:[#allocation47_spill] sm:$0xff] %v7232_v2  ;;  %10084 = vst [vmem:[#allocation48_spill] sm:$0xff] %v7238_v32 }
 0x714   :  { %2278 = vmatpush1.bf16.msra.mxu0 %v7220_v33  ;;  %2319 = vmatpush1.bf16.msra.mxu1 %v7226_v52  ;;  %v7244_v33 = vld [vmem:[%s9125_s3 + $0xe0] ss:$16 sps:$4 sm:$0xff]   ;;  %v7250_v52 = vld [vmem:[%s9125_s3 + $0xe8] ss:$16 sps:$4 sm:$0xff]  }
 0x715   :  { %2279 = vmatprep.subr.bf16.mxu0 %v7232_v2  ;;  %2320 = vmatprep.subr.bf16.mxu1 %v7238_v32  ;;  %10085 = vst [vmem:[#allocation49_spill] sm:$0xff] %v7244_v33  ;;  %10086 = vst [vmem:[#allocation50_spill] sm:$0xff] %v7250_v52  ;;  %v7256_v2 = vld [vmem:[%s9125_s3 + $0x104] ss:$16 sps:$4 sm:$0xff]   ;;  %v7262_v32 = vld [vmem:[%s9125_s3 + $0x10c] ss:$16 sps:$4 sm:$0xff]  }
 0x716   :  { %10087 = vst [vmem:[#allocation51_spill] sm:$0xff] %v7256_v2  ;;  %10088 = vst [vmem:[#allocation52_spill] sm:$0xff] %v7262_v32 }
 0x718   :  { %2280 = vmatpush1.bf16.msra.mxu0 %v7244_v33  ;;  %2321 = vmatpush1.bf16.msra.mxu1 %v7250_v52  ;;  %v7268_v33 = vld [vmem:[%s9125_s3 + $0x100] ss:$16 sps:$4 sm:$0xff]   ;;  %v7274_v52 = vld [vmem:[%s9125_s3 + $0x108] ss:$16 sps:$4 sm:$0xff]  }
 0x719   :  { %2281 = vmatprep.subr.bf16.mxu0 %v7256_v2  ;;  %2322 = vmatprep.subr.bf16.mxu1 %v7262_v32  ;;  %10089 = vst [vmem:[#allocation53_spill] sm:$0xff] %v7268_v33  ;;  %10090 = vst [vmem:[#allocation54_spill] sm:$0xff] %v7274_v52  ;;  %v7280_v2 = vld [vmem:[%s9125_s3 + $0x124] ss:$16 sps:$4 sm:$0xff]   ;;  %v7286_v32 = vld [vmem:[%s9125_s3 + $0x12c] ss:$16 sps:$4 sm:$0xff]  }
 0x71a   :  { %10091 = vst [vmem:[#allocation55_spill] sm:$0xff] %v7280_v2  ;;  %10092 = vst [vmem:[#allocation56_spill] sm:$0xff] %v7286_v32 }
 0x71c   :  { %2282 = vmatpush1.bf16.msra.mxu0 %v7268_v33  ;;  %2323 = vmatpush1.bf16.msra.mxu1 %v7274_v52  ;;  %v7292_v33 = vld [vmem:[%s9125_s3 + $0x120] ss:$16 sps:$4 sm:$0xff]   ;;  %v7298_v52 = vld [vmem:[%s9125_s3 + $0x128] ss:$16 sps:$4 sm:$0xff]  }
 0x71d   :  { %2283 = vmatprep.subr.bf16.mxu0 %v7280_v2  ;;  %2324 = vmatprep.subr.bf16.mxu1 %v7286_v32  ;;  %10093 = vst [vmem:[#allocation57_spill] sm:$0xff] %v7292_v33  ;;  %10094 = vst [vmem:[#allocation63_spill] sm:$0xff] %v7298_v52  ;;  %v7304_v2 = vld [vmem:[%s9125_s3 + $0x144] ss:$16 sps:$4 sm:$0xff]   ;;  %v7310_v32 = vld [vmem:[%s9125_s3 + $0x14c] ss:$16 sps:$4 sm:$0xff]  }
 0x71e   :  { %10095 = vst [vmem:[#allocation8_spill] sm:$0xff] %v7304_v2  ;;  %10096 = vst [vmem:[#allocation9_spill] sm:$0xff] %v7310_v32 }
 0x720   :  { %2284 = vmatpush1.bf16.msra.mxu0 %v7292_v33  ;;  %2325 = vmatpush1.bf16.msra.mxu1 %v7298_v52  ;;  %v7316_v33 = vld [vmem:[%s9125_s3 + $0x140] ss:$16 sps:$4 sm:$0xff]   ;;  %v7322_v52 = vld [vmem:[%s9125_s3 + $0x148] ss:$16 sps:$4 sm:$0xff]  }
 0x721   :  { %2285 = vmatprep.subr.bf16.mxu0 %v7304_v2  ;;  %2326 = vmatprep.subr.bf16.mxu1 %v7310_v32  ;;  %10097 = vst [vmem:[#allocation10_spill] sm:$0xff] %v7316_v33  ;;  %10098 = vst [vmem:[#allocation11_spill] sm:$0xff] %v7322_v52  ;;  %v7328_v2 = vld [vmem:[%s9125_s3 + $0x164] ss:$16 sps:$4 sm:$0xff]   ;;  %v7334_v32 = vld [vmem:[%s9125_s3 + $0x16c] ss:$16 sps:$4 sm:$0xff]  }
 0x722   :  { %10099 = vst [vmem:[#allocation12_spill] sm:$0xff] %v7328_v2  ;;  %10100 = vst [vmem:[#allocation13_spill] sm:$0xff] %v7334_v32 }
 0x724   :  { %2286 = vmatpush1.bf16.msra.mxu0 %v7316_v33  ;;  %2327 = vmatpush1.bf16.msra.mxu1 %v7322_v52  ;;  %v7340_v33 = vld [vmem:[%s9125_s3 + $0x160] ss:$16 sps:$4 sm:$0xff]   ;;  %v7346_v52 = vld [vmem:[%s9125_s3 + $0x168] ss:$16 sps:$4 sm:$0xff]  }
 0x725   :  { %2287 = vmatprep.subr.bf16.mxu0 %v7328_v2  ;;  %2328 = vmatprep.subr.bf16.mxu1 %v7334_v32  ;;  %10101 = vst [vmem:[#allocation14_spill] sm:$0xff] %v7340_v33  ;;  %10102 = vst [vmem:[#allocation15_spill] sm:$0xff] %v7346_v52  ;;  %v7352_v2 = vld [vmem:[%s9125_s3 + $0x184] ss:$16 sps:$4 sm:$0xff]   ;;  %v7358_v32 = vld [vmem:[%s9125_s3 + $0x18c] ss:$16 sps:$4 sm:$0xff]  }
 0x726   :  { %10103 = vst [vmem:[#allocation16_spill] sm:$0xff] %v7352_v2  ;;  %10104 = vst [vmem:[#allocation67_spill] sm:$0xff] %v7358_v32 }
 0x728   :  { %2288 = vmatpush1.bf16.msra.mxu0 %v7340_v33  ;;  %2329 = vmatpush1.bf16.msra.mxu1 %v7346_v52  ;;  %v7364_v33 = vld [vmem:[%s9125_s3 + $0x180] ss:$16 sps:$4 sm:$0xff]   ;;  %v7370_v52 = vld [vmem:[%s9125_s3 + $0x188] ss:$16 sps:$4 sm:$0xff]  }
 0x729   :  { %2289 = vmatprep.subr.bf16.mxu0 %v7352_v2  ;;  %2330 = vmatprep.subr.bf16.mxu1 %v7358_v32  ;;  %10105 = vst [vmem:[#allocation68_spill] sm:$0xff] %v7364_v33  ;;  %10106 = vst [vmem:[#allocation69_spill] sm:$0xff] %v7370_v52  ;;  %v7376_v2 = vld [vmem:[%s9125_s3 + $0x1a4] ss:$16 sps:$4 sm:$0xff]   ;;  %v7382_v32 = vld [vmem:[%s9125_s3 + $0x1ac] ss:$16 sps:$4 sm:$0xff]  }
 0x72a   :  { %10107 = vst [vmem:[#allocation70_spill] sm:$0xff] %v7376_v2  ;;  %10108 = vst [vmem:[#allocation71_spill] sm:$0xff] %v7382_v32 }
 0x72c   :  { %2290 = vmatpush1.bf16.msra.mxu0 %v7364_v33  ;;  %2331 = vmatpush1.bf16.msra.mxu1 %v7370_v52  ;;  %v7388_v33 = vld [vmem:[%s9125_s3 + $0x1a0] ss:$16 sps:$4 sm:$0xff]   ;;  %v7394_v52 = vld [vmem:[%s9125_s3 + $0x1a8] ss:$16 sps:$4 sm:$0xff]  }
 0x72d   :  { %2291 = vmatprep.subr.bf16.mxu0 %v7376_v2  ;;  %2332 = vmatprep.subr.bf16.mxu1 %v7382_v32  ;;  %10109 = vst [vmem:[#allocation72_spill] sm:$0xff] %v7388_v33  ;;  %10110 = vst [vmem:[#allocation73_spill] sm:$0xff] %v7394_v52  ;;  %v7400_v2 = vld [vmem:[%s9125_s3 + $0x1c4] ss:$16 sps:$4 sm:$0xff]   ;;  %v7406_v32 = vld [vmem:[%s9125_s3 + $0x1cc] ss:$16 sps:$4 sm:$0xff]  }
 0x72e   :  { %10111 = vst [vmem:[#allocation74_spill] sm:$0xff] %v7400_v2  ;;  %10112 = vst [vmem:[#allocation75_spill] sm:$0xff] %v7406_v32 }
 0x730   :  { %2292 = vmatpush1.bf16.msra.mxu0 %v7388_v33  ;;  %2333 = vmatpush1.bf16.msra.mxu1 %v7394_v52  ;;  %v7412_v33 = vld [vmem:[%s9125_s3 + $0x1c0] ss:$16 sps:$4 sm:$0xff]   ;;  %v7418_v52 = vld [vmem:[%s9125_s3 + $0x1c8] ss:$16 sps:$4 sm:$0xff]  }
 0x731   :  { %2293 = vmatprep.subr.bf16.mxu0 %v7400_v2  ;;  %2334 = vmatprep.subr.bf16.mxu1 %v7406_v32  ;;  %10113 = vst [vmem:[#allocation4_spill] sm:$0xff] %v7412_v33  ;;  %10114 = vst [vmem:[#allocation5_spill] sm:$0xff] %v7418_v52  ;;  %v7424_v2 = vld [vmem:[%s9125_s3 + $0x1e4] ss:$16 sps:$4 sm:$0xff]   ;;  %v7430_v32 = vld [vmem:[%s9125_s3 + $0x1ec] ss:$16 sps:$4 sm:$0xff]  }
 0x732   :  { %10115 = vst [vmem:[#allocation19_spill] sm:$0xff] %v7424_v2  ;;  %10116 = vst [vmem:[#allocation20_spill] sm:$0xff] %v7430_v32 }
 0x734   :  { %2294 = vmatpush1.bf16.msra.mxu0 %v7412_v33  ;;  %2335 = vmatpush1.bf16.msra.mxu1 %v7418_v52  ;;  %v7436_v33 = vld [vmem:[%s9125_s3 + $0x1e0] ss:$16 sps:$4 sm:$0xff]   ;;  %v7442_v52 = vld [vmem:[%s9125_s3 + $0x1e8] ss:$16 sps:$4 sm:$0xff]  }
 0x735   :  { %2295 = vmatprep.subr.bf16.mxu0 %v7424_v2  ;;  %2336 = vmatprep.subr.bf16.mxu1 %v7430_v32  ;;  %10117 = vst [vmem:[#allocation21_spill] sm:$0xff] %v7436_v33  ;;  %10118 = vst [vmem:[#allocation22_spill] sm:$0xff] %v7442_v52 }
 0x738   :  { %2296 = vmatpush1.bf16.msra.mxu0 %v7436_v33  ;;  %2337 = vmatpush1.bf16.msra.mxu1 %v7442_v52 }
 0x739   :  { %2388 = vmatprep.subr.bf16.mxu0 %v6987_v15  ;;  %2429 = vmatprep.subr.bf16.mxu1 %v6993_v46 }
 0x7ae   :  { %v2068_v2 = vpop.f32.mrb[44].mxu0  ;;  %v2109_v32 = vpop.f32.mrb[44].mxu1 }
 0x7af   :  { %v2069_v56 = vadd.f32 %v2068_v2, %v10043_v17  ;;  %v2070_v27 = vpop.f32.mrb[45].mxu0  ;;  %v2111_v55 = vpop.f32.mrb[45].mxu1  ;;  %v2110_v15 = vadd.f32 %v2109_v32, %v10045_v62 }
 0x7b0   :  { %v2071_v61 = vadd.f32 %v2070_v27, %v10044_v58  ;;  %v2072_v33 = vpop.f32.mrb[46].mxu0  ;;  %v2113_v60 = vpop.f32.mrb[46].mxu1  ;;  %v2112_v46 = vadd.f32 %v2111_v55, %v10046_v54 }
 0x7b1   :  { %v3930_v59 = vmul.f32 -1.442695, %v2069_v56  ;;  %v2073_v26 = vpop.f32.mrb[47].mxu0  ;;  %v2114_v20 = vpop.f32.mrb[47].mxu1  ;;  %v3932_v52 = vmul.f32 -1.442695, %v2110_v15 }
 0x7b2   :  { %v3931_v44 = vmul.f32 -1.442695, %v2071_v61  ;;  %v2147_v60 = vpop.permute.xlu0 %2146 }
 0x7b3   :  { %4462 = vpow2.f32 %v3930_v59  ;;  %v2149_v20 = vmul.f32 %v2147_v60, %v10047_v7 }
 0x7b4   :  { %4464 = vpow2.f32 %v3931_v44  ;;  %v2150_v44 = vmul.f32 %v2147_v60, %v10048_v9 }
 0x7b5   :  { %4466 = vtanh.f32 %v2112_v46 }
 0x7b6   :  { %4468 = vpow2.f32 %v3932_v52 }
 0x7bd   :  { %v4463_v18 = vpop.eup %4462 }
 0x7be   :  { %v2125_v16 = vadd.f32 1.0, %v4463_v18  ;;  %v4465_v2 = vpop.eup %4464  ;;  %v2153_v18 = vadd.f32 %v2149_v20, %v9863_v19 }
 0x7bf   :  { %v2126_v27 = vadd.f32 1.0, %v4465_v2  ;;  %v4467_v56 = vpop.eup %4466 }
 0x7c0   :  { %4470 = vrcp.f32 %v2125_v16  ;;  %v4469_v26 = vpop.eup %4468  ;;  %v2154_v16 = vadd.f32 %v2150_v44, %v9814_v63  ;;  %v2152_v44 = vmul.f32 %v2147_v60, %v5731_v53 }
 0x7c1   :  { %4472 = vrcp.f32 %v2126_v27  ;;  %v2127_v55 = vadd.f32 1.0, %v4469_v26 }
 0x7c3   :  { %4474 = vrcp.f32 %v2127_v55  ;;  %v2156_v55 = vadd.f32 %v2152_v44, %v5738_v35 }
 0x7ca   :  { %v4471_v59 = vpop.eup %4470 }
 0x7cb   :  { %v2136_v61 = vmul.f32 %v4471_v59, %v4467_v56  ;;  %v4473_v32 = vpop.eup %4472  ;;  %v2151_v56 = vmul.f32 %v2147_v60, %v9815_v49 }
 0x7cc   :  { %v2135_v33 = vmul.f32 %v4473_v32, %v7005_v38 }
 0x7ce   :  { %v2191_v15 = vpop.f32.mrb[48].mxu0  ;;  %v2232_v52 = vpop.f32.mrb[48].mxu1  ;;  %v7456_v46 = vadd.f32 %v2136_v61, %v2135_v33  ;;  %v2155_v61 = vadd.f32 %v2151_v56, %v5734_v1 }
 0x7cf   :  { %v2192_v2 = vadd.f32 %v2191_v15, %v2153_v18  ;;  %v2193_v27 = vpop.f32.mrb[49].mxu0  ;;  %v2234_v54 = vpop.f32.mrb[49].mxu1 }
 0x7d0   :  { %v2194_v7 = vadd.f32 %v2193_v27, %v2154_v16  ;;  %v2195_v62 = vpop.f32.mrb[50].mxu0  ;;  %v2236_v9 = vpop.f32.mrb[50].mxu1  ;;  %4476 = vtanh.f32 %v7456_v46  ;;  %v2233_v32 = vadd.f32 %v2232_v52, %v2155_v61 }
 0x7d1   :  { %v3935_v38 = vmul.f32 -1.442695, %v2192_v2  ;;  %v2196_v26 = vpop.f32.mrb[51].mxu0  ;;  %v2237_v20 = vpop.f32.mrb[51].mxu1  ;;  %v2235_v62 = vadd.f32 %v2234_v54, %v2156_v55 }
 0x7d2   :  { %v3936_v59 = vmul.f32 -1.442695, %v2194_v7  ;;  %v4475_v33 = vpop.eup %4474  ;;  %v3937_v18 = vmul.f32 -1.442695, %v2233_v32 }
 0x7d3   :  { %4478 = vpow2.f32 %v3935_v38 }
 0x7d4   :  { %4480 = vpow2.f32 %v3936_v59 }
 0x7d5   :  { %4482 = vtanh.f32 %v2235_v62  ;;  %v10153_v62 = vld [vmem:[#allocation55_spill] sm:$0xff] }
 0x7d6   :  { %4484 = vpow2.f32 %v3937_v18  ;;  %v10155_v18 = vld [vmem:[#allocation57_spill] sm:$0xff] }
 0x7da   :  { %v4477_v9 = vpop.eup %4476 }
 0x7db   :  { %v2139_v15 = vmul.f32 %v4477_v9, %v4475_v33  ;;  %v10154_v9 = vld [vmem:[#allocation56_spill] sm:$0xff] }
 0x7dd   :  { %v4479_v16 = vpop.eup %4478  ;;  %3933 = vst [vmem:[%s9129_s8 + $0x28] sm:$0xff] %v2139_v15  ;;  %v2264_v7 = vpack.c.bf16 %v2139_v15, %v2139_v15  ;;  %v10156_v15 = vld [vmem:[#allocation63_spill] sm:$0xff] }
 0x7de   :  { %v2248_v27 = vadd.f32 1.0, %v4479_v16  ;;  %v4481_v60 = vpop.eup %4480  ;;  %v10157_v16 = vld [vmem:[#allocation8_spill] sm:$0xff] }
 0x7df   :  { %v2249_v2 = vadd.f32 1.0, %v4481_v60  ;;  %2297 = vmatprep.mubr.bf16.mxu0 %v2264_v7  ;;  %2338 = vmatprep.mubr.bf16.mxu1 %v2264_v7  ;;  %v4483_v52 = vpop.eup %4482  ;;  %v10159_v7 = vld [vmem:[#allocation10_spill] sm:$0xff]  ;;  %v10160_v60 = vld [vmem:[#allocation11_spill] sm:$0xff] }
 0x7e0   :  { %4486 = vrcp.f32 %v2248_v27  ;;  %v4485_v54 = vpop.eup %4484  ;;  %v10158_v27 = vld [vmem:[#allocation9_spill] sm:$0xff] }
 0x7e1   :  { %4488 = vrcp.f32 %v2249_v2  ;;  %v2250_v20 = vadd.f32 1.0, %v4485_v54  ;;  %v10161_v2 = vld [vmem:[#allocation12_spill] sm:$0xff]  ;;  %v10163_v54 = vld [vmem:[#allocation14_spill] sm:$0xff] }
 0x7e3   :  { %4490 = vrcp.f32 %v2250_v20  ;;  %v10167_v20 = vld [vmem:[#allocation68_spill] sm:$0xff] }
 0x7ea   :  { %v4487_v56 = vpop.eup %4486 }
 0x7eb   :  { %v2259_v38 = vmul.f32 %v4487_v56, %v4483_v52  ;;  %v4489_v26 = vpop.eup %4488  ;;  %v10162_v52 = vld [vmem:[#allocation13_spill] sm:$0xff]  ;;  %v10164_v56 = vld [vmem:[#allocation15_spill] sm:$0xff] }
 0x7ec   :  { %v2258_v59 = vmul.f32 %v4489_v26, %v7016_v30  ;;  %v10140_v30 = vld [vmem:[#allocation44_spill] sm:$0xff]  ;;  %v10166_v26 = vld [vmem:[#allocation67_spill] sm:$0xff] }
 0x7ed   :  { %v4491_v61 = vpop.eup %4490 }
 0x7ee   :  { %v7467_v44 = vadd.f32 %v2259_v38, %v2258_v59  ;;  %v10165_v38 = vld [vmem:[#allocation16_spill] sm:$0xff]  ;;  %v10168_v59 = vld [vmem:[#allocation69_spill] sm:$0xff] }
 0x7f0   :  { %4492 = vtanh.f32 %v7467_v44 }
 0x7fa   :  { %v4493_v32 = vpop.eup %4492 }
 0x7fb   :  { %v2262_v55 = vmul.f32 %v4493_v32, %v4491_v61  ;;  %v10169_v61 = vld [vmem:[#allocation70_spill] sm:$0xff]  ;;  %v10170_v32 = vld [vmem:[#allocation71_spill] sm:$0xff] }
 0x7fd   :  { %v2263_v33 = vpack.c.bf16 %v2262_v55, %v2262_v55  ;;  %v10171_v55 = vld [vmem:[#allocation72_spill] sm:$0xff] }
 0x7ff   :  { %2298 = vmatmul.mubr.bf16.vlgmr.msra.gmra.mrb[52].mxu0 %v2263_v33  ;;  %2339 = vmatmul.mubr.bf16.vlgmr.msra.gmra.mrb[52].mxu1 %v2263_v33 }
 0x800   :  { %2389 = vmatpush1.bf16.msra.mxu0 %v6749_v28  ;;  %2430 = vmatpush1.bf16.msra.mxu1 %v6755_v24  ;;  %v10120_v28 = vld [vmem:[#allocation3_spill] sm:$0xff]  ;;  %v10121_v24 = vld [vmem:[#allocation64_spill] sm:$0xff] }
 0x801   :  { %2390 = vmatprep.subr.bf16.mxu0 %v6761_v3  ;;  %2431 = vmatprep.subr.bf16.mxu1 %v6767_v36  ;;  %v10122_v3 = vld [vmem:[#allocation66_spill] sm:$0xff]  ;;  %v10123_v36 = vld [vmem:[#allocation27_spill] sm:$0xff] }
 0x802   :  { %2420 = vmatprep.mubr.bf16.mxu0 %v9747_v29  ;;  %2461 = vmatprep.mubr.bf16.mxu1 %v9747_v29  ;;  %v10119_v29 = vld [vmem:[#allocation2_spill] sm:$0xff] }
 0x804   :  { %2391 = vmatpush1.bf16.msra.mxu0 %v6775_v23  ;;  %2432 = vmatpush1.bf16.msra.mxu1 %v6781_v39  ;;  %v10124_v23 = vld [vmem:[#allocation28_spill] sm:$0xff]  ;;  %v10125_v39 = vld [vmem:[#allocation29_spill] sm:$0xff] }
 0x805   :  { %2392 = vmatprep.subr.bf16.mxu0 %v6787_v57  ;;  %2433 = vmatprep.subr.bf16.mxu1 %v6793_v6  ;;  %v10126_v57 = vld [vmem:[#allocation30_spill] sm:$0xff]  ;;  %v10127_v6 = vld [vmem:[#allocation31_spill] sm:$0xff] }
 0x808   :  { %2393 = vmatpush1.bf16.msra.mxu0 %v6799_v34  ;;  %2434 = vmatpush1.bf16.msra.mxu1 %v6805_v42  ;;  %v10128_v34 = vld [vmem:[#allocation32_spill] sm:$0xff]  ;;  %v10129_v42 = vld [vmem:[#allocation33_spill] sm:$0xff] }
 0x809   :  { %2394 = vmatprep.subr.bf16.mxu0 %v6811_v11  ;;  %2435 = vmatprep.subr.bf16.mxu1 %v6817_v37  ;;  %v10130_v11 = vld [vmem:[#allocation34_spill] sm:$0xff]  ;;  %v10131_v37 = vld [vmem:[#allocation35_spill] sm:$0xff] }
 0x80c   :  { %2395 = vmatpush1.bf16.msra.mxu0 %v6823_v43  ;;  %2436 = vmatpush1.bf16.msra.mxu1 %v6829_v5  ;;  %v10132_v43 = vld [vmem:[#allocation36_spill] sm:$0xff]  ;;  %v10133_v5 = vld [vmem:[#allocation37_spill] sm:$0xff] }
 0x80d   :  { %2396 = vmatprep.subr.bf16.mxu0 %v6835_v4  ;;  %2437 = vmatprep.subr.bf16.mxu1 %v6841_v41  ;;  %v10134_v4 = vld [vmem:[#allocation38_spill] sm:$0xff]  ;;  %v10135_v41 = vld [vmem:[#allocation39_spill] sm:$0xff] }
 0x810   :  { %2397 = vmatpush1.bf16.msra.mxu0 %v10049_v12  ;;  %2438 = vmatpush1.bf16.msra.mxu1 %v10050_v51  ;;  %v10141_v12 = vld [vmem:[#allocation17_spill] sm:$0xff]  ;;  %v10142_v51 = vld [vmem:[#allocation18_spill] sm:$0xff] }
 0x811   :  { %2398 = vmatprep.subr.bf16.mxu0 %v10051_v47  ;;  %2439 = vmatprep.subr.bf16.mxu1 %v10052_v50  ;;  %v10143_v47 = vld [vmem:[#allocation45_spill] sm:$0xff]  ;;  %v10144_v50 = vld [vmem:[#allocation46_spill] sm:$0xff] }
 0x814   :  { %2399 = vmatpush1.bf16.msra.mxu0 %v10053_v31  ;;  %2440 = vmatpush1.bf16.msra.mxu1 %v10054_v0  ;;  %v10145_v31 = vld [vmem:[#allocation47_spill] sm:$0xff]  ;;  %v10146_v0 = vld [vmem:[#allocation48_spill] sm:$0xff] }
 0x815   :  { %2400 = vmatprep.subr.bf16.mxu0 %v10055_v8  ;;  %2441 = vmatprep.subr.bf16.mxu1 %v10056_v48  ;;  %v10147_v8 = vld [vmem:[#allocation49_spill] sm:$0xff]  ;;  %v10148_v48 = vld [vmem:[#allocation50_spill] sm:$0xff] }
 0x818   :  { %2401 = vmatpush1.bf16.msra.mxu0 %v6895_v45  ;;  %2442 = vmatpush1.bf16.msra.mxu1 %v6901_v22  ;;  %v10136_v45 = vld [vmem:[#allocation40_spill] sm:$0xff]  ;;  %v10137_v22 = vld [vmem:[#allocation41_spill] sm:$0xff] }
 0x819   :  { %2402 = vmatprep.subr.bf16.mxu0 %v6907_v25  ;;  %2443 = vmatprep.subr.bf16.mxu1 %v6913_v40  ;;  %v10138_v25 = vld [vmem:[#allocation42_spill] sm:$0xff]  ;;  %v10139_v40 = vld [vmem:[#allocation43_spill] sm:$0xff] }
 0x81c   :  { %2403 = vmatpush1.bf16.msra.mxu0 %v7052_v10  ;;  %2444 = vmatpush1.bf16.msra.mxu1 %v7058_v13  ;;  %v10149_v10 = vld [vmem:[#allocation51_spill] sm:$0xff]  ;;  %v10150_v13 = vld [vmem:[#allocation52_spill] sm:$0xff] }
 0x81d   :  { %2496 = vmatprep.subr.bf16.mxu0 %v7064_v14  ;;  %2537 = vmatprep.subr.bf16.mxu1 %v7070_v21  ;;  %v10151_v14 = vld [vmem:[#allocation53_spill] sm:$0xff]  ;;  %v10152_v21 = vld [vmem:[#allocation54_spill] sm:$0xff] }
 0x81f   :  { %2421 = vmatmul.mubr.bf16.vlgmr.msra.gmra.mrb[56].mxu0 %v2263_v33  ;;  %2462 = vmatmul.mubr.bf16.vlgmr.msra.gmra.mrb[56].mxu1 %v2263_v33  ;;  %v10172_v33 = vld [vmem:[#allocation73_spill] sm:$0xff] }
 0x820   :  { %2497 = vmatpush1.bf16.msra.mxu0 %v10119_v29  ;;  %2538 = vmatpush1.bf16.msra.mxu1 %v10120_v28  ;;  %v10173_v29 = vld [vmem:[#allocation74_spill] sm:$0xff]  ;;  %v10174_v28 = vld [vmem:[#allocation75_spill] sm:$0xff] }
 0x821   :  { %2498 = vmatprep.subr.bf16.mxu0 %v10121_v24  ;;  %2539 = vmatprep.subr.bf16.mxu1 %v10122_v3  ;;  %v10175_v24 = vld [vmem:[#allocation4_spill] sm:$0xff]  ;;  %v10176_v3 = vld [vmem:[#allocation5_spill] sm:$0xff] }
 0x824   :  { %2499 = vmatpush1.bf16.msra.mxu0 %v10123_v36  ;;  %2540 = vmatpush1.bf16.msra.mxu1 %v10124_v23  ;;  %v10177_v36 = vld [vmem:[#allocation19_spill] sm:$0xff]  ;;  %v10178_v23 = vld [vmem:[#allocation20_spill] sm:$0xff] }
 0x825   :  { %2500 = vmatprep.subr.bf16.mxu0 %v10125_v39  ;;  %2541 = vmatprep.subr.bf16.mxu1 %v10126_v57  ;;  %v10179_v39 = vld [vmem:[#allocation21_spill] sm:$0xff]  ;;  %v10180_v57 = vld [vmem:[#allocation22_spill] sm:$0xff] }
 0x828   :  { %2501 = vmatpush1.bf16.msra.mxu0 %v10127_v6  ;;  %2542 = vmatpush1.bf16.msra.mxu1 %v10128_v34  ;;  %v7569_v6 = vld [vmem:[%s9130_s2 + $0x4] ss:$16 sps:$4 sm:$0xff]   ;;  %v7574_v34 = vld [vmem:[%s9130_s2 + $0xc] ss:$16 sps:$4 sm:$0xff]  }
 0x829   :  { %2502 = vmatprep.subr.bf16.mxu0 %v10129_v42  ;;  %2543 = vmatprep.subr.bf16.mxu1 %v10130_v11 }
 0x82c   :  { %2503 = vmatpush1.bf16.msra.mxu0 %v10131_v37  ;;  %2544 = vmatpush1.bf16.msra.mxu1 %v10132_v43 }
 0x82d   :  { %2504 = vmatprep.subr.bf16.mxu0 %v10133_v5  ;;  %2545 = vmatprep.subr.bf16.mxu1 %v10134_v4 }
 0x830   :  { %2505 = vmatpush1.bf16.msra.mxu0 %v10135_v41  ;;  %2546 = vmatpush1.bf16.msra.mxu1 %v10136_v45 }
 0x831   :  { %2506 = vmatprep.subr.bf16.mxu0 %v10137_v22  ;;  %2547 = vmatprep.subr.bf16.mxu1 %v10138_v25 }
 0x834   :  { %2507 = vmatpush1.bf16.msra.mxu0 %v10139_v40  ;;  %2548 = vmatpush1.bf16.msra.mxu1 %v10140_v30 }
 0x835   :  { %2508 = vmatprep.subr.bf16.mxu0 %v10141_v12  ;;  %2549 = vmatprep.subr.bf16.mxu1 %v10142_v51  ;;  %v10181_v12 = vld [vmem:[#allocation6_spill] sm:$0xff] }
 0x838   :  { %2509 = vmatpush1.bf16.msra.mxu0 %v10143_v47  ;;  %2550 = vmatpush1.bf16.msra.mxu1 %v10144_v50  ;;  %v10182_v47 = vld [vmem:[#allocation7_spill] sm:$0xff] }
 0x839   :  { %2510 = vmatprep.subr.bf16.mxu0 %v10145_v31  ;;  %2551 = vmatprep.subr.bf16.mxu1 %v10146_v0 }
 0x83c   :  { %2511 = vmatpush1.bf16.msra.mxu0 %v10147_v8  ;;  %2552 = vmatpush1.bf16.msra.mxu1 %v10148_v48 }
 0x83d   :  { %2512 = vmatprep.subr.bf16.mxu0 %v10149_v10  ;;  %2553 = vmatprep.subr.bf16.mxu1 %v10150_v13  ;;  %v2378_v13 = vpop.permute.xlu1 %2377 }
 0x840   :  { %2513 = vmatpush1.bf16.msra.mxu0 %v10151_v14  ;;  %2554 = vmatpush1.bf16.msra.mxu1 %v10152_v21 }
 0x841   :  { %2514 = vmatprep.subr.bf16.mxu0 %v10153_v62  ;;  %2555 = vmatprep.subr.bf16.mxu1 %v10154_v9  ;;  %v10183_v62 = vld [vmem:[#allocation60_spill] sm:$0xff] }
 0x842   :  { %v2380_v9 = vmul.f32 %v2378_v13, %v10183_v62  ;;  %v7647_v62 = vld [vmem:[%s9130_s2 + $0x4c] ss:$16 sps:$4 sm:$0xff]  }
 0x844   :  { %2515 = vmatpush1.bf16.msra.mxu0 %v10155_v18  ;;  %2556 = vmatpush1.bf16.msra.mxu1 %v10156_v15  ;;  %v10184_v15 = vld [vmem:[#allocation61_spill] sm:$0xff] }
 0x845   :  { %2516 = vmatprep.subr.bf16.mxu0 %v10157_v16  ;;  %2557 = vmatprep.subr.bf16.mxu1 %v10158_v27  ;;  %v2381_v16 = vmul.f32 %v2378_v13, %v10184_v15  ;;  %v7666_v15 = vld [vmem:[%s9130_s2 + $0x64] ss:$16 sps:$4 sm:$0xff]  }
 0x848   :  { %2517 = vmatpush1.bf16.msra.mxu0 %v10159_v7  ;;  %2558 = vmatpush1.bf16.msra.mxu1 %v10160_v60 }
 0x849   :  { %2518 = vmatprep.subr.bf16.mxu0 %v10161_v2  ;;  %2559 = vmatprep.subr.bf16.mxu1 %v10162_v52  ;;  %v2384_v52 = vadd.f32 %v2380_v9, %v9863_v19  ;;  %v7654_v9 = vld [vmem:[%s9130_s2 + $0x40] ss:$16 sps:$4 sm:$0xff]  }
 0x84c   :  { %2519 = vmatpush1.bf16.msra.mxu0 %v10163_v54  ;;  %2560 = vmatpush1.bf16.msra.mxu1 %v10164_v56 }
 0x84d   :  { %2520 = vmatprep.subr.bf16.mxu0 %v10165_v38  ;;  %2561 = vmatprep.subr.bf16.mxu1 %v10166_v26  ;;  %v2385_v38 = vadd.f32 %v2381_v16, %v9814_v63  ;;  %v2383_v63 = vmul.f32 %v2378_v13, %v5731_v53  ;;  %v7671_v16 = vld [vmem:[%s9130_s2 + $0x6c] ss:$16 sps:$4 sm:$0xff]  }
 0x850   :  { %2521 = vmatpush1.bf16.msra.mxu0 %v10167_v20  ;;  %2562 = vmatpush1.bf16.msra.mxu1 %v10168_v59 }
 0x851   :  { %2522 = vmatprep.subr.bf16.mxu0 %v10169_v61  ;;  %2563 = vmatprep.subr.bf16.mxu1 %v10170_v32 }
 0x854   :  { %2523 = vmatpush1.bf16.msra.mxu0 %v10171_v55  ;;  %2564 = vmatpush1.bf16.msra.mxu1 %v10172_v33 }
 0x855   :  { %2524 = vmatprep.subr.bf16.mxu0 %v10173_v29  ;;  %2565 = vmatprep.subr.bf16.mxu1 %v10174_v28  ;;  %v2382_v29 = vmul.f32 %v2378_v13, %v9815_v49  ;;  %v7630_v13 = vld [vmem:[%s9130_s2 + $0x20] ss:$16 sps:$4 sm:$0xff]  }
 0x858   :  { %2525 = vmatpush1.bf16.msra.mxu0 %v10175_v24  ;;  %2566 = vmatpush1.bf16.msra.mxu1 %v10176_v3  ;;  %v2386_v3 = vadd.f32 %v2382_v29, %v5734_v1  ;;  %v7764_v29 = vld [vmem:[%s9130_s2 + $0xe4] ss:$16 sps:$4 sm:$0xff]  }
 0x859   :  { %2526 = vmatprep.subr.bf16.mxu0 %v10177_v36  ;;  %2567 = vmatprep.subr.bf16.mxu1 %v10178_v23  ;;  %v2387_v23 = vadd.f32 %v2383_v63, %v5738_v35  ;;  %v7793_v63 = vld [vmem:[%s9130_s2 + $0x10c] ss:$16 sps:$4 sm:$0xff]  }
 0x85c   :  { %2527 = vmatpush1.bf16.msra.mxu0 %v10179_v39  ;;  %2568 = vmatpush1.bf16.msra.mxu1 %v10180_v57 }
 0x85d   :  { %2925 = vmatprep.subr.bf16.mxu0 %v7569_v6  ;;  %2966 = vmatprep.subr.bf16.mxu1 %v7574_v34 }
 0x8d2   :  { %v2299_v42 = vpop.f32.mrb[52].mxu0  ;;  %v2340_v11 = vpop.f32.mrb[52].mxu1 }
 0x8d3   :  { %v2300_v37 = vadd.f32 %v2299_v42, %v10043_v17  ;;  %v2301_v43 = vpop.f32.mrb[53].mxu0  ;;  %v2342_v5 = vpop.f32.mrb[53].mxu1  ;;  %v2341_v51 = vadd.f32 %v2340_v11, %v10181_v12 }
 0x8d4   :  { %v2302_v4 = vadd.f32 %v2301_v43, %v10044_v58  ;;  %v2303_v41 = vpop.f32.mrb[54].mxu0  ;;  %v2344_v45 = vpop.f32.mrb[54].mxu1  ;;  %v2343_v50 = vadd.f32 %v2342_v5, %v10182_v47 }
 0x8d5   :  { %v3938_v22 = vmul.f32 -1.442695, %v2300_v37  ;;  %v2304_v25 = vpop.f32.mrb[55].mxu0  ;;  %v2345_v40 = vpop.f32.mrb[55].mxu1  ;;  %v3940_v31 = vmul.f32 -1.442695, %v2341_v51 }
 0x8d6   :  { %v3939_v30 = vmul.f32 -1.442695, %v2302_v4 }
 0x8d7   :  { %4494 = vpow2.f32 %v3938_v22 }
 0x8d8   :  { %4496 = vpow2.f32 %v3939_v30 }
 0x8d9   :  { %4498 = vtanh.f32 %v2343_v50 }
 0x8da   :  { %4500 = vpow2.f32 %v3940_v31 }
 0x8e1   :  { %v4495_v0 = vpop.eup %4494 }
 0x8e2   :  { %v2356_v8 = vadd.f32 1.0, %v4495_v0  ;;  %v4497_v48 = vpop.eup %4496  ;;  %v7604_v0 = vld [vmem:[%s9130_s2] ss:$16 sps:$4 sm:$0xff]  }
 0x8e3   :  { %v2357_v10 = vadd.f32 1.0, %v4497_v48  ;;  %v4499_v14 = vpop.eup %4498 }
 0x8e4   :  { %4502 = vrcp.f32 %v2356_v8  ;;  %v4501_v21 = vpop.eup %4500  ;;  %v7609_v8 = vld [vmem:[%s9130_s2 + $0x8] ss:$16 sps:$4 sm:$0xff]  }
 0x8e5   :  { %4504 = vrcp.f32 %v2357_v10  ;;  %v2358_v60 = vadd.f32 1.0, %v4501_v21  ;;  %v7621_v10 = vld [vmem:[%s9130_s2 + $0x2c] ss:$16 sps:$4 sm:$0xff]   ;;  %v7642_v21 = vld [vmem:[%s9130_s2 + $0x44] ss:$16 sps:$4 sm:$0xff]  }
 0x8e7   :  { %4506 = vrcp.f32 %v2358_v60  ;;  %v7692_v60 = vld [vmem:[%s9130_s2 + $0x84] ss:$16 sps:$4 sm:$0xff]  }
 0x8ee   :  { %v4503_v18 = vpop.eup %4502 }
 0x8ef   :  { %v2367_v27 = vmul.f32 %v4503_v18, %v4499_v14  ;;  %v4505_v7 = vpop.eup %4504  ;;  %v7635_v14 = vld [vmem:[%s9130_s2 + $0x28] ss:$16 sps:$4 sm:$0xff]  }
 0x8f0   :  { %v2366_v2 = vmul.f32 %v4505_v7, %v7456_v46  ;;  %v7659_v18 = vld [vmem:[%s9130_s2 + $0x48] ss:$16 sps:$4 sm:$0xff]  }
 0x8f1   :  { %v4507_v39 = vpop.eup %4506  ;;  %v7683_v7 = vld [vmem:[%s9130_s2 + $0x68] ss:$16 sps:$4 sm:$0xff]  }
 0x8f2   :  { %v2422_v54 = vpop.f32.mrb[56].mxu0  ;;  %v2463_v56 = vpop.f32.mrb[56].mxu1  ;;  %v7587_v26 = vadd.f32 %v2367_v27, %v2366_v2  ;;  %v7678_v27 = vld [vmem:[%s9130_s2 + $0x60] ss:$16 sps:$4 sm:$0xff]   ;;  %v7697_v2 = vld [vmem:[%s9130_s2 + $0x8c] ss:$16 sps:$4 sm:$0xff]  }
 0x8f3   :  { %v2423_v20 = vadd.f32 %v2422_v54, %v2384_v52  ;;  %v2424_v59 = vpop.f32.mrb[57].mxu0  ;;  %v2465_v61 = vpop.f32.mrb[57].mxu1  ;;  %v2464_v36 = vadd.f32 %v2463_v56, %v2386_v3  ;;  %v7702_v52 = vld [vmem:[%s9130_s2 + $0x80] ss:$16 sps:$4 sm:$0xff]   ;;  %v7707_v54 = vld [vmem:[%s9130_s2 + $0x88] ss:$16 sps:$4 sm:$0xff]  }
 0x8f4   :  { %v2425_v32 = vadd.f32 %v2424_v59, %v2385_v38  ;;  %v2426_v55 = vpop.f32.mrb[58].mxu0  ;;  %v2467_v33 = vpop.f32.mrb[58].mxu1  ;;  %4508 = vtanh.f32 %v7587_v26  ;;  %v2466_v57 = vadd.f32 %v2465_v61, %v2387_v23  ;;  %v7716_v56 = vld [vmem:[%s9130_s2 + $0xa4] ss:$16 sps:$4 sm:$0xff]   ;;  %v7721_v38 = vld [vmem:[%s9130_s2 + $0xac] ss:$16 sps:$4 sm:$0xff]  }
 0x8f5   :  { %v3943_v46 = vmul.f32 -1.442695, %v2423_v20  ;;  %v2427_v28 = vpop.f32.mrb[59].mxu0  ;;  %v2468_v19 = vpop.f32.mrb[59].mxu1  ;;  %v3945_v11 = vmul.f32 -1.442695, %v2464_v36 }
 0x8f6   :  { %v3944_v24 = vmul.f32 -1.442695, %v2425_v32  ;;  %v7726_v20 = vld [vmem:[%s9130_s2 + $0xa0] ss:$16 sps:$4 sm:$0xff]   ;;  %v7731_v59 = vld [vmem:[%s9130_s2 + $0xa8] ss:$16 sps:$4 sm:$0xff]  }
 0x8f7   :  { %4510 = vpow2.f32 %v3943_v46  ;;  %v7740_v61 = vld [vmem:[%s9130_s2 + $0xc4] ss:$16 sps:$4 sm:$0xff]   ;;  %v7745_v32 = vld [vmem:[%s9130_s2 + $0xcc] ss:$16 sps:$4 sm:$0xff]   ;;  %v7750_v55 = vld [vmem:[%s9130_s2 + $0xc0] ss:$16 sps:$4 sm:$0xff]  }
 0x8f8   :  { %4512 = vpow2.f32 %v3944_v24  ;;  %v7755_v33 = vld [vmem:[%s9130_s2 + $0xc8] ss:$16 sps:$4 sm:$0xff]   ;;  %v7769_v46 = vld [vmem:[%s9130_s2 + $0xec] ss:$16 sps:$4 sm:$0xff]   ;;  %v7774_v28 = vld [vmem:[%s9130_s2 + $0xe0] ss:$16 sps:$4 sm:$0xff]  }
 0x8f9   :  { %4514 = vtanh.f32 %v2466_v57  ;;  %v7779_v19 = vld [vmem:[%s9130_s2 + $0xe8] ss:$16 sps:$4 sm:$0xff]   ;;  %v7788_v24 = vld [vmem:[%s9130_s2 + $0x104] ss:$16 sps:$4 sm:$0xff]   ;;  %v7798_v3 = vld [vmem:[%s9130_s2 + $0x100] ss:$16 sps:$4 sm:$0xff]  }
 0x8fa   :  { %4516 = vpow2.f32 %v3945_v11  ;;  %v7803_v36 = vld [vmem:[%s9130_s2 + $0x108] ss:$16 sps:$4 sm:$0xff]   ;;  %v7812_v23 = vld [vmem:[%s9130_s2 + $0x124] ss:$16 sps:$4 sm:$0xff]   ;;  %v7822_v57 = vld [vmem:[%s9130_s2 + $0x120] ss:$16 sps:$4 sm:$0xff]  }
 0x8fb   :  { %v7836_v11 = vld [vmem:[%s9130_s2 + $0x144] ss:$16 sps:$4 sm:$0xff]  }
 0x8fc   :  { %10186 = vst [vmem:[#allocation24_spill] sm:$0xff] %v7836_v11 }
 0x8fe   :  { %v4509_v42 = vpop.eup %4508 }
 0x8ff   :  { %v2370_v49 = vmul.f32 %v4509_v42, %v4507_v39  ;;  %v7817_v39 = vld [vmem:[%s9130_s2 + $0x12c] ss:$16 sps:$4 sm:$0xff]   ;;  %v7827_v42 = vld [vmem:[%s9130_s2 + $0x128] ss:$16 sps:$4 sm:$0xff]  }
 0x900   :  { %10185 = vst [vmem:[#allocation23_spill] sm:$0xff] %v7827_v42 }
 0x901   :  { %v4511_v37 = vpop.eup %4510  ;;  %3941 = vst [vmem:[%s9129_s8 + $0x30] sm:$0xff] %v2370_v49  ;;  %v2495_v5 = vpack.c.bf16 %v2370_v49, %v2370_v49  ;;  %v7841_v49 = vld [vmem:[%s9130_s2 + $0x14c] ss:$16 sps:$4 sm:$0xff]  }
 0x902   :  { %v2479_v43 = vadd.f32 1.0, %v4511_v37  ;;  %v4513_v53 = vpop.eup %4512  ;;  %10187 = vst [vmem:[#allocation25_spill] sm:$0xff] %v7841_v49  ;;  %v7846_v37 = vld [vmem:[%s9130_s2 + $0x140] ss:$16 sps:$4 sm:$0xff]  }
 0x903   :  { %v2480_v1 = vadd.f32 1.0, %v4513_v53  ;;  %2528 = vmatprep.mubr.bf16.mxu0 %v2495_v5  ;;  %2569 = vmatprep.mubr.bf16.mxu1 %v2495_v5  ;;  %v4515_v35 = vpop.eup %4514  ;;  %10188 = vst [vmem:[#allocation26_spill] sm:$0xff] %v7846_v37  ;;  %v7860_v5 = vld [vmem:[%s9130_s2 + $0x164] ss:$16 sps:$4 sm:$0xff]   ;;  %v7865_v53 = vld [vmem:[%s9130_s2 + $0x16c] ss:$16 sps:$4 sm:$0xff]  }
 0x904   :  { %4518 = vrcp.f32 %v2479_v43  ;;  %v4517_v4 = vpop.eup %4516  ;;  %v7851_v43 = vld [vmem:[%s9130_s2 + $0x148] ss:$16 sps:$4 sm:$0xff]   ;;  %10190 = vst [vmem:[#allocation3_spill] sm:$0xff] %v7860_v5  ;;  %10191 = vst [vmem:[#allocation64_spill] sm:$0xff] %v7865_v53 }
 0x905   :  { %4520 = vrcp.f32 %v2480_v1  ;;  %v2481_v25 = vadd.f32 1.0, %v4517_v4  ;;  %10189 = vst [vmem:[#allocation2_spill] sm:$0xff] %v7851_v43  ;;  %v7870_v1 = vld [vmem:[%s9130_s2 + $0x160] ss:$16 sps:$4 sm:$0xff]   ;;  %v7884_v4 = vld [vmem:[%s9130_s2 + $0x184] ss:$16 sps:$4 sm:$0xff]  }
 0x906   :  { %10192 = vst [vmem:[#allocation66_spill] sm:$0xff] %v7870_v1  ;;  %10194 = vst [vmem:[#allocation28_spill] sm:$0xff] %v7884_v4 }
 0x907   :  { %4522 = vrcp.f32 %v2481_v25  ;;  %v7906_v25 = vld [vmem:[%s9130_s2 + $0x1a4] ss:$16 sps:$4 sm:$0xff]  }
 0x908   :  { %10198 = vst [vmem:[#allocation32_spill] sm:$0xff] %v7906_v25 }
 0x90e   :  { %v4519_v41 = vpop.eup %4518 }
 0x90f   :  { %v2490_v45 = vmul.f32 %v4519_v41, %v4515_v35  ;;  %v4521_v22 = vpop.eup %4520  ;;  %v7875_v35 = vld [vmem:[%s9130_s2 + $0x168] ss:$16 sps:$4 sm:$0xff]   ;;  %v7889_v41 = vld [vmem:[%s9130_s2 + $0x18c] ss:$16 sps:$4 sm:$0xff]  }
 0x910   :  { %v2489_v40 = vmul.f32 %v4521_v22, %v7467_v44  ;;  %v7616_v44 = vld [vmem:[%s9130_s2 + $0x24] ss:$16 sps:$4 sm:$0xff]   ;;  %10193 = vst [vmem:[#allocation27_spill] sm:$0xff] %v7875_v35  ;;  %10195 = vst [vmem:[#allocation29_spill] sm:$0xff] %v7889_v41  ;;  %v7899_v22 = vld [vmem:[%s9130_s2 + $0x188] ss:$16 sps:$4 sm:$0xff]  }
 0x911   :  { %v4523_v51 = vpop.eup %4522  ;;  %10197 = vst [vmem:[#allocation31_spill] sm:$0xff] %v7899_v22 }
 0x912   :  { %v7598_v30 = vadd.f32 %v2490_v45, %v2489_v40  ;;  %v7894_v45 = vld [vmem:[%s9130_s2 + $0x180] ss:$16 sps:$4 sm:$0xff]   ;;  %v7911_v40 = vld [vmem:[%s9130_s2 + $0x1ac] ss:$16 sps:$4 sm:$0xff]  }
 0x913   :  { %10196 = vst [vmem:[#allocation30_spill] sm:$0xff] %v7894_v45  ;;  %10199 = vst [vmem:[#allocation33_spill] sm:$0xff] %v7911_v40 }
 0x914   :  { %4524 = vtanh.f32 %v7598_v30 }
 0x91e   :  { %v4525_v50 = vpop.eup %4524 }
 0x91f   :  { %v2493_v31 = vmul.f32 %v4525_v50, %v4523_v51  ;;  %v7918_v51 = vld [vmem:[%s9130_s2 + $0x1a0] ss:$16 sps:$4 sm:$0xff]   ;;  %v7923_v50 = vld [vmem:[%s9130_s2 + $0x1a8] ss:$16 sps:$4 sm:$0xff]  }
 0x920   :  { %10200 = vst [vmem:[#allocation34_spill] sm:$0xff] %v7918_v51  ;;  %10201 = vst [vmem:[#allocation35_spill] sm:$0xff] %v7923_v50 }
 0x921   :  { %v7611_v48 = vpack.c.bf16 %v2493_v31, %v2493_v31  ;;  %v7930_v31 = vld [vmem:[%s9130_s2 + $0x1c4] ss:$16 sps:$4 sm:$0xff]  }
 0x922   :  { %10202 = vst [vmem:[#allocation36_spill] sm:$0xff] %v7930_v31 }
 0x923   :  { %2529 = vmatmul.mubr.bf16.vlgmr.msra.gmra.mrb[60].mxu0 %v7611_v48  ;;  %2570 = vmatmul.mubr.bf16.vlgmr.msra.gmra.mrb[60].mxu1 %v7611_v48 }
 0x924   :  { %2926 = vmatpush1.bf16.msra.mxu0 %v7604_v0  ;;  %2967 = vmatpush1.bf16.msra.mxu1 %v7609_v8 }
 0x925   :  { %2927 = vmatprep.subr.bf16.mxu0 %v7616_v44  ;;  %2968 = vmatprep.subr.bf16.mxu1 %v7621_v10 }
 0x928   :  { %2928 = vmatpush1.bf16.msra.mxu0 %v7630_v13  ;;  %2969 = vmatpush1.bf16.msra.mxu1 %v7635_v14 }
 0x929   :  { %2929 = vmatprep.subr.bf16.mxu0 %v7642_v21  ;;  %2970 = vmatprep.subr.bf16.mxu1 %v7647_v62 }
 0x92c   :  { %2930 = vmatpush1.bf16.msra.mxu0 %v7654_v9  ;;  %2971 = vmatpush1.bf16.msra.mxu1 %v7659_v18 }
 0x92d   :  { %2931 = vmatprep.subr.bf16.mxu0 %v7666_v15  ;;  %2972 = vmatprep.subr.bf16.mxu1 %v7671_v16 }
 0x930   :  { %2932 = vmatpush1.bf16.msra.mxu0 %v7678_v27  ;;  %2973 = vmatpush1.bf16.msra.mxu1 %v7683_v7 }
 0x931   :  { %2933 = vmatprep.subr.bf16.mxu0 %v7692_v60  ;;  %2974 = vmatprep.subr.bf16.mxu1 %v7697_v2 }
 0x934   :  { %2934 = vmatpush1.bf16.msra.mxu0 %v7702_v52  ;;  %2975 = vmatpush1.bf16.msra.mxu1 %v7707_v54 }
 0x935   :  { %2935 = vmatprep.subr.bf16.mxu0 %v7716_v56  ;;  %2976 = vmatprep.subr.bf16.mxu1 %v7721_v38 }
 0x938   :  { %2936 = vmatpush1.bf16.msra.mxu0 %v7726_v20  ;;  %2977 = vmatpush1.bf16.msra.mxu1 %v7731_v59 }
 0x939   :  { %2937 = vmatprep.subr.bf16.mxu0 %v7740_v61  ;;  %2978 = vmatprep.subr.bf16.mxu1 %v7745_v32 }
 0x93c   :  { %2938 = vmatpush1.bf16.msra.mxu0 %v7750_v55  ;;  %2979 = vmatpush1.bf16.msra.mxu1 %v7755_v33 }
 0x93d   :  { %2939 = vmatprep.subr.bf16.mxu0 %v7764_v29  ;;  %2980 = vmatprep.subr.bf16.mxu1 %v7769_v46 }
 0x940   :  { %2940 = vmatpush1.bf16.msra.mxu0 %v7774_v28  ;;  %2981 = vmatpush1.bf16.msra.mxu1 %v7779_v19 }
 0x941   :  { %2941 = vmatprep.subr.bf16.mxu0 %v7788_v24  ;;  %2982 = vmatprep.subr.bf16.mxu1 %v7793_v63 }
 0x944   :  { %2942 = vmatpush1.bf16.msra.mxu0 %v7798_v3  ;;  %2983 = vmatpush1.bf16.msra.mxu1 %v7803_v36 }
 0x945   :  { %2943 = vmatprep.subr.bf16.mxu0 %v7812_v23  ;;  %2984 = vmatprep.subr.bf16.mxu1 %v7817_v39 }
 0x948   :  { %2944 = vmatpush1.bf16.msra.mxu0 %v7822_v57  ;;  %2985 = vmatpush1.bf16.msra.mxu1 %v7827_v42 }
 0x949   :  { %2945 = vmatprep.subr.bf16.mxu0 %v7836_v11  ;;  %2986 = vmatprep.subr.bf16.mxu1 %v7841_v49 }
 0x94c   :  { %2946 = vmatpush1.bf16.msra.mxu0 %v7846_v37  ;;  %2987 = vmatpush1.bf16.msra.mxu1 %v7851_v43 }
 0x94d   :  { %2947 = vmatprep.subr.bf16.mxu0 %v7860_v5  ;;  %2988 = vmatprep.subr.bf16.mxu1 %v7865_v53 }
 0x950   :  { %2948 = vmatpush1.bf16.msra.mxu0 %v7870_v1  ;;  %2989 = vmatpush1.bf16.msra.mxu1 %v7875_v35 }
 0x951   :  { %2949 = vmatprep.subr.bf16.mxu0 %v7884_v4  ;;  %2990 = vmatprep.subr.bf16.mxu1 %v7889_v41 }
 0x954   :  { %2950 = vmatpush1.bf16.msra.mxu0 %v7894_v45  ;;  %2991 = vmatpush1.bf16.msra.mxu1 %v7899_v22  ;;  %v7935_v22 = vld [vmem:[%s9130_s2 + $0x1cc] ss:$16 sps:$4 sm:$0xff]  }
 0x955   :  { %2951 = vmatprep.subr.bf16.mxu0 %v7906_v25  ;;  %2992 = vmatprep.subr.bf16.mxu1 %v7911_v40  ;;  %10203 = vst [vmem:[#allocation37_spill] sm:$0xff] %v7935_v22  ;;  %v7942_v25 = vld [vmem:[%s9130_s2 + $0x1c0] ss:$16 sps:$4 sm:$0xff]   ;;  %v7947_v40 = vld [vmem:[%s9130_s2 + $0x1c8] ss:$16 sps:$4 sm:$0xff]  }
 0x956   :  { %10204 = vst [vmem:[#allocation38_spill] sm:$0xff] %v7942_v25  ;;  %10205 = vst [vmem:[#allocation39_spill] sm:$0xff] %v7947_v40 }
 0x958   :  { %2952 = vmatpush1.bf16.msra.mxu0 %v7918_v51  ;;  %2993 = vmatpush1.bf16.msra.mxu1 %v7923_v50  ;;  %v7954_v51 = vld [vmem:[%s9130_s2 + $0x1e4] ss:$16 sps:$4 sm:$0xff]   ;;  %v7959_v50 = vld [vmem:[%s9130_s2 + $0x1ec] ss:$16 sps:$4 sm:$0xff]  }
 0x959   :  { %2953 = vmatprep.subr.bf16.mxu0 %v7930_v31  ;;  %2994 = vmatprep.subr.bf16.mxu1 %v7935_v22  ;;  %10206 = vst [vmem:[#allocation40_spill] sm:$0xff] %v7954_v51  ;;  %10207 = vst [vmem:[#allocation41_spill] sm:$0xff] %v7959_v50  ;;  %v7966_v31 = vld [vmem:[%s9130_s2 + $0x1e0] ss:$16 sps:$4 sm:$0xff]   ;;  %v7971_v22 = vld [vmem:[%s9130_s2 + $0x1e8] ss:$16 sps:$4 sm:$0xff]  }
 0x95a   :  { %10208 = vst [vmem:[#allocation42_spill] sm:$0xff] %v7966_v31  ;;  %10209 = vst [vmem:[#allocation43_spill] sm:$0xff] %v7971_v22 }
 0x95c   :  { %2954 = vmatpush1.bf16.msra.mxu0 %v7942_v25  ;;  %2995 = vmatpush1.bf16.msra.mxu1 %v7947_v40  ;;  %v7980_v40 = vld [vmem:[%s9125_s3 + $0x4] ss:$16 sps:$4 sm:$0xff]   ;;  %v7986_v25 = vld [vmem:[%s9125_s3 + $0xc] ss:$16 sps:$4 sm:$0xff]  }
 0x95d   :  { %2955 = vmatprep.subr.bf16.mxu0 %v7954_v51  ;;  %2996 = vmatprep.subr.bf16.mxu1 %v7959_v50  ;;  %10210 = vst [vmem:[#allocation44_spill] sm:$0xff] %v7980_v40  ;;  %10211 = vst [vmem:[#allocation17_spill] sm:$0xff] %v7986_v25 }
 0x960   :  { %2956 = vmatpush1.bf16.msra.mxu0 %v7966_v31  ;;  %2997 = vmatpush1.bf16.msra.mxu1 %v7971_v22 }
 0x961   :  { %3032 = vmatprep.subr.bf16.mxu0 %v7980_v40  ;;  %3073 = vmatprep.subr.bf16.mxu1 %v7986_v25 }
 0x9f6   :  { %v2530_v51 = vpop.f32.mrb[60].mxu0  ;;  %v2571_v50 = vpop.f32.mrb[60].mxu1 }
 0x9f7   :  { %v2531_v31 = vadd.f32 %v2530_v51, %v10043_v17  ;;  %v2532_v45 = vpop.f32.mrb[61].mxu0  ;;  %v2573_v22 = vpop.f32.mrb[61].mxu1  ;;  %v2572_v43 = vadd.f32 %v2571_v50, %v10181_v12 }
 0x9f8   :  { %v2533_v41 = vadd.f32 %v2532_v45, %v10044_v58  ;;  %v2534_v4 = vpop.f32.mrb[62].mxu0  ;;  %v2575_v35 = vpop.f32.mrb[62].mxu1  ;;  %v2574_v25 = vadd.f32 %v2573_v22, %v10182_v47 }
 0x9f9   :  { %v3946_v1 = vmul.f32 -1.442695, %v2531_v31  ;;  %v2535_v53 = vpop.f32.mrb[63].mxu0  ;;  %v2576_v40 = vpop.f32.mrb[63].mxu1  ;;  %v3948_v37 = vmul.f32 -1.442695, %v2572_v43 }
 0x9fa   :  { %v3947_v5 = vmul.f32 -1.442695, %v2533_v41  ;;  %v8029_v31 = vld [vmem:[%s9125_s3 + $0x20] ss:$16 sps:$4 sm:$0xff]  }
 0x9fb   :  { %4526 = vpow2.f32 %v3946_v1  ;;  %10216 = vst [vmem:[#allocation48_spill] sm:$0xff] %v8029_v31 }
 0x9fc   :  { %4528 = vpow2.f32 %v3947_v5 }
 0x9fd   :  { %4530 = vtanh.f32 %v2574_v25  ;;  %v8023_v25 = vld [vmem:[%s9125_s3 + $0x2c] ss:$16 sps:$4 sm:$0xff]  }
 0x9fe   :  { %4532 = vpow2.f32 %v3948_v37  ;;  %v8011_v37 = vld [vmem:[%s9125_s3 + $0x8] ss:$16 sps:$4 sm:$0xff]   ;;  %10215 = vst [vmem:[#allocation47_spill] sm:$0xff] %v8023_v25 }
 0x9ff   :  { %10213 = vst [vmem:[#allocation45_spill] sm:$0xff] %v8011_v37 }
 0xa05   :  { %v4527_v49 = vpop.eup %4526 }
 0xa06   :  { %v2587_v11 = vadd.f32 1.0, %v4527_v49  ;;  %v4529_v51 = vpop.eup %4528 }
 0xa07   :  { %v2588_v45 = vadd.f32 1.0, %v4529_v51  ;;  %v4531_v35 = vpop.eup %4530  ;;  %v8035_v51 = vld [vmem:[%s9125_s3 + $0x28] ss:$16 sps:$4 sm:$0xff]  }
 0xa08   :  { %4534 = vrcp.f32 %v2587_v11  ;;  %v4533_v4 = vpop.eup %4532  ;;  %10217 = vst [vmem:[#allocation49_spill] sm:$0xff] %v8035_v51 }
 0xa09   :  { %4536 = vrcp.f32 %v2588_v45  ;;  %v2589_v1 = vadd.f32 1.0, %v4533_v4  ;;  %v8041_v45 = vld [vmem:[%s9125_s3 + $0x44] ss:$16 sps:$4 sm:$0xff]   ;;  %v8053_v4 = vld [vmem:[%s9125_s3 + $0x40] ss:$16 sps:$4 sm:$0xff]  }
 0xa0a   :  { %10218 = vst [vmem:[#allocation50_spill] sm:$0xff] %v8041_v45  ;;  %10220 = vst [vmem:[#allocation52_spill] sm:$0xff] %v8053_v4 }
 0xa0b   :  { %4538 = vrcp.f32 %v2589_v1  ;;  %v8077_v1 = vld [vmem:[%s9125_s3 + $0x60] ss:$16 sps:$4 sm:$0xff]  }
 0xa0c   :  { %10224 = vst [vmem:[#allocation56_spill] sm:$0xff] %v8077_v1 }
 0xa12   :  { %v4535_v53 = vpop.eup %4534 }
 0xa13   :  { %v2598_v40 = vmul.f32 %v4535_v53, %v4531_v35  ;;  %v4537_v41 = vpop.eup %4536  ;;  %v8047_v35 = vld [vmem:[%s9125_s3 + $0x4c] ss:$16 sps:$4 sm:$0xff]   ;;  %v8059_v53 = vld [vmem:[%s9125_s3 + $0x48] ss:$16 sps:$4 sm:$0xff]  }
 0xa14   :  { %v2597_v5 = vmul.f32 %v4537_v41, %v7587_v26  ;;  %v8005_v26 = vld [vmem:[%s9125_s3] ss:$16 sps:$4 sm:$0xff]   ;;  %10219 = vst [vmem:[#allocation51_spill] sm:$0xff] %v8047_v35  ;;  %10221 = vst [vmem:[#allocation53_spill] sm:$0xff] %v8059_v53  ;;  %v8071_v41 = vld [vmem:[%s9125_s3 + $0x6c] ss:$16 sps:$4 sm:$0xff]  }
 0xa15   :  { %v4539_v49 = vpop.eup %4538  ;;  %10212 = vst [vmem:[#allocation18_spill] sm:$0xff] %v8005_v26  ;;  %10223 = vst [vmem:[#allocation55_spill] sm:$0xff] %v8071_v41 }
 0xa16   :  { %v7994_v50 = vadd.f32 %v2598_v40, %v2597_v5  ;;  %v8065_v40 = vld [vmem:[%s9125_s3 + $0x64] ss:$16 sps:$4 sm:$0xff]   ;;  %v8083_v5 = vld [vmem:[%s9125_s3 + $0x68] ss:$16 sps:$4 sm:$0xff]  }
 0xa17   :  { %10222 = vst [vmem:[#allocation54_spill] sm:$0xff] %v8065_v40  ;;  %10225 = vst [vmem:[#allocation57_spill] sm:$0xff] %v8083_v5 }
 0xa18   :  { %4540 = vtanh.f32 %v7994_v50 }
 0xa22   :  { %v4541_v43 = vpop.eup %4540 }
 0xa23   :  { %v2601_v22 = vmul.f32 %v4541_v43, %v4539_v49  ;;  %v8089_v49 = vld [vmem:[%s9125_s3 + $0x84] ss:$16 sps:$4 sm:$0xff]   ;;  %v8095_v43 = vld [vmem:[%s9125_s3 + $0x8c] ss:$16 sps:$4 sm:$0xff]  }
 0xa24   :  { %10226 = vst [vmem:[#allocation63_spill] sm:$0xff] %v8089_v49  ;;  %10227 = vst [vmem:[#allocation8_spill] sm:$0xff] %v8095_v43 }
 0xa25   :  { %3949 = vst [vmem:[%s9129_s8 + $0x38] sm:$0xff] %v2601_v22  ;;  %v2604_v11 = vpack.c.bf16 %v2601_v22, %v2601_v22  ;;  %v8101_v22 = vld [vmem:[%s9125_s3 + $0x80] ss:$16 sps:$4 sm:$0xff]  }
 0xa26   :  { %10228 = vst [vmem:[#allocation9_spill] sm:$0xff] %v8101_v22 }
 0xa27   :  { %2957 = vmatprep.mubr.bf16.mxu0 %v2604_v11  ;;  %2998 = vmatprep.mubr.bf16.mxu1 %v2604_v11 }
 0xa28   :  { %2958 = vmatmul.mubr.bf16.vlgmr.msra.gmra.mrb[64].mxu0 %v7611_v48  ;;  %2999 = vmatmul.mubr.bf16.vlgmr.msra.gmra.mrb[64].mxu1 %v7611_v48  ;;  %v8017_v48 = vld [vmem:[%s9125_s3 + $0x24] ss:$16 sps:$4 sm:$0xff]  }
 0xa29   :  { %3064 = vmatprep.mubr.bf16.mxu0 %v2604_v11  ;;  %3105 = vmatprep.mubr.bf16.mxu1 %v2604_v11  ;;  %10214 = vst [vmem:[#allocation46_spill] sm:$0xff] %v8017_v48  ;;  %v8107_v11 = vld [vmem:[%s9125_s3 + $0x88] ss:$16 sps:$4 sm:$0xff]  }
 0xa2a   :  { %3033 = vmatpush1.bf16.msra.mxu0 %v8005_v26  ;;  %3074 = vmatpush1.bf16.msra.mxu1 %v8011_v37  ;;  %10229 = vst [vmem:[#allocation10_spill] sm:$0xff] %v8107_v11 }
 0xa2b   :  { %3034 = vmatprep.subr.bf16.mxu0 %v8017_v48  ;;  %3075 = vmatprep.subr.bf16.mxu1 %v8023_v25 }
 0xa2e   :  { %3035 = vmatpush1.bf16.msra.mxu0 %v8029_v31  ;;  %3076 = vmatpush1.bf16.msra.mxu1 %v8035_v51 }
 0xa2f   :  { %3036 = vmatprep.subr.bf16.mxu0 %v8041_v45  ;;  %3077 = vmatprep.subr.bf16.mxu1 %v8047_v35 }
 0xa32   :  { %3037 = vmatpush1.bf16.msra.mxu0 %v8053_v4  ;;  %3078 = vmatpush1.bf16.msra.mxu1 %v8059_v53 }
 0xa33   :  { %3038 = vmatprep.subr.bf16.mxu0 %v8065_v40  ;;  %3079 = vmatprep.subr.bf16.mxu1 %v8071_v41 }
 0xa36   :  { %3039 = vmatpush1.bf16.msra.mxu0 %v8077_v1  ;;  %3080 = vmatpush1.bf16.msra.mxu1 %v8083_v5  ;;  %v10276_v1 = vld [vmem:[#allocation59_spill] sm:$0xff] }
 0xa37   :  { %3040 = vmatprep.subr.bf16.mxu0 %v8089_v49  ;;  %3081 = vmatprep.subr.bf16.mxu1 %v8095_v43  ;;  %v8113_v49 = vld [vmem:[%s9125_s3 + $0xa4] ss:$16 sps:$4 sm:$0xff]   ;;  %v8119_v43 = vld [vmem:[%s9125_s3 + $0xac] ss:$16 sps:$4 sm:$0xff]  }
 0xa38   :  { %10230 = vst [vmem:[#allocation11_spill] sm:$0xff] %v8113_v49  ;;  %10231 = vst [vmem:[#allocation12_spill] sm:$0xff] %v8119_v43 }
 0xa3a   :  { %3041 = vmatpush1.bf16.msra.mxu0 %v8101_v22  ;;  %3082 = vmatpush1.bf16.msra.mxu1 %v8107_v11  ;;  %v8125_v22 = vld [vmem:[%s9125_s3 + $0xa0] ss:$16 sps:$4 sm:$0xff]   ;;  %v8131_v11 = vld [vmem:[%s9125_s3 + $0xa8] ss:$16 sps:$4 sm:$0xff]  }
 0xa3b   :  { %3042 = vmatprep.subr.bf16.mxu0 %v8113_v49  ;;  %3083 = vmatprep.subr.bf16.mxu1 %v8119_v43  ;;  %10232 = vst [vmem:[#allocation13_spill] sm:$0xff] %v8125_v22  ;;  %10233 = vst [vmem:[#allocation14_spill] sm:$0xff] %v8131_v11  ;;  %v8137_v49 = vld [vmem:[%s9125_s3 + $0xc4] ss:$16 sps:$4 sm:$0xff]   ;;  %v8143_v43 = vld [vmem:[%s9125_s3 + $0xcc] ss:$16 sps:$4 sm:$0xff]  }
 0xa3c   :  { %10234 = vst [vmem:[#allocation15_spill] sm:$0xff] %v8137_v49  ;;  %10235 = vst [vmem:[#allocation16_spill] sm:$0xff] %v8143_v43 }
 0xa3e   :  { %3043 = vmatpush1.bf16.msra.mxu0 %v8125_v22  ;;  %3084 = vmatpush1.bf16.msra.mxu1 %v8131_v11  ;;  %v8149_v22 = vld [vmem:[%s9125_s3 + $0xc0] ss:$16 sps:$4 sm:$0xff]   ;;  %v8155_v11 = vld [vmem:[%s9125_s3 + $0xc8] ss:$16 sps:$4 sm:$0xff]  }
 0xa3f   :  { %3044 = vmatprep.subr.bf16.mxu0 %v8137_v49  ;;  %3085 = vmatprep.subr.bf16.mxu1 %v8143_v43  ;;  %10236 = vst [vmem:[#allocation67_spill] sm:$0xff] %v8149_v22  ;;  %10237 = vst [vmem:[#allocation68_spill] sm:$0xff] %v8155_v11  ;;  %v8161_v49 = vld [vmem:[%s9125_s3 + $0xe4] ss:$16 sps:$4 sm:$0xff]   ;;  %v8167_v43 = vld [vmem:[%s9125_s3 + $0xec] ss:$16 sps:$4 sm:$0xff]  }
 0xa40   :  { %10238 = vst [vmem:[#allocation69_spill] sm:$0xff] %v8161_v49  ;;  %10239 = vst [vmem:[#allocation70_spill] sm:$0xff] %v8167_v43 }
 0xa42   :  { %3045 = vmatpush1.bf16.msra.mxu0 %v8149_v22  ;;  %3086 = vmatpush1.bf16.msra.mxu1 %v8155_v11  ;;  %v8173_v22 = vld [vmem:[%s9125_s3 + $0xe0] ss:$16 sps:$4 sm:$0xff]   ;;  %v8179_v11 = vld [vmem:[%s9125_s3 + $0xe8] ss:$16 sps:$4 sm:$0xff]  }
 0xa43   :  { %3046 = vmatprep.subr.bf16.mxu0 %v8161_v49  ;;  %3087 = vmatprep.subr.bf16.mxu1 %v8167_v43  ;;  %10240 = vst [vmem:[#allocation71_spill] sm:$0xff] %v8173_v22  ;;  %10241 = vst [vmem:[#allocation72_spill] sm:$0xff] %v8179_v11  ;;  %v8185_v49 = vld [vmem:[%s9125_s3 + $0x104] ss:$16 sps:$4 sm:$0xff]   ;;  %v8191_v43 = vld [vmem:[%s9125_s3 + $0x10c] ss:$16 sps:$4 sm:$0xff]  }
 0xa44   :  { %10242 = vst [vmem:[#allocation73_spill] sm:$0xff] %v8185_v49  ;;  %10243 = vst [vmem:[#allocation74_spill] sm:$0xff] %v8191_v43 }
 0xa46   :  { %3047 = vmatpush1.bf16.msra.mxu0 %v8173_v22  ;;  %3088 = vmatpush1.bf16.msra.mxu1 %v8179_v11  ;;  %v8197_v22 = vld [vmem:[%s9125_s3 + $0x100] ss:$16 sps:$4 sm:$0xff]   ;;  %v8203_v11 = vld [vmem:[%s9125_s3 + $0x108] ss:$16 sps:$4 sm:$0xff]  }
 0xa47   :  { %3048 = vmatprep.subr.bf16.mxu0 %v8185_v49  ;;  %3089 = vmatprep.subr.bf16.mxu1 %v8191_v43  ;;  %10244 = vst [vmem:[#allocation75_spill] sm:$0xff] %v8197_v22  ;;  %10245 = vst [vmem:[#allocation4_spill] sm:$0xff] %v8203_v11  ;;  %v8209_v49 = vld [vmem:[%s9125_s3 + $0x124] ss:$16 sps:$4 sm:$0xff]   ;;  %v8215_v43 = vld [vmem:[%s9125_s3 + $0x12c] ss:$16 sps:$4 sm:$0xff]  }
 0xa48   :  { %10246 = vst [vmem:[#allocation5_spill] sm:$0xff] %v8209_v49  ;;  %10247 = vst [vmem:[#allocation19_spill] sm:$0xff] %v8215_v43 }
 0xa4a   :  { %3049 = vmatpush1.bf16.msra.mxu0 %v8197_v22  ;;  %3090 = vmatpush1.bf16.msra.mxu1 %v8203_v11  ;;  %v8221_v22 = vld [vmem:[%s9125_s3 + $0x120] ss:$16 sps:$4 sm:$0xff]   ;;  %v8227_v11 = vld [vmem:[%s9125_s3 + $0x128] ss:$16 sps:$4 sm:$0xff]  }
 0xa4b   :  { %3050 = vmatprep.subr.bf16.mxu0 %v8209_v49  ;;  %3091 = vmatprep.subr.bf16.mxu1 %v8215_v43  ;;  %10248 = vst [vmem:[#allocation20_spill] sm:$0xff] %v8221_v22  ;;  %10249 = vst [vmem:[#allocation21_spill] sm:$0xff] %v8227_v11  ;;  %v8233_v49 = vld [vmem:[%s9125_s3 + $0x144] ss:$16 sps:$4 sm:$0xff]   ;;  %v8239_v43 = vld [vmem:[%s9125_s3 + $0x14c] ss:$16 sps:$4 sm:$0xff]  }
 0xa4c   :  { %10250 = vst [vmem:[#allocation22_spill] sm:$0xff] %v8233_v49  ;;  %10251 = vst [vmem:[#allocation6_spill] sm:$0xff] %v8239_v43 }
 0xa4e   :  { %3051 = vmatpush1.bf16.msra.mxu0 %v8221_v22  ;;  %3092 = vmatpush1.bf16.msra.mxu1 %v8227_v11  ;;  %v8245_v22 = vld [vmem:[%s9125_s3 + $0x140] ss:$16 sps:$4 sm:$0xff]   ;;  %v8251_v11 = vld [vmem:[%s9125_s3 + $0x148] ss:$16 sps:$4 sm:$0xff]  }
 0xa4f   :  { %3052 = vmatprep.subr.bf16.mxu0 %v8233_v49  ;;  %3093 = vmatprep.subr.bf16.mxu1 %v8239_v43  ;;  %10252 = vst [vmem:[#allocation7_spill] sm:$0xff] %v8245_v22  ;;  %10253 = vst [vmem:[#allocation60_spill] sm:$0xff] %v8251_v11  ;;  %v8257_v49 = vld [vmem:[%s9125_s3 + $0x164] ss:$16 sps:$4 sm:$0xff]   ;;  %v8263_v43 = vld [vmem:[%s9125_s3 + $0x16c] ss:$16 sps:$4 sm:$0xff]  }
 0xa50   :  { %10254 = vst [vmem:[#allocation61_spill] sm:$0xff] %v8257_v49  ;;  %10255 = vst [vmem:[#allocation76_spill] sm:$0xff] %v8263_v43 }
 0xa52   :  { %3053 = vmatpush1.bf16.msra.mxu0 %v8245_v22  ;;  %3094 = vmatpush1.bf16.msra.mxu1 %v8251_v11  ;;  %v8269_v22 = vld [vmem:[%s9125_s3 + $0x160] ss:$16 sps:$4 sm:$0xff]   ;;  %v8275_v11 = vld [vmem:[%s9125_s3 + $0x168] ss:$16 sps:$4 sm:$0xff]  }
 0xa53   :  { %3054 = vmatprep.subr.bf16.mxu0 %v8257_v49  ;;  %3095 = vmatprep.subr.bf16.mxu1 %v8263_v43  ;;  %10256 = vst [vmem:[#allocation77_spill] sm:$0xff] %v8269_v22  ;;  %10257 = vst [vmem:[#allocation78_spill] sm:$0xff] %v8275_v11  ;;  %v8281_v49 = vld [vmem:[%s9125_s3 + $0x184] ss:$16 sps:$4 sm:$0xff]   ;;  %v8287_v43 = vld [vmem:[%s9125_s3 + $0x18c] ss:$16 sps:$4 sm:$0xff]  }
 0xa54   :  { %10258 = vst [vmem:[#allocation79_spill] sm:$0xff] %v8281_v49  ;;  %10259 = vst [vmem:[#allocation80_spill] sm:$0xff] %v8287_v43 }
 0xa56   :  { %3055 = vmatpush1.bf16.msra.mxu0 %v8269_v22  ;;  %3096 = vmatpush1.bf16.msra.mxu1 %v8275_v11  ;;  %v8293_v22 = vld [vmem:[%s9125_s3 + $0x180] ss:$16 sps:$4 sm:$0xff]   ;;  %v8299_v11 = vld [vmem:[%s9125_s3 + $0x188] ss:$16 sps:$4 sm:$0xff]  }
 0xa57   :  { %3056 = vmatprep.subr.bf16.mxu0 %v8281_v49  ;;  %3097 = vmatprep.subr.bf16.mxu1 %v8287_v43  ;;  %10260 = vst [vmem:[#allocation81_spill] sm:$0xff] %v8293_v22  ;;  %10261 = vst [vmem:[#allocation82_spill] sm:$0xff] %v8299_v11  ;;  %v8305_v49 = vld [vmem:[%s9125_s3 + $0x1a4] ss:$16 sps:$4 sm:$0xff]   ;;  %v8311_v43 = vld [vmem:[%s9125_s3 + $0x1ac] ss:$16 sps:$4 sm:$0xff]  }
 0xa58   :  { %10262 = vst [vmem:[#allocation83_spill] sm:$0xff] %v8305_v49  ;;  %10263 = vst [vmem:[#allocation84_spill] sm:$0xff] %v8311_v43 }
 0xa5a   :  { %3057 = vmatpush1.bf16.msra.mxu0 %v8293_v22  ;;  %3098 = vmatpush1.bf16.msra.mxu1 %v8299_v11  ;;  %v8317_v22 = vld [vmem:[%s9125_s3 + $0x1a0] ss:$16 sps:$4 sm:$0xff]   ;;  %v8323_v11 = vld [vmem:[%s9125_s3 + $0x1a8] ss:$16 sps:$4 sm:$0xff]  }
 0xa5b   :  { %3058 = vmatprep.subr.bf16.mxu0 %v8305_v49  ;;  %3099 = vmatprep.subr.bf16.mxu1 %v8311_v43  ;;  %10264 = vst [vmem:[#allocation85_spill] sm:$0xff] %v8317_v22  ;;  %10265 = vst [vmem:[#allocation86_spill] sm:$0xff] %v8323_v11  ;;  %v8329_v49 = vld [vmem:[%s9125_s3 + $0x1c4] ss:$16 sps:$4 sm:$0xff]   ;;  %v8335_v43 = vld [vmem:[%s9125_s3 + $0x1cc] ss:$16 sps:$4 sm:$0xff]  }
 0xa5c   :  { %10266 = vst [vmem:[#allocation87_spill] sm:$0xff] %v8329_v49  ;;  %10267 = vst [vmem:[#allocation88_spill] sm:$0xff] %v8335_v43 }
 0xa5e   :  { %3059 = vmatpush1.bf16.msra.mxu0 %v8317_v22  ;;  %3100 = vmatpush1.bf16.msra.mxu1 %v8323_v11  ;;  %v8341_v22 = vld [vmem:[%s9125_s3 + $0x1c0] ss:$16 sps:$4 sm:$0xff]   ;;  %v8347_v11 = vld [vmem:[%s9125_s3 + $0x1c8] ss:$16 sps:$4 sm:$0xff]  }
 0xa5f   :  { %3060 = vmatprep.subr.bf16.mxu0 %v8329_v49  ;;  %3101 = vmatprep.subr.bf16.mxu1 %v8335_v43  ;;  %10268 = vst [vmem:[#allocation89_spill] sm:$0xff] %v8341_v22  ;;  %10269 = vst [vmem:[#allocation90_spill] sm:$0xff] %v8347_v11  ;;  %v8353_v49 = vld [vmem:[%s9125_s3 + $0x1e4] ss:$16 sps:$4 sm:$0xff]   ;;  %v8359_v43 = vld [vmem:[%s9125_s3 + $0x1ec] ss:$16 sps:$4 sm:$0xff]  }
 0xa60   :  { %10270 = vst [vmem:[#allocation91_spill] sm:$0xff] %v8353_v49  ;;  %10271 = vst [vmem:[#allocation92_spill] sm:$0xff] %v8359_v43 }
 0xa62   :  { %3061 = vmatpush1.bf16.msra.mxu0 %v8341_v22  ;;  %3102 = vmatpush1.bf16.msra.mxu1 %v8347_v11  ;;  %v8365_v22 = vld [vmem:[%s9125_s3 + $0x1e0] ss:$16 sps:$4 sm:$0xff]   ;;  %v8371_v11 = vld [vmem:[%s9125_s3 + $0x1e8] ss:$16 sps:$4 sm:$0xff]  }
 0xa63   :  { %3062 = vmatprep.subr.bf16.mxu0 %v8353_v49  ;;  %3103 = vmatprep.subr.bf16.mxu1 %v8359_v43  ;;  %10272 = vst [vmem:[#allocation93_spill] sm:$0xff] %v8365_v22  ;;  %10273 = vst [vmem:[#allocation94_spill] sm:$0xff] %v8371_v11  ;;  %v234_v43 = vld [vmem:[%s9131_s6] sm:$0xf] }
 0xa64   :  { %v10274_v49 = vld [vmem:[#allocation58_spill] sm:$0xff] }
 0xa65   :  { %v8380_v5 = vrot.slane %v234_v43, %v10274_v49  ;;  %v10277_v49 = vld [vmem:[#allocation62_spill] sm:$0xff] }
 0xa66   :  { %3063 = vmatpush1.bf16.msra.mxu0 %v8365_v22  ;;  %3104 = vmatpush1.bf16.msra.mxu1 %v8371_v11  ;;  %v8383_v22 = vrot.slane %v234_v43, %v10276_v1  ;;  %v8388_v48 = vrot.slane %v234_v43, %v10277_v49  ;;  %v10278_v1 = vld [vmem:[#allocation65_spill] sm:$0xff] }
 0xa67   :  { %3141 = vmatprep.subr.bf16.mxu0 %v7569_v6  ;;  %3182 = vmatprep.subr.bf16.mxu1 %v7574_v34  ;;  %10275 = vst [vmem:[#allocation58_spill] sm:$0xff] %v8380_v5  ;;  %v8391_v37 = vrot.slane %v234_v43, %v10278_v1 }
 0xafb   :  { %v2959_v41 = vpop.f32.mrb[64].mxu0  ;;  %v3000_v40 = vpop.f32.mrb[64].mxu1 }
 0xafc   :  { %v2960_v53 = vadd.f32 %v2959_v41, %v8380_v5  ;;  %v2961_v4 = vpop.f32.mrb[65].mxu0  ;;  %v3002_v11 = vpop.f32.mrb[65].mxu1  ;;  %v3001_v41 = vadd.f32 %v3000_v40, %v8388_v48 }
 0xafd   :  { %v2962_v6 = vadd.f32 %v2961_v4, %v8383_v22  ;;  %v2963_v35 = vpop.f32.mrb[66].mxu0  ;;  %v3004_v34 = vpop.f32.mrb[66].mxu1  ;;  %v3003_v5 = vadd.f32 %v3002_v11, %v8391_v37 }
 0xafe   :  { %v4014_v45 = vmul.f32 -1.442695, %v2960_v53  ;;  %v2964_v51 = vpop.f32.mrb[67].mxu0  ;;  %v3005_v31 = vpop.f32.mrb[67].mxu1  ;;  %v4016_v26 = vmul.f32 -1.442695, %v3001_v41 }
 0xaff   :  { %v4015_v25 = vmul.f32 -1.442695, %v2962_v6  ;;  %v10280_v41 = vld [vmem:[#allocation25_spill] sm:$0xff] }
 0xb00   :  { %4542 = vpow2.f32 %v4014_v45 }
 0xb01   :  { %4544 = vpow2.f32 %v4015_v25 }
 0xb02   :  { %4546 = vtanh.f32 %v3003_v5 }
 0xb03   :  { %4548 = vpow2.f32 %v4016_v26 }
 0xb0a   :  { %v4543_v4 = vpop.eup %4542 }
 0xb0b   :  { %v3016_v35 = vadd.f32 1.0, %v4543_v4  ;;  %v4545_v53 = vpop.eup %4544  ;;  %v10281_v4 = vld [vmem:[#allocation26_spill] sm:$0xff] }
 0xb0c   :  { %v3017_v31 = vadd.f32 1.0, %v4545_v53  ;;  %v4547_v51 = vpop.eup %4546  ;;  %v10283_v53 = vld [vmem:[#allocation3_spill] sm:$0xff] }
 0xb0d   :  { %4550 = vrcp.f32 %v3016_v35  ;;  %v4549_v45 = vpop.eup %4548  ;;  %v10282_v35 = vld [vmem:[#allocation2_spill] sm:$0xff] }
 0xb0e   :  { %4552 = vrcp.f32 %v3017_v31  ;;  %v3018_v43 = vadd.f32 1.0, %v4549_v45  ;;  %v10284_v31 = vld [vmem:[#allocation64_spill] sm:$0xff]  ;;  %v10286_v45 = vld [vmem:[#allocation27_spill] sm:$0xff] }
 0xb10   :  { %4554 = vrcp.f32 %v3018_v43  ;;  %v10290_v43 = vld [vmem:[#allocation31_spill] sm:$0xff] }
 0xb17   :  { %v4551_v6 = vpop.eup %4550 }
 0xb18   :  { %v3027_v25 = vmul.f32 %v4551_v6, %v4547_v51  ;;  %v4553_v34 = vpop.eup %4552  ;;  %v10285_v51 = vld [vmem:[#allocation66_spill] sm:$0xff]  ;;  %v10287_v6 = vld [vmem:[#allocation28_spill] sm:$0xff] }
 0xb19   :  { %v3026_v49 = vmul.f32 %v4553_v34, %v7598_v30  ;;  %v10279_v30 = vld [vmem:[#allocation24_spill] sm:$0xff]  ;;  %v10289_v34 = vld [vmem:[#allocation30_spill] sm:$0xff] }
 0xb1a   :  { %v4555_v11 = vpop.eup %4554 }
 0xb1b   :  { %v8396_v40 = vadd.f32 %v3027_v25, %v3026_v49  ;;  %v10288_v25 = vld [vmem:[#allocation29_spill] sm:$0xff]  ;;  %v10291_v49 = vld [vmem:[#allocation32_spill] sm:$0xff] }
 0xb1d   :  { %4556 = vtanh.f32 %v8396_v40 }
 0xb27   :  { %v4557_v5 = vpop.eup %4556 }
 0xb28   :  { %v3030_v1 = vmul.f32 %v4557_v5, %v4555_v11  ;;  %v10292_v11 = vld [vmem:[#allocation33_spill] sm:$0xff]  ;;  %v10293_v5 = vld [vmem:[#allocation34_spill] sm:$0xff] }
 0xb2a   :  { %v8399_v26 = vpack.c.bf16 %v3030_v1, %v3030_v1  ;;  %v10294_v1 = vld [vmem:[#allocation35_spill] sm:$0xff] }
 0xb2c   :  { %3065 = vmatmul.mubr.bf16.vlgmr.msra.gmra.mrb[68].mxu0 %v8399_v26  ;;  %3106 = vmatmul.mubr.bf16.vlgmr.msra.gmra.mrb[68].mxu1 %v8399_v26 }
 0xb2d   :  { %3142 = vmatpush1.bf16.msra.mxu0 %v7604_v0  ;;  %3183 = vmatpush1.bf16.msra.mxu1 %v7609_v8 }
 0xb2e   :  { %3143 = vmatprep.subr.bf16.mxu0 %v7616_v44  ;;  %3184 = vmatprep.subr.bf16.mxu1 %v7621_v10 }
 0xb31   :  { %3144 = vmatpush1.bf16.msra.mxu0 %v7630_v13  ;;  %3185 = vmatpush1.bf16.msra.mxu1 %v7635_v14 }
 0xb32   :  { %3145 = vmatprep.subr.bf16.mxu0 %v7642_v21  ;;  %3186 = vmatprep.subr.bf16.mxu1 %v7647_v62 }
 0xb35   :  { %3146 = vmatpush1.bf16.msra.mxu0 %v7654_v9  ;;  %3187 = vmatpush1.bf16.msra.mxu1 %v7659_v18 }
 0xb36   :  { %3147 = vmatprep.subr.bf16.mxu0 %v7666_v15  ;;  %3188 = vmatprep.subr.bf16.mxu1 %v7671_v16 }
 0xb39   :  { %3148 = vmatpush1.bf16.msra.mxu0 %v7678_v27  ;;  %3189 = vmatpush1.bf16.msra.mxu1 %v7683_v7 }
 0xb3a   :  { %3149 = vmatprep.subr.bf16.mxu0 %v7692_v60  ;;  %3190 = vmatprep.subr.bf16.mxu1 %v7697_v2 }
 0xb3d   :  { %3150 = vmatpush1.bf16.msra.mxu0 %v7702_v52  ;;  %3191 = vmatpush1.bf16.msra.mxu1 %v7707_v54 }
 0xb3e   :  { %3151 = vmatprep.subr.bf16.mxu0 %v7716_v56  ;;  %3192 = vmatprep.subr.bf16.mxu1 %v7721_v38 }
 0xb41   :  { %3152 = vmatpush1.bf16.msra.mxu0 %v7726_v20  ;;  %3193 = vmatpush1.bf16.msra.mxu1 %v7731_v59 }
 0xb42   :  { %3153 = vmatprep.subr.bf16.mxu0 %v7740_v61  ;;  %3194 = vmatprep.subr.bf16.mxu1 %v7745_v32 }
 0xb45   :  { %3154 = vmatpush1.bf16.msra.mxu0 %v7750_v55  ;;  %3195 = vmatpush1.bf16.msra.mxu1 %v7755_v33 }
 0xb46   :  { %3155 = vmatprep.subr.bf16.mxu0 %v7764_v29  ;;  %3196 = vmatprep.subr.bf16.mxu1 %v7769_v46 }
 0xb49   :  { %3156 = vmatpush1.bf16.msra.mxu0 %v7774_v28  ;;  %3197 = vmatpush1.bf16.msra.mxu1 %v7779_v19 }
 0xb4a   :  { %3157 = vmatprep.subr.bf16.mxu0 %v7788_v24  ;;  %3198 = vmatprep.subr.bf16.mxu1 %v7793_v63 }
 0xb4d   :  { %3158 = vmatpush1.bf16.msra.mxu0 %v7798_v3  ;;  %3199 = vmatpush1.bf16.msra.mxu1 %v7803_v36 }
 0xb4e   :  { %3159 = vmatprep.subr.bf16.mxu0 %v7812_v23  ;;  %3200 = vmatprep.subr.bf16.mxu1 %v7817_v39 }
 0xb51   :  { %3160 = vmatpush1.bf16.msra.mxu0 %v7822_v57  ;;  %3201 = vmatpush1.bf16.msra.mxu1 %v7827_v42 }
 0xb52   :  { %3161 = vmatprep.subr.bf16.mxu0 %v10279_v30  ;;  %3202 = vmatprep.subr.bf16.mxu1 %v10280_v41 }
 0xb55   :  { %3162 = vmatpush1.bf16.msra.mxu0 %v10281_v4  ;;  %3203 = vmatpush1.bf16.msra.mxu1 %v10282_v35 }
 0xb56   :  { %3163 = vmatprep.subr.bf16.mxu0 %v10283_v53  ;;  %3204 = vmatprep.subr.bf16.mxu1 %v10284_v31  ;;  %v10295_v31 = vld [vmem:[#allocation36_spill] sm:$0xff] }
 0xb59   :  { %3164 = vmatpush1.bf16.msra.mxu0 %v10285_v51  ;;  %3205 = vmatpush1.bf16.msra.mxu1 %v10286_v45  ;;  %v10296_v51 = vld [vmem:[#allocation37_spill] sm:$0xff]  ;;  %v10297_v45 = vld [vmem:[#allocation38_spill] sm:$0xff] }
 0xb5a   :  { %3165 = vmatprep.subr.bf16.mxu0 %v10287_v6  ;;  %3206 = vmatprep.subr.bf16.mxu1 %v10288_v25  ;;  %v10298_v6 = vld [vmem:[#allocation39_spill] sm:$0xff]  ;;  %v10299_v25 = vld [vmem:[#allocation40_spill] sm:$0xff] }
 0xb5d   :  { %3166 = vmatpush1.bf16.msra.mxu0 %v10289_v34  ;;  %3207 = vmatpush1.bf16.msra.mxu1 %v10290_v43  ;;  %v10300_v34 = vld [vmem:[#allocation41_spill] sm:$0xff]  ;;  %v10301_v43 = vld [vmem:[#allocation42_spill] sm:$0xff] }
 0xb5e   :  { %3167 = vmatprep.subr.bf16.mxu0 %v10291_v49  ;;  %3208 = vmatprep.subr.bf16.mxu1 %v10292_v11  ;;  %v10302_v49 = vld [vmem:[#allocation43_spill] sm:$0xff]  ;;  %v10303_v11 = vld [vmem:[#allocation44_spill] sm:$0xff] }
 0xb61   :  { %3168 = vmatpush1.bf16.msra.mxu0 %v10293_v5  ;;  %3209 = vmatpush1.bf16.msra.mxu1 %v10294_v1  ;;  %v10304_v5 = vld [vmem:[#allocation17_spill] sm:$0xff] }
 0xb62   :  { %3169 = vmatprep.subr.bf16.mxu0 %v10295_v31  ;;  %3210 = vmatprep.subr.bf16.mxu1 %v10296_v51 }
 0xb65   :  { %3170 = vmatpush1.bf16.msra.mxu0 %v10297_v45  ;;  %3211 = vmatpush1.bf16.msra.mxu1 %v10298_v6 }
 0xb66   :  { %3171 = vmatprep.subr.bf16.mxu0 %v10299_v25  ;;  %3212 = vmatprep.subr.bf16.mxu1 %v10300_v34 }
 0xb69   :  { %3172 = vmatpush1.bf16.msra.mxu0 %v10301_v43  ;;  %3213 = vmatpush1.bf16.msra.mxu1 %v10302_v49 }
 0xb6a   :  { %3248 = vmatprep.subr.bf16.mxu0 %v10303_v11  ;;  %3289 = vmatprep.subr.bf16.mxu1 %v10304_v5 }
 0xbff   :  { %v3066_v1 = vpop.f32.mrb[68].mxu0  ;;  %v3107_v31 = vpop.f32.mrb[68].mxu1 }
 0xc00   :  { %v3067_v51 = vadd.f32 %v3066_v1, %v10043_v17  ;;  %v3068_v53 = vpop.f32.mrb[69].mxu0  ;;  %v3109_v45 = vpop.f32.mrb[69].mxu1  ;;  %v3108_v11 = vadd.f32 %v3107_v31, %v10181_v12 }
 0xc01   :  { %v3069_v6 = vadd.f32 %v3068_v53, %v10044_v58  ;;  %v3070_v35 = vpop.f32.mrb[70].mxu0  ;;  %v3111_v25 = vpop.f32.mrb[70].mxu1  ;;  %v3110_v5 = vadd.f32 %v3109_v45, %v10182_v47 }
 0xc02   :  { %v4017_v4 = vmul.f32 -1.442695, %v3067_v51  ;;  %v3071_v34 = vpop.f32.mrb[71].mxu0  ;;  %v3112_v41 = vpop.f32.mrb[71].mxu1  ;;  %v4019_v49 = vmul.f32 -1.442695, %v3108_v11 }
 0xc03   :  { %v4018_v43 = vmul.f32 -1.442695, %v3069_v6  ;;  %v10307_v11 = vld [vmem:[#allocation46_spill] sm:$0xff] }
 0xc04   :  { %4558 = vpow2.f32 %v4017_v4 }
 0xc05   :  { %4560 = vpow2.f32 %v4018_v43 }
 0xc06   :  { %4562 = vtanh.f32 %v3110_v5  ;;  %v10308_v5 = vld [vmem:[#allocation47_spill] sm:$0xff] }
 0xc07   :  { %4564 = vpow2.f32 %v4019_v49  ;;  %v10306_v49 = vld [vmem:[#allocation45_spill] sm:$0xff] }
 0xc0e   :  { %v4559_v30 = vpop.eup %4558 }
 0xc0f   :  { %v3123_v42 = vadd.f32 1.0, %v4559_v30  ;;  %v4561_v1 = vpop.eup %4560 }
 0xc10   :  { %v3124_v53 = vadd.f32 1.0, %v4561_v1  ;;  %v4563_v35 = vpop.eup %4562  ;;  %v10309_v1 = vld [vmem:[#allocation48_spill] sm:$0xff] }
 0xc11   :  { %4566 = vrcp.f32 %v3123_v42  ;;  %v4565_v51 = vpop.eup %4564 }
 0xc12   :  { %4568 = vrcp.f32 %v3124_v53  ;;  %v3125_v4 = vadd.f32 1.0, %v4565_v51  ;;  %v10310_v53 = vld [vmem:[#allocation49_spill] sm:$0xff]  ;;  %v10312_v51 = vld [vmem:[#allocation51_spill] sm:$0xff] }
 0xc14   :  { %4570 = vrcp.f32 %v3125_v4  ;;  %v10317_v4 = vld [vmem:[#allocation56_spill] sm:$0xff] }
 0xc1b   :  { %v4567_v25 = vpop.eup %4566 }
 0xc1c   :  { %v3134_v41 = vmul.f32 %v4567_v25, %v4563_v35  ;;  %v4569_v6 = vpop.eup %4568  ;;  %v10311_v35 = vld [vmem:[#allocation50_spill] sm:$0xff]  ;;  %v10313_v25 = vld [vmem:[#allocation52_spill] sm:$0xff] }
 0xc1d   :  { %v3133_v34 = vmul.f32 %v4569_v6, %v7994_v50  ;;  %v10305_v50 = vld [vmem:[#allocation18_spill] sm:$0xff]  ;;  %v10316_v6 = vld [vmem:[#allocation55_spill] sm:$0xff] }
 0xc1e   :  { %v4571_v30 = vpop.eup %4570 }
 0xc1f   :  { %v8472_v31 = vadd.f32 %v3134_v41, %v3133_v34  ;;  %v10315_v41 = vld [vmem:[#allocation54_spill] sm:$0xff]  ;;  %v10318_v34 = vld [vmem:[#allocation57_spill] sm:$0xff] }
 0xc21   :  { %4572 = vtanh.f32 %v8472_v31 }
 0xc2b   :  { %v4573_v45 = vpop.eup %4572 }
 0xc2c   :  { %v3137_v43 = vmul.f32 %v4573_v45, %v4571_v30  ;;  %v10319_v30 = vld [vmem:[#allocation63_spill] sm:$0xff]  ;;  %v10320_v45 = vld [vmem:[#allocation8_spill] sm:$0xff] }
 0xc2e   :  { %4020 = vst [vmem:[%s9129_s8 + $0x40] sm:$0xff] %v3137_v43  ;;  %v3140_v42 = vpack.c.bf16 %v3137_v43, %v3137_v43  ;;  %v10321_v43 = vld [vmem:[#allocation9_spill] sm:$0xff] }
 0xc30   :  { %3173 = vmatprep.mubr.bf16.mxu0 %v3140_v42  ;;  %3214 = vmatprep.mubr.bf16.mxu1 %v3140_v42 }
 0xc31   :  { %3174 = vmatmul.mubr.bf16.vlgmr.msra.gmra.mrb[72].mxu0 %v8399_v26  ;;  %3215 = vmatmul.mubr.bf16.vlgmr.msra.gmra.mrb[72].mxu1 %v8399_v26  ;;  %v10314_v26 = vld [vmem:[#allocation53_spill] sm:$0xff] }
 0xc32   :  { %3280 = vmatprep.mubr.bf16.mxu0 %v3140_v42  ;;  %3321 = vmatprep.mubr.bf16.mxu1 %v3140_v42  ;;  %v10322_v42 = vld [vmem:[#allocation10_spill] sm:$0xff] }
 0xc33   :  { %3249 = vmatpush1.bf16.msra.mxu0 %v10305_v50  ;;  %3290 = vmatpush1.bf16.msra.mxu1 %v10306_v49 }
 0xc34   :  { %3250 = vmatprep.subr.bf16.mxu0 %v10307_v11  ;;  %3291 = vmatprep.subr.bf16.mxu1 %v10308_v5 }
 0xc37   :  { %3251 = vmatpush1.bf16.msra.mxu0 %v10309_v1  ;;  %3292 = vmatpush1.bf16.msra.mxu1 %v10310_v53 }
 0xc38   :  { %3252 = vmatprep.subr.bf16.mxu0 %v10311_v35  ;;  %3293 = vmatprep.subr.bf16.mxu1 %v10312_v51  ;;  %v10323_v51 = vld [vmem:[#allocation11_spill] sm:$0xff] }
 0xc3b   :  { %3253 = vmatpush1.bf16.msra.mxu0 %v10313_v25  ;;  %3294 = vmatpush1.bf16.msra.mxu1 %v10314_v26  ;;  %v10324_v25 = vld [vmem:[#allocation12_spill] sm:$0xff]  ;;  %v10325_v26 = vld [vmem:[#allocation13_spill] sm:$0xff] }
 0xc3c   :  { %3254 = vmatprep.subr.bf16.mxu0 %v10315_v41  ;;  %3295 = vmatprep.subr.bf16.mxu1 %v10316_v6  ;;  %v10326_v41 = vld [vmem:[#allocation14_spill] sm:$0xff]  ;;  %v10327_v6 = vld [vmem:[#allocation15_spill] sm:$0xff] }
 0xc3f   :  { %3255 = vmatpush1.bf16.msra.mxu0 %v10317_v4  ;;  %3296 = vmatpush1.bf16.msra.mxu1 %v10318_v34  ;;  %v10328_v4 = vld [vmem:[#allocation16_spill] sm:$0xff]  ;;  %v10329_v34 = vld [vmem:[#allocation67_spill] sm:$0xff] }
 0xc40   :  { %3256 = vmatprep.subr.bf16.mxu0 %v10319_v30  ;;  %3297 = vmatprep.subr.bf16.mxu1 %v10320_v45  ;;  %v10330_v30 = vld [vmem:[#allocation68_spill] sm:$0xff]  ;;  %v10331_v45 = vld [vmem:[#allocation69_spill] sm:$0xff] }
 0xc43   :  { %3257 = vmatpush1.bf16.msra.mxu0 %v10321_v43  ;;  %3298 = vmatpush1.bf16.msra.mxu1 %v10322_v42  ;;  %v10332_v43 = vld [vmem:[#allocation70_spill] sm:$0xff]  ;;  %v10333_v42 = vld [vmem:[#allocation71_spill] sm:$0xff] }
 0xc44   :  { %3258 = vmatprep.subr.bf16.mxu0 %v10323_v51  ;;  %3299 = vmatprep.subr.bf16.mxu1 %v10324_v25  ;;  %v10334_v51 = vld [vmem:[#allocation72_spill] sm:$0xff]  ;;  %v10335_v25 = vld [vmem:[#allocation73_spill] sm:$0xff] }
 0xc47   :  { %3259 = vmatpush1.bf16.msra.mxu0 %v10325_v26  ;;  %3300 = vmatpush1.bf16.msra.mxu1 %v10326_v41  ;;  %v10336_v26 = vld [vmem:[#allocation74_spill] sm:$0xff]  ;;  %v10337_v41 = vld [vmem:[#allocation75_spill] sm:$0xff] }
 0xc48   :  { %3260 = vmatprep.subr.bf16.mxu0 %v10327_v6  ;;  %3301 = vmatprep.subr.bf16.mxu1 %v10328_v4  ;;  %v10338_v6 = vld [vmem:[#allocation4_spill] sm:$0xff]  ;;  %v10339_v4 = vld [vmem:[#allocation5_spill] sm:$0xff] }
 0xc4b   :  { %3261 = vmatpush1.bf16.msra.mxu0 %v10329_v34  ;;  %3302 = vmatpush1.bf16.msra.mxu1 %v10330_v30  ;;  %v10340_v34 = vld [vmem:[#allocation19_spill] sm:$0xff]  ;;  %v10341_v30 = vld [vmem:[#allocation20_spill] sm:$0xff] }
 0xc4c   :  { %3262 = vmatprep.subr.bf16.mxu0 %v10331_v45  ;;  %3303 = vmatprep.subr.bf16.mxu1 %v10332_v43  ;;  %v10342_v45 = vld [vmem:[#allocation21_spill] sm:$0xff]  ;;  %v10343_v43 = vld [vmem:[#allocation22_spill] sm:$0xff] }
 0xc4f   :  { %3263 = vmatpush1.bf16.msra.mxu0 %v10333_v42  ;;  %3304 = vmatpush1.bf16.msra.mxu1 %v10334_v51  ;;  %v10344_v42 = vld [vmem:[#allocation6_spill] sm:$0xff]  ;;  %v10345_v51 = vld [vmem:[#allocation7_spill] sm:$0xff] }
 0xc50   :  { %3264 = vmatprep.subr.bf16.mxu0 %v10335_v25  ;;  %3305 = vmatprep.subr.bf16.mxu1 %v10336_v26  ;;  %v10346_v25 = vld [vmem:[#allocation60_spill] sm:$0xff]  ;;  %v10347_v26 = vld [vmem:[#allocation61_spill] sm:$0xff] }
 0xc53   :  { %3265 = vmatpush1.bf16.msra.mxu0 %v10337_v41  ;;  %3306 = vmatpush1.bf16.msra.mxu1 %v10338_v6  ;;  %v10348_v41 = vld [vmem:[#allocation76_spill] sm:$0xff]  ;;  %v10349_v6 = vld [vmem:[#allocation77_spill] sm:$0xff] }
 0xc54   :  { %3266 = vmatprep.subr.bf16.mxu0 %v10339_v4  ;;  %3307 = vmatprep.subr.bf16.mxu1 %v10340_v34  ;;  %v10350_v4 = vld [vmem:[#allocation78_spill] sm:$0xff]  ;;  %v10351_v34 = vld [vmem:[#allocation79_spill] sm:$0xff] }
 0xc57   :  { %3267 = vmatpush1.bf16.msra.mxu0 %v10341_v30  ;;  %3308 = vmatpush1.bf16.msra.mxu1 %v10342_v45  ;;  %v10352_v30 = vld [vmem:[#allocation80_spill] sm:$0xff]  ;;  %v10353_v45 = vld [vmem:[#allocation81_spill] sm:$0xff] }
 0xc58   :  { %3268 = vmatprep.subr.bf16.mxu0 %v10343_v43  ;;  %3309 = vmatprep.subr.bf16.mxu1 %v10344_v42  ;;  %v10354_v43 = vld [vmem:[#allocation82_spill] sm:$0xff]  ;;  %v10355_v42 = vld [vmem:[#allocation83_spill] sm:$0xff] }
 0xc5b   :  { %3269 = vmatpush1.bf16.msra.mxu0 %v10345_v51  ;;  %3310 = vmatpush1.bf16.msra.mxu1 %v10346_v25  ;;  %v10356_v51 = vld [vmem:[#allocation84_spill] sm:$0xff]  ;;  %v10357_v25 = vld [vmem:[#allocation85_spill] sm:$0xff] }
 0xc5c   :  { %3270 = vmatprep.subr.bf16.mxu0 %v10347_v26  ;;  %3311 = vmatprep.subr.bf16.mxu1 %v10348_v41  ;;  %v10358_v26 = vld [vmem:[#allocation86_spill] sm:$0xff]  ;;  %v10359_v41 = vld [vmem:[#allocation87_spill] sm:$0xff] }
 0xc5f   :  { %3271 = vmatpush1.bf16.msra.mxu0 %v10349_v6  ;;  %3312 = vmatpush1.bf16.msra.mxu1 %v10350_v4  ;;  %v10360_v6 = vld [vmem:[#allocation88_spill] sm:$0xff]  ;;  %v10361_v4 = vld [vmem:[#allocation89_spill] sm:$0xff] }
 0xc60   :  { %3272 = vmatprep.subr.bf16.mxu0 %v10351_v34  ;;  %3313 = vmatprep.subr.bf16.mxu1 %v10352_v30  ;;  %v10362_v34 = vld [vmem:[#allocation90_spill] sm:$0xff]  ;;  %v10363_v30 = vld [vmem:[#allocation91_spill] sm:$0xff] }
 0xc63   :  { %3273 = vmatpush1.bf16.msra.mxu0 %v10353_v45  ;;  %3314 = vmatpush1.bf16.msra.mxu1 %v10354_v43  ;;  %v10364_v45 = vld [vmem:[#allocation92_spill] sm:$0xff]  ;;  %v10365_v43 = vld [vmem:[#allocation93_spill] sm:$0xff] }
 0xc64   :  { %3274 = vmatprep.subr.bf16.mxu0 %v10355_v42  ;;  %3315 = vmatprep.subr.bf16.mxu1 %v10356_v51  ;;  %v10366_v42 = vld [vmem:[#allocation94_spill] sm:$0xff] }
 0xc67   :  { %3275 = vmatpush1.bf16.msra.mxu0 %v10357_v25  ;;  %3316 = vmatpush1.bf16.msra.mxu1 %v10358_v26  ;;  %v8545_v26 = vld [vmem:[%s9130_s2 + $0x4] ss:$16 sps:$4 sm:$0xff]  }
 0xc68   :  { %3276 = vmatprep.subr.bf16.mxu0 %v10359_v41  ;;  %3317 = vmatprep.subr.bf16.mxu1 %v10360_v6  ;;  %10367 = vst [vmem:[#allocation59_spill] sm:$0xff] %v8545_v26 }
 0xc6b   :  { %3277 = vmatpush1.bf16.msra.mxu0 %v10361_v4  ;;  %3318 = vmatpush1.bf16.msra.mxu1 %v10362_v34  ;;  %v8551_v4 = vld [vmem:[%s9130_s2 + $0xc] ss:$16 sps:$4 sm:$0xff]   ;;  %v10369_v34 = vld [vmem:[#allocation58_spill] sm:$0xff] }
 0xc6c   :  { %3278 = vmatprep.subr.bf16.mxu0 %v10363_v30  ;;  %3319 = vmatprep.subr.bf16.mxu1 %v10364_v45  ;;  %10368 = vst [vmem:[#allocation62_spill] sm:$0xff] %v8551_v4 }
 0xc6f   :  { %3279 = vmatpush1.bf16.msra.mxu0 %v10365_v43  ;;  %3320 = vmatpush1.bf16.msra.mxu1 %v10366_v42 }
 0xc70   :  { %3357 = vmatprep.subr.bf16.mxu0 %v8545_v26  ;;  %3398 = vmatprep.subr.bf16.mxu1 %v8551_v4 }
 0xd04   :  { %v3175_v30 = vpop.f32.mrb[72].mxu0  ;;  %v3216_v45 = vpop.f32.mrb[72].mxu1 }
 0xd05   :  { %v3176_v43 = vadd.f32 %v3175_v30, %v10369_v34  ;;  %v3177_v6 = vpop.f32.mrb[73].mxu0  ;;  %v3218_v42 = vpop.f32.mrb[73].mxu1  ;;  %v3217_v5 = vadd.f32 %v3216_v45, %v8388_v48 }
 0xd06   :  { %v3178_v41 = vadd.f32 %v3177_v6, %v8383_v22  ;;  %v3179_v25 = vpop.f32.mrb[74].mxu0  ;;  %v3220_v51 = vpop.f32.mrb[74].mxu1  ;;  %v3219_v4 = vadd.f32 %v3218_v42, %v8391_v37 }
 0xd07   :  { %v4021_v35 = vmul.f32 -1.442695, %v3176_v43  ;;  %v3180_v53 = vpop.f32.mrb[75].mxu0  ;;  %v3221_v26 = vpop.f32.mrb[75].mxu1  ;;  %v4023_v11 = vmul.f32 -1.442695, %v3217_v5 }
 0xd08   :  { %v4022_v1 = vmul.f32 -1.442695, %v3178_v41 }
 0xd09   :  { %4574 = vpow2.f32 %v4021_v35 }
 0xd0a   :  { %4576 = vpow2.f32 %v4022_v1 }
 0xd0b   :  { %4578 = vtanh.f32 %v3219_v4 }
 0xd0c   :  { %4580 = vpow2.f32 %v4023_v11 }
 0xd13   :  { %v4575_v49 = vpop.eup %4574 }
 0xd14   :  { %v3232_v50 = vadd.f32 1.0, %v4575_v49  ;;  %v4577_v30 = vpop.eup %4576 }
 0xd15   :  { %v3233_v6 = vadd.f32 1.0, %v4577_v30  ;;  %v4579_v51 = vpop.eup %4578 }
 0xd16   :  { %4582 = vrcp.f32 %v3232_v50  ;;  %v4581_v25 = vpop.eup %4580 }
 0xd17   :  { %4584 = vrcp.f32 %v3233_v6  ;;  %v3234_v35 = vadd.f32 1.0, %v4581_v25 }
 0xd19   :  { %4586 = vrcp.f32 %v3234_v35 }
 0xd20   :  { %v4583_v53 = vpop.eup %4582 }
 0xd21   :  { %v3243_v26 = vmul.f32 %v4583_v53, %v4579_v51  ;;  %v4585_v41 = vpop.eup %4584 }
 0xd22   :  { %v3242_v1 = vmul.f32 %v4585_v41, %v8396_v40 }
 0xd23   :  { %v4587_v49 = vpop.eup %4586 }
 0xd24   :  { %v8559_v45 = vadd.f32 %v3243_v26, %v3242_v1 }
 0xd26   :  { %4588 = vtanh.f32 %v8559_v45 }
 0xd30   :  { %v4589_v5 = vpop.eup %4588 }
 0xd31   :  { %v3246_v4 = vmul.f32 %v4589_v5, %v4587_v49 }
 0xd33   :  { %v8562_v11 = vpack.c.bf16 %v3246_v4, %v3246_v4 }
 0xd35   :  { %3281 = vmatmul.mubr.bf16.vlgmr.msra.gmra.mrb[76].mxu0 %v8562_v11  ;;  %3322 = vmatmul.mubr.bf16.vlgmr.msra.gmra.mrb[76].mxu1 %v8562_v11 }
 0xd36   :  { %3358 = vmatpush1.bf16.msra.mxu0 %v7604_v0  ;;  %3399 = vmatpush1.bf16.msra.mxu1 %v7609_v8  ;;  %v10370_v0 = vld [vmem:[#allocation23_spill] sm:$0xff]  ;;  %v10371_v8 = vld [vmem:[#allocation24_spill] sm:$0xff] }
 0xd37   :  { %3359 = vmatprep.subr.bf16.mxu0 %v7616_v44  ;;  %3400 = vmatprep.subr.bf16.mxu1 %v7621_v10  ;;  %v10372_v44 = vld [vmem:[#allocation25_spill] sm:$0xff]  ;;  %v10373_v10 = vld [vmem:[#allocation26_spill] sm:$0xff] }
 0xd3a   :  { %3360 = vmatpush1.bf16.msra.mxu0 %v7630_v13  ;;  %3401 = vmatpush1.bf16.msra.mxu1 %v7635_v14  ;;  %v10374_v13 = vld [vmem:[#allocation2_spill] sm:$0xff]  ;;  %v10375_v14 = vld [vmem:[#allocation3_spill] sm:$0xff] }
 0xd3b   :  { %3361 = vmatprep.subr.bf16.mxu0 %v7642_v21  ;;  %3402 = vmatprep.subr.bf16.mxu1 %v7647_v62  ;;  %v10376_v21 = vld [vmem:[#allocation64_spill] sm:$0xff]  ;;  %v10377_v62 = vld [vmem:[#allocation66_spill] sm:$0xff] }
 0xd3e   :  { %3362 = vmatpush1.bf16.msra.mxu0 %v7654_v9  ;;  %3403 = vmatpush1.bf16.msra.mxu1 %v7659_v18  ;;  %v10378_v9 = vld [vmem:[#allocation27_spill] sm:$0xff]  ;;  %v10379_v18 = vld [vmem:[#allocation28_spill] sm:$0xff] }
 0xd3f   :  { %3363 = vmatprep.subr.bf16.mxu0 %v7666_v15  ;;  %3404 = vmatprep.subr.bf16.mxu1 %v7671_v16  ;;  %v10380_v15 = vld [vmem:[#allocation29_spill] sm:$0xff]  ;;  %v10381_v16 = vld [vmem:[#allocation30_spill] sm:$0xff] }
 0xd42   :  { %3364 = vmatpush1.bf16.msra.mxu0 %v7678_v27  ;;  %3405 = vmatpush1.bf16.msra.mxu1 %v7683_v7  ;;  %v10382_v27 = vld [vmem:[#allocation31_spill] sm:$0xff]  ;;  %v10383_v7 = vld [vmem:[#allocation32_spill] sm:$0xff] }
 0xd43   :  { %3365 = vmatprep.subr.bf16.mxu0 %v7692_v60  ;;  %3406 = vmatprep.subr.bf16.mxu1 %v7697_v2  ;;  %v10384_v60 = vld [vmem:[#allocation33_spill] sm:$0xff]  ;;  %v10385_v2 = vld [vmem:[#allocation34_spill] sm:$0xff] }
 0xd46   :  { %3366 = vmatpush1.bf16.msra.mxu0 %v7702_v52  ;;  %3407 = vmatpush1.bf16.msra.mxu1 %v7707_v54  ;;  %v10386_v52 = vld [vmem:[#allocation35_spill] sm:$0xff]  ;;  %v10387_v54 = vld [vmem:[#allocation36_spill] sm:$0xff] }
 0xd47   :  { %3367 = vmatprep.subr.bf16.mxu0 %v7716_v56  ;;  %3408 = vmatprep.subr.bf16.mxu1 %v7721_v38  ;;  %v10388_v56 = vld [vmem:[#allocation37_spill] sm:$0xff]  ;;  %v10389_v38 = vld [vmem:[#allocation38_spill] sm:$0xff] }
 0xd4a   :  { %3368 = vmatpush1.bf16.msra.mxu0 %v7726_v20  ;;  %3409 = vmatpush1.bf16.msra.mxu1 %v7731_v59  ;;  %v10390_v20 = vld [vmem:[#allocation39_spill] sm:$0xff]  ;;  %v10391_v59 = vld [vmem:[#allocation40_spill] sm:$0xff] }
 0xd4b   :  { %3369 = vmatprep.subr.bf16.mxu0 %v7740_v61  ;;  %3410 = vmatprep.subr.bf16.mxu1 %v7745_v32  ;;  %v10392_v61 = vld [vmem:[#allocation41_spill] sm:$0xff]  ;;  %v10393_v32 = vld [vmem:[#allocation42_spill] sm:$0xff] }
 0xd4e   :  { %3370 = vmatpush1.bf16.msra.mxu0 %v7750_v55  ;;  %3411 = vmatpush1.bf16.msra.mxu1 %v7755_v33  ;;  %v10394_v55 = vld [vmem:[#allocation43_spill] sm:$0xff]  ;;  %v10395_v33 = vld [vmem:[#allocation44_spill] sm:$0xff] }
 0xd4f   :  { %3371 = vmatprep.subr.bf16.mxu0 %v7764_v29  ;;  %3412 = vmatprep.subr.bf16.mxu1 %v7769_v46  ;;  %v10396_v29 = vld [vmem:[#allocation17_spill] sm:$0xff] }
 0xd52   :  { %3372 = vmatpush1.bf16.msra.mxu0 %v7774_v28  ;;  %3413 = vmatpush1.bf16.msra.mxu1 %v7779_v19 }
 0xd53   :  { %3373 = vmatprep.subr.bf16.mxu0 %v7788_v24  ;;  %3414 = vmatprep.subr.bf16.mxu1 %v7793_v63 }
 0xd56   :  { %3374 = vmatpush1.bf16.msra.mxu0 %v7798_v3  ;;  %3415 = vmatpush1.bf16.msra.mxu1 %v7803_v36 }
 0xd57   :  { %3375 = vmatprep.subr.bf16.mxu0 %v7812_v23  ;;  %3416 = vmatprep.subr.bf16.mxu1 %v7817_v39 }
 0xd5a   :  { %3376 = vmatpush1.bf16.msra.mxu0 %v7822_v57  ;;  %3417 = vmatpush1.bf16.msra.mxu1 %v10370_v0 }
 0xd5b   :  { %3377 = vmatprep.subr.bf16.mxu0 %v10371_v8  ;;  %3418 = vmatprep.subr.bf16.mxu1 %v10372_v44 }
 0xd5e   :  { %3378 = vmatpush1.bf16.msra.mxu0 %v10373_v10  ;;  %3419 = vmatpush1.bf16.msra.mxu1 %v10374_v13 }
 0xd5f   :  { %3379 = vmatprep.subr.bf16.mxu0 %v10375_v14  ;;  %3420 = vmatprep.subr.bf16.mxu1 %v10376_v21  ;;  %v10398_v14 = vld [vmem:[#allocation45_spill] sm:$0xff]  ;;  %v10399_v21 = vld [vmem:[#allocation46_spill] sm:$0xff] }
 0xd62   :  { %3380 = vmatpush1.bf16.msra.mxu0 %v10377_v62  ;;  %3421 = vmatpush1.bf16.msra.mxu1 %v10378_v9  ;;  %v10400_v62 = vld [vmem:[#allocation47_spill] sm:$0xff]  ;;  %v10401_v9 = vld [vmem:[#allocation48_spill] sm:$0xff] }
 0xd63   :  { %3381 = vmatprep.subr.bf16.mxu0 %v10379_v18  ;;  %3422 = vmatprep.subr.bf16.mxu1 %v10380_v15  ;;  %v10402_v18 = vld [vmem:[#allocation49_spill] sm:$0xff]  ;;  %v10403_v15 = vld [vmem:[#allocation50_spill] sm:$0xff] }
 0xd66   :  { %3382 = vmatpush1.bf16.msra.mxu0 %v10381_v16  ;;  %3423 = vmatpush1.bf16.msra.mxu1 %v10382_v27  ;;  %v10404_v16 = vld [vmem:[#allocation51_spill] sm:$0xff]  ;;  %v10405_v27 = vld [vmem:[#allocation52_spill] sm:$0xff] }
 0xd67   :  { %3383 = vmatprep.subr.bf16.mxu0 %v10383_v7  ;;  %3424 = vmatprep.subr.bf16.mxu1 %v10384_v60  ;;  %v10407_v7 = vld [vmem:[#allocation54_spill] sm:$0xff]  ;;  %v10408_v60 = vld [vmem:[#allocation55_spill] sm:$0xff] }
 0xd6a   :  { %3384 = vmatpush1.bf16.msra.mxu0 %v10385_v2  ;;  %3425 = vmatpush1.bf16.msra.mxu1 %v10386_v52  ;;  %v10409_v2 = vld [vmem:[#allocation56_spill] sm:$0xff]  ;;  %v10410_v52 = vld [vmem:[#allocation57_spill] sm:$0xff] }
 0xd6b   :  { %3385 = vmatprep.subr.bf16.mxu0 %v10387_v54  ;;  %3426 = vmatprep.subr.bf16.mxu1 %v10388_v56  ;;  %v10411_v54 = vld [vmem:[#allocation63_spill] sm:$0xff]  ;;  %v10412_v56 = vld [vmem:[#allocation8_spill] sm:$0xff] }
 0xd6e   :  { %3386 = vmatpush1.bf16.msra.mxu0 %v10389_v38  ;;  %3427 = vmatpush1.bf16.msra.mxu1 %v10390_v20  ;;  %v10413_v38 = vld [vmem:[#allocation9_spill] sm:$0xff]  ;;  %v10414_v20 = vld [vmem:[#allocation10_spill] sm:$0xff] }
 0xd6f   :  { %3387 = vmatprep.subr.bf16.mxu0 %v10391_v59  ;;  %3428 = vmatprep.subr.bf16.mxu1 %v10392_v61  ;;  %v10415_v59 = vld [vmem:[#allocation11_spill] sm:$0xff]  ;;  %v10416_v61 = vld [vmem:[#allocation12_spill] sm:$0xff] }
 0xd72   :  { %3388 = vmatpush1.bf16.msra.mxu0 %v10393_v32  ;;  %3429 = vmatpush1.bf16.msra.mxu1 %v10394_v55  ;;  %v10417_v32 = vld [vmem:[#allocation13_spill] sm:$0xff]  ;;  %v10418_v55 = vld [vmem:[#allocation14_spill] sm:$0xff] }
 0xd73   :  { %3464 = vmatprep.subr.bf16.mxu0 %v10395_v33  ;;  %3505 = vmatprep.subr.bf16.mxu1 %v10396_v29  ;;  %v10419_v33 = vld [vmem:[#allocation15_spill] sm:$0xff]  ;;  %v10420_v29 = vld [vmem:[#allocation16_spill] sm:$0xff] }
 0xe08   :  { %v3282_v46 = vpop.f32.mrb[76].mxu0  ;;  %v3323_v28 = vpop.f32.mrb[76].mxu1 }
 0xe09   :  { %v3283_v19 = vadd.f32 %v3282_v46, %v10043_v17  ;;  %v3284_v24 = vpop.f32.mrb[77].mxu0  ;;  %v3325_v63 = vpop.f32.mrb[77].mxu1  ;;  %v3324_v43 = vadd.f32 %v3323_v28, %v10181_v12  ;;  %v10421_v46 = vld [vmem:[#allocation67_spill] sm:$0xff]  ;;  %v10422_v28 = vld [vmem:[#allocation68_spill] sm:$0xff] }
 0xe0a   :  { %v3285_v3 = vadd.f32 %v3284_v24, %v10044_v58  ;;  %v3286_v36 = vpop.f32.mrb[78].mxu0  ;;  %v3327_v23 = vpop.f32.mrb[78].mxu1  ;;  %v3326_v42 = vadd.f32 %v3325_v63, %v10182_v47  ;;  %v10424_v24 = vld [vmem:[#allocation70_spill] sm:$0xff]  ;;  %v10425_v63 = vld [vmem:[#allocation71_spill] sm:$0xff] }
 0xe0b   :  { %v4024_v39 = vmul.f32 -1.442695, %v3283_v19  ;;  %v3287_v57 = vpop.f32.mrb[79].mxu0  ;;  %v3328_v40 = vpop.f32.mrb[79].mxu1  ;;  %v4026_v30 = vmul.f32 -1.442695, %v3324_v43 }
 0xe0c   :  { %v4025_v50 = vmul.f32 -1.442695, %v3285_v3  ;;  %v10423_v19 = vld [vmem:[#allocation69_spill] sm:$0xff]  ;;  %v10426_v3 = vld [vmem:[#allocation72_spill] sm:$0xff]  ;;  %v10428_v23 = vld [vmem:[#allocation74_spill] sm:$0xff] }
 0xe0d   :  { %4590 = vpow2.f32 %v4024_v39  ;;  %v10427_v36 = vld [vmem:[#allocation73_spill] sm:$0xff]  ;;  %v10429_v39 = vld [vmem:[#allocation75_spill] sm:$0xff]  ;;  %v10430_v57 = vld [vmem:[#allocation4_spill] sm:$0xff] }
 0xe0e   :  { %4592 = vpow2.f32 %v4025_v50  ;;  %v10431_v40 = vld [vmem:[#allocation5_spill] sm:$0xff]  ;;  %v10432_v50 = vld [vmem:[#allocation19_spill] sm:$0xff]  ;;  %v10433_v43 = vld [vmem:[#allocation20_spill] sm:$0xff] }
 0xe0f   :  { %4594 = vtanh.f32 %v3326_v42  ;;  %v10434_v42 = vld [vmem:[#allocation21_spill] sm:$0xff] }
 0xe10   :  { %4596 = vpow2.f32 %v4026_v30  ;;  %v10435_v30 = vld [vmem:[#allocation22_spill] sm:$0xff] }
 0xe17   :  { %v4591_v6 = vpop.eup %4590 }
 0xe18   :  { %v3339_v51 = vadd.f32 1.0, %v4591_v6  ;;  %v4593_v25 = vpop.eup %4592  ;;  %v10436_v6 = vld [vmem:[#allocation6_spill] sm:$0xff] }
 0xe19   :  { %v3340_v53 = vadd.f32 1.0, %v4593_v25  ;;  %v4595_v26 = vpop.eup %4594  ;;  %v10438_v25 = vld [vmem:[#allocation60_spill] sm:$0xff] }
 0xe1a   :  { %4598 = vrcp.f32 %v3339_v51  ;;  %v4597_v41 = vpop.eup %4596  ;;  %v10437_v51 = vld [vmem:[#allocation7_spill] sm:$0xff] }
 0xe1b   :  { %4600 = vrcp.f32 %v3340_v53  ;;  %v3341_v5 = vadd.f32 1.0, %v4597_v41  ;;  %v10439_v53 = vld [vmem:[#allocation61_spill] sm:$0xff] }
 0xe1c   :  { %v10441_v41 = vld [vmem:[#allocation77_spill] sm:$0xff] }
 0xe1d   :  { %4602 = vrcp.f32 %v3341_v5  ;;  %v10445_v5 = vld [vmem:[#allocation81_spill] sm:$0xff] }
 0xe24   :  { %v4599_v35 = vpop.eup %4598 }
 0xe25   :  { %v3350_v1 = vmul.f32 %v4599_v35, %v4595_v26  ;;  %v4601_v49 = vpop.eup %4600  ;;  %v10440_v26 = vld [vmem:[#allocation76_spill] sm:$0xff]  ;;  %v10442_v35 = vld [vmem:[#allocation78_spill] sm:$0xff] }
 0xe26   :  { %v3349_v4 = vmul.f32 %v4601_v49, %v8472_v31  ;;  %v10397_v31 = vld [vmem:[#allocation18_spill] sm:$0xff]  ;;  %v10444_v49 = vld [vmem:[#allocation80_spill] sm:$0xff] }
 0xe27   :  { %v4603_v8 = vpop.eup %4602 }
 0xe28   :  { %v8635_v0 = vadd.f32 %v3350_v1, %v3349_v4  ;;  %v10443_v1 = vld [vmem:[#allocation79_spill] sm:$0xff]  ;;  %v10446_v4 = vld [vmem:[#allocation82_spill] sm:$0xff] }
 0xe2a   :  { %4604 = vtanh.f32 %v8635_v0 }
 0xe34   :  { %v4605_v44 = vpop.eup %4604 }
 0xe35   :  { %v3353_v10 = vmul.f32 %v4605_v44, %v4603_v8  ;;  %v10447_v8 = vld [vmem:[#allocation83_spill] sm:$0xff]  ;;  %v10448_v44 = vld [vmem:[#allocation84_spill] sm:$0xff] }
 0xe37   :  { %4027 = vst [vmem:[%s9129_s8 + $0x48] sm:$0xff] %v3353_v10  ;;  %v3356_v13 = vpack.c.bf16 %v3353_v10, %v3353_v10  ;;  %v10449_v10 = vld [vmem:[#allocation85_spill] sm:$0xff] }
 0xe39   :  { %3389 = vmatprep.mubr.bf16.mxu0 %v3356_v13  ;;  %3430 = vmatprep.mubr.bf16.mxu1 %v3356_v13 }
 0xe3a   :  { %3390 = vmatmul.mubr.bf16.vlgmr.msra.gmra.mrb[80].mxu0 %v8562_v11  ;;  %3431 = vmatmul.mubr.bf16.vlgmr.msra.gmra.mrb[80].mxu1 %v8562_v11  ;;  %v10406_v11 = vld [vmem:[#allocation53_spill] sm:$0xff] }
 0xe3b   :  { %3496 = vmatprep.mubr.bf16.mxu0 %v3356_v13  ;;  %3537 = vmatprep.mubr.bf16.mxu1 %v3356_v13  ;;  %v10450_v13 = vld [vmem:[#allocation86_spill] sm:$0xff] }
 0xe3c   :  { %3465 = vmatpush1.bf16.msra.mxu0 %v10397_v31  ;;  %3506 = vmatpush1.bf16.msra.mxu1 %v10398_v14  ;;  %v10451_v31 = vld [vmem:[#allocation87_spill] sm:$0xff]  ;;  %v10452_v14 = vld [vmem:[#allocation88_spill] sm:$0xff] }
 0xe3d   :  { %3466 = vmatprep.subr.bf16.mxu0 %v10399_v21  ;;  %3507 = vmatprep.subr.bf16.mxu1 %v10400_v62  ;;  %v10453_v21 = vld [vmem:[#allocation89_spill] sm:$0xff]  ;;  %v10454_v62 = vld [vmem:[#allocation90_spill] sm:$0xff] }
 0xe40   :  { %3467 = vmatpush1.bf16.msra.mxu0 %v10401_v9  ;;  %3508 = vmatpush1.bf16.msra.mxu1 %v10402_v18  ;;  %v10455_v9 = vld [vmem:[#allocation91_spill] sm:$0xff]  ;;  %v10456_v18 = vld [vmem:[#allocation92_spill] sm:$0xff] }
 0xe41   :  { %3468 = vmatprep.subr.bf16.mxu0 %v10403_v15  ;;  %3509 = vmatprep.subr.bf16.mxu1 %v10404_v16  ;;  %v10457_v15 = vld [vmem:[#allocation93_spill] sm:$0xff]  ;;  %v10458_v16 = vld [vmem:[#allocation94_spill] sm:$0xff] }
 0xe44   :  { %3469 = vmatpush1.bf16.msra.mxu0 %v10405_v27  ;;  %3510 = vmatpush1.bf16.msra.mxu1 %v10406_v11  ;;  %v10459_v27 = vld [vmem:[#allocation59_spill] sm:$0xff]  ;;  %v10460_v11 = vld [vmem:[#allocation62_spill] sm:$0xff] }
 0xe45   :  { %3470 = vmatprep.subr.bf16.mxu0 %v10407_v7  ;;  %3511 = vmatprep.subr.bf16.mxu1 %v10408_v60 }
 0xe48   :  { %3471 = vmatpush1.bf16.msra.mxu0 %v10409_v2  ;;  %3512 = vmatpush1.bf16.msra.mxu1 %v10410_v52 }
 0xe49   :  { %3472 = vmatprep.subr.bf16.mxu0 %v10411_v54  ;;  %3513 = vmatprep.subr.bf16.mxu1 %v10412_v56 }
 0xe4c   :  { %3473 = vmatpush1.bf16.msra.mxu0 %v10413_v38  ;;  %3514 = vmatpush1.bf16.msra.mxu1 %v10414_v20 }
 0xe4d   :  { %3474 = vmatprep.subr.bf16.mxu0 %v10415_v59  ;;  %3515 = vmatprep.subr.bf16.mxu1 %v10416_v61 }
 0xe50   :  { %3475 = vmatpush1.bf16.msra.mxu0 %v10417_v32  ;;  %3516 = vmatpush1.bf16.msra.mxu1 %v10418_v55 }
 0xe51   :  { %3476 = vmatprep.subr.bf16.mxu0 %v10419_v33  ;;  %3517 = vmatprep.subr.bf16.mxu1 %v10420_v29 }
 0xe54   :  { %3477 = vmatpush1.bf16.msra.mxu0 %v10421_v46  ;;  %3518 = vmatpush1.bf16.msra.mxu1 %v10422_v28 }
 0xe55   :  { %3478 = vmatprep.subr.bf16.mxu0 %v10423_v19  ;;  %3519 = vmatprep.subr.bf16.mxu1 %v10424_v24 }
 0xe58   :  { %3479 = vmatpush1.bf16.msra.mxu0 %v10425_v63  ;;  %3520 = vmatpush1.bf16.msra.mxu1 %v10426_v3 }
 0xe59   :  { %3480 = vmatprep.subr.bf16.mxu0 %v10427_v36  ;;  %3521 = vmatprep.subr.bf16.mxu1 %v10428_v23 }
 0xe5c   :  { %3481 = vmatpush1.bf16.msra.mxu0 %v10429_v39  ;;  %3522 = vmatpush1.bf16.msra.mxu1 %v10430_v57 }
 0xe5d   :  { %3482 = vmatprep.subr.bf16.mxu0 %v10431_v40  ;;  %3523 = vmatprep.subr.bf16.mxu1 %v10432_v50 }
 0xe60   :  { %3483 = vmatpush1.bf16.msra.mxu0 %v10433_v43  ;;  %3524 = vmatpush1.bf16.msra.mxu1 %v10434_v42 }
 0xe61   :  { %3484 = vmatprep.subr.bf16.mxu0 %v10435_v30  ;;  %3525 = vmatprep.subr.bf16.mxu1 %v10436_v6 }
 0xe64   :  { %3485 = vmatpush1.bf16.msra.mxu0 %v10437_v51  ;;  %3526 = vmatpush1.bf16.msra.mxu1 %v10438_v25  ;;  %v4928_v25 = vld [vmem:[%s9130_s2] ss:$16 sps:$4 sm:$0xff]  }
 0xe65   :  { %3486 = vmatprep.subr.bf16.mxu0 %v10439_v53  ;;  %3527 = vmatprep.subr.bf16.mxu1 %v10440_v26  ;;  %v4930_v53 = vld [vmem:[%s9130_s2 + $0x24] ss:$16 sps:$4 sm:$0xff]   ;;  %v4931_v26 = vld [vmem:[%s9130_s2 + $0x2c] ss:$16 sps:$4 sm:$0xff]  }
 0xe68   :  { %3487 = vmatpush1.bf16.msra.mxu0 %v10441_v41  ;;  %3528 = vmatpush1.bf16.msra.mxu1 %v10442_v35  ;;  %v4932_v41 = vld [vmem:[%s9130_s2 + $0x20] ss:$16 sps:$4 sm:$0xff]   ;;  %v4933_v35 = vld [vmem:[%s9130_s2 + $0x28] ss:$16 sps:$4 sm:$0xff]  }
 0xe69   :  { %3488 = vmatprep.subr.bf16.mxu0 %v10443_v1  ;;  %3529 = vmatprep.subr.bf16.mxu1 %v10444_v49  ;;  %v4934_v1 = vld [vmem:[%s9130_s2 + $0x44] ss:$16 sps:$4 sm:$0xff]   ;;  %v4935_v49 = vld [vmem:[%s9130_s2 + $0x4c] ss:$16 sps:$4 sm:$0xff]  }
 0xe6c   :  { %3489 = vmatpush1.bf16.msra.mxu0 %v10445_v5  ;;  %3530 = vmatpush1.bf16.msra.mxu1 %v10446_v4  ;;  %v4936_v5 = vld [vmem:[%s9130_s2 + $0x40] ss:$16 sps:$4 sm:$0xff]   ;;  %v4937_v4 = vld [vmem:[%s9130_s2 + $0x48] ss:$16 sps:$4 sm:$0xff]  }
 0xe6d   :  { %3490 = vmatprep.subr.bf16.mxu0 %v10447_v8  ;;  %3531 = vmatprep.subr.bf16.mxu1 %v10448_v44  ;;  %v4938_v8 = vld [vmem:[%s9130_s2 + $0x64] ss:$16 sps:$4 sm:$0xff]   ;;  %v4939_v44 = vld [vmem:[%s9130_s2 + $0x6c] ss:$16 sps:$4 sm:$0xff]  }
 0xe70   :  { %3491 = vmatpush1.bf16.msra.mxu0 %v10449_v10  ;;  %3532 = vmatpush1.bf16.msra.mxu1 %v10450_v13  ;;  %v4940_v10 = vld [vmem:[%s9130_s2 + $0x60] ss:$16 sps:$4 sm:$0xff]   ;;  %v4941_v13 = vld [vmem:[%s9130_s2 + $0x68] ss:$16 sps:$4 sm:$0xff]  }
 0xe71   :  { %3492 = vmatprep.subr.bf16.mxu0 %v10451_v31  ;;  %3533 = vmatprep.subr.bf16.mxu1 %v10452_v14  ;;  %v4942_v31 = vld [vmem:[%s9130_s2 + $0x84] ss:$16 sps:$4 sm:$0xff]   ;;  %v4943_v14 = vld [vmem:[%s9130_s2 + $0x8c] ss:$16 sps:$4 sm:$0xff]  }
 0xe74   :  { %3493 = vmatpush1.bf16.msra.mxu0 %v10453_v21  ;;  %3534 = vmatpush1.bf16.msra.mxu1 %v10454_v62  ;;  %v4944_v21 = vld [vmem:[%s9130_s2 + $0x80] ss:$16 sps:$4 sm:$0xff]   ;;  %v4945_v62 = vld [vmem:[%s9130_s2 + $0x88] ss:$16 sps:$4 sm:$0xff]  }
 0xe75   :  { %3494 = vmatprep.subr.bf16.mxu0 %v10455_v9  ;;  %3535 = vmatprep.subr.bf16.mxu1 %v10456_v18  ;;  %v4946_v9 = vld [vmem:[%s9130_s2 + $0xa4] ss:$16 sps:$4 sm:$0xff]   ;;  %v4947_v18 = vld [vmem:[%s9130_s2 + $0xac] ss:$16 sps:$4 sm:$0xff]  }
 0xe78   :  { %3495 = vmatpush1.bf16.msra.mxu0 %v10457_v15  ;;  %3536 = vmatpush1.bf16.msra.mxu1 %v10458_v16  ;;  %v4948_v15 = vld [vmem:[%s9130_s2 + $0xa0] ss:$16 sps:$4 sm:$0xff]   ;;  %v4949_v16 = vld [vmem:[%s9130_s2 + $0xa8] ss:$16 sps:$4 sm:$0xff]  }
 0xe79   :  { %3573 = vmatprep.subr.bf16.mxu0 %v10459_v27  ;;  %3614 = vmatprep.subr.bf16.mxu1 %v10460_v11  ;;  %v4950_v27 = vld [vmem:[%s9130_s2 + $0xc4] ss:$16 sps:$4 sm:$0xff]   ;;  %v4951_v11 = vld [vmem:[%s9130_s2 + $0xcc] ss:$16 sps:$4 sm:$0xff]  }
 0xf0d   :  { %v3391_v7 = vpop.f32.mrb[80].mxu0  ;;  %v3432_v60 = vpop.f32.mrb[80].mxu1 }
 0xf0e   :  { %v3392_v2 = vadd.f32 %v3391_v7, %v10369_v34  ;;  %v3393_v52 = vpop.f32.mrb[81].mxu0  ;;  %v3434_v54 = vpop.f32.mrb[81].mxu1  ;;  %v3433_v33 = vadd.f32 %v3432_v60, %v8388_v48  ;;  %v4952_v7 = vld [vmem:[%s9130_s2 + $0xc0] ss:$16 sps:$4 sm:$0xff]   ;;  %v4953_v60 = vld [vmem:[%s9130_s2 + $0xc8] ss:$16 sps:$4 sm:$0xff]  }
 0xf0f   :  { %v3394_v56 = vadd.f32 %v3393_v52, %v8383_v22  ;;  %v3395_v38 = vpop.f32.mrb[82].mxu0  ;;  %v3436_v20 = vpop.f32.mrb[82].mxu1  ;;  %v3435_v29 = vadd.f32 %v3434_v54, %v8391_v37  ;;  %v4955_v52 = vld [vmem:[%s9130_s2 + $0xec] ss:$16 sps:$4 sm:$0xff]   ;;  %v4956_v54 = vld [vmem:[%s9130_s2 + $0xe0] ss:$16 sps:$4 sm:$0xff]  }
 0xf10   :  { %v4028_v59 = vmul.f32 -1.442695, %v3392_v2  ;;  %v3396_v61 = vpop.f32.mrb[83].mxu0  ;;  %v3437_v32 = vpop.f32.mrb[83].mxu1  ;;  %v4030_v46 = vmul.f32 -1.442695, %v3433_v33 }
 0xf11   :  { %v4029_v55 = vmul.f32 -1.442695, %v3394_v56  ;;  %v4954_v2 = vld [vmem:[%s9130_s2 + $0xe4] ss:$16 sps:$4 sm:$0xff]   ;;  %v4957_v56 = vld [vmem:[%s9130_s2 + $0xe8] ss:$16 sps:$4 sm:$0xff]  }
 0xf12   :  { %4606 = vpow2.f32 %v4028_v59  ;;  %v4958_v38 = vld [vmem:[%s9130_s2 + $0x104] ss:$16 sps:$4 sm:$0xff]   ;;  %v4959_v20 = vld [vmem:[%s9130_s2 + $0x10c] ss:$16 sps:$4 sm:$0xff]   ;;  %v4960_v59 = vld [vmem:[%s9130_s2 + $0x100] ss:$16 sps:$4 sm:$0xff]  }
 0xf13   :  { %4608 = vpow2.f32 %v4029_v55  ;;  %v4961_v61 = vld [vmem:[%s9130_s2 + $0x108] ss:$16 sps:$4 sm:$0xff]   ;;  %v4962_v32 = vld [vmem:[%s9130_s2 + $0x124] ss:$16 sps:$4 sm:$0xff]   ;;  %v4963_v55 = vld [vmem:[%s9130_s2 + $0x12c] ss:$16 sps:$4 sm:$0xff]  }
 0xf14   :  { %4610 = vtanh.f32 %v3435_v29  ;;  %v4964_v33 = vld [vmem:[%s9130_s2 + $0x120] ss:$16 sps:$4 sm:$0xff]   ;;  %v4965_v29 = vld [vmem:[%s9130_s2 + $0x128] ss:$16 sps:$4 sm:$0xff]  }
 0xf15   :  { %4612 = vpow2.f32 %v4030_v46  ;;  %v4966_v46 = vld [vmem:[%s9130_s2 + $0x144] ss:$16 sps:$4 sm:$0xff]  }
 0xf1c   :  { %v4607_v28 = vpop.eup %4606 }
 0xf1d   :  { %v3448_v19 = vadd.f32 1.0, %v4607_v28  ;;  %v4609_v24 = vpop.eup %4608  ;;  %v4967_v28 = vld [vmem:[%s9130_s2 + $0x14c] ss:$16 sps:$4 sm:$0xff]  }
 0xf1e   :  { %v3449_v63 = vadd.f32 1.0, %v4609_v24  ;;  %v4611_v3 = vpop.eup %4610  ;;  %v4969_v24 = vld [vmem:[%s9130_s2 + $0x148] ss:$16 sps:$4 sm:$0xff]  }
 0xf1f   :  { %4614 = vrcp.f32 %v3448_v19  ;;  %v4613_v36 = vpop.eup %4612  ;;  %v4968_v19 = vld [vmem:[%s9130_s2 + $0x140] ss:$16 sps:$4 sm:$0xff]  }
 0xf20   :  { %4616 = vrcp.f32 %v3449_v63  ;;  %v3450_v40 = vadd.f32 1.0, %v4613_v36  ;;  %v4970_v63 = vld [vmem:[%s9130_s2 + $0x164] ss:$16 sps:$4 sm:$0xff]   ;;  %v4972_v36 = vld [vmem:[%s9130_s2 + $0x160] ss:$16 sps:$4 sm:$0xff]  }
 0xf22   :  { %4618 = vrcp.f32 %v3450_v40  ;;  %v4976_v40 = vld [vmem:[%s9130_s2 + $0x180] ss:$16 sps:$4 sm:$0xff]  }
 0xf29   :  { %v4615_v23 = vpop.eup %4614 }
 0xf2a   :  { %v3459_v39 = vmul.f32 %v4615_v23, %v4611_v3  ;;  %v4617_v57 = vpop.eup %4616  ;;  %v4971_v3 = vld [vmem:[%s9130_s2 + $0x16c] ss:$16 sps:$4 sm:$0xff]   ;;  %v4973_v23 = vld [vmem:[%s9130_s2 + $0x168] ss:$16 sps:$4 sm:$0xff]  }
 0xf2b   :  { %v3458_v50 = vmul.f32 %v4617_v57, %v8559_v45  ;;  %v4929_v45 = vld [vmem:[%s9130_s2 + $0x8] ss:$16 sps:$4 sm:$0xff]   ;;  %v4975_v57 = vld [vmem:[%s9130_s2 + $0x18c] ss:$16 sps:$4 sm:$0xff]  }
 0xf2c   :  { %v4619_v42 = vpop.eup %4618 }
 0xf2d   :  { %v8712_v43 = vadd.f32 %v3459_v39, %v3458_v50  ;;  %v4974_v39 = vld [vmem:[%s9130_s2 + $0x184] ss:$16 sps:$4 sm:$0xff]   ;;  %v4977_v50 = vld [vmem:[%s9130_s2 + $0x188] ss:$16 sps:$4 sm:$0xff]  }
 0xf2f   :  { %4620 = vtanh.f32 %v8712_v43 }
 0xf39   :  { %v4621_v30 = vpop.eup %4620 }
 0xf3a   :  { %v3462_v6 = vmul.f32 %v4621_v30, %v4619_v42  ;;  %v4978_v42 = vld [vmem:[%s9130_s2 + $0x1a4] ss:$16 sps:$4 sm:$0xff]   ;;  %v4979_v30 = vld [vmem:[%s9130_s2 + $0x1ac] ss:$16 sps:$4 sm:$0xff]  }
 0xf3c   :  { %v8715_v51 = vpack.c.bf16 %v3462_v6, %v3462_v6  ;;  %v4980_v6 = vld [vmem:[%s9130_s2 + $0x1a0] ss:$16 sps:$4 sm:$0xff]  }
 0xf3e   :  { %3497 = vmatmul.mubr.bf16.vlgmr.msra.gmra.mrb[84].mxu0 %v8715_v51  ;;  %3538 = vmatmul.mubr.bf16.vlgmr.msra.gmra.mrb[84].mxu1 %v8715_v51 }
 0xf3f   :  { %3574 = vmatpush1.bf16.msra.mxu0 %v4928_v25  ;;  %3615 = vmatpush1.bf16.msra.mxu1 %v4929_v45  ;;  %v4981_v25 = vld [vmem:[%s9130_s2 + $0x1a8] ss:$16 sps:$4 sm:$0xff]   ;;  %v4982_v45 = vld [vmem:[%s9130_s2 + $0x1c4] ss:$16 sps:$4 sm:$0xff]  }
 0xf40   :  { %3575 = vmatprep.subr.bf16.mxu0 %v4930_v53  ;;  %3616 = vmatprep.subr.bf16.mxu1 %v4931_v26  ;;  %v4983_v53 = vld [vmem:[%s9130_s2 + $0x1cc] ss:$16 sps:$4 sm:$0xff]   ;;  %v4984_v26 = vld [vmem:[%s9130_s2 + $0x1c0] ss:$16 sps:$4 sm:$0xff]  }
 0xf43   :  { %3576 = vmatpush1.bf16.msra.mxu0 %v4932_v41  ;;  %3617 = vmatpush1.bf16.msra.mxu1 %v4933_v35  ;;  %v4985_v41 = vld [vmem:[%s9130_s2 + $0x1c8] ss:$16 sps:$4 sm:$0xff]   ;;  %v4986_v35 = vld [vmem:[%s9130_s2 + $0x1e4] ss:$16 sps:$4 sm:$0xff]  }
 0xf44   :  { %3577 = vmatprep.subr.bf16.mxu0 %v4934_v1  ;;  %3618 = vmatprep.subr.bf16.mxu1 %v4935_v49  ;;  %v4987_v1 = vld [vmem:[%s9130_s2 + $0x1ec] ss:$16 sps:$4 sm:$0xff]   ;;  %v4988_v49 = vld [vmem:[%s9130_s2 + $0x1e0] ss:$16 sps:$4 sm:$0xff]  }
 0xf47   :  { %3578 = vmatpush1.bf16.msra.mxu0 %v4936_v5  ;;  %3619 = vmatpush1.bf16.msra.mxu1 %v4937_v4  ;;  %v4989_v5 = vld [vmem:[%s9130_s2 + $0x1e8] ss:$16 sps:$4 sm:$0xff]   ;;  %v4990_v4 = vld [vmem:[%s9125_s3 + $0x4] ss:$16 sps:$4 sm:$0xff]  }
 0xf48   :  { %3579 = vmatprep.subr.bf16.mxu0 %v4938_v8  ;;  %3620 = vmatprep.subr.bf16.mxu1 %v4939_v44  ;;  %v4991_v8 = vld [vmem:[%s9125_s3 + $0xc] ss:$16 sps:$4 sm:$0xff]  }
 0xf4b   :  { %3580 = vmatpush1.bf16.msra.mxu0 %v4940_v10  ;;  %3621 = vmatpush1.bf16.msra.mxu1 %v4941_v13 }
 0xf4c   :  { %3581 = vmatprep.subr.bf16.mxu0 %v4942_v31  ;;  %3622 = vmatprep.subr.bf16.mxu1 %v4943_v14 }
 0xf4f   :  { %3582 = vmatpush1.bf16.msra.mxu0 %v4944_v21  ;;  %3623 = vmatpush1.bf16.msra.mxu1 %v4945_v62 }
 0xf50   :  { %3583 = vmatprep.subr.bf16.mxu0 %v4946_v9  ;;  %3624 = vmatprep.subr.bf16.mxu1 %v4947_v18 }
 0xf53   :  { %3584 = vmatpush1.bf16.msra.mxu0 %v4948_v15  ;;  %3625 = vmatpush1.bf16.msra.mxu1 %v4949_v16 }
 0xf54   :  { %3585 = vmatprep.subr.bf16.mxu0 %v4950_v27  ;;  %3626 = vmatprep.subr.bf16.mxu1 %v4951_v11 }
 0xf57   :  { %3586 = vmatpush1.bf16.msra.mxu0 %v4952_v7  ;;  %3627 = vmatpush1.bf16.msra.mxu1 %v4953_v60 }
 0xf58   :  { %3587 = vmatprep.subr.bf16.mxu0 %v4954_v2  ;;  %3628 = vmatprep.subr.bf16.mxu1 %v4955_v52 }
 0xf5b   :  { %3588 = vmatpush1.bf16.msra.mxu0 %v4956_v54  ;;  %3629 = vmatpush1.bf16.msra.mxu1 %v4957_v56 }
 0xf5c   :  { %3589 = vmatprep.subr.bf16.mxu0 %v4958_v38  ;;  %3630 = vmatprep.subr.bf16.mxu1 %v4959_v20 }
 0xf5f   :  { %3590 = vmatpush1.bf16.msra.mxu0 %v4960_v59  ;;  %3631 = vmatpush1.bf16.msra.mxu1 %v4961_v61 }
 0xf60   :  { %3591 = vmatprep.subr.bf16.mxu0 %v4962_v32  ;;  %3632 = vmatprep.subr.bf16.mxu1 %v4963_v55 }
 0xf63   :  { %3592 = vmatpush1.bf16.msra.mxu0 %v4964_v33  ;;  %3633 = vmatpush1.bf16.msra.mxu1 %v4965_v29 }
 0xf64   :  { %3593 = vmatprep.subr.bf16.mxu0 %v4966_v46  ;;  %3634 = vmatprep.subr.bf16.mxu1 %v4967_v28 }
 0xf67   :  { %3594 = vmatpush1.bf16.msra.mxu0 %v4968_v19  ;;  %3635 = vmatpush1.bf16.msra.mxu1 %v4969_v24 }
 0xf68   :  { %3595 = vmatprep.subr.bf16.mxu0 %v4970_v63  ;;  %3636 = vmatprep.subr.bf16.mxu1 %v4971_v3  ;;  %v4993_v63 = vld [vmem:[%s9125_s3 + $0x8] ss:$16 sps:$4 sm:$0xff]   ;;  %v4994_v3 = vld [vmem:[%s9125_s3 + $0x24] ss:$16 sps:$4 sm:$0xff]  }
 0xf6b   :  { %3596 = vmatpush1.bf16.msra.mxu0 %v4972_v36  ;;  %3637 = vmatpush1.bf16.msra.mxu1 %v4973_v23  ;;  %v4996_v36 = vld [vmem:[%s9125_s3 + $0x20] ss:$16 sps:$4 sm:$0xff]   ;;  %v4997_v23 = vld [vmem:[%s9125_s3 + $0x28] ss:$16 sps:$4 sm:$0xff]  }
 0xf6c   :  { %3597 = vmatprep.subr.bf16.mxu0 %v4974_v39  ;;  %3638 = vmatprep.subr.bf16.mxu1 %v4975_v57  ;;  %v4998_v39 = vld [vmem:[%s9125_s3 + $0x44] ss:$16 sps:$4 sm:$0xff]   ;;  %v4999_v57 = vld [vmem:[%s9125_s3 + $0x4c] ss:$16 sps:$4 sm:$0xff]  }
 0xf6f   :  { %3598 = vmatpush1.bf16.msra.mxu0 %v4976_v40  ;;  %3639 = vmatpush1.bf16.msra.mxu1 %v4977_v50  ;;  %v5000_v40 = vld [vmem:[%s9125_s3 + $0x40] ss:$16 sps:$4 sm:$0xff]   ;;  %v5001_v50 = vld [vmem:[%s9125_s3 + $0x48] ss:$16 sps:$4 sm:$0xff]  }
 0xf70   :  { %3599 = vmatprep.subr.bf16.mxu0 %v4978_v42  ;;  %3640 = vmatprep.subr.bf16.mxu1 %v4979_v30  ;;  %v5002_v42 = vld [vmem:[%s9125_s3 + $0x64] ss:$16 sps:$4 sm:$0xff]   ;;  %v5003_v30 = vld [vmem:[%s9125_s3 + $0x6c] ss:$16 sps:$4 sm:$0xff]  }
 0xf73   :  { %3600 = vmatpush1.bf16.msra.mxu0 %v4980_v6  ;;  %3641 = vmatpush1.bf16.msra.mxu1 %v4981_v25  ;;  %v5004_v6 = vld [vmem:[%s9125_s3 + $0x60] ss:$16 sps:$4 sm:$0xff]   ;;  %v5005_v25 = vld [vmem:[%s9125_s3 + $0x68] ss:$16 sps:$4 sm:$0xff]  }
 0xf74   :  { %3601 = vmatprep.subr.bf16.mxu0 %v4982_v45  ;;  %3642 = vmatprep.subr.bf16.mxu1 %v4983_v53  ;;  %v5006_v45 = vld [vmem:[%s9125_s3 + $0x84] ss:$16 sps:$4 sm:$0xff]   ;;  %v5007_v53 = vld [vmem:[%s9125_s3 + $0x8c] ss:$16 sps:$4 sm:$0xff]  }
 0xf77   :  { %3602 = vmatpush1.bf16.msra.mxu0 %v4984_v26  ;;  %3643 = vmatpush1.bf16.msra.mxu1 %v4985_v41  ;;  %v5008_v26 = vld [vmem:[%s9125_s3 + $0x80] ss:$16 sps:$4 sm:$0xff]   ;;  %v5009_v41 = vld [vmem:[%s9125_s3 + $0x88] ss:$16 sps:$4 sm:$0xff]  }
 0xf78   :  { %3603 = vmatprep.subr.bf16.mxu0 %v4986_v35  ;;  %3644 = vmatprep.subr.bf16.mxu1 %v4987_v1  ;;  %v5010_v35 = vld [vmem:[%s9125_s3 + $0xa4] ss:$16 sps:$4 sm:$0xff]   ;;  %v5011_v1 = vld [vmem:[%s9125_s3 + $0xac] ss:$16 sps:$4 sm:$0xff]  }
 0xf7b   :  { %3604 = vmatpush1.bf16.msra.mxu0 %v4988_v49  ;;  %3645 = vmatpush1.bf16.msra.mxu1 %v4989_v5  ;;  %v5012_v49 = vld [vmem:[%s9125_s3 + $0xa0] ss:$16 sps:$4 sm:$0xff]   ;;  %v5013_v5 = vld [vmem:[%s9125_s3 + $0xa8] ss:$16 sps:$4 sm:$0xff]  }
 0xf7c   :  { %3680 = vmatprep.subr.bf16.mxu0 %v4990_v4  ;;  %3721 = vmatprep.subr.bf16.mxu1 %v4991_v8  ;;  %v5014_v4 = vld [vmem:[%s9125_s3 + $0xc4] ss:$16 sps:$4 sm:$0xff]   ;;  %v5015_v8 = vld [vmem:[%s9125_s3 + $0xcc] ss:$16 sps:$4 sm:$0xff]  }
0x1011   :  { %v3498_v44 = vpop.f32.mrb[84].mxu0  ;;  %v3539_v10 = vpop.f32.mrb[84].mxu1 }
0x1012   :  { %v3499_v13 = vadd.f32 %v3498_v44, %v10043_v17  ;;  %v3500_v31 = vpop.f32.mrb[85].mxu0  ;;  %v3541_v14 = vpop.f32.mrb[85].mxu1  ;;  %v3540_v11 = vadd.f32 %v3539_v10, %v10181_v12  ;;  %v5016_v44 = vld [vmem:[%s9125_s3 + $0xc0] ss:$16 sps:$4 sm:$0xff]   ;;  %v5017_v10 = vld [vmem:[%s9125_s3 + $0xc8] ss:$16 sps:$4 sm:$0xff]  }
0x1013   :  { %v3501_v21 = vadd.f32 %v3500_v31, %v10044_v58  ;;  %v3502_v62 = vpop.f32.mrb[86].mxu0  ;;  %v3543_v9 = vpop.f32.mrb[86].mxu1  ;;  %v3542_v7 = vadd.f32 %v3541_v14, %v10182_v47  ;;  %v5019_v31 = vld [vmem:[%s9125_s3 + $0xec] ss:$16 sps:$4 sm:$0xff]   ;;  %v5020_v14 = vld [vmem:[%s9125_s3 + $0xe0] ss:$16 sps:$4 sm:$0xff]  }
0x1014   :  { %v4031_v18 = vmul.f32 -1.442695, %v3499_v13  ;;  %v3503_v15 = vpop.f32.mrb[87].mxu0  ;;  %v3544_v16 = vpop.f32.mrb[87].mxu1  ;;  %v4033_v60 = vmul.f32 -1.442695, %v3540_v11 }
0x1015   :  { %v4032_v27 = vmul.f32 -1.442695, %v3501_v21  ;;  %v5018_v13 = vld [vmem:[%s9125_s3 + $0xe4] ss:$16 sps:$4 sm:$0xff]   ;;  %v5021_v21 = vld [vmem:[%s9125_s3 + $0xe8] ss:$16 sps:$4 sm:$0xff]  }
0x1016   :  { %4622 = vpow2.f32 %v4031_v18  ;;  %v5022_v62 = vld [vmem:[%s9125_s3 + $0x104] ss:$16 sps:$4 sm:$0xff]   ;;  %v5023_v9 = vld [vmem:[%s9125_s3 + $0x10c] ss:$16 sps:$4 sm:$0xff]   ;;  %v5024_v18 = vld [vmem:[%s9125_s3 + $0x100] ss:$16 sps:$4 sm:$0xff]  }
0x1017   :  { %4624 = vpow2.f32 %v4032_v27  ;;  %v5025_v15 = vld [vmem:[%s9125_s3 + $0x108] ss:$16 sps:$4 sm:$0xff]   ;;  %v5026_v16 = vld [vmem:[%s9125_s3 + $0x124] ss:$16 sps:$4 sm:$0xff]   ;;  %v5027_v27 = vld [vmem:[%s9125_s3 + $0x12c] ss:$16 sps:$4 sm:$0xff]  }
0x1018   :  { %4626 = vtanh.f32 %v3542_v7  ;;  %v5028_v11 = vld [vmem:[%s9125_s3 + $0x120] ss:$16 sps:$4 sm:$0xff]   ;;  %v5029_v7 = vld [vmem:[%s9125_s3 + $0x128] ss:$16 sps:$4 sm:$0xff]  }
0x1019   :  { %4628 = vpow2.f32 %v4033_v60  ;;  %v5030_v60 = vld [vmem:[%s9125_s3 + $0x144] ss:$16 sps:$4 sm:$0xff]  }
0x1020   :  { %v4623_v2 = vpop.eup %4622 }
0x1021   :  { %v3555_v52 = vadd.f32 1.0, %v4623_v2  ;;  %v4625_v54 = vpop.eup %4624  ;;  %v5031_v2 = vld [vmem:[%s9125_s3 + $0x14c] ss:$16 sps:$4 sm:$0xff]  }
0x1022   :  { %v3556_v56 = vadd.f32 1.0, %v4625_v54  ;;  %v4627_v38 = vpop.eup %4626  ;;  %v5033_v54 = vld [vmem:[%s9125_s3 + $0x148] ss:$16 sps:$4 sm:$0xff]  }
0x1023   :  { %4630 = vrcp.f32 %v3555_v52  ;;  %v4629_v20 = vpop.eup %4628  ;;  %v5032_v52 = vld [vmem:[%s9125_s3 + $0x140] ss:$16 sps:$4 sm:$0xff]  }
0x1024   :  { %4632 = vrcp.f32 %v3556_v56  ;;  %v3557_v55 = vadd.f32 1.0, %v4629_v20  ;;  %v5034_v56 = vld [vmem:[%s9125_s3 + $0x164] ss:$16 sps:$4 sm:$0xff]   ;;  %v5036_v20 = vld [vmem:[%s9125_s3 + $0x160] ss:$16 sps:$4 sm:$0xff]  }
0x1026   :  { %4634 = vrcp.f32 %v3557_v55  ;;  %v5040_v55 = vld [vmem:[%s9125_s3 + $0x180] ss:$16 sps:$4 sm:$0xff]  }
0x102d   :  { %v4631_v59 = vpop.eup %4630 }
0x102e   :  { %v3566_v61 = vmul.f32 %v4631_v59, %v4627_v38  ;;  %v4633_v32 = vpop.eup %4632  ;;  %v5035_v38 = vld [vmem:[%s9125_s3 + $0x16c] ss:$16 sps:$4 sm:$0xff]   ;;  %v5037_v59 = vld [vmem:[%s9125_s3 + $0x168] ss:$16 sps:$4 sm:$0xff]  }
0x102f   :  { %v3565_v33 = vmul.f32 %v4633_v32, %v8635_v0  ;;  %v4992_v0 = vld [vmem:[%s9125_s3] ss:$16 sps:$4 sm:$0xff]   ;;  %v5039_v32 = vld [vmem:[%s9125_s3 + $0x18c] ss:$16 sps:$4 sm:$0xff]  }
0x1030   :  { %v4635_v46 = vpop.eup %4634 }
0x1031   :  { %v8916_v29 = vadd.f32 %v3566_v61, %v3565_v33  ;;  %v5038_v61 = vld [vmem:[%s9125_s3 + $0x184] ss:$16 sps:$4 sm:$0xff]   ;;  %v5041_v33 = vld [vmem:[%s9125_s3 + $0x188] ss:$16 sps:$4 sm:$0xff]  }
0x1033   :  { %4636 = vtanh.f32 %v8916_v29 }
0x103d   :  { %v4637_v28 = vpop.eup %4636 }
0x103e   :  { %v3569_v19 = vmul.f32 %v4637_v28, %v4635_v46  ;;  %v5042_v46 = vld [vmem:[%s9125_s3 + $0x1a4] ss:$16 sps:$4 sm:$0xff]   ;;  %v5043_v28 = vld [vmem:[%s9125_s3 + $0x1ac] ss:$16 sps:$4 sm:$0xff]  }
0x1040   :  { %4034 = vst [vmem:[%s9129_s8 + $0x50] sm:$0xff] %v3569_v19  ;;  %v3572_v24 = vpack.c.bf16 %v3569_v19, %v3569_v19  ;;  %v5044_v19 = vld [vmem:[%s9125_s3 + $0x1a0] ss:$16 sps:$4 sm:$0xff]  }
0x1042   :  { %3605 = vmatprep.mubr.bf16.mxu0 %v3572_v24  ;;  %3646 = vmatprep.mubr.bf16.mxu1 %v3572_v24 }
0x1043   :  { %3606 = vmatmul.mubr.bf16.vlgmr.msra.gmra.mrb[88].mxu0 %v8715_v51  ;;  %3647 = vmatmul.mubr.bf16.vlgmr.msra.gmra.mrb[88].mxu1 %v8715_v51  ;;  %v4995_v51 = vld [vmem:[%s9125_s3 + $0x2c] ss:$16 sps:$4 sm:$0xff]  }
0x1044   :  { %3712 = vmatprep.mubr.bf16.mxu0 %v3572_v24  ;;  %3753 = vmatprep.mubr.bf16.mxu1 %v3572_v24  ;;  %v5045_v24 = vld [vmem:[%s9125_s3 + $0x1a8] ss:$16 sps:$4 sm:$0xff]  }
0x1045   :  { %3681 = vmatpush1.bf16.msra.mxu0 %v4992_v0  ;;  %3722 = vmatpush1.bf16.msra.mxu1 %v4993_v63  ;;  %v5046_v0 = vld [vmem:[%s9125_s3 + $0x1c4] ss:$16 sps:$4 sm:$0xff]   ;;  %v5047_v63 = vld [vmem:[%s9125_s3 + $0x1cc] ss:$16 sps:$4 sm:$0xff]  }
0x1046   :  { %3682 = vmatprep.subr.bf16.mxu0 %v4994_v3  ;;  %3723 = vmatprep.subr.bf16.mxu1 %v4995_v51  ;;  %v5048_v3 = vld [vmem:[%s9125_s3 + $0x1c0] ss:$16 sps:$4 sm:$0xff]   ;;  %v5049_v51 = vld [vmem:[%s9125_s3 + $0x1c8] ss:$16 sps:$4 sm:$0xff]  }
0x1049   :  { %3683 = vmatpush1.bf16.msra.mxu0 %v4996_v36  ;;  %3724 = vmatpush1.bf16.msra.mxu1 %v4997_v23  ;;  %v5050_v36 = vld [vmem:[%s9125_s3 + $0x1e4] ss:$16 sps:$4 sm:$0xff]   ;;  %v5051_v23 = vld [vmem:[%s9125_s3 + $0x1ec] ss:$16 sps:$4 sm:$0xff]  }
0x104a   :  { %3684 = vmatprep.subr.bf16.mxu0 %v4998_v39  ;;  %3725 = vmatprep.subr.bf16.mxu1 %v4999_v57  ;;  %v5052_v39 = vld [vmem:[%s9125_s3 + $0x1e0] ss:$16 sps:$4 sm:$0xff]   ;;  %v5053_v57 = vld [vmem:[%s9125_s3 + $0x1e8] ss:$16 sps:$4 sm:$0xff]  }
0x104d   :  { %3685 = vmatpush1.bf16.msra.mxu0 %v5000_v40  ;;  %3726 = vmatpush1.bf16.msra.mxu1 %v5001_v50 }
0x104e   :  { %3686 = vmatprep.subr.bf16.mxu0 %v5002_v42  ;;  %3727 = vmatprep.subr.bf16.mxu1 %v5003_v30 }
0x1051   :  { %3687 = vmatpush1.bf16.msra.mxu0 %v5004_v6  ;;  %3728 = vmatpush1.bf16.msra.mxu1 %v5005_v25 }
0x1052   :  { %3688 = vmatprep.subr.bf16.mxu0 %v5006_v45  ;;  %3729 = vmatprep.subr.bf16.mxu1 %v5007_v53 }
0x1055   :  { %3689 = vmatpush1.bf16.msra.mxu0 %v5008_v26  ;;  %3730 = vmatpush1.bf16.msra.mxu1 %v5009_v41 }
0x1056   :  { %3690 = vmatprep.subr.bf16.mxu0 %v5010_v35  ;;  %3731 = vmatprep.subr.bf16.mxu1 %v5011_v1 }
0x1059   :  { %3691 = vmatpush1.bf16.msra.mxu0 %v5012_v49  ;;  %3732 = vmatpush1.bf16.msra.mxu1 %v5013_v5 }
0x105a   :  { %3692 = vmatprep.subr.bf16.mxu0 %v5014_v4  ;;  %3733 = vmatprep.subr.bf16.mxu1 %v5015_v8 }
0x105d   :  { %3693 = vmatpush1.bf16.msra.mxu0 %v5016_v44  ;;  %3734 = vmatpush1.bf16.msra.mxu1 %v5017_v10 }
0x105e   :  { %3694 = vmatprep.subr.bf16.mxu0 %v5018_v13  ;;  %3735 = vmatprep.subr.bf16.mxu1 %v5019_v31 }
0x1061   :  { %3695 = vmatpush1.bf16.msra.mxu0 %v5020_v14  ;;  %3736 = vmatpush1.bf16.msra.mxu1 %v5021_v21 }
0x1062   :  { %3696 = vmatprep.subr.bf16.mxu0 %v5022_v62  ;;  %3737 = vmatprep.subr.bf16.mxu1 %v5023_v9 }
0x1065   :  { %3697 = vmatpush1.bf16.msra.mxu0 %v5024_v18  ;;  %3738 = vmatpush1.bf16.msra.mxu1 %v5025_v15 }
0x1066   :  { %3698 = vmatprep.subr.bf16.mxu0 %v5026_v16  ;;  %3739 = vmatprep.subr.bf16.mxu1 %v5027_v27 }
0x1069   :  { %3699 = vmatpush1.bf16.msra.mxu0 %v5028_v11  ;;  %3740 = vmatpush1.bf16.msra.mxu1 %v5029_v7 }
0x106a   :  { %3700 = vmatprep.subr.bf16.mxu0 %v5030_v60  ;;  %3741 = vmatprep.subr.bf16.mxu1 %v5031_v2 }
0x106d   :  { %3701 = vmatpush1.bf16.msra.mxu0 %v5032_v52  ;;  %3742 = vmatpush1.bf16.msra.mxu1 %v5033_v54 }
0x106e   :  { %3702 = vmatprep.subr.bf16.mxu0 %v5034_v56  ;;  %3743 = vmatprep.subr.bf16.mxu1 %v5035_v38 }
0x1071   :  { %3703 = vmatpush1.bf16.msra.mxu0 %v5036_v20  ;;  %3744 = vmatpush1.bf16.msra.mxu1 %v5037_v59 }
0x1072   :  { %3704 = vmatprep.subr.bf16.mxu0 %v5038_v61  ;;  %3745 = vmatprep.subr.bf16.mxu1 %v5039_v32 }
0x1075   :  { %3705 = vmatpush1.bf16.msra.mxu0 %v5040_v55  ;;  %3746 = vmatpush1.bf16.msra.mxu1 %v5041_v33 }
0x1076   :  { %3706 = vmatprep.subr.bf16.mxu0 %v5042_v46  ;;  %3747 = vmatprep.subr.bf16.mxu1 %v5043_v28 }
0x1079   :  { %3707 = vmatpush1.bf16.msra.mxu0 %v5044_v19  ;;  %3748 = vmatpush1.bf16.msra.mxu1 %v5045_v24 }
0x107a   :  { %3708 = vmatprep.subr.bf16.mxu0 %v5046_v0  ;;  %3749 = vmatprep.subr.bf16.mxu1 %v5047_v63 }
0x107d   :  { %3709 = vmatpush1.bf16.msra.mxu0 %v5048_v3  ;;  %3750 = vmatpush1.bf16.msra.mxu1 %v5049_v51 }
0x107e   :  { %3710 = vmatprep.subr.bf16.mxu0 %v5050_v36  ;;  %3751 = vmatprep.subr.bf16.mxu1 %v5051_v23 }
0x1081   :  { %3711 = vmatpush1.bf16.msra.mxu0 %v5052_v39  ;;  %3752 = vmatpush1.bf16.msra.mxu1 %v5053_v57 }
0x1116   :  { %v3607_v40 = vpop.f32.mrb[88].mxu0  ;;  %v3648_v50 = vpop.f32.mrb[88].mxu1 }
0x1117   :  { %v3608_v42 = vadd.f32 %v3607_v40, %v10369_v34  ;;  %v3609_v30 = vpop.f32.mrb[89].mxu0  ;;  %v3650_v6 = vpop.f32.mrb[89].mxu1  ;;  %v3649_v49 = vadd.f32 %v3648_v50, %v8388_v48 }
0x1118   :  { %v3610_v25 = vadd.f32 %v3609_v30, %v8383_v22  ;;  %v3611_v45 = vpop.f32.mrb[90].mxu0  ;;  %v3652_v53 = vpop.f32.mrb[90].mxu1  ;;  %v3651_v5 = vadd.f32 %v3650_v6, %v8391_v37 }
0x1119   :  { %v4035_v26 = vmul.f32 -1.442695, %v3608_v42  ;;  %v3612_v41 = vpop.f32.mrb[91].mxu0  ;;  %v3653_v35 = vpop.f32.mrb[91].mxu1  ;;  %v4037_v4 = vmul.f32 -1.442695, %v3649_v49 }
0x111a   :  { %v4036_v1 = vmul.f32 -1.442695, %v3610_v25 }
0x111b   :  { %4638 = vpow2.f32 %v4035_v26 }
0x111c   :  { %4640 = vpow2.f32 %v4036_v1 }
0x111d   :  { %4642 = vtanh.f32 %v3651_v5 }
0x111e   :  { %4644 = vpow2.f32 %v4037_v4 }
0x1125   :  { %v4639_v8 = vpop.eup %4638 }
0x1126   :  { %v3664_v44 = vadd.f32 1.0, %v4639_v8  ;;  %v4641_v34 = vpop.eup %4640 }
0x1127   :  { %v3665_v22 = vadd.f32 1.0, %v4641_v34  ;;  %v4643_v10 = vpop.eup %4642 }
0x1128   :  { %4646 = vrcp.f32 %v3664_v44  ;;  %v4645_v13 = vpop.eup %4644 }
0x1129   :  { %4648 = vrcp.f32 %v3665_v22  ;;  %v3666_v62 = vadd.f32 1.0, %v4645_v13 }
0x112b   :  { %4650 = vrcp.f32 %v3666_v62 }
0x1132   :  { %v4647_v31 = vpop.eup %4646 }
0x1133   :  { %v3675_v14 = vmul.f32 %v4647_v31, %v4643_v10  ;;  %v4649_v21 = vpop.eup %4648 }
0x1134   :  { %v3674_v9 = vmul.f32 %v4649_v21, %v8712_v43 }
0x1135   :  { %v4651_v37 = vpop.eup %4650 }
0x1136   :  { %v3676_v48 = vadd.f32 %v3675_v14, %v3674_v9 }
0x1138   :  { %4652 = vtanh.f32 %v3676_v48 }
0x1142   :  { %v4653_v18 = vpop.eup %4652 }
0x1143   :  { %v3678_v15 = vmul.f32 %v4653_v18, %v4651_v37 }
0x1145   :  { %v3679_v16 = vpack.c.bf16 %v3678_v15, %v3678_v15 }
0x1147   :  { %3713 = vmatmul.mubr.bf16.vlgmr.msra.gmra.mrb[92].mxu0 %v3679_v16  ;;  %3754 = vmatmul.mubr.bf16.vlgmr.msra.gmra.mrb[92].mxu1 %v3679_v16 }
0x121a   :  { %v3714_v27 = vpop.f32.mrb[92].mxu0  ;;  %v3755_v11 = vpop.f32.mrb[92].mxu1 }
0x121b   :  { %v3715_v7 = vadd.f32 %v3714_v27, %v10043_v17  ;;  %v3716_v60 = vpop.f32.mrb[93].mxu0  ;;  %v3757_v2 = vpop.f32.mrb[93].mxu1  ;;  %v3756_v61 = vadd.f32 %v3755_v11, %v10181_v12 }
0x121c   :  { %v3717_v52 = vadd.f32 %v3716_v60, %v10044_v58  ;;  %v3718_v54 = vpop.f32.mrb[94].mxu0  ;;  %v3759_v56 = vpop.f32.mrb[94].mxu1  ;;  %v3758_v32 = vadd.f32 %v3757_v2, %v10182_v47 }
0x121d   :  { %v4038_v43 = vmul.f32 -1.442695, %v3715_v7  ;;  %v3719_v38 = vpop.f32.mrb[95].mxu0  ;;  %v3760_v20 = vpop.f32.mrb[95].mxu1  ;;  %v4040_v55 = vmul.f32 -1.442695, %v3756_v61 }
0x121e   :  { %v4039_v59 = vmul.f32 -1.442695, %v3717_v52 }
0x121f   :  { %4654 = vpow2.f32 %v4038_v43 }
0x1220   :  { %4656 = vpow2.f32 %v4039_v59 }
0x1221   :  { %4658 = vtanh.f32 %v3758_v32 }
0x1222   :  { %4660 = vpow2.f32 %v4040_v55 }
0x1229   :  { %v4655_v33 = vpop.eup %4654 }
0x122a   :  { %v3771_v46 = vadd.f32 1.0, %v4655_v33  ;;  %v4657_v17 = vpop.eup %4656 }
0x122b   :  { %v3772_v58 = vadd.f32 1.0, %v4657_v17  ;;  %v4659_v28 = vpop.eup %4658 }
0x122c   :  { %4662 = vrcp.f32 %v3771_v46  ;;  %v4661_v19 = vpop.eup %4660 }
0x122d   :  { %4664 = vrcp.f32 %v3772_v58  ;;  %v3773_v3 = vadd.f32 1.0, %v4661_v19 }
0x122f   :  { %4666 = vrcp.f32 %v3773_v3 }
0x1236   :  { %v4663_v24 = vpop.eup %4662 }
0x1237   :  { %v3782_v0 = vmul.f32 %v4663_v24, %v4659_v28  ;;  %v4665_v63 = vpop.eup %4664 }
0x1238   :  { %v3781_v51 = vmul.f32 %v4665_v63, %v8916_v29 }
0x1239   :  { %v4667_v47 = vpop.eup %4666 }
0x123a   :  { %v3783_v12 = vadd.f32 %v3782_v0, %v3781_v51 }
0x123c   :  { %4668 = vtanh.f32 %v3783_v12 }
0x1246   :  { %v4669_v36 = vpop.eup %4668 }
0x1247   :  { %v3785_v23 = vmul.f32 %v4669_v36, %v4667_v47 }
0x1249   :  { %4041 = vst [vmem:[%s9129_s8 + $0x58] sm:$0xff] %v3785_v23 }

</bundles_post_ra>
